<compile_context>
chip_gen: v7x
topology: tpu7x:2x2x1
jax: 0.10.0
libtpu: 0.0.40
codegen_flags: <defaults>
</compile_context>

<pallas_src>
import functools

import jax
import jax.numpy as jnp
from jax import lax
from jax.experimental import pallas as pl
from jax.experimental.pallas import tpu as pltpu


def _round_up(x, m):
    return ((x + m - 1) // m) * m


def _cdiv(a, b):
    return -(-a // b)


def _vpu_has_native_bf16():
    """bf16 VALU exists on v6e/v7x; not on v5e and older (bf16 would add casts)."""
    try:
        kind = jax.devices()[0].device_kind.lower()
    except Exception:
        return True
    return not any(v in kind for v in ("v2", "v3", "v4", "v5"))


def _choose_batch_tile(batch, block_b):
    """Batch tile: minimal for tiny batches; >=2 (even) grid steps otherwise."""
    b8 = _round_up(batch, 8)
    if b8 <= 256:
        return b8                      # one small step, minimal padding
    n_steps = max(2, _cdiv(b8, block_b))
    if n_steps % 2:
        n_steps += 1                   # even #steps: no lone tail tile on v7x
    return _round_up(_cdiv(b8, n_steps), 8)


def discriminator_kernel(x_ref,
                         w1_ref, b1_ref,
                         w2_ref, b2_ref,
                         w3_ref, b3_ref,
                         w4_ref, b4_ref,
                         o_ref,
                         *, bf16_epilogue):
    """Fused 784 -> 1024 -> 512 -> 256 -> 1 MLP with LeakyReLU(0.2) + Sigmoid.

    x_ref: [TB, 784] bf16 batch tile.
    w1/w2/w3: [in, out] bf16 (VMEM-resident); b1/b2/b3: [1, out]
      (bf16 when bf16_epilogue else f32).
    w4: [1, 256] bf16 row; b4: [1, 1] f32.
    o_ref: [1, 1, TB] f32 lane-dense probability row for this tile.
    """

    def linear_lrelu(h_in, w_ref, b_ref):
        # MXU matmul, f32 accumulation.
        acc = jnp.dot(h_in, w_ref[...], preferred_element_type=jnp.float32)
        if bf16_epilogue:
            # One f32->bf16 round, then bf16 add/mul/max on the native bf16 VALU
            # (halves VPU work and vreg/VMEM traffic for the epilogue).
            h = acc.astype(jnp.bfloat16) + b_ref[...]
        else:
            h = acc + b_ref[...]
        h = jnp.maximum(h, 0.2 * h)          # LeakyReLU(0.2): one vmul + one vmax
        return h.astype(jnp.bfloat16)        # bf16 operand for the next MXU op

    # layerN: Linear + LeakyReLU(0.2)  (+ Dropout == identity in eval mode)
    h = linear_lrelu(x_ref[...], w1_ref, b1_ref)   # 784 -> 1024
    h = linear_lrelu(h, w2_ref, b2_ref)            # 1024 -> 512
    h = linear_lrelu(h, w3_ref, b3_ref)            # 512 -> 256

    # layer4: Linear(256, 1) + Sigmoid, computed lane-dense:
    # [1,256] . [TB,256]^T -> [1,TB]  (trans_b matmul, same path as Q@K^T).
    # Gives an unmasked lane-dense store instead of a (TB,1) masked column.
    logit = lax.dot_general(w4_ref[...], h, (((1,), (1,)), ((), ())),
                            preferred_element_type=jnp.float32) + b4_ref[...]
    o_ref[0] = jax.nn.sigmoid(logit)               # [1, TB]


def discriminator_forward(x, params, *, block_b=512):
    """x: [B, 784] float32; params: dict of (w, b) per layer, w stored as [in, out]."""
    B, F = x.shape
    assert F == 28 * 28, F

    bf16_epilogue = _vpu_has_native_bf16()

    TB = _choose_batch_tile(B, block_b)
    Bp = _round_up(B, TB)
    num_tiles = Bp // TB

    # bf16 inputs/weights for the MXU matmuls (f32 accumulation in-kernel).
    xp = x.astype(jnp.bfloat16)
    if Bp != B:
        xp = jnp.pad(xp, ((0, Bp - B), (0, 0)))

    w1 = params["w1"].astype(jnp.bfloat16)
    w2 = params["w2"].astype(jnp.bfloat16)
    w3 = params["w3"].astype(jnp.bfloat16)
    bias_dtype = jnp.bfloat16 if bf16_epilogue else jnp.float32
    b1 = params["b1"].astype(bias_dtype)
    b2 = params["b2"].astype(bias_dtype)
    b3 = params["b3"].astype(bias_dtype)
    w4 = jnp.transpose(params["w4"]).astype(jnp.bfloat16)   # [1, 256] row
    b4 = params["b4"].astype(jnp.float32)                    # [1, 1]

    operands = (xp, w1, b1, w2, b2, w3, b3, w4, b4)

    # Advisory cost: helps XLA schedule the host-side casts/pads/reshape
    # around the custom call.
    flops = 2 * Bp * (784 * 1024 + 1024 * 512 + 512 * 256 + 256 * 1)
    bytes_accessed = sum(int(a.size) * a.dtype.itemsize for a in operands) + Bp * 4
    cost = pl.CostEstimate(flops=flops, transcendentals=Bp,
                           bytes_accessed=bytes_accessed)

    kernel = functools.partial(discriminator_kernel, bf16_epilogue=bf16_epilogue)

    def build(single_buffer_weights):
        # Weights/biases: full-shape blocks with constant index_map -> DMA'd
        # once, VMEM-resident across all batch tiles. Buffered(1) drops the
        # pointless second buffer for these never-changing blocks (VMEM
        # headroom on v7x's 64 MiB).
        if single_buffer_weights:
            resident = lambda a: pl.BlockSpec(a.shape, lambda i: (0,) * a.ndim,
                                              pipeline_mode=pl.Buffered(1))
        else:
            resident = lambda a: pl.BlockSpec(a.shape, lambda i: (0,) * a.ndim)
        return pl.pallas_call(
            kernel,
            # Lane-dense output: one (1, TB) probability row per batch tile.
            out_shape=jax.ShapeDtypeStruct((num_tiles, 1, TB), jnp.float32),
            grid=(num_tiles,),
            in_specs=[
                pl.BlockSpec((TB, F), lambda i: (i, 0)),   # x: tiled over batch
                resident(w1), resident(b1),
                resident(w2), resident(b2),
                resident(w3), resident(b3),
                resident(w4), resident(b4),
            ],
            out_specs=pl.BlockSpec((1, 1, TB), lambda i: (i, 0, 0)),
            compiler_params=pltpu.CompilerParams(
                dimension_semantics=("parallel",),
                # v5e scoped default is only 16 MiB; weights + TB>=512
                # activations need more. 32 MiB also fits v7x (64 MiB physical).
                vmem_limit_bytes=32 << 20,
            ),
            cost_estimate=cost,
        )

    try:
        out = build(single_buffer_weights=True)(*operands)
    except Exception:
        # pl.Buffered(1) not supported by this jax/Mosaic build -> fall back to
        # default double-buffered resident weights (still only ~6 MB of VMEM).
        out = build(single_buffer_weights=False)(*operands)

    return out.reshape(Bp, 1)[:B]


def init_params(key):
    """Deterministic PyTorch-style init: U(-1/sqrt(fan_in), 1/sqrt(fan_in))."""
    dims = [(28 * 28, 1024), (1024, 512), (512, 256), (256, 1)]
    params = {}
    for i, (fan_in, fan_out) in enumerate(dims, start=1):
        key, kw, kb = jax.random.split(key, 3)
        bound = 1.0 / (fan_in ** 0.5)
        # stored as [in, out] (transposed relative to nn.Linear's [out, in])
        params[f"w{i}"] = jax.random.uniform(
            kw, (fan_in, fan_out), jnp.float32, -bound, bound)
        params[f"b{i}"] = jax.random.uniform(
            kb, (1, fan_out), jnp.float32, -bound, bound)
    return params


def reference_forward(x, params):
    """Pure-JAX f32 reference matching the PyTorch module in eval mode."""
    h = x @ params["w1"] + params["b1"]
    h = jnp.where(h > 0, h, 0.2 * h)
    h = h @ params["w2"] + params["b2"]
    h = jnp.where(h > 0, h, 0.2 * h)
    h = h @ params["w3"] + params["b3"]
    h = jnp.where(h > 0, h, 0.2 * h)
    logit = h @ params["w4"] + params["b4"]
    return jax.nn.sigmoid(logit)


if __name__ == "__main__":
    key = jax.random.PRNGKey(0)
    key, kx = jax.random.split(key)

    B = 2
    x = jax.random.normal(kx, (B, 28 * 28), dtype=jnp.float32)
    params = init_params(key)

    out = discriminator_forward(x, params)
    out = jax.block_until_ready(out)

    ref = reference_forward(x, params)
    assert out.shape == (B, 1), out.shape
    # bf16 matmuls/epilogue with f32 accumulation vs f32 reference -> loose tolerance.
    assert jnp.allclose(out, ref, atol=2e-2, rtol=2e-2), (out, ref)

    print("KERNEL_OK")
</pallas_src>

<mosaic_0001>
module attributes {stable_mosaic.version = 11 : i64} {
  func.func @discriminator_kernel(%arg0: i32, %arg1: memref<8x784xbf16, #tpu.memory_space<vmem>>, %arg2: memref<784x1024xbf16, #tpu.memory_space<vmem>>, %arg3: memref<1x1024xbf16, #tpu.memory_space<vmem>>, %arg4: memref<1024x512xbf16, #tpu.memory_space<vmem>>, %arg5: memref<1x512xbf16, #tpu.memory_space<vmem>>, %arg6: memref<512x256xbf16, #tpu.memory_space<vmem>>, %arg7: memref<1x256xbf16, #tpu.memory_space<vmem>>, %arg8: memref<1x256xbf16, #tpu.memory_space<vmem>>, %arg9: memref<1x1xf32, #tpu.memory_space<vmem>>, %arg10: memref<1x1x8xf32, #tpu.memory_space<vmem>>) attributes {dimension_semantics = [#tpu.dimension_semantics<parallel>], iteration_bounds = array<i64: 1>, scalar_prefetch = 0 : i64, scratch_operands = 0 : i64, tpu.core_type = #tpu.core_type<tc>, window_params = [{transform_indices = @transform_0, window_bounds = array<i64: 8, 784>}, {pipeline_mode = #tpu.pipeline_mode<synchronous>, transform_indices = @transform_1, window_bounds = array<i64: 784, 1024>}, {pipeline_mode = #tpu.pipeline_mode<synchronous>, transform_indices = @transform_2, window_bounds = array<i64: 1, 1024>}, {pipeline_mode = #tpu.pipeline_mode<synchronous>, transform_indices = @transform_3, window_bounds = array<i64: 1024, 512>}, {pipeline_mode = #tpu.pipeline_mode<synchronous>, transform_indices = @transform_4, window_bounds = array<i64: 1, 512>}, {pipeline_mode = #tpu.pipeline_mode<synchronous>, transform_indices = @transform_5, window_bounds = array<i64: 512, 256>}, {pipeline_mode = #tpu.pipeline_mode<synchronous>, transform_indices = @transform_6, window_bounds = array<i64: 1, 256>}, {pipeline_mode = #tpu.pipeline_mode<synchronous>, transform_indices = @transform_7, window_bounds = array<i64: 1, 256>}, {pipeline_mode = #tpu.pipeline_mode<synchronous>, transform_indices = @transform_8, window_bounds = array<i64: 1, 1>}, {transform_indices = @transform_9, window_bounds = array<i64: 1, 1, 8>}]} {
    %c0 = arith.constant 0 : index
    %c0_0 = arith.constant 0 : index
    %0 = vector.load %arg1[%c0, %c0_0] : memref<8x784xbf16, #tpu.memory_space<vmem>>, vector<8x784xbf16>
    %c0_1 = arith.constant 0 : index
    %c0_2 = arith.constant 0 : index
    %1 = vector.load %arg2[%c0_1, %c0_2] : memref<784x1024xbf16, #tpu.memory_space<vmem>>, vector<784x1024xbf16>
    %cst = arith.constant dense<0.000000e+00> : vector<8x1024xf32>
    %2 = tpu.matmul %0, %1, %cst {dimension_numbers = #tpu.dot_dimension_numbers<[1], [0], [0], [1], [0, 0, 1, 1], [], []>} : vector<8x784xbf16>, vector<784x1024xbf16>, vector<8x1024xf32> -> vector<8x1024xf32>
    %3 = arith.truncf %2 : vector<8x1024xf32> to vector<8x1024xbf16>
    %c0_3 = arith.constant 0 : index
    %c0_4 = arith.constant 0 : index
    %4 = vector.load %arg3[%c0_3, %c0_4] : memref<1x1024xbf16, #tpu.memory_space<vmem>>, vector<1x1024xbf16>
    %5 = vector.broadcast %4 : vector<1x1024xbf16> to vector<8x1024xbf16>
    %6 = arith.addf %3, %5 : vector<8x1024xbf16>
    %cst_5 = arith.constant 2.001950e-01 : bf16
    %7 = vector.broadcast %cst_5 : bf16 to vector<8x1024xbf16>
    %8 = arith.mulf %7, %6 : vector<8x1024xbf16>
    %9 = arith.maximumf %6, %8 : vector<8x1024xbf16>
    %c0_6 = arith.constant 0 : index
    %c0_7 = arith.constant 0 : index
    %10 = vector.load %arg4[%c0_6, %c0_7] : memref<1024x512xbf16, #tpu.memory_space<vmem>>, vector<1024x512xbf16>
    %cst_8 = arith.constant dense<0.000000e+00> : vector<8x512xf32>
    %11 = tpu.matmul %9, %10, %cst_8 {dimension_numbers = #tpu.dot_dimension_numbers<[1], [0], [0], [1], [0, 0, 1, 1], [], []>} : vector<8x1024xbf16>, vector<1024x512xbf16>, vector<8x512xf32> -> vector<8x512xf32>
    %12 = arith.truncf %11 : vector<8x512xf32> to vector<8x512xbf16>
    %c0_9 = arith.constant 0 : index
    %c0_10 = arith.constant 0 : index
    %13 = vector.load %arg5[%c0_9, %c0_10] : memref<1x512xbf16, #tpu.memory_space<vmem>>, vector<1x512xbf16>
    %14 = vector.broadcast %13 : vector<1x512xbf16> to vector<8x512xbf16>
    %15 = arith.addf %12, %14 : vector<8x512xbf16>
    %cst_11 = arith.constant 2.001950e-01 : bf16
    %16 = vector.broadcast %cst_11 : bf16 to vector<8x512xbf16>
    %17 = arith.mulf %16, %15 : vector<8x512xbf16>
    %18 = arith.maximumf %15, %17 : vector<8x512xbf16>
    %c0_12 = arith.constant 0 : index
    %c0_13 = arith.constant 0 : index
    %19 = vector.load %arg6[%c0_12, %c0_13] : memref<512x256xbf16, #tpu.memory_space<vmem>>, vector<512x256xbf16>
    %cst_14 = arith.constant dense<0.000000e+00> : vector<8x256xf32>
    %20 = tpu.matmul %18, %19, %cst_14 {dimension_numbers = #tpu.dot_dimension_numbers<[1], [0], [0], [1], [0, 0, 1, 1], [], []>} : vector<8x512xbf16>, vector<512x256xbf16>, vector<8x256xf32> -> vector<8x256xf32>
    %21 = arith.truncf %20 : vector<8x256xf32> to vector<8x256xbf16>
    %c0_15 = arith.constant 0 : index
    %c0_16 = arith.constant 0 : index
    %22 = vector.load %arg7[%c0_15, %c0_16] : memref<1x256xbf16, #tpu.memory_space<vmem>>, vector<1x256xbf16>
    %23 = vector.broadcast %22 : vector<1x256xbf16> to vector<8x256xbf16>
    %24 = arith.addf %21, %23 : vector<8x256xbf16>
    %cst_17 = arith.constant 2.001950e-01 : bf16
    %25 = vector.broadcast %cst_17 : bf16 to vector<8x256xbf16>
    %26 = arith.mulf %25, %24 : vector<8x256xbf16>
    %27 = arith.maximumf %24, %26 : vector<8x256xbf16>
    %c0_18 = arith.constant 0 : index
    %c0_19 = arith.constant 0 : index
    %28 = vector.load %arg8[%c0_18, %c0_19] : memref<1x256xbf16, #tpu.memory_space<vmem>>, vector<1x256xbf16>
    %cst_20 = arith.constant dense<0.000000e+00> : vector<1x8xf32>
    %29 = tpu.matmul %28, %27, %cst_20 {dimension_numbers = #tpu.dot_dimension_numbers<[1], [1], [0], [0], [0, 0, 1, 0], [], []>} : vector<1x256xbf16>, vector<8x256xbf16>, vector<1x8xf32> -> vector<1x8xf32>
    %c0_21 = arith.constant 0 : index
    %c0_22 = arith.constant 0 : index
    %30 = vector.load %arg9[%c0_21, %c0_22] : memref<1x1xf32, #tpu.memory_space<vmem>>, vector<1x1xf32>
    %31 = vector.broadcast %30 : vector<1x1xf32> to vector<1x8xf32>
    %32 = arith.addf %29, %31 : vector<1x8xf32>
    %33 = arith.negf %32 : vector<1x8xf32>
    %34 = math.exp %33 : vector<1x8xf32>
    %cst_23 = arith.constant 1.000000e+00 : f32
    %35 = vector.broadcast %cst_23 : f32 to vector<1x8xf32>
    %36 = arith.addf %35, %34 : vector<1x8xf32>
    %37 = arith.divf %35, %36 : vector<1x8xf32>
    %c0_24 = arith.constant 0 : index
    %c0_25 = arith.constant 0 : index
    %c0_26 = arith.constant 0 : index
    %38 = vector.load %arg10[%c0_24, %c0_25, %c0_26] : memref<1x1x8xf32, #tpu.memory_space<vmem>>, vector<1x1x8xf32>
    %39 = vector.shape_cast %38 : vector<1x1x8xf32> to vector<1x8xf32>
    %40 = vector.shape_cast %37 : vector<1x8xf32> to vector<1x1x8xf32>
    tpu.vector_store %arg10[%c0_24, %c0_25, %c0_26], %40 {strides = array<i32>} : memref<1x1x8xf32, #tpu.memory_space<vmem>>, vector<1x1x8xf32>,
    return
  }
  func.func @transform_0(%arg0: i32) -> (i32, i32) {
    %c0_i32 = arith.constant 0 : i32
    %c0_i32_0 = arith.constant 0 : i32
    return %arg0, %c0_i32 : i32, i32
  }
  func.func @transform_1(%arg0: i32) -> (i32, i32) {
    %c0_i32 = arith.constant 0 : i32
    %c0_i32_0 = arith.constant 0 : i32
    %c0_i32_1 = arith.constant 0 : i32
    return %c0_i32, %c0_i32_0 : i32, i32
  }
  func.func @transform_2(%arg0: i32) -> (i32, i32) {
    %c0_i32 = arith.constant 0 : i32
    %c0_i32_0 = arith.constant 0 : i32
    %c0_i32_1 = arith.constant 0 : i32
    return %c0_i32, %c0_i32_0 : i32, i32
  }
  func.func @transform_3(%arg0: i32) -> (i32, i32) {
    %c0_i32 = arith.constant 0 : i32
    %c0_i32_0 = arith.constant 0 : i32
    %c0_i32_1 = arith.constant 0 : i32
    return %c0_i32, %c0_i32_0 : i32, i32
  }
  func.func @transform_4(%arg0: i32) -> (i32, i32) {
    %c0_i32 = arith.constant 0 : i32
    %c0_i32_0 = arith.constant 0 : i32
    %c0_i32_1 = arith.constant 0 : i32
    return %c0_i32, %c0_i32_0 : i32, i32
  }
  func.func @transform_5(%arg0: i32) -> (i32, i32) {
    %c0_i32 = arith.constant 0 : i32
    %c0_i32_0 = arith.constant 0 : i32
    %c0_i32_1 = arith.constant 0 : i32
    return %c0_i32, %c0_i32_0 : i32, i32
  }
  func.func @transform_6(%arg0: i32) -> (i32, i32) {
    %c0_i32 = arith.constant 0 : i32
    %c0_i32_0 = arith.constant 0 : i32
    %c0_i32_1 = arith.constant 0 : i32
    return %c0_i32, %c0_i32_0 : i32, i32
  }
  func.func @transform_7(%arg0: i32) -> (i32, i32) {
    %c0_i32 = arith.constant 0 : i32
    %c0_i32_0 = arith.constant 0 : i32
    %c0_i32_1 = arith.constant 0 : i32
    return %c0_i32, %c0_i32_0 : i32, i32
  }
  func.func @transform_8(%arg0: i32) -> (i32, i32) {
    %c0_i32 = arith.constant 0 : i32
    %c0_i32_0 = arith.constant 0 : i32
    %c0_i32_1 = arith.constant 0 : i32
    return %c0_i32, %c0_i32_0 : i32, i32
  }
  func.func @transform_9(%arg0: i32) -> (i32, i32, i32) {
    %c0_i32 = arith.constant 0 : i32
    %c0_i32_0 = arith.constant 0 : i32
    %c0_i32_1 = arith.constant 0 : i32
    return %arg0, %c0_i32, %c0_i32_0 : i32, i32, i32
  }
}

module attributes {stable_mosaic.version = 11 : i64} {
  func.func @discriminator_kernel(%arg0: i32, %arg1: memref<8x784xbf16, #tpu.memory_space<vmem>>, %arg2: memref<784x1024xbf16, #tpu.memory_space<vmem>>, %arg3: memref<1x1024xbf16, #tpu.memory_space<vmem>>, %arg4: memref<1024x512xbf16, #tpu.memory_space<vmem>>, %arg5: memref<1x512xbf16, #tpu.memory_space<vmem>>, %arg6: memref<512x256xbf16, #tpu.memory_space<vmem>>, %arg7: memref<1x256xbf16, #tpu.memory_space<vmem>>, %arg8: memref<1x256xbf16, #tpu.memory_space<vmem>>, %arg9: memref<1x1xf32, #tpu.memory_space<vmem>>, %arg10: memref<1x1x8xf32, #tpu.memory_space<vmem>>) attributes {dimension_semantics = [#tpu.dimension_semantics<parallel>], iteration_bounds = array<i64: 1>, scalar_prefetch = 0 : i64, scratch_operands = 0 : i64, tpu.core_type = #tpu.core_type<tc>, window_params = [{transform_indices = @transform_0, window_bounds = array<i64: 8, 784>}, {pipeline_mode = #tpu.pipeline_mode<synchronous>, transform_indices = @transform_1, window_bounds = array<i64: 784, 1024>}, {pipeline_mode = #tpu.pipeline_mode<synchronous>, transform_indices = @transform_2, window_bounds = array<i64: 1, 1024>}, {pipeline_mode = #tpu.pipeline_mode<synchronous>, transform_indices = @transform_3, window_bounds = array<i64: 1024, 512>}, {pipeline_mode = #tpu.pipeline_mode<synchronous>, transform_indices = @transform_4, window_bounds = array<i64: 1, 512>}, {pipeline_mode = #tpu.pipeline_mode<synchronous>, transform_indices = @transform_5, window_bounds = array<i64: 512, 256>}, {pipeline_mode = #tpu.pipeline_mode<synchronous>, transform_indices = @transform_6, window_bounds = array<i64: 1, 256>}, {pipeline_mode = #tpu.pipeline_mode<synchronous>, transform_indices = @transform_7, window_bounds = array<i64: 1, 256>}, {pipeline_mode = #tpu.pipeline_mode<synchronous>, transform_indices = @transform_8, window_bounds = array<i64: 1, 1>}, {transform_indices = @transform_9, window_bounds = array<i64: 1, 1, 8>}]} {
    %c0 = arith.constant 0 : index
    %c0_0 = arith.constant 0 : index
    %0 = vector.load %arg1[%c0, %c0_0] : memref<8x784xbf16, #tpu.memory_space<vmem>>, vector<8x784xbf16>
    %c0_1 = arith.constant 0 : index
    %c0_2 = arith.constant 0 : index
    %1 = vector.load %arg2[%c0_1, %c0_2] : memref<784x1024xbf16, #tpu.memory_space<vmem>>, vector<784x1024xbf16>
    %cst = arith.constant dense<0.000000e+00> : vector<8x1024xf32>
    %2 = tpu.matmul %0, %1, %cst {dimension_numbers = #tpu.dot_dimension_numbers<[1], [0], [0], [1], [0, 0, 1, 1], [], []>} : vector<8x784xbf16>, vector<784x1024xbf16>, vector<8x1024xf32> -> vector<8x1024xf32>
    %3 = arith.truncf %2 : vector<8x1024xf32> to vector<8x1024xbf16>
    %c0_3 = arith.constant 0 : index
    %c0_4 = arith.constant 0 : index
    %4 = vector.load %arg3[%c0_3, %c0_4] : memref<1x1024xbf16, #tpu.memory_space<vmem>>, vector<1x1024xbf16>
    %5 = vector.broadcast %4 : vector<1x1024xbf16> to vector<8x1024xbf16>
    %6 = arith.addf %3, %5 : vector<8x1024xbf16>
    %cst_5 = arith.constant 2.001950e-01 : bf16
    %7 = vector.broadcast %cst_5 : bf16 to vector<8x1024xbf16>
    %8 = arith.mulf %7, %6 : vector<8x1024xbf16>
    %9 = arith.maximumf %6, %8 : vector<8x1024xbf16>
    %c0_6 = arith.constant 0 : index
    %c0_7 = arith.constant 0 : index
    %10 = vector.load %arg4[%c0_6, %c0_7] : memref<1024x512xbf16, #tpu.memory_space<vmem>>, vector<1024x512xbf16>
    %cst_8 = arith.constant dense<0.000000e+00> : vector<8x512xf32>
    %11 = tpu.matmul %9, %10, %cst_8 {dimension_numbers = #tpu.dot_dimension_numbers<[1], [0], [0], [1], [0, 0, 1, 1], [], []>} : vector<8x1024xbf16>, vector<1024x512xbf16>, vector<8x512xf32> -> vector<8x512xf32>
    %12 = arith.truncf %11 : vector<8x512xf32> to vector<8x512xbf16>
    %c0_9 = arith.constant 0 : index
    %c0_10 = arith.constant 0 : index
    %13 = vector.load %arg5[%c0_9, %c0_10] : memref<1x512xbf16, #tpu.memory_space<vmem>>, vector<1x512xbf16>
    %14 = vector.broadcast %13 : vector<1x512xbf16> to vector<8x512xbf16>
    %15 = arith.addf %12, %14 : vector<8x512xbf16>
    %cst_11 = arith.constant 2.001950e-01 : bf16
    %16 = vector.broadcast %cst_11 : bf16 to vector<8x512xbf16>
    %17 = arith.mulf %16, %15 : vector<8x512xbf16>
    %18 = arith.maximumf %15, %17 : vector<8x512xbf16>
    %c0_12 = arith.constant 0 : index
    %c0_13 = arith.constant 0 : index
    %19 = vector.load %arg6[%c0_12, %c0_13] : memref<512x256xbf16, #tpu.memory_space<vmem>>, vector<512x256xbf16>
    %cst_14 = arith.constant dense<0.000000e+00> : vector<8x256xf32>
    %20 = tpu.matmul %18, %19, %cst_14 {dimension_numbers = #tpu.dot_dimension_numbers<[1], [0], [0], [1], [0, 0, 1, 1], [], []>} : vector<8x512xbf16>, vector<512x256xbf16>, vector<8x256xf32> -> vector<8x256xf32>
    %21 = arith.truncf %20 : vector<8x256xf32> to vector<8x256xbf16>
    %c0_15 = arith.constant 0 : index
    %c0_16 = arith.constant 0 : index
    %22 = vector.load %arg7[%c0_15, %c0_16] : memref<1x256xbf16, #tpu.memory_space<vmem>>, vector<1x256xbf16>
    %23 = vector.broadcast %22 : vector<1x256xbf16> to vector<8x256xbf16>
    %24 = arith.addf %21, %23 : vector<8x256xbf16>
    %cst_17 = arith.constant 2.001950e-01 : bf16
    %25 = vector.broadcast %cst_17 : bf16 to vector<8x256xbf16>
    %26 = arith.mulf %25, %24 : vector<8x256xbf16>
    %27 = arith.maximumf %24, %26 : vector<8x256xbf16>
    %c0_18 = arith.constant 0 : index
    %c0_19 = arith.constant 0 : index
    %28 = vector.load %arg8[%c0_18, %c0_19] : memref<1x256xbf16, #tpu.memory_space<vmem>>, vector<1x256xbf16>
    %cst_20 = arith.constant dense<0.000000e+00> : vector<1x8xf32>
    %29 = tpu.matmul %28, %27, %cst_20 {dimension_numbers = #tpu.dot_dimension_numbers<[1], [1], [0], [0], [0, 0, 1, 0], [], []>} : vector<1x256xbf16>, vector<8x256xbf16>, vector<1x8xf32> -> vector<1x8xf32>
    %c0_21 = arith.constant 0 : index
    %c0_22 = arith.constant 0 : index
    %30 = vector.load %arg9[%c0_21, %c0_22] : memref<1x1xf32, #tpu.memory_space<vmem>>, vector<1x1xf32>
    %31 = vector.broadcast %30 : vector<1x1xf32> to vector<1x8xf32>
    %32 = arith.addf %29, %31 : vector<1x8xf32>
    %33 = arith.negf %32 : vector<1x8xf32>
    %34 = math.exp %33 : vector<1x8xf32>
    %cst_23 = arith.constant 1.000000e+00 : f32
    %35 = vector.broadcast %cst_23 : f32 to vector<1x8xf32>
    %36 = arith.addf %35, %34 : vector<1x8xf32>
    %37 = arith.divf %35, %36 : vector<1x8xf32>
    %c0_24 = arith.constant 0 : index
    %c0_25 = arith.constant 0 : index
    %c0_26 = arith.constant 0 : index
    %38 = vector.load %arg10[%c0_24, %c0_25, %c0_26] : memref<1x1x8xf32, #tpu.memory_space<vmem>>, vector<1x1x8xf32>
    %39 = vector.shape_cast %38 : vector<1x1x8xf32> to vector<1x8xf32>
    %40 = vector.shape_cast %37 : vector<1x8xf32> to vector<1x1x8xf32>
    tpu.vector_store %arg10[%c0_24, %c0_25, %c0_26], %40 {strides = array<i32>} : memref<1x1x8xf32, #tpu.memory_space<vmem>>, vector<1x1x8xf32>,
    return
  }
  func.func @transform_0(%arg0: i32) -> (i32, i32) {
    %c0_i32 = arith.constant 0 : i32
    %c0_i32_0 = arith.constant 0 : i32
    return %arg0, %c0_i32 : i32, i32
  }
  func.func @transform_1(%arg0: i32) -> (i32, i32) {
    %c0_i32 = arith.constant 0 : i32
    %c0_i32_0 = arith.constant 0 : i32
    %c0_i32_1 = arith.constant 0 : i32
    return %c0_i32, %c0_i32_0 : i32, i32
  }
  func.func @transform_2(%arg0: i32) -> (i32, i32) {
    %c0_i32 = arith.constant 0 : i32
    %c0_i32_0 = arith.constant 0 : i32
    %c0_i32_1 = arith.constant 0 : i32
    return %c0_i32, %c0_i32_0 : i32, i32
  }
  func.func @transform_3(%arg0: i32) -> (i32, i32) {
    %c0_i32 = arith.constant 0 : i32
    %c0_i32_0 = arith.constant 0 : i32
    %c0_i32_1 = arith.constant 0 : i32
    return %c0_i32, %c0_i32_0 : i32, i32
  }
  func.func @transform_4(%arg0: i32) -> (i32, i32) {
    %c0_i32 = arith.constant 0 : i32
    %c0_i32_0 = arith.constant 0 : i32
    %c0_i32_1 = arith.constant 0 : i32
    return %c0_i32, %c0_i32_0 : i32, i32
  }
  func.func @transform_5(%arg0: i32) -> (i32, i32) {
    %c0_i32 = arith.constant 0 : i32
    %c0_i32_0 = arith.constant 0 : i32
    %c0_i32_1 = arith.constant 0 : i32
    return %c0_i32, %c0_i32_0 : i32, i32
  }
  func.func @transform_6(%arg0: i32) -> (i32, i32) {
    %c0_i32 = arith.constant 0 : i32
    %c0_i32_0 = arith.constant 0 : i32
    %c0_i32_1 = arith.constant 0 : i32
    return %c0_i32, %c0_i32_0 : i32, i32
  }
  func.func @transform_7(%arg0: i32) -> (i32, i32) {
    %c0_i32 = arith.constant 0 : i32
    %c0_i32_0 = arith.constant 0 : i32
    %c0_i32_1 = arith.constant 0 : i32
    return %c0_i32, %c0_i32_0 : i32, i32
  }
  func.func @transform_8(%arg0: i32) -> (i32, i32) {
    %c0_i32 = arith.constant 0 : i32
    %c0_i32_0 = arith.constant 0 : i32
    %c0_i32_1 = arith.constant 0 : i32
    return %c0_i32, %c0_i32_0 : i32, i32
  }
  func.func @transform_9(%arg0: i32) -> (i32, i32, i32) {
    %c0_i32 = arith.constant 0 : i32
    %c0_i32_0 = arith.constant 0 : i32
    %c0_i32_1 = arith.constant 0 : i32
    return %arg0, %c0_i32, %c0_i32_0 : i32, i32, i32
  }
}

</mosaic_0001>

<bundles_post_ra>
// kernel: tpu_custom_call.1
= control target key start
LH: loop header
LB: loop body
LE: loop exit
PB: predicated region body
PF: predicated region fallthrough
CT: control target
= control target key end

     0   :  { %s7741_s0 = inlined_call_operand.hbm [shape: bf16[8,784], index: 0, kind: input, shape index: {}]   ;;  %s7742_s1 = inlined_call_operand.hbm [shape: bf16[784,1024], index: 1, kind: input, shape index: {}]   ;;  %s7743_s2 = inlined_call_operand.hbm [shape: bf16[1,1024], index: 2, kind: input, shape index: {}]   ;;  %s7744_s3 = inlined_call_operand.hbm [shape: bf16[1024,512], index: 3, kind: input, shape index: {}]   ;;  %s7745_s4 = inlined_call_operand.hbm [shape: bf16[1,512], index: 4, kind: input, shape index: {}]   ;;  %s7746_s5 = inlined_call_operand.hbm [shape: bf16[512,256], index: 5, kind: input, shape index: {}]   ;;  %s7747_s6 = inlined_call_operand.hbm [shape: bf16[1,256], index: 6, kind: input, shape index: {}]   ;;  %s7748_s7 = inlined_call_operand.hbm [shape: bf16[1,256], index: 7, kind: input, shape index: {}]   ;;  %s7749_s8 = inlined_call_operand.<no memory space> [shape: f32[1,1], index: 8, kind: input, shape index: {}]   ;;  %s7750_s9 = inlined_call_operand.hbm [shape: f32[1,1,8], index: 9, kind: output, shape index: {}]  }
   0x1   :  { %v14_v0 = vstv %s7749_s8 }
   0x2   :  { %15 = vst [vmem:[#allocation2] sm:$0x1] %v14_v0 }
   0x3   :  { %16 = vsyncpa [#allocation4], 0 }
   0x4   :  { %17 = vsyncpa [#allocation7], 0 }
   0x5   :  { %18 = vsyncpa [#allocation10], 0 }
   0x6   :  { %19 = vsyncpa [#allocation13], 0 }
   0x7   :  { %20 = vsyncpa [#allocation16], 0 }
   0x8   :  { %21 = vsyncpa [#allocation5], 0  ;;  %s7387_s11 = smov [#allocation6]   ;;  %s7177_s15 = scalar_lea.hbm %s7742_s1, 50176 }
   0x9   :  { %s37_s12 = sshll.u32 %s7387_s11, 4  ;;  %p7178_p0 = scmp.ne.s32.totalorder %s7742_s1, %s7177_s15  ;;  %s38_s12 = int_to_ptr.vmem [resolvable:$true] %s37_s12 }
   0xa   :  { %p7181_p1 = scmp.lt.u32.totalorder %s7177_s15, %s7742_s1 }
   0xc   :  { %p7183_p2 = pnand %p7181_p1, %p7178_p0 }
   0xe   :  { %7186 = shalt.err (!%p7183_p2)
}
   0xf   :  { %s7187_s19 = scalar_lea.vmem %s38_s12, 50176  ;;  %p7192_p4 = scmp.lt.s32.totalorder %s38_s12, %s38_s12 }
  0x10   :  { %p7188_p3 = scmp.ne.s32.totalorder %s38_s12, %s7187_s19  ;;  %p7193_p5 = scmp.lt.s32.totalorder %s7187_s19, %s7187_s19 }
  0x12   :  { %p7194_p6 = por %p7193_p5, %p7192_p4 }
  0x14   :  { %p7195_p7 = pnand %p7194_p6, %p7188_p3 }
  0x16   :  { %7198 = shalt.err (!%p7195_p7)
}
  0x17   :  { %s7388_s20 = smov 512   ;;  %s7389_s21 = smov 32  }
  0x18   :  { %43 = dma.hbm_to_vmem [thread:$0]  %s7742_s1, 50176, %s38_s12, [#allocation7], %s7388_s20, %s7388_s20, %s7389_s21  }
  0x19   :  { %s7390_s24 = smov [#allocation9]   ;;  %s7199_s28 = scalar_lea.hbm %s7744_s3, 32768 }
  0x1a   :  { %s59_s25 = sshll.u32 %s7390_s24, 4  ;;  %p7200_p8 = scmp.ne.s32.totalorder %s7744_s3, %s7199_s28  ;;  %s60_s25 = int_to_ptr.vmem [resolvable:$true] %s59_s25 }
  0x1b   :  { %p7203_p9 = scmp.lt.u32.totalorder %s7199_s28, %s7744_s3 }
  0x1d   :  { %p7205_p10 = pnand %p7203_p9, %p7200_p8 }
  0x1f   :  { %7208 = shalt.err (!%p7205_p10)
}
  0x20   :  { %s7209_s13 = scalar_lea.vmem %s60_s25, 32768  ;;  %p7214_p12 = scmp.lt.s32.totalorder %s60_s25, %s60_s25 }
  0x21   :  { %p7210_p11 = scmp.ne.s32.totalorder %s60_s25, %s7209_s13  ;;  %p7215_p13 = scmp.lt.s32.totalorder %s7209_s13, %s7209_s13 }
  0x23   :  { %p7216_p0 = por %p7215_p13, %p7214_p12 }
  0x25   :  { %p7217_p1 = pnand %p7216_p0, %p7210_p11 }
  0x27   :  { %7220 = shalt.err (!%p7217_p1)
}
  0x28   :  { %s7391_s1 = smov 256   ;;  %s7392_s12 = smov 16  }
  0x29   :  { %65 = dma.hbm_to_vmem [thread:$0]  %s7744_s3, 32768, %s60_s25, [#allocation10], %s7391_s1, %s7391_s1, %s7392_s12  }
  0x2a   :  { %s7393_s16 = smov [#allocation12]   ;;  %s7221_s19 = scalar_lea.hbm %s7746_s5, 8192 }
  0x2b   :  { %s81_s17 = sshll.u32 %s7393_s16, 4  ;;  %p7222_p2 = scmp.ne.s32.totalorder %s7746_s5, %s7221_s19  ;;  %s82_s17 = int_to_ptr.vmem [resolvable:$true] %s81_s17 }
  0x2c   :  { %p7225_p3 = scmp.lt.u32.totalorder %s7221_s19, %s7746_s5 }
  0x2e   :  { %p7227_p4 = pnand %p7225_p3, %p7222_p2 }
  0x30   :  { %7230 = shalt.err (!%p7227_p4)
}
  0x31   :  { %s7231_s24 = scalar_lea.vmem %s82_s17, 8192  ;;  %p7236_p6 = scmp.lt.s32.totalorder %s82_s17, %s82_s17 }
  0x32   :  { %p7232_p5 = scmp.ne.s32.totalorder %s82_s17, %s7231_s24  ;;  %p7237_p7 = scmp.lt.s32.totalorder %s7231_s24, %s7231_s24 }
  0x34   :  { %p7238_p8 = por %p7237_p7, %p7236_p6 }
  0x36   :  { %p7239_p9 = pnand %p7238_p8, %p7232_p5 }
  0x38   :  { %7242 = shalt.err (!%p7239_p9)
}
  0x39   :  { %s7394_s3 = smov 128   ;;  %s7395_s25 = smov 8  }
  0x3a   :  { %87 = dma.hbm_to_vmem [thread:$0]  %s7746_s5, 8192, %s82_s17, [#allocation13], %s7394_s3, %s7394_s3, %s7395_s25  }
  0x3b   :  { %s7396_s28 = smov [#allocation3]   ;;  %s7397_s30 = smov [#allocation8]  }
  0x3c   :  { %s28_s29 = sshll.u32 %s7396_s28, 4  ;;  %s50_s10 = sshll.u32 %s7397_s30, 4  ;;  %s29_s29 = int_to_ptr.vmem [resolvable:$true] %s28_s29  ;;  %s51_s10 = int_to_ptr.vmem [resolvable:$true] %s50_s10 }
  0x3d   :  { %s7243_s1 = scalar_lea.hbm %s7741_s0, 448 }
  0x3e   :  { %p7244_p10 = scmp.ne.s32.totalorder %s7741_s0, %s7243_s1  ;;  %p7247_p11 = scmp.lt.u32.totalorder %s7243_s1, %s7741_s0 }
  0x40   :  { %p7249_p12 = pnand %p7247_p11, %p7244_p10 }
  0x42   :  { %7252 = shalt.err (!%p7249_p12)
}
  0x43   :  { %s7253_s5 = scalar_lea.vmem %s29_s29, 448  ;;  %p7258_p0 = scmp.lt.s32.totalorder %s29_s29, %s29_s29 }
  0x44   :  { %p7254_p13 = scmp.ne.s32.totalorder %s29_s29, %s7253_s5  ;;  %p7259_p1 = scmp.lt.s32.totalorder %s7253_s5, %s7253_s5 }
  0x46   :  { %p7260_p2 = por %p7259_p1, %p7258_p0 }
  0x48   :  { %p7261_p3 = pnand %p7260_p2, %p7254_p13 }
  0x4a   :  { %7264 = shalt.err (!%p7261_p3)
}
  0x4b   :  { %31 = dma.hbm_to_vmem [thread:$0]  %s7741_s0, 448, %s29_s29, [#allocation4]  }
  0x4c   :  { %s7265_s20 = scalar_lea.hbm %s7743_s2, 128 }
  0x4d   :  { %p7266_p4 = scmp.ne.s32.totalorder %s7743_s2, %s7265_s20  ;;  %p7269_p5 = scmp.lt.u32.totalorder %s7265_s20, %s7743_s2 }
  0x4f   :  { %p7271_p6 = pnand %p7269_p5, %p7266_p4 }
  0x51   :  { %7274 = shalt.err (!%p7271_p6)
}
  0x52   :  { %s7275_s3 = scalar_lea.vmem %s51_s10, 128  ;;  %p7280_p8 = scmp.lt.s32.totalorder %s51_s10, %s51_s10 }
  0x53   :  { %p7276_p7 = scmp.ne.s32.totalorder %s51_s10, %s7275_s3  ;;  %p7281_p9 = scmp.lt.s32.totalorder %s7275_s3, %s7275_s3 }
  0x55   :  { %p7282_p10 = por %p7281_p9, %p7280_p8 }
  0x57   :  { %p7283_p11 = pnand %p7282_p10, %p7276_p7 }
  0x59   :  { %7286 = shalt.err (!%p7283_p11)
}
  0x5a   :  { %53 = dma.hbm_to_vmem [thread:$0]  %s7743_s2, 128, %s51_s10, [#allocation7]  }
  0x5b   :  { %s7398_s26 = smov [#allocation11]   ;;  %s7399_s28 = smov [#allocation14]  }
  0x5c   :  { %s72_s27 = sshll.u32 %s7398_s26, 4  ;;  %s94_s29 = sshll.u32 %s7399_s28, 4  ;;  %s73_s27 = int_to_ptr.vmem [resolvable:$true] %s72_s27  ;;  %s95_s29 = int_to_ptr.vmem [resolvable:$true] %s94_s29 }
  0x5d   :  { %s7287_s13 = scalar_lea.hbm %s7745_s4, 64 }
  0x5e   :  { %p7288_p12 = scmp.ne.s32.totalorder %s7745_s4, %s7287_s13  ;;  %p7291_p13 = scmp.lt.u32.totalorder %s7287_s13, %s7745_s4 }
  0x60   :  { %p7293_p0 = pnand %p7291_p13, %p7288_p12 }
  0x62   :  { %7296 = shalt.err (!%p7293_p0)
}
  0x63   :  { %s7297_s2 = scalar_lea.vmem %s73_s27, 64  ;;  %p7302_p2 = scmp.lt.s32.totalorder %s73_s27, %s73_s27 }
  0x64   :  { %p7298_p1 = scmp.ne.s32.totalorder %s73_s27, %s7297_s2  ;;  %p7303_p3 = scmp.lt.s32.totalorder %s7297_s2, %s7297_s2 }
  0x66   :  { %p7304_p4 = por %p7303_p3, %p7302_p2 }
  0x68   :  { %p7305_p5 = pnand %p7304_p4, %p7298_p1 }
  0x6a   :  { %7308 = shalt.err (!%p7305_p5)
}
  0x6b   :  { %75 = dma.hbm_to_vmem [thread:$0]  %s7745_s4, 64, %s73_s27, [#allocation10]  }
  0x6c   :  { %s7309_s18 = scalar_lea.hbm %s7747_s6, 32 }
  0x6d   :  { %p7310_p6 = scmp.ne.s32.totalorder %s7747_s6, %s7309_s18  ;;  %p7313_p7 = scmp.lt.u32.totalorder %s7309_s18, %s7747_s6 }
  0x6f   :  { %p7315_p8 = pnand %p7313_p7, %p7310_p6 }
  0x71   :  { %7318 = shalt.err (!%p7315_p8)
}
  0x72   :  { %s7319_s22 = scalar_lea.vmem %s95_s29, 32  ;;  %p7324_p10 = scmp.lt.s32.totalorder %s95_s29, %s95_s29 }
  0x73   :  { %p7320_p9 = scmp.ne.s32.totalorder %s95_s29, %s7319_s22  ;;  %p7325_p11 = scmp.lt.s32.totalorder %s7319_s22, %s7319_s22 }
  0x75   :  { %p7326_p12 = por %p7325_p11, %p7324_p10 }
  0x77   :  { %p7327_p13 = pnand %p7326_p12, %p7320_p9 }
  0x79   :  { %7330 = shalt.err (!%p7327_p13)
}
  0x7a   :  { %97 = dma.hbm_to_vmem [thread:$0]  %s7747_s6, 32, %s95_s29, [#allocation13]  }
  0x7b   :  { %s7400_s24 = smov [#allocation15]   ;;  %s7331_s26 = scalar_lea.hbm %s7748_s7, 32 }
  0x7c   :  { %s104_s3 = sshll.u32 %s7400_s24, 4  ;;  %p7332_p0 = scmp.ne.s32.totalorder %s7748_s7, %s7331_s26  ;;  %s105_s3 = int_to_ptr.vmem [resolvable:$true] %s104_s3 }
  0x7d   :  { %p7335_p1 = scmp.lt.u32.totalorder %s7331_s26, %s7748_s7 }
  0x7f   :  { %p7337_p2 = pnand %p7335_p1, %p7332_p0 }
  0x81   :  { %7340 = shalt.err (!%p7337_p2)
}
  0x82   :  { %s7341_s13 = scalar_lea.vmem %s105_s3, 32  ;;  %p7346_p4 = scmp.lt.s32.totalorder %s105_s3, %s105_s3 }
  0x83   :  { %p7342_p3 = scmp.ne.s32.totalorder %s105_s3, %s7341_s13  ;;  %p7347_p5 = scmp.lt.s32.totalorder %s7341_s13, %s7341_s13 }
  0x85   :  { %p7348_p6 = por %p7347_p5, %p7346_p4 }
  0x87   :  { %p7349_p7 = pnand %p7348_p6, %p7342_p3 }
  0x89   :  { %7352 = shalt.err (!%p7349_p7)
}
  0x8a   :  { %107 = dma.hbm_to_vmem [thread:$0]  %s7748_s7, 32, %s105_s3, [#allocation16]  }
  0x8b   :  { %7375 = dma.done.wait [#allocation4], 448  }
  0x8c   :  { %7376 = vsyncadd [#allocation4], 4294966848 }
  0x8d   :  { %7377 = dma.done.wait [#allocation7], 50304  }
  0x8e   :  { %7378 = vsyncadd [#allocation7], 4294916992 }
  0x8f   :  { %7379 = dma.done.wait [#allocation10], 32832  }
  0x90   :  { %7380 = vsyncadd [#allocation10], 4294934464 }
  0x91   :  { %7381 = dma.done.wait [#allocation13], 8224  }
  0x92   :  { %7382 = vsyncadd [#allocation13], 4294959072 }
  0x93   :  { %7383 = dma.done.wait [#allocation16], 32  }
  0x94   :  { %7384 = vsyncadd [#allocation16], 4294967264  ;;  %v140_v1 = vld [vmem:[#allocation6] sm:$0xff]  ;;  %v7401_v43 = vmov 0   ;;  %v7556_v56 = vld [vmem:[#allocation3 + $0x8] sm:$0xff]  ;;  %vm2516_vm0 = vcmask 130048  }
  0x95   :  { %v144_v2 = vld [vmem:[#allocation6 + $0x20] sm:$0xff]  ;;  %6682 = vset.pattern.permute.xlu0 %v7401_v43  ;;  %v7564_v63 = vcombine.high %v7556_v56, %v7556_v56  ;;  %s7403_s7 = smov [#allocation17]   ;;  %vm5843_vm1 = vcmask 57344  }
  0x96   :  { %v268_v3 = vld [vmem:[#allocation6 + $0x400] sm:$0xff]  ;;  %v5872_v4 = vcombine.high %v140_v1, %v144_v2  ;;  %v5871_v6 = vcombine.low %v140_v1, %v144_v2  ;;  %s5851_s1 = sshll.u32 %s7403_s7, 4  ;;  %s5852_s1 = int_to_ptr.vmem [resolvable:$true] %s5851_s1 }
  0x97   :  { %v272_v5 = vld [vmem:[#allocation6 + $0x420] sm:$0xff]  ;;  %2593 = vmatprep.mubr.bf16.mxu0 %v7564_v63  ;;  %s7353_s12 = scalar_lea.vmem %s5852_s1, 16  ;;  %s7357_s14 = scalar_lea.vmem %s5852_s1, 32 }
  0x98   :  { %v148_v7 = vld [vmem:[#allocation6 + $0x40] sm:$0xff]  ;;  %v6000_v9 = vcombine.high %v268_v3, %v272_v5  ;;  %v5999_v10 = vcombine.low %v268_v3, %v272_v5  ;;  %2520 = vmatprep.subr.bf16.mxu1 %v5872_v4  ;;  %p7354_p8 = scmp.ne.s32.totalorder %s5852_s1, %s7353_s12  ;;  %p7358_p9 = scmp.lt.s32.totalorder %s5852_s1, %s5852_s1 }
  0x99   :  { %v152_v8 = vld [vmem:[#allocation6 + $0x60] sm:$0xff]  ;;  %2521 = vmatpush1.bf16.msra.mxu1 %v5871_v6  ;;  %p7359_p10 = scmp.lt.s32.totalorder %s7357_s14, %s7353_s12 }
  0x9a   :  { %v5880_v11 = vcombine.high %v148_v7, %v152_v8  ;;  %v276_v12 = vld [vmem:[#allocation6 + $0x440] sm:$0xff]  ;;  %2561 = vmatprep.subr.bf16.mxu0 %v6000_v9  ;;  %v5879_v19 = vcombine.low %v148_v7, %v152_v8 }
  0x9b   :  { %v280_v13 = vld [vmem:[#allocation6 + $0x460] sm:$0xff]  ;;  %2562 = vmatpush1.bf16.msra.mxu0 %v5999_v10  ;;  %p7360_p11 = por %p7359_p10, %p7358_p9 }
  0x9c   :  { %v156_v14 = vld [vmem:[#allocation6 + $0x80] sm:$0xff]  ;;  %v6008_v15 = vcombine.high %v276_v12, %v280_v13  ;;  %2522 = vmatprep.subr.bf16.mxu1 %v5880_v11  ;;  %v6007_v20 = vcombine.low %v276_v12, %v280_v13 }
  0x9d   :  { %v160_v16 = vld [vmem:[#allocation6 + $0xa0] sm:$0xff]  ;;  %2523 = vmatpush1.bf16.msra.mxu1 %v5879_v19  ;;  %p7361_p12 = pnand %p7360_p11, %p7354_p8 }
  0x9e   :  { %v284_v17 = vld [vmem:[#allocation6 + $0x480] sm:$0xff]  ;;  %v5888_v21 = vcombine.high %v156_v14, %v160_v16  ;;  %2563 = vmatprep.subr.bf16.mxu0 %v6008_v15  ;;  %v5887_v27 = vcombine.low %v156_v14, %v160_v16 }
  0x9f   :  { %v288_v18 = vld [vmem:[#allocation6 + $0x4a0] sm:$0xff]  ;;  %2564 = vmatpush1.bf16.msra.mxu0 %v6007_v20 }
  0xa0   :  { %v6016_v22 = vcombine.high %v284_v17, %v288_v18  ;;  %v164_v23 = vld [vmem:[#allocation6 + $0xc0] sm:$0xff]  ;;  %2524 = vmatprep.subr.bf16.mxu1 %v5888_v21  ;;  %v6015_v28 = vcombine.low %v284_v17, %v288_v18 }
  0xa1   :  { %v168_v24 = vld [vmem:[#allocation6 + $0xe0] sm:$0xff]  ;;  %2525 = vmatpush1.bf16.msra.mxu1 %v5887_v27 }
  0xa2   :  { %v292_v25 = vld [vmem:[#allocation6 + $0x4c0] sm:$0xff]  ;;  %v5896_v29 = vcombine.high %v164_v23, %v168_v24  ;;  %2565 = vmatprep.subr.bf16.mxu0 %v6016_v22  ;;  %v5895_v35 = vcombine.low %v164_v23, %v168_v24 }
  0xa3   :  { %v296_v26 = vld [vmem:[#allocation6 + $0x4e0] sm:$0xff]  ;;  %2566 = vmatpush1.bf16.msra.mxu0 %v6015_v28 }
  0xa4   :  { %v6024_v30 = vcombine.high %v292_v25, %v296_v26  ;;  %v172_v31 = vld [vmem:[#allocation6 + $0x100] sm:$0xff]  ;;  %2526 = vmatprep.subr.bf16.mxu1 %v5896_v29  ;;  %v6023_v36 = vcombine.low %v292_v25, %v296_v26 }
  0xa5   :  { %v176_v32 = vld [vmem:[#allocation6 + $0x120] sm:$0xff]  ;;  %2527 = vmatpush1.bf16.msra.mxu1 %v5895_v35 }
  0xa6   :  { %v300_v33 = vld [vmem:[#allocation6 + $0x500] sm:$0xff]  ;;  %v5904_v37 = vcombine.high %v172_v31, %v176_v32  ;;  %2567 = vmatprep.subr.bf16.mxu0 %v6024_v30  ;;  %v5903_v44 = vcombine.low %v172_v31, %v176_v32 }
  0xa7   :  { %v304_v34 = vld [vmem:[#allocation6 + $0x520] sm:$0xff]  ;;  %2568 = vmatpush1.bf16.msra.mxu0 %v6023_v36 }
  0xa8   :  { %v6032_v38 = vcombine.high %v300_v33, %v304_v34  ;;  %v180_v39 = vld [vmem:[#allocation6 + $0x140] sm:$0xff]  ;;  %2528 = vmatprep.subr.bf16.mxu1 %v5904_v37  ;;  %v6031_v45 = vcombine.low %v300_v33, %v304_v34 }
  0xa9   :  { %v184_v40 = vld [vmem:[#allocation6 + $0x160] sm:$0xff]  ;;  %2529 = vmatpush1.bf16.msra.mxu1 %v5903_v44 }
  0xaa   :  { %v308_v41 = vld [vmem:[#allocation6 + $0x540] sm:$0xff]  ;;  %v5912_v46 = vcombine.high %v180_v39, %v184_v40  ;;  %2569 = vmatprep.subr.bf16.mxu0 %v6032_v38  ;;  %v5911_v52 = vcombine.low %v180_v39, %v184_v40 }
  0xab   :  { %v312_v42 = vld [vmem:[#allocation6 + $0x560] sm:$0xff]  ;;  %2570 = vmatpush1.bf16.msra.mxu0 %v6031_v45 }
  0xac   :  { %v6040_v47 = vcombine.high %v308_v41, %v312_v42  ;;  %v188_v48 = vld [vmem:[#allocation6 + $0x180] sm:$0xff]  ;;  %2530 = vmatprep.subr.bf16.mxu1 %v5912_v46  ;;  %v6039_v53 = vcombine.low %v308_v41, %v312_v42 }
  0xad   :  { %v192_v49 = vld [vmem:[#allocation6 + $0x1a0] sm:$0xff]  ;;  %2531 = vmatpush1.bf16.msra.mxu1 %v5911_v52 }
  0xae   :  { %v316_v50 = vld [vmem:[#allocation6 + $0x580] sm:$0xff]  ;;  %v5920_v54 = vcombine.high %v188_v48, %v192_v49  ;;  %2571 = vmatprep.subr.bf16.mxu0 %v6040_v47  ;;  %v5919_v0 = vcombine.low %v188_v48, %v192_v49 }
  0xaf   :  { %v320_v51 = vld [vmem:[#allocation6 + $0x5a0] sm:$0xff]  ;;  %2572 = vmatpush1.bf16.msra.mxu0 %v6039_v53 }
  0xb0   :  { %v7554_v55 = vld [vmem:[#allocation3] sm:$0xff]  ;;  %v6048_v57 = vcombine.high %v316_v50, %v320_v51  ;;  %2532 = vmatprep.subr.bf16.mxu1 %v5920_v54  ;;  %v6047_v1 = vcombine.low %v316_v50, %v320_v51 }
  0xb1   :  { %v196_v58 = vld [vmem:[#allocation6 + $0x1c0] sm:$0xff]  ;;  %v7560_v60 = vcombine.high %v7554_v55, %v7554_v55  ;;  %2533 = vmatpush1.bf16.msra.mxu1 %v5919_v0 }
  0xb2   :  { %v200_v59 = vld [vmem:[#allocation6 + $0x1e0] sm:$0xff]  ;;  %2573 = vmatprep.subr.bf16.mxu0 %v6048_v57 }
  0xb3   :  { %v324_v61 = vld [vmem:[#allocation6 + $0x5c0] sm:$0xff]  ;;  %2552 = vmatprep.mubr.bf16.mxu1 %v7560_v60  ;;  %v5928_v2 = vcombine.high %v196_v58, %v200_v59  ;;  %v5927_v8 = vcombine.low %v196_v58, %v200_v59  ;;  %2574 = vmatpush1.bf16.msra.mxu0 %v6047_v1 }
  0xb4   :  { %v328_v62 = vld [vmem:[#allocation6 + $0x5e0] sm:$0xff] }
  0xb5   :  { %v6056_v3 = vcombine.high %v324_v61, %v328_v62  ;;  %v204_v4 = vld [vmem:[#allocation6 + $0x200] sm:$0xff]  ;;  %2534 = vmatprep.subr.bf16.mxu1 %v5928_v2  ;;  %v6055_v9 = vcombine.low %v324_v61, %v328_v62 }
  0xb6   :  { %v208_v5 = vld [vmem:[#allocation6 + $0x220] sm:$0xff]  ;;  %2535 = vmatpush1.bf16.msra.mxu1 %v5927_v8 }
  0xb7   :  { %v332_v6 = vld [vmem:[#allocation6 + $0x600] sm:$0xff]  ;;  %v5936_v10 = vcombine.high %v204_v4, %v208_v5  ;;  %2575 = vmatprep.subr.bf16.mxu0 %v6056_v3  ;;  %v5935_v16 = vcombine.low %v204_v4, %v208_v5 }
  0xb8   :  { %v336_v7 = vld [vmem:[#allocation6 + $0x620] sm:$0xff]  ;;  %2576 = vmatpush1.bf16.msra.mxu0 %v6055_v9  ;;  %v141_v9 = vld [vmem:[#allocation6 + $0x8] sm:$0xff] }
  0xb9   :  { %v6064_v11 = vcombine.high %v332_v6, %v336_v7  ;;  %v212_v12 = vld [vmem:[#allocation6 + $0x240] sm:$0xff]  ;;  %2536 = vmatprep.subr.bf16.mxu1 %v5936_v10  ;;  %v6063_v17 = vcombine.low %v332_v6, %v336_v7  ;;  %v145_v10 = vld [vmem:[#allocation6 + $0x28] sm:$0xff] }
  0xba   :  { %v216_v13 = vld [vmem:[#allocation6 + $0x260] sm:$0xff]  ;;  %2537 = vmatpush1.bf16.msra.mxu1 %v5935_v16 }
  0xbb   :  { %v340_v14 = vld [vmem:[#allocation6 + $0x640] sm:$0xff]  ;;  %v5944_v18 = vcombine.high %v212_v12, %v216_v13  ;;  %2577 = vmatprep.subr.bf16.mxu0 %v6064_v11  ;;  %v5943_v24 = vcombine.low %v212_v12, %v216_v13 }
  0xbc   :  { %v344_v15 = vld [vmem:[#allocation6 + $0x660] sm:$0xff]  ;;  %2578 = vmatpush1.bf16.msra.mxu0 %v6063_v17  ;;  %v149_v17 = vld [vmem:[#allocation6 + $0x48] sm:$0xff] }
  0xbd   :  { %v6072_v19 = vcombine.high %v340_v14, %v344_v15  ;;  %v220_v20 = vld [vmem:[#allocation6 + $0x280] sm:$0xff]  ;;  %2538 = vmatprep.subr.bf16.mxu1 %v5944_v18  ;;  %v6071_v25 = vcombine.low %v340_v14, %v344_v15  ;;  %v5874_v15 = vcombine.high %v141_v9, %v145_v10  ;;  %v153_v18 = vld [vmem:[#allocation6 + $0x68] sm:$0xff] }
  0xbe   :  { %v224_v21 = vld [vmem:[#allocation6 + $0x2a0] sm:$0xff]  ;;  %2539 = vmatpush1.bf16.msra.mxu1 %v5943_v24  ;;  %v7576_v24 = vcombine.low %v7556_v56, %v7556_v56  ;;  %v5881_v56 = vcombine.low %v149_v17, %v153_v18 }
  0xbf   :  { %v348_v22 = vld [vmem:[#allocation6 + $0x680] sm:$0xff]  ;;  %v5952_v26 = vcombine.high %v220_v20, %v224_v21  ;;  %2579 = vmatprep.subr.bf16.mxu0 %v6072_v19  ;;  %v5951_v32 = vcombine.low %v220_v20, %v224_v21  ;;  %v7570_v19 = vcombine.low %v7554_v55, %v7554_v55  ;;  %v157_v55 = vld [vmem:[#allocation6 + $0x88] sm:$0xff] }
  0xc0   :  { %v352_v23 = vld [vmem:[#allocation6 + $0x6a0] sm:$0xff]  ;;  %2580 = vmatpush1.bf16.msra.mxu0 %v6071_v25 }
  0xc1   :  { %v6080_v27 = vcombine.high %v348_v22, %v352_v23  ;;  %v228_v28 = vld [vmem:[#allocation6 + $0x2c0] sm:$0xff]  ;;  %2540 = vmatprep.subr.bf16.mxu1 %v5952_v26  ;;  %v6079_v33 = vcombine.low %v348_v22, %v352_v23  ;;  %v7572_v22 = vld [vmem:[#allocation3 + $0x10] sm:$0xff]  ;;  %v5873_v23 = vcombine.low %v141_v9, %v145_v10  ;;  %v5882_v26 = vcombine.high %v149_v17, %v153_v18  ;;  %v197_v10 = vld [vmem:[#allocation6 + $0x1c8] sm:$0xff] }
  0xc2   :  { %v232_v29 = vld [vmem:[#allocation6 + $0x2e0] sm:$0xff]  ;;  %2541 = vmatpush1.bf16.msra.mxu1 %v5951_v32  ;;  %v205_v18 = vld [vmem:[#allocation6 + $0x208] sm:$0xff] }
  0xc3   :  { %v356_v30 = vld [vmem:[#allocation6 + $0x6c0] sm:$0xff]  ;;  %v5960_v34 = vcombine.high %v228_v28, %v232_v29  ;;  %2581 = vmatprep.subr.bf16.mxu0 %v6080_v27  ;;  %v5959_v40 = vcombine.low %v228_v28, %v232_v29 }
  0xc4   :  { %v360_v31 = vld [vmem:[#allocation6 + $0x6e0] sm:$0xff]  ;;  %2582 = vmatpush1.bf16.msra.mxu0 %v6079_v33 }
  0xc5   :  { %v6088_v35 = vcombine.high %v356_v30, %v360_v31  ;;  %v236_v36 = vld [vmem:[#allocation6 + $0x300] sm:$0xff]  ;;  %2542 = vmatprep.subr.bf16.mxu1 %v5960_v34  ;;  %v6087_v41 = vcombine.low %v356_v30, %v360_v31  ;;  %v161_v30 = vld [vmem:[#allocation6 + $0xa8] sm:$0xff]  ;;  %v7580_v31 = vcombine.high %v7572_v22, %v7572_v22 }
  0xc6   :  { %v240_v37 = vld [vmem:[#allocation6 + $0x320] sm:$0xff]  ;;  %2543 = vmatpush1.bf16.msra.mxu1 %v5959_v40  ;;  %v5890_v33 = vcombine.high %v157_v55, %v161_v30 }
  0xc7   :  { %v364_v38 = vld [vmem:[#allocation6 + $0x700] sm:$0xff]  ;;  %v5968_v42 = vcombine.high %v236_v36, %v240_v37  ;;  %2583 = vmatprep.subr.bf16.mxu0 %v6088_v35  ;;  %v5967_v49 = vcombine.low %v236_v36, %v240_v37  ;;  %v165_v37 = vld [vmem:[#allocation6 + $0xc8] sm:$0xff] }
  0xc8   :  { %v368_v39 = vld [vmem:[#allocation6 + $0x720] sm:$0xff]  ;;  %2584 = vmatpush1.bf16.msra.mxu0 %v6087_v41 }
  0xc9   :  { %v6096_v44 = vcombine.high %v364_v38, %v368_v39  ;;  %v244_v45 = vld [vmem:[#allocation6 + $0x340] sm:$0xff]  ;;  %2544 = vmatprep.subr.bf16.mxu1 %v5968_v42  ;;  %v6095_v50 = vcombine.low %v364_v38, %v368_v39  ;;  %v169_v38 = vld [vmem:[#allocation6 + $0xe8] sm:$0xff]  ;;  %v5889_v39 = vcombine.low %v157_v55, %v161_v30 }
  0xca   :  { %v248_v46 = vld [vmem:[#allocation6 + $0x360] sm:$0xff]  ;;  %2545 = vmatpush1.bf16.msra.mxu1 %v5967_v49  ;;  %v5898_v41 = vcombine.high %v165_v37, %v169_v38  ;;  %v217_v55 = vld [vmem:[#allocation6 + $0x268] sm:$0xff] }
  0xcb   :  { %v372_v47 = vld [vmem:[#allocation6 + $0x740] sm:$0xff]  ;;  %v5976_v51 = vcombine.high %v244_v45, %v248_v46  ;;  %2585 = vmatprep.subr.bf16.mxu0 %v6096_v44  ;;  %v5975_v59 = vcombine.low %v244_v45, %v248_v46  ;;  %v173_v46 = vld [vmem:[#allocation6 + $0x108] sm:$0xff] }
  0xcc   :  { %v376_v48 = vld [vmem:[#allocation6 + $0x760] sm:$0xff]  ;;  %2586 = vmatpush1.bf16.msra.mxu0 %v6095_v50 }
  0xcd   :  { %v6104_v52 = vcombine.high %v372_v47, %v376_v48  ;;  %v252_v53 = vld [vmem:[#allocation6 + $0x380] sm:$0xff]  ;;  %2546 = vmatprep.subr.bf16.mxu1 %v5976_v51  ;;  %v6103_v61 = vcombine.low %v372_v47, %v376_v48  ;;  %v177_v47 = vld [vmem:[#allocation6 + $0x128] sm:$0xff]  ;;  %v5897_v48 = vcombine.low %v165_v37, %v169_v38 }
  0xce   :  { %v256_v54 = vld [vmem:[#allocation6 + $0x3a0] sm:$0xff]  ;;  %2547 = vmatpush1.bf16.msra.mxu1 %v5975_v59  ;;  %v5906_v50 = vcombine.high %v173_v46, %v177_v47  ;;  %v225_v37 = vld [vmem:[#allocation6 + $0x2a8] sm:$0xff] }
  0xcf   :  { %v380_v57 = vld [vmem:[#allocation6 + $0x780] sm:$0xff]  ;;  %v5984_v62 = vcombine.high %v252_v53, %v256_v54  ;;  %2587 = vmatprep.subr.bf16.mxu0 %v6104_v52  ;;  %v5983_v5 = vcombine.low %v252_v53, %v256_v54  ;;  %v181_v54 = vld [vmem:[#allocation6 + $0x148] sm:$0xff] }
  0xd0   :  { %v384_v58 = vld [vmem:[#allocation6 + $0x7a0] sm:$0xff]  ;;  %2588 = vmatpush1.bf16.msra.mxu0 %v6103_v61 }
  0xd1   :  { %v6112_v0 = vcombine.high %v380_v57, %v384_v58  ;;  %v260_v1 = vld [vmem:[#allocation6 + $0x3c0] sm:$0xff]  ;;  %2548 = vmatprep.subr.bf16.mxu1 %v5984_v62  ;;  %v6111_v6 = vcombine.low %v380_v57, %v384_v58  ;;  %v185_v57 = vld [vmem:[#allocation6 + $0x168] sm:$0xff]  ;;  %v5905_v58 = vcombine.low %v173_v46, %v177_v47 }
  0xd2   :  { %v264_v2 = vld [vmem:[#allocation6 + $0x3e0] sm:$0xff]  ;;  %2549 = vmatpush1.bf16.msra.mxu1 %v5983_v5  ;;  %v5914_v61 = vcombine.high %v181_v54, %v185_v57  ;;  %v233_v46 = vld [vmem:[#allocation6 + $0x2e8] sm:$0xff] }
  0xd3   :  { %v388_v3 = vld [vmem:[#allocation6 + $0x7c0] sm:$0xff]  ;;  %v5992_v7 = vcombine.high %v260_v1, %v264_v2  ;;  %2589 = vmatprep.subr.bf16.mxu0 %v6112_v0  ;;  %v5991_v13 = vcombine.low %v260_v1, %v264_v2  ;;  %v189_v2 = vld [vmem:[#allocation6 + $0x188] sm:$0xff] }
  0xd4   :  { %v392_v4 = vld [vmem:[#allocation6 + $0x7e0] sm:$0xff]  ;;  %2590 = vmatpush1.bf16.msra.mxu0 %v6111_v6 }
  0xd5   :  { %v6120_v8 = vcombine.high %v388_v3, %v392_v4  ;;  %v396_v11 = vld [vmem:[#allocation6 + $0x800] sm:$0xff]  ;;  %2550 = vmatprep.subr.bf16.mxu1 %v5992_v7  ;;  %v6119_v14 = vcombine.low %v388_v3, %v392_v4  ;;  %v193_v3 = vld [vmem:[#allocation6 + $0x1a8] sm:$0xff]  ;;  %v5913_v4 = vcombine.low %v181_v54, %v185_v57 }
  0xd6   :  { %v400_v12 = vld [vmem:[#allocation6 + $0x820] sm:$0xff]  ;;  %2551 = vmatpush1.bf16.msra.mxu1 %v5991_v13  ;;  %v5922_v6 = vcombine.high %v189_v2, %v193_v3  ;;  %v241_v54 = vld [vmem:[#allocation6 + $0x328] sm:$0xff] }
  0xd7   :  { %2591 = vmatprep.subr.bf16.mxu0 %v6120_v8  ;;  %v6128_v16 = vcombine.high %v396_v11, %v400_v12  ;;  %v404_v20 = vld [vmem:[#allocation6 + $0x840] sm:$0xff]  ;;  %v6127_v25 = vcombine.low %v396_v11, %v400_v12  ;;  %2684 = vmatprep.subr.bf16.mxu1 %v5874_v15  ;;  %v201_v11 = vld [vmem:[#allocation6 + $0x1e8] sm:$0xff]  ;;  %v5921_v12 = vcombine.low %v189_v2, %v193_v3 }
  0xd8   :  { %v408_v21 = vld [vmem:[#allocation6 + $0x860] sm:$0xff]  ;;  %2592 = vmatpush1.bf16.msra.mxu0 %v6119_v14  ;;  %v5930_v14 = vcombine.high %v197_v10, %v201_v11  ;;  %v249_v2 = vld [vmem:[#allocation6 + $0x368] sm:$0xff] }
  0xd9   :  { %v412_v27 = vld [vmem:[#allocation6 + $0x880] sm:$0xff]  ;;  %2602 = vmatprep.subr.bf16.mxu0 %v6128_v16  ;;  %v6136_v29 = vcombine.high %v404_v20, %v408_v21  ;;  %2553 = vmatmul.mubr.bf16.vlgmr.msra.gmra.mrb[0].mxu1 %v7570_v19  ;;  %v6135_v32 = vcombine.low %v404_v20, %v408_v21  ;;  %v209_v20 = vld [vmem:[#allocation6 + $0x228] sm:$0xff]  ;;  %v5929_v21 = vcombine.low %v197_v10, %v201_v11 }
  0xda   :  { %v416_v28 = vld [vmem:[#allocation6 + $0x8a0] sm:$0xff]  ;;  %2685 = vmatpush1.bf16.msra.mxu1 %v5873_v23  ;;  %2716 = vmatprep.mubr.bf16.mxu1 %v7560_v60  ;;  %v5937_v30 = vcombine.low %v205_v18, %v209_v20  ;;  %v257_v10 = vld [vmem:[#allocation6 + $0x3a8] sm:$0xff] }
  0xdb   :  { %2594 = vmatmul.mubr.bf16.vlgmr.msra.gmra.mrb[0].mxu0 %v7576_v24  ;;  %2686 = vmatprep.subr.bf16.mxu1 %v5882_v26  ;;  %v420_v34 = vld [vmem:[#allocation6 + $0x8c0] sm:$0xff]  ;;  %v6144_v36 = vcombine.high %v412_v27, %v416_v28  ;;  %v6143_v40 = vcombine.low %v412_v27, %v416_v28 }
  0xdc   :  { %2603 = vmatpush1.bf16.msra.mxu0 %v6127_v25  ;;  %v424_v35 = vld [vmem:[#allocation6 + $0x8e0] sm:$0xff]  ;;  %2634 = vmatprep.mubr.bf16.mxu0 %v7580_v31  ;;  %v5938_v25 = vcombine.high %v205_v18, %v209_v20  ;;  %v265_v18 = vld [vmem:[#allocation6 + $0x3e8] sm:$0xff] }
  0xdd   :  { %2604 = vmatprep.subr.bf16.mxu0 %v6136_v29  ;;  %v428_v42 = vld [vmem:[#allocation6 + $0x900] sm:$0xff]  ;;  %v6152_v45 = vcombine.high %v420_v34, %v424_v35  ;;  %v6151_v49 = vcombine.low %v420_v34, %v424_v35  ;;  %v213_v29 = vld [vmem:[#allocation6 + $0x248] sm:$0xff] }
  0xde   :  { %2687 = vmatpush1.bf16.msra.mxu1 %v5881_v56  ;;  %v432_v44 = vld [vmem:[#allocation6 + $0x920] sm:$0xff]  ;;  %v5945_v38 = vcombine.low %v213_v29, %v217_v55 }
  0xdf   :  { %2688 = vmatprep.subr.bf16.mxu1 %v5890_v33  ;;  %v436_v51 = vld [vmem:[#allocation6 + $0x940] sm:$0xff]  ;;  %v6160_v53 = vcombine.high %v428_v42, %v432_v44  ;;  %v6159_v59 = vcombine.low %v428_v42, %v432_v44 }
  0xe0   :  { %2605 = vmatpush1.bf16.msra.mxu0 %v6135_v32  ;;  %v440_v52 = vld [vmem:[#allocation6 + $0x960] sm:$0xff]  ;;  %v5946_v32 = vcombine.high %v213_v29, %v217_v55 }
  0xe1   :  { %2606 = vmatprep.subr.bf16.mxu0 %v6144_v36  ;;  %v444_v62 = vld [vmem:[#allocation6 + $0x980] sm:$0xff]  ;;  %v6168_v1 = vcombine.high %v436_v51, %v440_v52  ;;  %v6167_v5 = vcombine.low %v436_v51, %v440_v52  ;;  %v221_v36 = vld [vmem:[#allocation6 + $0x288] sm:$0xff] }
  0xe2   :  { %2689 = vmatpush1.bf16.msra.mxu1 %v5889_v39  ;;  %v448_v0 = vld [vmem:[#allocation6 + $0x9a0] sm:$0xff]  ;;  %v5953_v47 = vcombine.low %v221_v36, %v225_v37 }
  0xe3   :  { %2690 = vmatprep.subr.bf16.mxu1 %v5898_v41  ;;  %v452_v7 = vld [vmem:[#allocation6 + $0x9c0] sm:$0xff]  ;;  %v6176_v9 = vcombine.high %v444_v62, %v448_v0  ;;  %v6175_v13 = vcombine.low %v444_v62, %v448_v0 }
  0xe4   :  { %2607 = vmatpush1.bf16.msra.mxu0 %v6143_v40  ;;  %v456_v8 = vld [vmem:[#allocation6 + $0x9e0] sm:$0xff]  ;;  %v5954_v40 = vcombine.high %v221_v36, %v225_v37  ;;  %v146_v36 = vld [vmem:[#allocation6 + $0x30] sm:$0xff]  ;;  %v7588_v37 = vcombine.low %v7572_v22, %v7572_v22  ;;  %v293_v22 = vld [vmem:[#allocation6 + $0x4c8] sm:$0xff] }
  0xe5   :  { %2608 = vmatprep.subr.bf16.mxu0 %v6152_v45  ;;  %v460_v15 = vld [vmem:[#allocation6 + $0xa00] sm:$0xff]  ;;  %v6184_v17 = vcombine.high %v452_v7, %v456_v8  ;;  %v6183_v23 = vcombine.low %v452_v7, %v456_v8  ;;  %v229_v45 = vld [vmem:[#allocation6 + $0x2c8] sm:$0xff] }
  0xe6   :  { %2691 = vmatpush1.bf16.msra.mxu1 %v5897_v48  ;;  %v464_v16 = vld [vmem:[#allocation6 + $0xa20] sm:$0xff]  ;;  %v5961_v57 = vcombine.low %v229_v45, %v233_v46 }
  0xe7   :  { %2692 = vmatprep.subr.bf16.mxu1 %v5906_v50  ;;  %v468_v26 = vld [vmem:[#allocation6 + $0xa40] sm:$0xff]  ;;  %v6192_v28 = vcombine.high %v460_v15, %v464_v16  ;;  %v6191_v56 = vcombine.low %v460_v15, %v464_v16 }
  0xe8   :  { %2609 = vmatpush1.bf16.msra.mxu0 %v6151_v49  ;;  %v472_v27 = vld [vmem:[#allocation6 + $0xa60] sm:$0xff]  ;;  %v5962_v49 = vcombine.high %v229_v45, %v233_v46 }
  0xe9   :  { %2610 = vmatprep.subr.bf16.mxu0 %v6160_v53  ;;  %v476_v33 = vld [vmem:[#allocation6 + $0xa80] sm:$0xff]  ;;  %v6200_v35 = vcombine.high %v468_v26, %v472_v27  ;;  %v6199_v39 = vcombine.low %v468_v26, %v472_v27  ;;  %v237_v53 = vld [vmem:[#allocation6 + $0x308] sm:$0xff] }
  0xea   :  { %2693 = vmatpush1.bf16.msra.mxu1 %v5905_v58  ;;  %v480_v34 = vld [vmem:[#allocation6 + $0xaa0] sm:$0xff]  ;;  %v5969_v3 = vcombine.low %v237_v53, %v241_v54  ;;  %v273_v26 = vld [vmem:[#allocation6 + $0x428] sm:$0xff] }
  0xeb   :  { %2694 = vmatprep.subr.bf16.mxu1 %v5914_v61  ;;  %v484_v41 = vld [vmem:[#allocation6 + $0xac0] sm:$0xff]  ;;  %v6208_v44 = vcombine.high %v476_v33, %v480_v34  ;;  %v6207_v48 = vcombine.low %v476_v33, %v480_v34  ;;  %v281_v33 = vld [vmem:[#allocation6 + $0x468] sm:$0xff] }
  0xec   :  { %2611 = vmatpush1.bf16.msra.mxu0 %v6159_v59  ;;  %v488_v42 = vld [vmem:[#allocation6 + $0xae0] sm:$0xff]  ;;  %v5970_v59 = vcombine.high %v237_v53, %v241_v54  ;;  %v305_v53 = vld [vmem:[#allocation6 + $0x528] sm:$0xff]  ;;  %v6689_v54 = vld [vmem:[#allocation3 + $0x18] ss:$0 sps:$4 sm:$0xff]  }
  0xed   :  { %2612 = vmatprep.subr.bf16.mxu0 %v6168_v1  ;;  %v492_v50 = vld [vmem:[#allocation6 + $0xb00] sm:$0xff]  ;;  %v6216_v52 = vcombine.high %v484_v41, %v488_v42  ;;  %v6215_v58 = vcombine.low %v484_v41, %v488_v42  ;;  %v245_v1 = vld [vmem:[#allocation6 + $0x348] sm:$0xff] }
  0xee   :  { %2695 = vmatpush1.bf16.msra.mxu1 %v5913_v4  ;;  %v496_v51 = vld [vmem:[#allocation6 + $0xb20] sm:$0xff]  ;;  %v5977_v11 = vcombine.low %v245_v1, %v249_v2  ;;  %v285_v41 = vld [vmem:[#allocation6 + $0x488] sm:$0xff] }
  0xef   :  { %2696 = vmatprep.subr.bf16.mxu1 %v5922_v6  ;;  %v500_v61 = vld [vmem:[#allocation6 + $0xb40] sm:$0xff]  ;;  %v6224_v0 = vcombine.high %v492_v50, %v496_v51  ;;  %v6223_v4 = vcombine.low %v492_v50, %v496_v51  ;;  %v289_v42 = vld [vmem:[#allocation6 + $0x4a8] sm:$0xff]  ;;  %v150_v50 = vld [vmem:[#allocation6 + $0x50] sm:$0xff] }
  0xf0   :  { %2613 = vmatpush1.bf16.msra.mxu0 %v6167_v5  ;;  %v504_v62 = vld [vmem:[#allocation6 + $0xb60] sm:$0xff]  ;;  %v5978_v5 = vcombine.high %v245_v1, %v249_v2  ;;  %v6018_v46 = vcombine.high %v285_v41, %v289_v42  ;;  %v154_v51 = vld [vmem:[#allocation6 + $0x70] sm:$0xff]  ;;  %v313_v2 = vld [vmem:[#allocation6 + $0x568] sm:$0xff] }
  0xf1   :  { %2614 = vmatprep.subr.bf16.mxu0 %v6176_v9  ;;  %v508_v6 = vld [vmem:[#allocation6 + $0xb80] sm:$0xff]  ;;  %v6232_v8 = vcombine.high %v500_v61, %v504_v62  ;;  %v253_v9 = vld [vmem:[#allocation6 + $0x388] sm:$0xff]  ;;  %v5884_v1 = vcombine.high %v150_v50, %v154_v51 }
  0xf2   :  { %2697 = vmatpush1.bf16.msra.mxu1 %v5921_v12  ;;  %v512_v7 = vld [vmem:[#allocation6 + $0xba0] sm:$0xff]  ;;  %v6231_v12 = vcombine.low %v500_v61, %v504_v62  ;;  %v5985_v20 = vcombine.low %v253_v9, %v257_v10  ;;  %v158_v61 = vld [vmem:[#allocation6 + $0x90] sm:$0xff] }
  0xf3   :  { %2698 = vmatprep.subr.bf16.mxu1 %v5930_v14  ;;  %v516_v14 = vld [vmem:[#allocation6 + $0xbc0] sm:$0xff]  ;;  %v6240_v16 = vcombine.high %v508_v6, %v512_v7  ;;  %v162_v62 = vld [vmem:[#allocation6 + $0xb0] sm:$0xff] }
  0xf4   :  { %2615 = vmatpush1.bf16.msra.mxu0 %v6175_v13  ;;  %v5986_v13 = vcombine.high %v253_v9, %v257_v10  ;;  %v520_v15 = vld [vmem:[#allocation6 + $0xbe0] sm:$0xff]  ;;  %v5892_v9 = vcombine.high %v158_v61, %v162_v62  ;;  %v321_v10 = vld [vmem:[#allocation6 + $0x5a8] sm:$0xff] }
  0xf5   :  { %2616 = vmatprep.subr.bf16.mxu0 %v6184_v17  ;;  %v261_v17 = vld [vmem:[#allocation6 + $0x3c8] sm:$0xff]  ;;  %v6248_v27 = vcombine.high %v516_v14, %v520_v15  ;;  %v528_v29 = vld [vmem:[#allocation6 + $0xc20] sm:$0xff] }
  0xf6   :  { %2699 = vmatpush1.bf16.msra.mxu1 %v5929_v21  ;;  %v6239_v21 = vcombine.low %v508_v6, %v512_v7  ;;  %v5993_v55 = vcombine.low %v261_v17, %v265_v18  ;;  %v166_v6 = vld [vmem:[#allocation6 + $0xd0] sm:$0xff] }
  0xf7   :  { %2700 = vmatprep.subr.bf16.mxu1 %v5938_v25  ;;  %v269_v25 = vld [vmem:[#allocation6 + $0x408] sm:$0xff]  ;;  %v170_v7 = vld [vmem:[#allocation6 + $0xf0] sm:$0xff] }
  0xf8   :  { %2617 = vmatpush1.bf16.msra.mxu0 %v6183_v23  ;;  %v5994_v23 = vcombine.high %v261_v17, %v265_v18  ;;  %v5900_v17 = vcombine.high %v166_v6, %v170_v7  ;;  %v329_v18 = vld [vmem:[#allocation6 + $0x5e8] sm:$0xff] }
  0xf9   :  { %2618 = vmatprep.subr.bf16.mxu0 %v6192_v28  ;;  %v524_v28 = vld [vmem:[#allocation6 + $0xc00] sm:$0xff] }
  0xfa   :  { %2701 = vmatpush1.bf16.msra.mxu1 %v5937_v30  ;;  %v6247_v30 = vcombine.low %v516_v14, %v520_v15  ;;  %v6256_v34 = vcombine.high %v524_v28, %v528_v29  ;;  %v174_v14 = vld [vmem:[#allocation6 + $0x110] sm:$0xff] }
  0xfb   :  { %2702 = vmatprep.subr.bf16.mxu1 %v5946_v32  ;;  %v277_v32 = vld [vmem:[#allocation6 + $0x448] sm:$0xff]  ;;  %v178_v15 = vld [vmem:[#allocation6 + $0x130] sm:$0xff] }
  0xfc   :  { %2619 = vmatpush1.bf16.msra.mxu0 %v6191_v56  ;;  %v6002_v56 = vcombine.high %v269_v25, %v273_v26  ;;  %v6009_v45 = vcombine.low %v277_v32, %v281_v33 }
  0xfd   :  { %2620 = vmatprep.subr.bf16.mxu0 %v6200_v35  ;;  %v142_v35 = vld [vmem:[#allocation6 + $0x10] sm:$0xff] }
  0xfe   :  { %2703 = vmatpush1.bf16.msra.mxu1 %v5945_v38  ;;  %v6001_v38 = vcombine.low %v269_v25, %v273_v26  ;;  %v182_v25 = vld [vmem:[#allocation6 + $0x150] sm:$0xff] }
  0xff   :  { %2704 = vmatprep.subr.bf16.mxu1 %v5954_v40  ;;  %v6255_v40 = vcombine.low %v524_v28, %v528_v29  ;;  %v186_v26 = vld [vmem:[#allocation6 + $0x170] sm:$0xff]  ;;  %v5908_v28 = vcombine.high %v174_v14, %v178_v15  ;;  %v337_v29 = vld [vmem:[#allocation6 + $0x628] sm:$0xff] }
 0x100   :  { %2621 = vmatpush1.bf16.msra.mxu0 %v6199_v39  ;;  %v6010_v39 = vcombine.high %v277_v32, %v281_v33  ;;  %v190_v32 = vld [vmem:[#allocation6 + $0x190] sm:$0xff] }
 0x101   :  { %2622 = vmatprep.subr.bf16.mxu0 %v6208_v44  ;;  %v5876_v44 = vcombine.high %v142_v35, %v146_v36  ;;  %v194_v33 = vld [vmem:[#allocation6 + $0x1b0] sm:$0xff] }
 0x102   :  { %2705 = vmatpush1.bf16.msra.mxu1 %v5953_v47  ;;  %v297_v47 = vld [vmem:[#allocation6 + $0x4e8] sm:$0xff] }
 0x103   :  { %2706 = vmatprep.subr.bf16.mxu1 %v5962_v49  ;;  %v6026_v49 = vcombine.high %v293_v22, %v297_v47 }
 0x104   :  { %2623 = vmatpush1.bf16.msra.mxu0 %v6207_v48  ;;  %v6017_v48 = vcombine.low %v285_v41, %v289_v42  ;;  %v198_v41 = vld [vmem:[#allocation6 + $0x1d0] sm:$0xff] }
 0x105   :  { %2624 = vmatprep.subr.bf16.mxu0 %v6216_v52  ;;  %v301_v52 = vld [vmem:[#allocation6 + $0x508] sm:$0xff]  ;;  %v202_v42 = vld [vmem:[#allocation6 + $0x1f0] sm:$0xff] }
 0x106   :  { %2707 = vmatpush1.bf16.msra.mxu1 %v5961_v57  ;;  %v6025_v57 = vcombine.low %v293_v22, %v297_v47  ;;  %v5923_v47 = vcombine.low %v190_v32, %v194_v33 }
 0x107   :  { %2708 = vmatprep.subr.bf16.mxu1 %v5970_v59  ;;  %v6034_v59 = vcombine.high %v301_v52, %v305_v53 }
 0x108   :  { %2625 = vmatpush1.bf16.msra.mxu0 %v6215_v58  ;;  %v5875_v58 = vcombine.low %v142_v35, %v146_v36  ;;  %v5916_v35 = vcombine.high %v182_v25, %v186_v26  ;;  %v345_v36 = vld [vmem:[#allocation6 + $0x668] sm:$0xff] }
 0x109   :  { %2626 = vmatprep.subr.bf16.mxu0 %v6224_v0  ;;  %v309_v0 = vld [vmem:[#allocation6 + $0x548] sm:$0xff] }
 0x10a   :  { %2709 = vmatpush1.bf16.msra.mxu1 %v5969_v3  ;;  %v6033_v3 = vcombine.low %v301_v52, %v305_v53  ;;  %v5932_v52 = vcombine.high %v198_v41, %v202_v42  ;;  %v361_v53 = vld [vmem:[#allocation6 + $0x6e8] sm:$0xff] }
 0x10b   :  { %2710 = vmatprep.subr.bf16.mxu1 %v5978_v5  ;;  %v6042_v5 = vcombine.high %v309_v0, %v313_v2 }
 0x10c   :  { %2627 = vmatpush1.bf16.msra.mxu0 %v6223_v4  ;;  %v5883_v4 = vcombine.low %v150_v50, %v154_v51  ;;  %v210_v50 = vld [vmem:[#allocation6 + $0x230] sm:$0xff]  ;;  %v357_v51 = vld [vmem:[#allocation6 + $0x6c8] sm:$0xff] }
 0x10d   :  { %2628 = vmatprep.subr.bf16.mxu0 %v6232_v8  ;;  %v317_v8 = vld [vmem:[#allocation6 + $0x588] sm:$0xff] }
 0x10e   :  { %2711 = vmatpush1.bf16.msra.mxu1 %v5977_v11  ;;  %v6041_v11 = vcombine.low %v309_v0, %v313_v2  ;;  %v6089_v2 = vcombine.low %v357_v51, %v361_v53 }
 0x10f   :  { %2712 = vmatprep.subr.bf16.mxu1 %v5986_v13  ;;  %v6050_v13 = vcombine.high %v317_v8, %v321_v10 }
 0x110   :  { %2629 = vmatpush1.bf16.msra.mxu0 %v6231_v12  ;;  %v5891_v12 = vcombine.low %v158_v61, %v162_v62  ;;  %v218_v61 = vld [vmem:[#allocation6 + $0x270] sm:$0xff]  ;;  %v365_v62 = vld [vmem:[#allocation6 + $0x708] sm:$0xff] }
 0x111   :  { %2630 = vmatprep.subr.bf16.mxu0 %v6240_v16  ;;  %v325_v16 = vld [vmem:[#allocation6 + $0x5c8] sm:$0xff] }
 0x112   :  { %2713 = vmatpush1.bf16.msra.mxu1 %v5985_v20  ;;  %v6049_v20 = vcombine.low %v317_v8, %v321_v10 }
 0x113   :  { %2714 = vmatprep.subr.bf16.mxu1 %v5994_v23  ;;  %v6058_v23 = vcombine.high %v325_v16, %v329_v18 }
 0x114   :  { %2631 = vmatpush1.bf16.msra.mxu0 %v6239_v21  ;;  %v5899_v21 = vcombine.low %v166_v6, %v170_v7  ;;  %v226_v6 = vld [vmem:[#allocation6 + $0x2b0] sm:$0xff]  ;;  %v373_v7 = vld [vmem:[#allocation6 + $0x748] sm:$0xff] }
 0x115   :  { %2632 = vmatprep.subr.bf16.mxu0 %v6248_v27  ;;  %v333_v27 = vld [vmem:[#allocation6 + $0x608] sm:$0xff] }
 0x116   :  { %2715 = vmatpush1.bf16.msra.mxu1 %v5993_v55  ;;  %v6057_v55 = vcombine.low %v325_v16, %v329_v18 }
 0x117   :  { %2725 = vmatprep.subr.bf16.mxu1 %v6002_v56  ;;  %v6066_v56 = vcombine.high %v333_v27, %v337_v29 }
 0x118   :  { %2633 = vmatpush1.bf16.msra.mxu0 %v6247_v30  ;;  %v5907_v30 = vcombine.low %v174_v14, %v178_v15  ;;  %v234_v14 = vld [vmem:[#allocation6 + $0x2f0] sm:$0xff]  ;;  %v381_v15 = vld [vmem:[#allocation6 + $0x788] sm:$0xff] }
 0x119   :  { %2643 = vmatprep.subr.bf16.mxu0 %v6256_v34  ;;  %2717 = vmatmul.mubr.bf16.vlgmr.msra.gmra.mrb[4].mxu1 %v7570_v19  ;;  %v341_v34 = vld [vmem:[#allocation6 + $0x648] sm:$0xff] }
 0x11a   :  { %2726 = vmatpush1.bf16.msra.mxu1 %v6001_v38  ;;  %2757 = vmatprep.mubr.bf16.mxu1 %v7564_v63  ;;  %v6065_v38 = vcombine.low %v333_v27, %v337_v29  ;;  %v6073_v22 = vcombine.low %v341_v34, %v345_v36 }
 0x11b   :  { %2635 = vmatmul.mubr.bf16.vlgmr.msra.gmra.mrb[0].mxu0 %v7588_v37  ;;  %2727 = vmatprep.subr.bf16.mxu1 %v6010_v39  ;;  %v5915_v39 = vcombine.low %v182_v25, %v186_v26  ;;  %v242_v25 = vld [vmem:[#allocation6 + $0x330] sm:$0xff]  ;;  %v389_v26 = vld [vmem:[#allocation6 + $0x7c8] sm:$0xff] }
 0x11c   :  { %2644 = vmatpush1.bf16.msra.mxu0 %v6255_v40  ;;  %2675 = vmatprep.mubr.bf16.mxu0 %v7401_v43  ;;  %v6074_v40 = vcombine.high %v341_v34, %v345_v36 }
 0x11d   :  { %2848 = vmatprep.subr.bf16.mxu0 %v5876_v44  ;;  %v349_v44 = vld [vmem:[#allocation6 + $0x688] sm:$0xff] }
 0x11e   :  { %2728 = vmatpush1.bf16.msra.mxu1 %v6009_v45  ;;  %v5924_v45 = vcombine.high %v190_v32, %v194_v33  ;;  %v250_v32 = vld [vmem:[#allocation6 + $0x370] sm:$0xff]  ;;  %v397_v33 = vld [vmem:[#allocation6 + $0x808] sm:$0xff] }
 0x11f   :  { %2729 = vmatprep.subr.bf16.mxu1 %v6018_v46  ;;  %v353_v46 = vld [vmem:[#allocation6 + $0x6a8] sm:$0xff] }
 0x122   :  { %2730 = vmatpush1.bf16.msra.mxu1 %v6017_v48  ;;  %v6082_v48 = vcombine.high %v349_v44, %v353_v46 }
 0x123   :  { %2731 = vmatprep.subr.bf16.mxu1 %v6026_v49  ;;  %v206_v49 = vld [vmem:[#allocation6 + $0x210] sm:$0xff] }
 0x124   :  { %v5940_v0 = vcombine.high %v206_v49, %v210_v50 }
 0x126   :  { %2732 = vmatpush1.bf16.msra.mxu1 %v6025_v57  ;;  %v5931_v57 = vcombine.low %v198_v41, %v202_v42  ;;  %v258_v41 = vld [vmem:[#allocation6 + $0x3b0] sm:$0xff]  ;;  %v405_v42 = vld [vmem:[#allocation6 + $0x848] sm:$0xff] }
 0x127   :  { %6263 = vmatmul.mubr.msk.bf16.vlgmr.msra.gmra.mrb[0].mxu0 %vm2516_vm0, %v6689_v54  ;;  %2733 = vmatprep.subr.bf16.mxu1 %v6034_v59  ;;  %v6081_v54 = vcombine.low %v349_v44, %v353_v46  ;;  %v214_v59 = vld [vmem:[#allocation6 + $0x250] sm:$0xff] }
 0x128   :  { %2849 = vmatpush1.bf16.msra.mxu0 %v5875_v58  ;;  %2880 = vmatprep.mubr.bf16.mxu0 %v7560_v60  ;;  %v6090_v58 = vcombine.high %v357_v51, %v361_v53  ;;  %v5948_v8 = vcombine.high %v214_v59, %v218_v61 }
 0x129   :  { %2850 = vmatprep.subr.bf16.mxu0 %v5884_v1  ;;  %v369_v1 = vld [vmem:[#allocation6 + $0x728] sm:$0xff] }
 0x12a   :  { %2734 = vmatpush1.bf16.msra.mxu1 %v6033_v3  ;;  %v5939_v3 = vcombine.low %v206_v49, %v210_v50  ;;  %v6097_v10 = vcombine.low %v365_v62, %v369_v1  ;;  %v266_v49 = vld [vmem:[#allocation6 + $0x3f0] sm:$0xff]  ;;  %v413_v50 = vld [vmem:[#allocation6 + $0x888] sm:$0xff] }
 0x12b   :  { %2735 = vmatprep.subr.bf16.mxu1 %v6042_v5  ;;  %v222_v5 = vld [vmem:[#allocation6 + $0x290] sm:$0xff] }
 0x12c   :  { %2851 = vmatpush1.bf16.msra.mxu0 %v5883_v4  ;;  %v6098_v4 = vcombine.high %v365_v62, %v369_v1  ;;  %v5956_v16 = vcombine.high %v222_v5, %v226_v6 }
 0x12d   :  { %2852 = vmatprep.subr.bf16.mxu0 %v5892_v9  ;;  %v377_v9 = vld [vmem:[#allocation6 + $0x768] sm:$0xff] }
 0x12e   :  { %2736 = vmatpush1.bf16.msra.mxu1 %v6041_v11  ;;  %v5947_v11 = vcombine.low %v214_v59, %v218_v61  ;;  %v6105_v18 = vcombine.low %v373_v7, %v377_v9  ;;  %v274_v59 = vld [vmem:[#allocation6 + $0x430] sm:$0xff]  ;;  %v421_v61 = vld [vmem:[#allocation6 + $0x8c8] sm:$0xff] }
 0x12f   :  { %2737 = vmatprep.subr.bf16.mxu1 %v6050_v13  ;;  %v230_v13 = vld [vmem:[#allocation6 + $0x2d0] sm:$0xff] }
 0x130   :  { %2853 = vmatpush1.bf16.msra.mxu0 %v5891_v12  ;;  %v6106_v12 = vcombine.high %v373_v7, %v377_v9  ;;  %v5964_v27 = vcombine.high %v230_v13, %v234_v14 }
 0x131   :  { %2854 = vmatprep.subr.bf16.mxu0 %v5900_v17  ;;  %v385_v17 = vld [vmem:[#allocation6 + $0x7a8] sm:$0xff] }
 0x132   :  { %2738 = vmatpush1.bf16.msra.mxu1 %v6049_v20  ;;  %v5955_v20 = vcombine.low %v222_v5, %v226_v6  ;;  %v6113_v29 = vcombine.low %v381_v15, %v385_v17  ;;  %v282_v5 = vld [vmem:[#allocation6 + $0x470] sm:$0xff]  ;;  %v429_v6 = vld [vmem:[#allocation6 + $0x908] sm:$0xff] }
 0x133   :  { %2739 = vmatprep.subr.bf16.mxu1 %v6058_v23  ;;  %v238_v23 = vld [vmem:[#allocation6 + $0x310] sm:$0xff] }
 0x134   :  { %2855 = vmatpush1.bf16.msra.mxu0 %v5899_v21  ;;  %v6114_v21 = vcombine.high %v381_v15, %v385_v17  ;;  %v5972_v34 = vcombine.high %v238_v23, %v242_v25  ;;  %v441_v15 = vld [vmem:[#allocation6 + $0x968] sm:$0xff] }
 0x135   :  { %2856 = vmatprep.subr.bf16.mxu0 %v5908_v28  ;;  %v393_v28 = vld [vmem:[#allocation6 + $0x7e8] sm:$0xff] }
 0x136   :  { %2740 = vmatpush1.bf16.msra.mxu1 %v6057_v55  ;;  %v5963_v55 = vcombine.low %v230_v13, %v234_v14  ;;  %v6121_v36 = vcombine.low %v389_v26, %v393_v28  ;;  %v290_v13 = vld [vmem:[#allocation6 + $0x4b0] sm:$0xff]  ;;  %v437_v14 = vld [vmem:[#allocation6 + $0x948] sm:$0xff] }
 0x137   :  { %2741 = vmatprep.subr.bf16.mxu1 %v6066_v56  ;;  %v246_v56 = vld [vmem:[#allocation6 + $0x350] sm:$0xff] }
 0x138   :  { %2857 = vmatpush1.bf16.msra.mxu0 %v5907_v30  ;;  %v6122_v30 = vcombine.high %v389_v26, %v393_v28  ;;  %v5980_v44 = vcombine.high %v246_v56, %v250_v32  ;;  %v298_v26 = vld [vmem:[#allocation6 + $0x4f0] sm:$0xff]  ;;  %v6169_v28 = vcombine.low %v437_v14, %v441_v15 }
 0x139   :  { %2858 = vmatprep.subr.bf16.mxu0 %v5916_v35  ;;  %v401_v35 = vld [vmem:[#allocation6 + $0x828] sm:$0xff] }
 0x13a   :  { %2742 = vmatpush1.bf16.msra.mxu1 %v6065_v38  ;;  %v5971_v38 = vcombine.low %v238_v23, %v242_v25  ;;  %v6129_v46 = vcombine.low %v397_v33, %v401_v35  ;;  %v6170_v23 = vcombine.high %v437_v14, %v441_v15  ;;  %v294_v25 = vld [vmem:[#allocation6 + $0x4d0] sm:$0xff] }
 0x13b   :  { %2743 = vmatprep.subr.bf16.mxu1 %v6074_v40  ;;  %v254_v40 = vld [vmem:[#allocation6 + $0x390] sm:$0xff] }
 0x13c   :  { %2859 = vmatpush1.bf16.msra.mxu0 %v5915_v39  ;;  %v6130_v39 = vcombine.high %v397_v33, %v401_v35  ;;  %v5988_v51 = vcombine.high %v254_v40, %v258_v41  ;;  %v457_v33 = vld [vmem:[#allocation6 + $0x9e8] sm:$0xff]  ;;  %v342_v14 = vld [vmem:[#allocation6 + $0x650] sm:$0xff] }
 0x13d   :  { %2860 = vmatprep.subr.bf16.mxu0 %v5924_v45  ;;  %v409_v45 = vld [vmem:[#allocation6 + $0x868] sm:$0xff]  ;;  %v346_v15 = vld [vmem:[#allocation6 + $0x670] sm:$0xff] }
 0x13e   :  { %2744 = vmatpush1.bf16.msra.mxu1 %v6073_v22  ;;  %v5979_v22 = vcombine.low %v246_v56, %v250_v32  ;;  %v6137_v53 = vcombine.low %v405_v42, %v409_v45  ;;  %v302_v56 = vld [vmem:[#allocation6 + $0x510] sm:$0xff] }
 0x13f   :  { %2745 = vmatprep.subr.bf16.mxu1 %v6082_v48  ;;  %v262_v48 = vld [vmem:[#allocation6 + $0x3d0] sm:$0xff] }
 0x140   :  { %2861 = vmatpush1.bf16.msra.mxu0 %v5923_v47  ;;  %v6138_v47 = vcombine.high %v405_v42, %v409_v45  ;;  %v5996_v62 = vcombine.high %v262_v48, %v266_v49  ;;  %v306_v32 = vld [vmem:[#allocation6 + $0x530] sm:$0xff]  ;;  %v465_v42 = vld [vmem:[#allocation6 + $0xa28] sm:$0xff] }
 0x141   :  { %2862 = vmatprep.subr.bf16.mxu0 %v5932_v52  ;;  %v417_v52 = vld [vmem:[#allocation6 + $0x8a8] sm:$0xff] }
 0x142   :  { %2746 = vmatpush1.bf16.msra.mxu1 %v6081_v54  ;;  %v5987_v54 = vcombine.low %v254_v40, %v258_v41  ;;  %v6145_v1 = vcombine.low %v413_v50, %v417_v52  ;;  %v314_v40 = vld [vmem:[#allocation6 + $0x570] sm:$0xff]  ;;  %v461_v41 = vld [vmem:[#allocation6 + $0xa08] sm:$0xff] }
 0x143   :  { %2747 = vmatprep.subr.bf16.mxu1 %v6090_v58  ;;  %v270_v58 = vld [vmem:[#allocation6 + $0x410] sm:$0xff] }
 0x144   :  { %2863 = vmatpush1.bf16.msra.mxu0 %v5931_v57  ;;  %v6146_v57 = vcombine.high %v413_v50, %v417_v52  ;;  %v6004_v7 = vcombine.high %v270_v58, %v274_v59  ;;  %v318_v50 = vld [vmem:[#allocation6 + $0x590] sm:$0xff]  ;;  %v6193_v52 = vcombine.low %v461_v41, %v465_v42 }
 0x145   :  { %2864 = vmatprep.subr.bf16.mxu0 %v5940_v0  ;;  %v425_v0 = vld [vmem:[#allocation6 + $0x8e8] sm:$0xff] }
 0x146   :  { %2748 = vmatpush1.bf16.msra.mxu1 %v6089_v2  ;;  %v5995_v2 = vcombine.low %v262_v48, %v266_v49  ;;  %v6153_v9 = vcombine.low %v421_v61, %v425_v0  ;;  %v469_v48 = vld [vmem:[#allocation6 + $0xa48] sm:$0xff] }
 0x147   :  { %2749 = vmatprep.subr.bf16.mxu1 %v6098_v4  ;;  %v278_v4 = vld [vmem:[#allocation6 + $0x450] sm:$0xff]  ;;  %v473_v49 = vld [vmem:[#allocation6 + $0xa68] sm:$0xff] }
 0x148   :  { %2865 = vmatpush1.bf16.msra.mxu0 %v5939_v3  ;;  %v6154_v3 = vcombine.high %v421_v61, %v425_v0  ;;  %v326_v61 = vld [vmem:[#allocation6 + $0x5d0] sm:$0xff]  ;;  %v6201_v0 = vcombine.low %v469_v48, %v473_v49 }
 0x149   :  { %2866 = vmatprep.subr.bf16.mxu0 %v5948_v8  ;;  %v433_v8 = vld [vmem:[#allocation6 + $0x928] sm:$0xff] }
 0x14a   :  { %2750 = vmatpush1.bf16.msra.mxu1 %v6097_v10  ;;  %v6003_v10 = vcombine.low %v270_v58, %v274_v59  ;;  %v6161_v17 = vcombine.low %v429_v6, %v433_v8  ;;  %v477_v58 = vld [vmem:[#allocation6 + $0xa88] sm:$0xff] }
 0x14b   :  { %2751 = vmatprep.subr.bf16.mxu1 %v6106_v12  ;;  %v286_v12 = vld [vmem:[#allocation6 + $0x490] sm:$0xff]  ;;  %v481_v59 = vld [vmem:[#allocation6 + $0xaa8] sm:$0xff] }
 0x14c   :  { %2867 = vmatpush1.bf16.msra.mxu0 %v5947_v11  ;;  %v6162_v11 = vcombine.high %v429_v6, %v433_v8  ;;  %v334_v6 = vld [vmem:[#allocation6 + $0x610] sm:$0xff]  ;;  %v6209_v8 = vcombine.low %v477_v58, %v481_v59 }
 0x14d   :  { %2868 = vmatprep.subr.bf16.mxu0 %v5956_v16  ;;  %v6012_v16 = vcombine.high %v278_v4, %v282_v5 }
 0x14e   :  { %2752 = vmatpush1.bf16.msra.mxu1 %v6105_v18  ;;  %v445_v18 = vld [vmem:[#allocation6 + $0x988] sm:$0xff] }
 0x14f   :  { %2753 = vmatprep.subr.bf16.mxu1 %v6114_v21  ;;  %v6011_v21 = vcombine.low %v278_v4, %v282_v5  ;;  %v485_v4 = vld [vmem:[#allocation6 + $0xac8] sm:$0xff] }
 0x150   :  { %2869 = vmatpush1.bf16.msra.mxu0 %v5955_v20  ;;  %v449_v20 = vld [vmem:[#allocation6 + $0x9a8] sm:$0xff] }
 0x151   :  { %2870 = vmatprep.subr.bf16.mxu0 %v5964_v27  ;;  %v6020_v27 = vcombine.high %v286_v12, %v290_v13  ;;  %v6177_v35 = vcombine.low %v445_v18, %v449_v20  ;;  %v489_v5 = vld [vmem:[#allocation6 + $0xae8] sm:$0xff] }
 0x152   :  { %2754 = vmatpush1.bf16.msra.mxu1 %v6113_v29  ;;  %v453_v29 = vld [vmem:[#allocation6 + $0x9c8] sm:$0xff] }
 0x153   :  { %2755 = vmatprep.subr.bf16.mxu1 %v6122_v30  ;;  %v6178_v30 = vcombine.high %v445_v18, %v449_v20  ;;  %v6185_v45 = vcombine.low %v453_v29, %v457_v33  ;;  %v6076_v20 = vcombine.high %v342_v14, %v346_v15 }
 0x154   :  { %2871 = vmatpush1.bf16.msra.mxu0 %v5963_v55  ;;  %v6019_v55 = vcombine.low %v286_v12, %v290_v13  ;;  %v493_v12 = vld [vmem:[#allocation6 + $0xb08] sm:$0xff] }
 0x155   :  { %2872 = vmatprep.subr.bf16.mxu0 %v5972_v34  ;;  %v6028_v34 = vcombine.high %v294_v25, %v298_v26  ;;  %v497_v13 = vld [vmem:[#allocation6 + $0xb28] sm:$0xff] }
 0x156   :  { %2756 = vmatpush1.bf16.msra.mxu1 %v6121_v36  ;;  %v6027_v36 = vcombine.low %v294_v25, %v298_v26  ;;  %v6226_v18 = vcombine.high %v493_v12, %v497_v13  ;;  %v350_v25 = vld [vmem:[#allocation6 + $0x690] sm:$0xff] }
 0x157   :  { %2766 = vmatprep.subr.bf16.mxu1 %v6130_v39  ;;  %v310_v39 = vld [vmem:[#allocation6 + $0x550] sm:$0xff] }
 0x158   :  { %2873 = vmatpush1.bf16.msra.mxu0 %v5971_v38  ;;  %v6186_v38 = vcombine.high %v453_v29, %v457_v33  ;;  %v354_v26 = vld [vmem:[#allocation6 + $0x6b0] sm:$0xff] }
 0x159   :  { %2874 = vmatprep.subr.bf16.mxu0 %v5980_v44  ;;  %2758 = vmatmul.mubr.bf16.vlgmr.msra.gmra.mrb[4].mxu1 %v7576_v24  ;;  %v6036_v44 = vcombine.high %v302_v56, %v306_v32  ;;  %v362_v33 = vld [vmem:[#allocation6 + $0x6f0] sm:$0xff] }
 0x15a   :  { %2767 = vmatpush1.bf16.msra.mxu1 %v6129_v46  ;;  %2798 = vmatprep.mubr.bf16.mxu1 %v7580_v31  ;;  %v6035_v46 = vcombine.low %v302_v56, %v306_v32  ;;  %v513_v56 = vld [vmem:[#allocation6 + $0xba8] sm:$0xff]  ;;  %v358_v32 = vld [vmem:[#allocation6 + $0x6d0] sm:$0xff] }
 0x15b   :  { %2768 = vmatprep.subr.bf16.mxu1 %v6138_v47  ;;  %v6044_v47 = vcombine.high %v310_v39, %v314_v40 }
 0x15c   :  { %2875 = vmatpush1.bf16.msra.mxu0 %v5979_v22  ;;  %v6194_v22 = vcombine.high %v461_v41, %v465_v42  ;;  %v366_v41 = vld [vmem:[#allocation6 + $0x710] sm:$0xff] }
 0x15d   :  { %2876 = vmatprep.subr.bf16.mxu0 %v5988_v51  ;;  %v322_v51 = vld [vmem:[#allocation6 + $0x5b0] sm:$0xff] }
 0x15e   :  { %2769 = vmatpush1.bf16.msra.mxu1 %v6137_v53  ;;  %v6043_v53 = vcombine.low %v310_v39, %v314_v40  ;;  %v517_v39 = vld [vmem:[#allocation6 + $0xbc8] sm:$0xff]  ;;  %v370_v42 = vld [vmem:[#allocation6 + $0x730] sm:$0xff] }
 0x15f   :  { %2770 = vmatprep.subr.bf16.mxu1 %v6146_v57  ;;  %v6052_v57 = vcombine.high %v318_v50, %v322_v51  ;;  %v521_v40 = vld [vmem:[#allocation6 + $0xbe8] sm:$0xff] }
 0x160   :  { %2877 = vmatpush1.bf16.msra.mxu0 %v5987_v54  ;;  %v6202_v54 = vcombine.high %v469_v48, %v473_v49  ;;  %v529_v48 = vld [vmem:[#allocation6 + $0xc28] sm:$0xff]  ;;  %v374_v49 = vld [vmem:[#allocation6 + $0x750] sm:$0xff] }
 0x161   :  { %2878 = vmatprep.subr.bf16.mxu0 %v5996_v62  ;;  %v330_v62 = vld [vmem:[#allocation6 + $0x5f0] sm:$0xff] }
 0x162   :  { %2771 = vmatpush1.bf16.msra.mxu1 %v6145_v1  ;;  %v6051_v1 = vcombine.low %v318_v50, %v322_v51  ;;  %v378_v50 = vld [vmem:[#allocation6 + $0x770] sm:$0xff]  ;;  %v6249_v51 = vcombine.low %v517_v39, %v521_v40 }
 0x163   :  { %2772 = vmatprep.subr.bf16.mxu1 %v6154_v3  ;;  %v6060_v3 = vcombine.high %v326_v61, %v330_v62 }
 0x164   :  { %2879 = vmatpush1.bf16.msra.mxu0 %v5995_v2  ;;  %v6210_v2 = vcombine.high %v477_v58, %v481_v59  ;;  %v147_v58 = vld [vmem:[#allocation6 + $0x38] sm:$0xff]  ;;  %v382_v59 = vld [vmem:[#allocation6 + $0x790] sm:$0xff] }
 0x165   :  { %2889 = vmatprep.subr.bf16.mxu0 %v6004_v7  ;;  %v338_v7 = vld [vmem:[#allocation6 + $0x630] sm:$0xff] }
 0x166   :  { %2773 = vmatpush1.bf16.msra.mxu1 %v6153_v9  ;;  %v6059_v9 = vcombine.low %v326_v61, %v330_v62  ;;  %v386_v61 = vld [vmem:[#allocation6 + $0x7b0] sm:$0xff] }
 0x167   :  { %2881 = vmatmul.mubr.bf16.vlgmr.msra.gmra.mrb[4].mxu0 %v7570_v19  ;;  %2774 = vmatprep.subr.bf16.mxu1 %v6162_v11  ;;  %v6068_v11 = vcombine.high %v334_v6, %v338_v7 }
 0x168   :  { %2890 = vmatpush1.bf16.msra.mxu0 %v6003_v10  ;;  %2921 = vmatprep.mubr.bf16.mxu0 %v7564_v63  ;;  %v6218_v10 = vcombine.high %v485_v4, %v489_v5 }
 0x169   :  { %2891 = vmatprep.subr.bf16.mxu0 %v6012_v16  ;;  %v6217_v16 = vcombine.low %v485_v4, %v489_v5  ;;  %v394_v4 = vld [vmem:[#allocation6 + $0x7f0] sm:$0xff]  ;;  %v6115_v5 = vcombine.low %v382_v59, %v386_v61 }
 0x16a   :  { %2775 = vmatpush1.bf16.msra.mxu1 %v6161_v17  ;;  %v6067_v17 = vcombine.low %v334_v6, %v338_v7  ;;  %v398_v7 = vld [vmem:[#allocation6 + $0x810] sm:$0xff] }
 0x16b   :  { %2776 = vmatprep.subr.bf16.mxu1 %v6170_v23  ;;  %v505_v23 = vld [vmem:[#allocation6 + $0xb68] sm:$0xff] }
 0x16c   :  { %2892 = vmatpush1.bf16.msra.mxu0 %v6011_v21  ;;  %v501_v21 = vld [vmem:[#allocation6 + $0xb48] sm:$0xff] }
 0x16d   :  { %2893 = vmatprep.subr.bf16.mxu0 %v6020_v27  ;;  %v6225_v27 = vcombine.low %v493_v12, %v497_v13  ;;  %v6234_v29 = vcombine.high %v501_v21, %v505_v23  ;;  %v155_v12 = vld [vmem:[#allocation6 + $0x78] sm:$0xff]  ;;  %v406_v13 = vld [vmem:[#allocation6 + $0x850] sm:$0xff] }
 0x16e   :  { %2777 = vmatpush1.bf16.msra.mxu1 %v6169_v28  ;;  %v6075_v28 = vcombine.low %v342_v14, %v346_v15  ;;  %v410_v14 = vld [vmem:[#allocation6 + $0x870] sm:$0xff] }
 0x16f   :  { %2778 = vmatprep.subr.bf16.mxu1 %v6178_v30  ;;  %v509_v30 = vld [vmem:[#allocation6 + $0xb88] sm:$0xff] }
 0x170   :  { %2894 = vmatpush1.bf16.msra.mxu0 %v6019_v55  ;;  %v6084_v55 = vcombine.high %v350_v25, %v354_v26 }
 0x171   :  { %2895 = vmatprep.subr.bf16.mxu0 %v6028_v34  ;;  %v6233_v34 = vcombine.low %v501_v21, %v505_v23  ;;  %v163_v21 = vld [vmem:[#allocation6 + $0xb8] sm:$0xff] }
 0x172   :  { %2779 = vmatpush1.bf16.msra.mxu1 %v6177_v35  ;;  %v6083_v35 = vcombine.low %v350_v25, %v354_v26  ;;  %v7602_v23 = vld [vmem:[#allocation3 + $0x18] ss:$0 sps:$4 sm:$0xff]   ;;  %v414_v25 = vld [vmem:[#allocation6 + $0x890] sm:$0xff] }
 0x173   :  { %2780 = vmatprep.subr.bf16.mxu1 %v6186_v38  ;;  %v6092_v38 = vcombine.high %v358_v32, %v362_v33  ;;  %v418_v26 = vld [vmem:[#allocation6 + $0x8b0] sm:$0xff] }
 0x174   :  { %2896 = vmatpush1.bf16.msra.mxu0 %v6027_v36  ;;  %v6242_v36 = vcombine.high %v509_v30, %v513_v56 }
 0x175   :  { %2897 = vmatprep.subr.bf16.mxu0 %v6036_v44  ;;  %v6241_v44 = vcombine.low %v509_v30, %v513_v56  ;;  %v167_v30 = vld [vmem:[#allocation6 + $0xd8] sm:$0xff] }
 0x176   :  { %2781 = vmatpush1.bf16.msra.mxu1 %v6185_v45  ;;  %v6091_v45 = vcombine.low %v358_v32, %v362_v33  ;;  %v171_v56 = vld [vmem:[#allocation6 + $0xf8] sm:$0xff]  ;;  %v422_v32 = vld [vmem:[#allocation6 + $0x8d0] sm:$0xff] }
 0x177   :  { %2782 = vmatprep.subr.bf16.mxu1 %v6194_v22  ;;  %v6100_v22 = vcombine.high %v366_v41, %v370_v42  ;;  %v426_v33 = vld [vmem:[#allocation6 + $0x8f0] sm:$0xff] }
 0x178   :  { %2898 = vmatpush1.bf16.msra.mxu0 %v6035_v46  ;;  %v6250_v46 = vcombine.high %v517_v39, %v521_v40  ;;  %v6156_v39 = vcombine.high %v422_v32, %v426_v33  ;;  %v175_v40 = vld [vmem:[#allocation6 + $0x118] sm:$0xff] }
 0x179   :  { %2899 = vmatprep.subr.bf16.mxu0 %v6044_v47  ;;  %v525_v47 = vld [vmem:[#allocation6 + $0xc08] sm:$0xff] }
 0x17a   :  { %2783 = vmatpush1.bf16.msra.mxu1 %v6193_v52  ;;  %v6099_v52 = vcombine.low %v366_v41, %v370_v42  ;;  %v6257_v62 = vcombine.low %v525_v47, %v529_v48  ;;  %v179_v41 = vld [vmem:[#allocation6 + $0x138] sm:$0xff] }
 0x17b   :  { %2784 = vmatprep.subr.bf16.mxu1 %v6202_v54  ;;  %v6108_v54 = vcombine.high %v374_v49, %v378_v50 }
 0x17c   :  { %2900 = vmatpush1.bf16.msra.mxu0 %v6043_v53  ;;  %v6258_v53 = vcombine.high %v525_v47, %v529_v48  ;;  %v6155_v47 = vcombine.low %v422_v32, %v426_v33  ;;  %v5910_v48 = vcombine.high %v175_v40, %v179_v41  ;;  %v223_v33 = vld [vmem:[#allocation6 + $0x298] sm:$0xff] }
 0x17d   :  { %2901 = vmatprep.subr.bf16.mxu0 %v6052_v57  ;;  %v143_v57 = vld [vmem:[#allocation6 + $0x18] sm:$0xff] }
 0x17e   :  { %2785 = vmatpush1.bf16.msra.mxu1 %v6201_v0  ;;  %v6107_v0 = vcombine.low %v374_v49, %v378_v50  ;;  %v5877_v15 = vcombine.low %v143_v57, %v147_v58  ;;  %v183_v50 = vld [vmem:[#allocation6 + $0x158] sm:$0xff] }
 0x17f   :  { %2786 = vmatprep.subr.bf16.mxu1 %v6210_v2  ;;  %v6116_v2 = vcombine.high %v382_v59, %v386_v61  ;;  %v191_v61 = vld [vmem:[#allocation6 + $0x198] sm:$0xff] }
 0x180   :  { %2902 = vmatpush1.bf16.msra.mxu0 %v6051_v1  ;;  %v5878_v1 = vcombine.high %v143_v57, %v147_v58 }
 0x181   :  { %2903 = vmatprep.subr.bf16.mxu0 %v6060_v3  ;;  %v390_v3 = vld [vmem:[#allocation6 + $0x7d0] sm:$0xff] }
 0x182   :  { %2787 = vmatpush1.bf16.msra.mxu1 %v6209_v8  ;;  %v6124_v6 = vcombine.high %v390_v3, %v394_v4  ;;  %v402_v8 = vld [vmem:[#allocation6 + $0x830] sm:$0xff] }
 0x183   :  { %2788 = vmatprep.subr.bf16.mxu1 %v6218_v10  ;;  %v6132_v10 = vcombine.high %v398_v7, %v402_v8 }
 0x184   :  { %2904 = vmatpush1.bf16.msra.mxu0 %v6059_v9  ;;  %v6123_v9 = vcombine.low %v390_v3, %v394_v4 }
 0x185   :  { %2905 = vmatprep.subr.bf16.mxu0 %v6068_v11  ;;  %v151_v11 = vld [vmem:[#allocation6 + $0x58] sm:$0xff] }
 0x186   :  { %2789 = vmatpush1.bf16.msra.mxu1 %v6217_v16  ;;  %v6131_v16 = vcombine.low %v398_v7, %v402_v8  ;;  %v203_v7 = vld [vmem:[#allocation6 + $0x1f8] sm:$0xff]  ;;  %v454_v8 = vld [vmem:[#allocation6 + $0x9d0] sm:$0xff] }
 0x187   :  { %2790 = vmatprep.subr.bf16.mxu1 %v6226_v18  ;;  %v6140_v18 = vcombine.high %v406_v13, %v410_v14 }
 0x188   :  { %2906 = vmatpush1.bf16.msra.mxu0 %v6067_v17  ;;  %v5886_v17 = vcombine.high %v151_v11, %v155_v12 }
 0x189   :  { %2907 = vmatprep.subr.bf16.mxu0 %v6076_v20  ;;  %v159_v20 = vld [vmem:[#allocation6 + $0x98] sm:$0xff] }
 0x18a   :  { %2791 = vmatpush1.bf16.msra.mxu1 %v6225_v27  ;;  %v5885_v27 = vcombine.low %v151_v11, %v155_v12 }
 0x18b   :  { %2792 = vmatprep.subr.bf16.mxu1 %v6234_v29  ;;  %v5894_v29 = vcombine.high %v159_v20, %v163_v21 }
 0x18c   :  { %2908 = vmatpush1.bf16.msra.mxu0 %v6075_v28  ;;  %v6139_v28 = vcombine.low %v406_v13, %v410_v14  ;;  %v207_v14 = vld [vmem:[#allocation6 + $0x218] sm:$0xff] }
 0x18d   :  { %2909 = vmatprep.subr.bf16.mxu0 %v6084_v55  ;;  %v6148_v55 = vcombine.high %v414_v25, %v418_v26 }
 0x18e   :  { %2793 = vmatpush1.bf16.msra.mxu1 %v6233_v34  ;;  %v5893_v34 = vcombine.low %v159_v20, %v163_v21 }
 0x18f   :  { %2794 = vmatprep.subr.bf16.mxu1 %v6242_v36  ;;  %v5902_v36 = vcombine.high %v167_v30, %v171_v56 }
 0x190   :  { %2910 = vmatpush1.bf16.msra.mxu0 %v6083_v35  ;;  %v6147_v35 = vcombine.low %v414_v25, %v418_v26  ;;  %v215_v26 = vld [vmem:[#allocation6 + $0x258] sm:$0xff] }
 0x191   :  { %2911 = vmatprep.subr.bf16.mxu0 %v6092_v38 }
 0x192   :  { %2795 = vmatpush1.bf16.msra.mxu1 %v6241_v44  ;;  %v430_v44 = vld [vmem:[#allocation6 + $0x910] sm:$0xff] }
 0x193   :  { %2796 = vmatprep.subr.bf16.mxu1 %v6250_v46 }
 0x194   :  { %2912 = vmatpush1.bf16.msra.mxu0 %v6091_v45  ;;  %v434_v45 = vld [vmem:[#allocation6 + $0x930] sm:$0xff] }
 0x195   :  { %2913 = vmatprep.subr.bf16.mxu0 %v6100_v22  ;;  %v5901_v22 = vcombine.low %v167_v30, %v171_v56  ;;  %v6164_v49 = vcombine.high %v430_v44, %v434_v45  ;;  %v6163_v57 = vcombine.low %v430_v44, %v434_v45  ;;  %v231_v45 = vld [vmem:[#allocation6 + $0x2d8] sm:$0xff] }
 0x196   :  { %2797 = vmatpush1.bf16.msra.mxu1 %v6249_v51  ;;  %v187_v51 = vld [vmem:[#allocation6 + $0x178] sm:$0xff] }
 0x197   :  { %2807 = vmatprep.subr.bf16.mxu1 %v6258_v53  ;;  %v442_v53 = vld [vmem:[#allocation6 + $0x970] sm:$0xff]  ;;  %v5918_v58 = vcombine.high %v183_v50, %v187_v51 }
 0x198   :  { %2914 = vmatpush1.bf16.msra.mxu0 %v6099_v52  ;;  %v438_v52 = vld [vmem:[#allocation6 + $0x950] sm:$0xff] }
 0x199   :  { %2915 = vmatprep.subr.bf16.mxu0 %v6108_v54  ;;  %2799 = vmatmul.mubr.bf16.vlgmr.msra.gmra.mrb[4].mxu1 %v7588_v37  ;;  %v5909_v54 = vcombine.low %v175_v40, %v179_v41  ;;  %v6172_v59 = vcombine.high %v438_v52, %v442_v53  ;;  %v6171_v3 = vcombine.low %v438_v52, %v442_v53  ;;  %v243_v52 = vld [vmem:[#allocation6 + $0x338] sm:$0xff]  ;;  %v494_v53 = vld [vmem:[#allocation6 + $0xb10] sm:$0xff] }
 0x19a   :  { %2808 = vmatpush1.bf16.msra.mxu1 %v6257_v62  ;;  %2839 = vmatprep.mubr.bf16.mxu1 %v7401_v43  ;;  %v195_v62 = vld [vmem:[#allocation6 + $0x1b8] sm:$0xff] }
 0x19b   :  { %3012 = vmatprep.subr.bf16.mxu1 %v5878_v1  ;;  %v450_v1 = vld [vmem:[#allocation6 + $0x9b0] sm:$0xff]  ;;  %v5926_v4 = vcombine.high %v191_v61, %v195_v62 }
 0x19c   :  { %2916 = vmatpush1.bf16.msra.mxu0 %v6107_v0  ;;  %v446_v0 = vld [vmem:[#allocation6 + $0x990] sm:$0xff] }
 0x19d   :  { %2917 = vmatprep.subr.bf16.mxu0 %v6116_v2  ;;  %v5917_v2 = vcombine.low %v183_v50, %v187_v51  ;;  %v6179_v11 = vcombine.low %v446_v0, %v450_v1  ;;  %v239_v51 = vld [vmem:[#allocation6 + $0x318] sm:$0xff] }
 0x1a0   :  { %2918 = vmatpush1.bf16.msra.mxu0 %v6115_v5  ;;  %v6180_v5 = vcombine.high %v446_v0, %v450_v1  ;;  %v251_v0 = vld [vmem:[#allocation6 + $0x378] sm:$0xff]  ;;  %v502_v1 = vld [vmem:[#allocation6 + $0xb50] sm:$0xff] }
 0x1a1   :  { %2919 = vmatprep.subr.bf16.mxu0 %v6124_v6  ;;  %v199_v6 = vld [vmem:[#allocation6 + $0x1d8] sm:$0xff] }
 0x1a2   :  { %v5934_v12 = vcombine.high %v199_v6, %v203_v7 }
 0x1a4   :  { %2920 = vmatpush1.bf16.msra.mxu0 %v6123_v9  ;;  %v458_v9 = vld [vmem:[#allocation6 + $0x9f0] sm:$0xff] }
 0x1a5   :  { %2930 = vmatprep.subr.bf16.mxu0 %v6132_v10  ;;  %6264 = vmatmul.mubr.msk.bf16.vlgmr.msra.gmra.mrb[4].mxu1 %vm2516_vm0, %v7602_v23  ;;  %v5925_v10 = vcombine.low %v191_v61, %v195_v62  ;;  %v6188_v13 = vcombine.high %v454_v8, %v458_v9  ;;  %v6187_v20 = vcombine.low %v454_v8, %v458_v9  ;;  %v247_v62 = vld [vmem:[#allocation6 + $0x358] sm:$0xff]  ;;  %v510_v9 = vld [vmem:[#allocation6 + $0xb90] sm:$0xff] }
 0x1a6   :  { %3013 = vmatpush1.bf16.msra.mxu1 %v5877_v15  ;;  %3044 = vmatprep.mubr.bf16.mxu1 %v7560_v60  ;;  %v211_v15 = vld [vmem:[#allocation6 + $0x238] sm:$0xff] }
 0x1a7   :  { %2922 = vmatmul.mubr.bf16.vlgmr.msra.gmra.mrb[4].mxu0 %v7576_v24  ;;  %3014 = vmatprep.subr.bf16.mxu1 %v5886_v17  ;;  %v466_v17 = vld [vmem:[#allocation6 + $0xa30] sm:$0xff]  ;;  %v5942_v21 = vcombine.high %v207_v14, %v211_v15  ;;  %v259_v8 = vld [vmem:[#allocation6 + $0x3b8] sm:$0xff] }
 0x1a8   :  { %2931 = vmatpush1.bf16.msra.mxu0 %v6131_v16  ;;  %2962 = vmatprep.mubr.bf16.mxu0 %v7580_v31  ;;  %v462_v16 = vld [vmem:[#allocation6 + $0xa10] sm:$0xff] }
 0x1a9   :  { %2932 = vmatprep.subr.bf16.mxu0 %v6140_v18  ;;  %v5933_v18 = vcombine.low %v199_v6, %v203_v7  ;;  %v6196_v25 = vcombine.high %v462_v16, %v466_v17  ;;  %v6195_v30 = vcombine.low %v462_v16, %v466_v17  ;;  %v255_v7 = vld [vmem:[#allocation6 + $0x398] sm:$0xff]  ;;  %v518_v17 = vld [vmem:[#allocation6 + $0xbd0] sm:$0xff] }
 0x1aa   :  { %3015 = vmatpush1.bf16.msra.mxu1 %v5885_v27  ;;  %v219_v27 = vld [vmem:[#allocation6 + $0x278] sm:$0xff] }
 0x1ab   :  { %3016 = vmatprep.subr.bf16.mxu1 %v5894_v29  ;;  %v474_v29 = vld [vmem:[#allocation6 + $0xa70] sm:$0xff]  ;;  %v5950_v56 = vcombine.high %v215_v26, %v219_v27  ;;  %v267_v16 = vld [vmem:[#allocation6 + $0x3f8] sm:$0xff] }
 0x1ac   :  { %2933 = vmatpush1.bf16.msra.mxu0 %v6139_v28  ;;  %v7609_v38 = vpop.f32.mrb[0].mxu1  ;;  %v470_v28 = vld [vmem:[#allocation6 + $0xa50] sm:$0xff] }
 0x1ad   :  { %2934 = vmatprep.subr.bf16.mxu0 %v6148_v55  ;;  %v7611_v42 = vpop.f32.mrb[1].mxu1  ;;  %v5941_v55 = vcombine.low %v207_v14, %v211_v15  ;;  %v6204_v32 = vcombine.high %v470_v28, %v474_v29  ;;  %v6203_v40 = vcombine.low %v470_v28, %v474_v29  ;;  %v263_v15 = vld [vmem:[#allocation6 + $0x3d8] sm:$0xff]  ;;  %v526_v29 = vld [vmem:[#allocation6 + $0xc10] sm:$0xff] }
 0x1ae   :  { %3017 = vmatpush1.bf16.msra.mxu1 %v5893_v34  ;;  %v2558_v46 = vpop.f32.mrb[2].mxu1  ;;  %v227_v34 = vld [vmem:[#allocation6 + $0x2b8] sm:$0xff] }
 0x1af   :  { %v2559_v60 = vpop.f32.mrb[3].mxu1  ;;  %3018 = vmatprep.subr.bf16.mxu1 %v5902_v36  ;;  %v482_v36 = vld [vmem:[#allocation6 + $0xab0] sm:$0xff]  ;;  %v5958_v41 = vcombine.high %v223_v33, %v227_v34  ;;  %v235_v46 = vld [vmem:[#allocation6 + $0x2f8] sm:$0xff] }
 0x1b0   :  { %2935 = vmatpush1.bf16.msra.mxu0 %v6147_v35  ;;  %v478_v35 = vld [vmem:[#allocation6 + $0xa90] sm:$0xff]  ;;  %v275_v28 = vld [vmem:[#allocation6 + $0x438] sm:$0xff] }
 0x1b1   :  { %2936 = vmatprep.subr.bf16.mxu0 %v6156_v39  ;;  %v5949_v39 = vcombine.low %v215_v26, %v219_v27  ;;  %v6212_v44 = vcombine.high %v478_v35, %v482_v36  ;;  %v490_v60 = vld [vmem:[#allocation6 + $0xaf0] sm:$0xff]  ;;  %v271_v27 = vld [vmem:[#allocation6 + $0x418] sm:$0xff] }
 0x1b2   :  { %3019 = vmatpush1.bf16.msra.mxu1 %v5901_v22  ;;  %v486_v22 = vld [vmem:[#allocation6 + $0xad0] sm:$0xff] }
 0x1b3   :  { %3020 = vmatprep.subr.bf16.mxu1 %v5910_v48  ;;  %v6211_v48 = vcombine.low %v478_v35, %v482_v36  ;;  %v6220_v50 = vcombine.high %v486_v22, %v490_v60  ;;  %v3190_v35 = vlaneseq  ;;  %v279_v36 = vld [vmem:[#allocation6 + $0x458] sm:$0xff] }
 0x1b4   :  { %2937 = vmatpush1.bf16.msra.mxu0 %v6155_v47  ;;  %v5957_v47 = vcombine.low %v223_v33, %v227_v34  ;;  %v7402_v33 = vmov 1966171168  }
 0x1b5   :  { %2938 = vmatprep.subr.bf16.mxu0 %v6164_v49  ;;  %v5966_v49 = vcombine.high %v231_v45, %v235_v46  ;;  %v3188_v34 = vunpack.c.l.s4 %v7402_v33  ;;  %v335_v33 = vld [vmem:[#allocation6 + $0x618] sm:$0xff] }
 0x1b6   :  { %3021 = vmatpush1.bf16.msra.mxu1 %v5909_v54  ;;  %v498_v54 = vld [vmem:[#allocation6 + $0xb30] sm:$0xff] }
 0x1b7   :  { %3022 = vmatprep.subr.bf16.mxu1 %v5918_v58  ;;  %v6219_v58 = vcombine.low %v486_v22, %v490_v60  ;;  %v6228_v61 = vcombine.high %v494_v53, %v498_v54  ;;  %v3191_v22 = vshrl.u32 %v3190_v35, 7  ;;  %v287_v60 = vld [vmem:[#allocation6 + $0x498] sm:$0xff] }
 0x1b8   :  { %2939 = vmatpush1.bf16.msra.mxu0 %v6163_v57  ;;  %v5965_v57 = vcombine.low %v231_v45, %v235_v46  ;;  %v3189_v46 = vunpack.c.0.s8 %v3188_v34  ;;  %v339_v34 = vld [vmem:[#allocation6 + $0x638] sm:$0xff] }
 0x1b9   :  { %2940 = vmatprep.subr.bf16.mxu0 %v6172_v59  ;;  %v5974_v59 = vcombine.high %v239_v51, %v243_v52 }
 0x1ba   :  { %3023 = vmatpush1.bf16.msra.mxu1 %v5917_v2  ;;  %v506_v2 = vld [vmem:[#allocation6 + $0xb70] sm:$0xff] }
 0x1bb   :  { %3024 = vmatprep.subr.bf16.mxu1 %v5926_v4  ;;  %v6227_v4 = vcombine.low %v494_v53, %v498_v54  ;;  %v6236_v6 = vcombine.high %v502_v1, %v506_v2  ;;  %v299_v53 = vld [vmem:[#allocation6 + $0x4f8] sm:$0xff]  ;;  %v7618_v54 = vld [vmem:[#allocation8] sm:$0xff] }
 0x1bc   :  { %2941 = vmatpush1.bf16.msra.mxu0 %v6171_v3  ;;  %v5973_v3 = vcombine.low %v239_v51, %v243_v52  ;;  %v7615_v51 = vsub.s32 %v3189_v46, %v3191_v22  ;;  %v295_v52 = vld [vmem:[#allocation6 + $0x4d8] sm:$0xff]  ;;  %v6069_v46 = vcombine.low %v335_v33, %v339_v34 }
 0x1bd   :  { %2942 = vmatprep.subr.bf16.mxu0 %v6180_v5  ;;  %v5982_v5 = vcombine.high %v247_v62, %v251_v0 }
 0x1be   :  { %3025 = vmatpush1.bf16.msra.mxu1 %v5925_v10  ;;  %v514_v10 = vld [vmem:[#allocation6 + $0xbb0] sm:$0xff] }
 0x1bf   :  { %3026 = vmatprep.subr.bf16.mxu1 %v5934_v12  ;;  %v6235_v12 = vcombine.low %v502_v1, %v506_v2  ;;  %v6244_v14 = vcombine.high %v510_v9, %v514_v10 }
 0x1c0   :  { %2943 = vmatpush1.bf16.msra.mxu0 %v6179_v11  ;;  %v5981_v11 = vcombine.low %v247_v62, %v251_v0  ;;  %v6029_v62 = vcombine.low %v295_v52, %v299_v53  ;;  %v6690_v0 = vld [vmem:[#allocation9] ss:$16 sps:$4 sm:$0xff]  }
 0x1c1   :  { %2944 = vmatprep.subr.bf16.mxu0 %v6188_v13  ;;  %v5990_v13 = vcombine.high %v255_v7, %v259_v8 }
 0x1c2   :  { %3027 = vmatpush1.bf16.msra.mxu1 %v5933_v18  ;;  %v522_v18 = vld [vmem:[#allocation6 + $0xbf0] sm:$0xff] }
 0x1c3   :  { %3028 = vmatprep.subr.bf16.mxu1 %v5942_v21  ;;  %v6243_v21 = vcombine.low %v510_v9, %v514_v10  ;;  %v6252_v26 = vcombine.high %v518_v17, %v522_v18  ;;  %v6698_v9 = vld [vmem:[#allocation9 + $0x44] ss:$16 sps:$4 sm:$0xff]  }
 0x1c4   :  { %2945 = vmatpush1.bf16.msra.mxu0 %v6187_v20  ;;  %v5989_v20 = vcombine.low %v255_v7, %v259_v8  ;;  %v319_v10 = vld [vmem:[#allocation6 + $0x598] sm:$0xff] }
 0x1c5   :  { %2946 = vmatprep.subr.bf16.mxu0 %v6196_v25  ;;  %v5998_v25 = vcombine.high %v263_v15, %v267_v16 }
 0x1c6   :  { %3029 = vmatpush1.bf16.msra.mxu1 %v5941_v55  ;;  %v530_v55 = vld [vmem:[#allocation6 + $0xc30] sm:$0xff] }
 0x1c7   :  { %3030 = vmatprep.subr.bf16.mxu1 %v5950_v56  ;;  %v6251_v56 = vcombine.low %v518_v17, %v522_v18  ;;  %v6259_v45 = vcombine.low %v526_v29, %v530_v55  ;;  %v327_v17 = vld [vmem:[#allocation6 + $0x5d8] sm:$0xff] }
 0x1c8   :  { %2947 = vmatpush1.bf16.msra.mxu0 %v6195_v30  ;;  %v5997_v30 = vcombine.low %v263_v15, %v267_v16  ;;  %v6701_v16 = vld [vmem:[#allocation9 + $0x64] ss:$16 sps:$4 sm:$0xff]  }
 0x1c9   :  { %2948 = vmatprep.subr.bf16.mxu0 %v6204_v32  ;;  %v6006_v32 = vcombine.high %v271_v27, %v275_v28  ;;  %v331_v18 = vld [vmem:[#allocation6 + $0x5f8] sm:$0xff] }
 0x1ca   :  { %3031 = vmatpush1.bf16.msra.mxu1 %v5949_v39  ;;  %v283_v39 = vld [vmem:[#allocation6 + $0x478] sm:$0xff] }
 0x1cb   :  { %3032 = vmatprep.subr.bf16.mxu1 %v5958_v41  ;;  %v6005_v41 = vcombine.low %v271_v27, %v275_v28 }
 0x1cc   :  { %2949 = vmatpush1.bf16.msra.mxu0 %v6203_v40  ;;  %v6260_v40 = vcombine.high %v526_v29, %v530_v55  ;;  %v6699_v55 = vld [vmem:[#allocation9 + $0x60] ss:$16 sps:$4 sm:$0xff]  }
 0x1cd   :  { %2950 = vmatprep.subr.bf16.mxu0 %v6212_v44  ;;  %v6014_v44 = vcombine.high %v279_v36, %v283_v39 }
 0x1ce   :  { %3033 = vmatpush1.bf16.msra.mxu1 %v5957_v47  ;;  %v291_v47 = vld [vmem:[#allocation6 + $0x4b8] sm:$0xff] }
 0x1cf   :  { %3034 = vmatprep.subr.bf16.mxu1 %v5966_v49  ;;  %v6013_v49 = vcombine.low %v279_v36, %v283_v39  ;;  %v6702_v39 = vld [vmem:[#allocation9 + $0x80] ss:$16 sps:$4 sm:$0xff]  }
 0x1d0   :  { %2951 = vmatpush1.bf16.msra.mxu0 %v6211_v48  ;;  %v6692_v48 = vld [vmem:[#allocation9 + $0x4] ss:$16 sps:$4 sm:$0xff]  }
 0x1d1   :  { %2952 = vmatprep.subr.bf16.mxu0 %v6220_v50  ;;  %v6022_v50 = vcombine.high %v287_v60, %v291_v47 }
 0x1d2   :  { %3035 = vmatpush1.bf16.msra.mxu1 %v5965_v57  ;;  %v6030_v57 = vcombine.high %v295_v52, %v299_v53  ;;  %v6708_v53 = vld [vmem:[#allocation9 + $0xc0] ss:$16 sps:$4 sm:$0xff]  }
 0x1d3   :  { %3036 = vmatprep.subr.bf16.mxu1 %v5974_v59  ;;  %v303_v59 = vld [vmem:[#allocation6 + $0x518] sm:$0xff] }
 0x1d4   :  { %2953 = vmatpush1.bf16.msra.mxu0 %v6219_v58  ;;  %v7623_v58 = vrot.slane %v7618_v54, %v7615_v51 }
 0x1d5   :  { %2954 = vmatprep.subr.bf16.mxu0 %v6228_v61  ;;  %v307_v61 = vld [vmem:[#allocation6 + $0x538] sm:$0xff] }
 0x1d6   :  { %3037 = vmatpush1.bf16.msra.mxu1 %v5973_v3  ;;  %v6038_v1 = vcombine.high %v303_v59, %v307_v61  ;;  %v3201_v2 = vcombine.high %v7623_v58, %v7623_v58  ;;  %v6695_v3 = vld [vmem:[#allocation9 + $0x24] ss:$16 sps:$4 sm:$0xff]  }
 0x1d7   :  { %3038 = vmatprep.subr.bf16.mxu1 %v5982_v5  ;;  %v6037_v5 = vcombine.low %v303_v59, %v307_v61  ;;  %v359_v59 = vld [vmem:[#allocation6 + $0x6d8] sm:$0xff] }
 0x1d8   :  { %2955 = vmatpush1.bf16.msra.mxu0 %v6227_v4  ;;  %v315_v4 = vld [vmem:[#allocation6 + $0x578] sm:$0xff]  ;;  %v7630_v8 = vrot.slane %v3201_v2, %v7615_v51 }
 0x1d9   :  { %2956 = vmatprep.subr.bf16.mxu0 %v6236_v6  ;;  %v6693_v6 = vld [vmem:[#allocation9 + $0x20] ss:$16 sps:$4 sm:$0xff]   ;;  %v6716_v2 = vld [vmem:[#allocation9 + $0x104] ss:$16 sps:$4 sm:$0xff]  }
 0x1da   :  { %3039 = vmatpush1.bf16.msra.mxu1 %v5981_v11  ;;  %v323_v11 = vld [vmem:[#allocation6 + $0x5b8] sm:$0xff] }
 0x1db   :  { %3040 = vmatprep.subr.bf16.mxu1 %v5990_v13  ;;  %v6696_v13 = vld [vmem:[#allocation9 + $0x40] ss:$16 sps:$4 sm:$0xff]   ;;  %v6054_v15 = vcombine.high %v319_v10, %v323_v11 }
 0x1dc   :  { %2957 = vmatpush1.bf16.msra.mxu0 %v6235_v12  ;;  %v363_v61 = vld [vmem:[#allocation6 + $0x6f8] sm:$0xff] }
 0x1dd   :  { %2958 = vmatprep.subr.bf16.mxu0 %v6244_v14  ;;  %v7632_v14 = vsub.s32 0, %v3191_v22  ;;  %v6705_v22 = vld [vmem:[#allocation9 + $0xa0] ss:$16 sps:$4 sm:$0xff]  }
 0x1de   :  { %3041 = vmatpush1.bf16.msra.mxu1 %v5989_v20 }
 0x1df   :  { %3042 = vmatprep.subr.bf16.mxu1 %v5998_v25 }
 0x1e0   :  { %2959 = vmatpush1.bf16.msra.mxu0 %v6243_v21 }
 0x1e1   :  { %2960 = vmatprep.subr.bf16.mxu0 %v6252_v26  ;;  %v6053_v26 = vcombine.low %v319_v10, %v323_v11  ;;  %v379_v10 = vld [vmem:[#allocation6 + $0x778] sm:$0xff] }
 0x1e2   :  { %3043 = vmatpush1.bf16.msra.mxu1 %v5997_v30  ;;  %v6062_v30 = vcombine.high %v327_v17, %v331_v18 }
 0x1e3   :  { %3053 = vmatprep.subr.bf16.mxu1 %v6006_v32  ;;  %v6704_v32 = vld [vmem:[#allocation9 + $0x84] ss:$16 sps:$4 sm:$0xff]  }
 0x1e4   :  { %2961 = vmatpush1.bf16.msra.mxu0 %v6251_v56 }
 0x1e5   :  { %2971 = vmatprep.subr.bf16.mxu0 %v6260_v40  ;;  %3045 = vmatmul.mubr.bf16.vlgmr.msra.gmra.mrb[8].mxu1 %v7570_v19  ;;  %v6021_v19 = vcombine.low %v287_v60, %v291_v47  ;;  %v6070_v40 = vcombine.high %v335_v33, %v339_v34  ;;  %v403_v33 = vld [vmem:[#allocation6 + $0x838] sm:$0xff] }
 0x1e6   :  { %3054 = vmatpush1.bf16.msra.mxu1 %v6005_v41  ;;  %3085 = vmatprep.mubr.bf16.mxu1 %v7564_v63  ;;  %v311_v63 = vld [vmem:[#allocation6 + $0x558] sm:$0xff] }
 0x1e7   :  { %2963 = vmatmul.mubr.bf16.vlgmr.msra.gmra.mrb[4].mxu0 %v7588_v37  ;;  %3055 = vmatprep.subr.bf16.mxu1 %v6014_v44  ;;  %v6046_v7 = vcombine.high %v311_v63, %v315_v4  ;;  %v6045_v12 = vcombine.low %v311_v63, %v315_v4  ;;  %v343_v41 = vld [vmem:[#allocation6 + $0x658] sm:$0xff]  ;;  %v6093_v4 = vcombine.low %v359_v59, %v363_v61 }
 0x1e8   :  { %2972 = vmatpush1.bf16.msra.mxu0 %v6259_v45  ;;  %3003 = vmatprep.mubr.bf16.mxu0 %v7401_v43  ;;  %v347_v44 = vld [vmem:[#allocation6 + $0x678] sm:$0xff] }
 0x1e9   :  { %4851 = vmatprep.subr.bf16.mxu0 %v6692_v48  ;;  %v6078_v47 = vcombine.high %v343_v41, %v347_v44  ;;  %v6710_v48 = vld [vmem:[#allocation9 + $0xc4] ss:$16 sps:$4 sm:$0xff]   ;;  %v6077_v52 = vcombine.low %v343_v41, %v347_v44  ;;  %v6729_v41 = vld [vmem:[#allocation9 + $0x1a0] ss:$16 sps:$4 sm:$0xff]  }
 0x1ea   :  { %3056 = vmatpush1.bf16.msra.mxu1 %v6013_v49  ;;  %v351_v49 = vld [vmem:[#allocation6 + $0x698] sm:$0xff] }
 0x1eb   :  { %3057 = vmatprep.subr.bf16.mxu1 %v6022_v50  ;;  %v355_v50 = vld [vmem:[#allocation6 + $0x6b8] sm:$0xff] }
 0x1ec   :  { %v371_v63 = vld [vmem:[#allocation6 + $0x738] sm:$0xff] }
 0x1ee   :  { %3058 = vmatpush1.bf16.msra.mxu1 %v6021_v19  ;;  %v6086_v19 = vcombine.high %v351_v49, %v355_v50 }
 0x1ef   :  { %3059 = vmatprep.subr.bf16.mxu1 %v6030_v57  ;;  %v6713_v57 = vld [vmem:[#allocation9 + $0xe4] ss:$16 sps:$4 sm:$0xff]  }
 0x1f2   :  { %3060 = vmatpush1.bf16.msra.mxu1 %v6029_v62  ;;  %v6085_v62 = vcombine.low %v351_v49, %v355_v50  ;;  %v6732_v50 = vld [vmem:[#allocation9 + $0x1c0] ss:$16 sps:$4 sm:$0xff]  }
 0x1f3   :  { %6265 = vmatmul.mubr.msk.bf16.vlgmr.msra.gmra.mrb[4].mxu0 %vm2516_vm0, %v7602_v23  ;;  %3061 = vmatprep.subr.bf16.mxu1 %v6038_v1  ;;  %v3243_v23 = vpack.i.b16 %v7630_v8, %v7630_v8  ;;  %v6094_v1 = vcombine.high %v359_v59, %v363_v61  ;;  %v6735_v61 = vld [vmem:[#allocation9 + $0x1e0] ss:$16 sps:$4 sm:$0xff]  }
 0x1f4   :  { %4852 = vmatpush1.bf16.msra.mxu0 %v6690_v0  ;;  %v6711_v0 = vld [vmem:[#allocation9 + $0xe0] ss:$16 sps:$4 sm:$0xff]  }
 0x1f5   :  { %4853 = vmatprep.subr.bf16.mxu0 %v6695_v3  ;;  %v3248_v28 = vrot.slane %v3243_v23, %v7632_v14  ;;  %v367_v3 = vld [vmem:[#allocation6 + $0x718] sm:$0xff] }
 0x1f6   :  { %3062 = vmatpush1.bf16.msra.mxu1 %v6037_v5  ;;  %v6714_v5 = vld [vmem:[#allocation9 + $0x100] ss:$16 sps:$4 sm:$0xff]   ;;  %v6101_v11 = vcombine.low %v367_v3, %v371_v63  ;;  %v6722_v23 = vld [vmem:[#allocation9 + $0x144] ss:$16 sps:$4 sm:$0xff]  }
 0x1f7   :  { %3063 = vmatprep.subr.bf16.mxu1 %v6046_v7  ;;  %v6719_v7 = vld [vmem:[#allocation9 + $0x124] ss:$16 sps:$4 sm:$0xff]  }
 0x1f8   :  { %4854 = vmatpush1.bf16.msra.mxu0 %v6693_v6  ;;  %v6102_v6 = vcombine.high %v367_v3, %v371_v63  ;;  %v6738_v63 = vld [vmem:[#allocation9 + $0x200] ss:$16 sps:$4 sm:$0xff]  }
 0x1f9   :  { %4855 = vmatprep.subr.bf16.mxu0 %v6698_v9  ;;  %v375_v9 = vld [vmem:[#allocation6 + $0x758] sm:$0xff] }
 0x1fa   :  { %v2677_v20 = vpop.f32.mrb[0].mxu0  ;;  %3064 = vmatpush1.bf16.msra.mxu1 %v6045_v12  ;;  %v6717_v12 = vld [vmem:[#allocation9 + $0x120] ss:$16 sps:$4 sm:$0xff]  }
 0x1fb   :  { %v7637_v21 = vadd.f32 %v2677_v20, %v7609_v38  ;;  %v2679_v25 = vpop.f32.mrb[1].mxu0  ;;  %3065 = vmatprep.subr.bf16.mxu1 %v6054_v15  ;;  %v6061_v38 = vcombine.low %v327_v17, %v331_v18  ;;  %v383_v15 = vld [vmem:[#allocation6 + $0x798] sm:$0xff]  ;;  %v6109_v17 = vcombine.low %v375_v9, %v379_v10 }
 0x1fc   :  { %4856 = vmatpush1.bf16.msra.mxu0 %v6696_v13  ;;  %v6592_v27 = vadd.f32 %v2679_v25, %v7611_v42  ;;  %v2681_v29 = vpop.f32.mrb[2].mxu0  ;;  %v6707_v42 = vld [vmem:[#allocation9 + $0xa4] ss:$16 sps:$4 sm:$0xff]   ;;  %v6110_v13 = vcombine.high %v375_v9, %v379_v10  ;;  %v6720_v18 = vld [vmem:[#allocation9 + $0x140] ss:$16 sps:$4 sm:$0xff]  }
 0x1fd   :  { %v2682_v56 = vpop.f32.mrb[3].mxu0  ;;  %4857 = vmatprep.subr.bf16.mxu0 %v6701_v16  ;;  %v387_v16 = vld [vmem:[#allocation6 + $0x7b8] sm:$0xff] }
 0x1fe   :  { %v3177_v35 = vpack.c.bf16 %v6592_v27, %v6592_v27  ;;  %3066 = vmatpush1.bf16.msra.mxu1 %v6053_v26  ;;  %v6118_v20 = vcombine.high %v383_v15, %v387_v16  ;;  %v6725_v25 = vld [vmem:[#allocation9 + $0x164] ss:$16 sps:$4 sm:$0xff]   ;;  %v6723_v29 = vld [vmem:[#allocation9 + $0x160] ss:$16 sps:$4 sm:$0xff]  }
 0x1ff   :  { %3067 = vmatprep.subr.bf16.mxu1 %v6062_v30  ;;  %v391_v26 = vld [vmem:[#allocation6 + $0x7d8] sm:$0xff]  ;;  %v7646_v30 = vrot.slane %v7623_v58, %v7615_v51 }
 0x200   :  { %v3292_v36 = vadd.bf16 %v3248_v28, %v3177_v35  ;;  %4858 = vmatpush1.bf16.msra.mxu0 %v6699_v55  ;;  %v395_v27 = vld [vmem:[#allocation6 + $0x7f8] sm:$0xff]  ;;  %v6117_v28 = vcombine.low %v383_v15, %v387_v16 }
 0x201   :  { %4859 = vmatprep.subr.bf16.mxu0 %v6704_v32  ;;  %v6126_v55 = vcombine.high %v391_v26, %v395_v27  ;;  %v6728_v56 = vld [vmem:[#allocation9 + $0x184] ss:$16 sps:$4 sm:$0xff]   ;;  %v6125_v34 = vcombine.low %v391_v26, %v395_v27  ;;  %v6726_v35 = vld [vmem:[#allocation9 + $0x180] ss:$16 sps:$4 sm:$0xff]  }
 0x202   :  { %v3300_v45 = vmul.bf16 1045249613, %v3292_v36  ;;  %3068 = vmatpush1.bf16.msra.mxu1 %v6061_v38  ;;  %v399_v32 = vld [vmem:[#allocation6 + $0x818] sm:$0xff] }
 0x203   :  { %3069 = vmatprep.subr.bf16.mxu1 %v6070_v40  ;;  %v6134_v38 = vcombine.high %v399_v32, %v403_v33  ;;  %v407_v40 = vld [vmem:[#allocation6 + $0x858] sm:$0xff]  ;;  %v6133_v58 = vcombine.low %v399_v32, %v403_v33 }
 0x204   :  { %4860 = vmatpush1.bf16.msra.mxu0 %v6702_v39  ;;  %v7641_v60 = vmax.bf16 %v3300_v45, %v3292_v36  ;;  %v3236_v36 = vpack.i.b16 %v7646_v30, %v7646_v30  ;;  %v6731_v39 = vld [vmem:[#allocation9 + $0x1a4] ss:$16 sps:$4 sm:$0xff]   ;;  %v3176_v45 = vpack.c.bf16 %v7637_v21, %v7637_v21 }
 0x205   :  { %4861 = vmatprep.subr.bf16.mxu0 %v6707_v42  ;;  %v411_v42 = vld [vmem:[#allocation6 + $0x878] sm:$0xff] }
 0x206   :  { %4883 = vmatprep.mubr.bf16.mxu0 %v7641_v60  ;;  %3070 = vmatpush1.bf16.msra.mxu1 %v6069_v46  ;;  %v6142_v44 = vcombine.high %v407_v40, %v411_v42  ;;  %v3241_v46 = vrot.slane %v3236_v36, %v7632_v14  ;;  %v6141_v49 = vcombine.low %v407_v40, %v411_v42  ;;  %v423_v21 = vld [vmem:[#allocation6 + $0x8d8] sm:$0xff] }
 0x207   :  { %3071 = vmatprep.subr.bf16.mxu1 %v6078_v47  ;;  %v415_v47 = vld [vmem:[#allocation6 + $0x898] sm:$0xff] }
 0x208   :  { %4862 = vmatpush1.bf16.msra.mxu0 %v6705_v22  ;;  %v6734_v22 = vld [vmem:[#allocation9 + $0x1c4] ss:$16 sps:$4 sm:$0xff]   ;;  %v6753_v42 = vld [vmem:[#allocation9 + $0x2a0] ss:$16 sps:$4 sm:$0xff]  }
 0x209   :  { %4863 = vmatprep.subr.bf16.mxu0 %v6710_v48  ;;  %v419_v48 = vld [vmem:[#allocation6 + $0x8b8] sm:$0xff] }
 0x20a   :  { %3072 = vmatpush1.bf16.msra.mxu1 %v6077_v52  ;;  %v6150_v52 = vcombine.high %v415_v47, %v419_v48  ;;  %v6149_v59 = vcombine.low %v415_v47, %v419_v48  ;;  %v6755_v36 = vld [vmem:[#allocation9 + $0x2a4] ss:$16 sps:$4 sm:$0xff]  }
 0x20b   :  { %3073 = vmatprep.subr.bf16.mxu1 %v6086_v19  ;;  %v6737_v19 = vld [vmem:[#allocation9 + $0x1e4] ss:$16 sps:$4 sm:$0xff]  }
 0x20c   :  { %4864 = vmatpush1.bf16.msra.mxu0 %v6708_v53  ;;  %v3291_v53 = vadd.bf16 %v3241_v46, %v3176_v45  ;;  %v487_v47 = vld [vmem:[#allocation6 + $0xad8] sm:$0xff] }
 0x20d   :  { %4865 = vmatprep.subr.bf16.mxu0 %v6713_v57  ;;  %v427_v57 = vld [vmem:[#allocation6 + $0x8f8] sm:$0xff] }
 0x20e   :  { %3074 = vmatpush1.bf16.msra.mxu1 %v6085_v62  ;;  %v6158_v62 = vcombine.high %v423_v21, %v427_v57  ;;  %v491_v48 = vld [vmem:[#allocation6 + $0xaf8] sm:$0xff] }
 0x20f   :  { %3075 = vmatprep.subr.bf16.mxu1 %v6094_v1  ;;  %v435_v1 = vld [vmem:[#allocation6 + $0x938] sm:$0xff] }
 0x210   :  { %4866 = vmatpush1.bf16.msra.mxu0 %v6711_v0  ;;  %v431_v0 = vld [vmem:[#allocation6 + $0x918] sm:$0xff] }
 0x211   :  { %4867 = vmatprep.subr.bf16.mxu0 %v6716_v2  ;;  %v6157_v2 = vcombine.low %v423_v21, %v427_v57  ;;  %v6166_v3 = vcombine.high %v431_v0, %v435_v1  ;;  %v6165_v9 = vcombine.low %v431_v0, %v435_v1  ;;  %v499_v21 = vld [vmem:[#allocation6 + $0xb38] sm:$0xff] }
 0x212   :  { %3076 = vmatpush1.bf16.msra.mxu1 %v6093_v4  ;;  %v6764_v57 = vld [vmem:[#allocation9 + $0x304] ss:$16 sps:$4 sm:$0xff]  }
 0x213   :  { %3077 = vmatprep.subr.bf16.mxu1 %v6102_v6  ;;  %v443_v6 = vld [vmem:[#allocation6 + $0x978] sm:$0xff] }
 0x214   :  { %4868 = vmatpush1.bf16.msra.mxu0 %v6714_v5  ;;  %v439_v5 = vld [vmem:[#allocation6 + $0x958] sm:$0xff] }
 0x215   :  { %4869 = vmatprep.subr.bf16.mxu0 %v6719_v7  ;;  %v6743_v7 = vld [vmem:[#allocation9 + $0x224] ss:$16 sps:$4 sm:$0xff]   ;;  %v6174_v10 = vcombine.high %v439_v5, %v443_v6  ;;  %v6173_v15 = vcombine.low %v439_v5, %v443_v6 }
 0x216   :  { %3078 = vmatpush1.bf16.msra.mxu1 %v6101_v11  ;;  %v6741_v11 = vld [vmem:[#allocation9 + $0x220] ss:$16 sps:$4 sm:$0xff]   ;;  %v6767_v1 = vld [vmem:[#allocation9 + $0x324] ss:$16 sps:$4 sm:$0xff]  }
 0x217   :  { %3079 = vmatprep.subr.bf16.mxu1 %v6110_v13  ;;  %v451_v13 = vld [vmem:[#allocation6 + $0x9b8] sm:$0xff] }
 0x218   :  { %4870 = vmatpush1.bf16.msra.mxu0 %v6717_v12  ;;  %v447_v12 = vld [vmem:[#allocation6 + $0x998] sm:$0xff] }
 0x219   :  { %4871 = vmatprep.subr.bf16.mxu0 %v6722_v23  ;;  %v6746_v23 = vld [vmem:[#allocation9 + $0x244] ss:$16 sps:$4 sm:$0xff]   ;;  %v6182_v16 = vcombine.high %v447_v12, %v451_v13  ;;  %v6181_v26 = vcombine.low %v447_v12, %v451_v13 }
 0x21a   :  { %3080 = vmatpush1.bf16.msra.mxu1 %v6109_v17  ;;  %v6744_v17 = vld [vmem:[#allocation9 + $0x240] ss:$16 sps:$4 sm:$0xff]   ;;  %v6770_v6 = vld [vmem:[#allocation9 + $0x344] ss:$16 sps:$4 sm:$0xff]  }
 0x21b   :  { %3081 = vmatprep.subr.bf16.mxu1 %v6118_v20  ;;  %v459_v20 = vld [vmem:[#allocation6 + $0x9f8] sm:$0xff] }
 0x21c   :  { %4872 = vmatpush1.bf16.msra.mxu0 %v6720_v18  ;;  %v455_v18 = vld [vmem:[#allocation6 + $0x9d8] sm:$0xff] }
 0x21d   :  { %4873 = vmatprep.subr.bf16.mxu0 %v6725_v25  ;;  %v6749_v25 = vld [vmem:[#allocation9 + $0x264] ss:$16 sps:$4 sm:$0xff]   ;;  %v6190_v27 = vcombine.high %v455_v18, %v459_v20  ;;  %v6189_v32 = vcombine.low %v455_v18, %v459_v20 }
 0x21e   :  { %3082 = vmatpush1.bf16.msra.mxu1 %v6117_v28  ;;  %v6747_v28 = vld [vmem:[#allocation9 + $0x260] ss:$16 sps:$4 sm:$0xff]   ;;  %v6773_v13 = vld [vmem:[#allocation9 + $0x364] ss:$16 sps:$4 sm:$0xff]  }
 0x21f   :  { %3083 = vmatprep.subr.bf16.mxu1 %v6126_v55  ;;  %v467_v55 = vld [vmem:[#allocation6 + $0xa38] sm:$0xff] }
 0x220   :  { %4874 = vmatpush1.bf16.msra.mxu0 %v6723_v29  ;;  %v463_v29 = vld [vmem:[#allocation6 + $0xa18] sm:$0xff] }
 0x221   :  { %4875 = vmatprep.subr.bf16.mxu0 %v6728_v56  ;;  %v6752_v56 = vld [vmem:[#allocation9 + $0x284] ss:$16 sps:$4 sm:$0xff]   ;;  %v6198_v33 = vcombine.high %v463_v29, %v467_v55 }
 0x222   :  { %3084 = vmatpush1.bf16.msra.mxu1 %v6125_v34  ;;  %v6750_v34 = vld [vmem:[#allocation9 + $0x280] ss:$16 sps:$4 sm:$0xff]   ;;  %v6779_v20 = vld [vmem:[#allocation9 + $0x384] ss:$16 sps:$4 sm:$0xff]  }
 0x223   :  { %3094 = vmatprep.subr.bf16.mxu1 %v6134_v38  ;;  %v475_v38 = vld [vmem:[#allocation6 + $0xa78] sm:$0xff] }
 0x224   :  { %4876 = vmatpush1.bf16.msra.mxu0 %v6726_v35  ;;  %v471_v35 = vld [vmem:[#allocation6 + $0xa58] sm:$0xff] }
 0x225   :  { %4877 = vmatprep.subr.bf16.mxu0 %v6731_v39  ;;  %3086 = vmatmul.mubr.bf16.vlgmr.msra.gmra.mrb[8].mxu1 %v7576_v24  ;;  %v3299_v24 = vmul.bf16 1045249613, %v3291_v53  ;;  %v6197_v39 = vcombine.low %v463_v29, %v467_v55  ;;  %v6206_v40 = vcombine.high %v471_v35, %v475_v38  ;;  %v6205_v45 = vcombine.low %v471_v35, %v475_v38  ;;  %v507_v0 = vld [vmem:[#allocation6 + $0xb78] sm:$0xff]  ;;  %v6776_v55 = vld [vmem:[#allocation9 + $0xc] ss:$16 sps:$4 sm:$0xff]  }
 0x226   :  { %3095 = vmatpush1.bf16.msra.mxu1 %v6133_v58  ;;  %3126 = vmatprep.mubr.bf16.mxu1 %v7580_v31  ;;  %v6740_v31 = vld [vmem:[#allocation9 + $0x204] ss:$16 sps:$4 sm:$0xff]   ;;  %v6795_v35 = vld [vmem:[#allocation9 + $0x3e0] ss:$16 sps:$4 sm:$0xff]  }
 0x227   :  { %3096 = vmatprep.subr.bf16.mxu1 %v6142_v44  ;;  %v7655_v4 = vmax.bf16 %v3299_v24, %v3291_v53  ;;  %v479_v58 = vld [vmem:[#allocation6 + $0xa98] sm:$0xff] }
 0x228   :  { %4878 = vmatpush1.bf16.msra.mxu0 %v6729_v41  ;;  %v483_v41 = vld [vmem:[#allocation6 + $0xab8] sm:$0xff] }
 0x229   :  { %4879 = vmatprep.subr.bf16.mxu0 %v6734_v22  ;;  %v6758_v44 = vld [vmem:[#allocation9 + $0x2c4] ss:$16 sps:$4 sm:$0xff]   ;;  %v6214_v46 = vcombine.high %v479_v58, %v483_v41  ;;  %v6756_v22 = vld [vmem:[#allocation9 + $0x2c0] ss:$16 sps:$4 sm:$0xff]  }
 0x22a   :  { %3097 = vmatpush1.bf16.msra.mxu1 %v6141_v49  ;;  %v6761_v49 = vld [vmem:[#allocation9 + $0x2e4] ss:$16 sps:$4 sm:$0xff]   ;;  %v6759_v53 = vld [vmem:[#allocation9 + $0x2e0] ss:$16 sps:$4 sm:$0xff]  }
 0x22b   :  { %3098 = vmatprep.subr.bf16.mxu1 %v6150_v52  ;;  %v6222_v52 = vcombine.high %v487_v47, %v491_v48  ;;  %v503_v24 = vld [vmem:[#allocation6 + $0xb58] sm:$0xff] }
 0x22c   :  { %4880 = vmatpush1.bf16.msra.mxu0 %v6732_v50  ;;  %v6213_v50 = vcombine.low %v479_v58, %v483_v41  ;;  %v515_v5 = vld [vmem:[#allocation6 + $0xbb8] sm:$0xff]  ;;  %v6788_v58 = vld [vmem:[#allocation9 + $0x4c] ss:$16 sps:$4 sm:$0xff]  }
 0x22d   :  { %4881 = vmatprep.subr.bf16.mxu0 %v6737_v19  ;;  %v495_v19 = vld [vmem:[#allocation6 + $0xb18] sm:$0xff] }
 0x22e   :  { %3099 = vmatpush1.bf16.msra.mxu1 %v6149_v59  ;;  %v6221_v59 = vcombine.low %v487_v47, %v491_v48  ;;  %v523_v12 = vld [vmem:[#allocation6 + $0xbf8] sm:$0xff] }
 0x22f   :  { %3100 = vmatprep.subr.bf16.mxu1 %v6158_v62  ;;  %v6762_v62 = vld [vmem:[#allocation9 + $0x300] ss:$16 sps:$4 sm:$0xff]   ;;  %v6812_v38 = vld [vmem:[#allocation9 + $0x404] ss:$16 sps:$4 sm:$0xff]  }
 0x230   :  { %4882 = vmatpush1.bf16.msra.mxu0 %v6735_v61  ;;  %v6230_v61 = vcombine.high %v495_v19, %v499_v21  ;;  %v531_v18 = vld [vmem:[#allocation6 + $0xc38] sm:$0xff] }
 0x231   :  { %4892 = vmatprep.subr.bf16.mxu0 %v6740_v31  ;;  %v6229_v31 = vcombine.low %v495_v19, %v499_v21  ;;  %v6800_v19 = vld [vmem:[#allocation9 + $0x8c] ss:$16 sps:$4 sm:$0xff]  }
 0x232   :  { %3101 = vmatpush1.bf16.msra.mxu1 %v6157_v2  ;;  %v6238_v2 = vcombine.high %v503_v24, %v507_v0 }
 0x233   :  { %4884 = vmatmul.mubr.bf16.vlgmr.msra.gmra.mrb[8].mxu0 %v7655_v4  ;;  %3102 = vmatprep.subr.bf16.mxu1 %v6166_v3  ;;  %v6765_v3 = vld [vmem:[#allocation9 + $0x320] ss:$16 sps:$4 sm:$0xff]  }
 0x234   :  { %4893 = vmatpush1.bf16.msra.mxu0 %v6738_v63  ;;  %v511_v63 = vld [vmem:[#allocation6 + $0xb98] sm:$0xff] }
 0x235   :  { %4894 = vmatprep.subr.bf16.mxu0 %v6743_v7  ;;  %v6237_v7 = vcombine.low %v503_v24, %v507_v0  ;;  %v6810_v0 = vld [vmem:[#allocation9 + $0x400] ss:$16 sps:$4 sm:$0xff]  }
 0x236   :  { %3103 = vmatpush1.bf16.msra.mxu1 %v6165_v9  ;;  %v6246_v9 = vcombine.high %v511_v63, %v515_v5 }
 0x237   :  { %3104 = vmatprep.subr.bf16.mxu1 %v6174_v10  ;;  %v6768_v10 = vld [vmem:[#allocation9 + $0x340] ss:$16 sps:$4 sm:$0xff]  }
 0x238   :  { %4895 = vmatpush1.bf16.msra.mxu0 %v6741_v11  ;;  %v519_v11 = vld [vmem:[#allocation6 + $0xbd8] sm:$0xff] }
 0x239   :  { %4896 = vmatprep.subr.bf16.mxu0 %v6746_v23  ;;  %v6245_v23 = vcombine.low %v511_v63, %v515_v5  ;;  %v6816_v63 = vld [vmem:[#allocation9 + $0x420] ss:$16 sps:$4 sm:$0xff]   ;;  %v6824_v5 = vld [vmem:[#allocation9 + $0x444] ss:$16 sps:$4 sm:$0xff]  }
 0x23a   :  { %3105 = vmatpush1.bf16.msra.mxu1 %v6173_v15  ;;  %v6254_v15 = vcombine.high %v519_v11, %v523_v12 }
 0x23b   :  { %3106 = vmatprep.subr.bf16.mxu1 %v6182_v16  ;;  %v6771_v16 = vld [vmem:[#allocation9 + $0x360] ss:$16 sps:$4 sm:$0xff]  }
 0x23c   :  { %4897 = vmatpush1.bf16.msra.mxu0 %v6744_v17  ;;  %v527_v17 = vld [vmem:[#allocation6 + $0xc18] sm:$0xff] }
 0x23d   :  { %4898 = vmatprep.subr.bf16.mxu0 %v6749_v25  ;;  %v6253_v25 = vcombine.low %v519_v11, %v523_v12  ;;  %v6261_v29 = vcombine.low %v527_v17, %v531_v18  ;;  %v6807_v11 = vld [vmem:[#allocation9 + $0xe8] ss:$16 sps:$4 sm:$0xff]   ;;  %v6815_v12 = vld [vmem:[#allocation9 + $0x10c] ss:$16 sps:$4 sm:$0xff]  }
 0x23e   :  { %3107 = vmatpush1.bf16.msra.mxu1 %v6181_v26  ;;  %v6262_v26 = vcombine.high %v527_v17, %v531_v18  ;;  %v6834_v17 = vld [vmem:[#allocation9 + $0x480] ss:$16 sps:$4 sm:$0xff]   ;;  %v6842_v18 = vld [vmem:[#allocation9 + $0x4a4] ss:$16 sps:$4 sm:$0xff]  }
 0x23f   :  { %3108 = vmatprep.subr.bf16.mxu1 %v6190_v27  ;;  %v6777_v27 = vld [vmem:[#allocation9 + $0x380] ss:$16 sps:$4 sm:$0xff]  }
 0x240   :  { %4899 = vmatpush1.bf16.msra.mxu0 %v6747_v28  ;;  %v6785_v28 = vld [vmem:[#allocation9 + $0x3a4] ss:$16 sps:$4 sm:$0xff]  }
 0x241   :  { %4900 = vmatprep.subr.bf16.mxu0 %v6752_v56  ;;  %v6783_v56 = vld [vmem:[#allocation9 + $0x3a0] ss:$16 sps:$4 sm:$0xff]  }
 0x242   :  { %3109 = vmatpush1.bf16.msra.mxu1 %v6189_v32  ;;  %v6791_v32 = vld [vmem:[#allocation9 + $0x3c4] ss:$16 sps:$4 sm:$0xff]  }
 0x243   :  { %3110 = vmatprep.subr.bf16.mxu1 %v6198_v33  ;;  %v6789_v33 = vld [vmem:[#allocation9 + $0x3c0] ss:$16 sps:$4 sm:$0xff]  }
 0x244   :  { %4901 = vmatpush1.bf16.msra.mxu0 %v6750_v34  ;;  %v6797_v34 = vld [vmem:[#allocation9 + $0x3e4] ss:$16 sps:$4 sm:$0xff]  }
 0x245   :  { %4902 = vmatprep.subr.bf16.mxu0 %v6755_v36  ;;  %v6774_v36 = vld [vmem:[#allocation9 + $0x8] ss:$16 sps:$4 sm:$0xff]  }
 0x246   :  { %3111 = vmatpush1.bf16.msra.mxu1 %v6197_v39  ;;  %v6782_v39 = vld [vmem:[#allocation9 + $0x2c] ss:$16 sps:$4 sm:$0xff]  }
 0x247   :  { %3112 = vmatprep.subr.bf16.mxu1 %v6206_v40  ;;  %v3231_v40 = vcombine.high %v7646_v30, %v7646_v30 }
 0x248   :  { %4903 = vmatpush1.bf16.msra.mxu0 %v6753_v42  ;;  %v6780_v42 = vld [vmem:[#allocation9 + $0x28] ss:$16 sps:$4 sm:$0xff]  }
 0x249   :  { %4904 = vmatprep.subr.bf16.mxu0 %v6758_v44  ;;  %v3250_v41 = vpack.i.b16 %v3231_v40, %v3231_v40  ;;  %v6866_v40 = vld [vmem:[#allocation9 + $0x524] ss:$16 sps:$4 sm:$0xff]  }
 0x24a   :  { %3113 = vmatpush1.bf16.msra.mxu1 %v6205_v45  ;;  %v6786_v45 = vld [vmem:[#allocation9 + $0x48] ss:$16 sps:$4 sm:$0xff]  }
 0x24b   :  { %3114 = vmatprep.subr.bf16.mxu1 %v6214_v46  ;;  %v3255_v30 = vrot.slane %v3250_v41, %v7632_v14  ;;  %v6794_v46 = vld [vmem:[#allocation9 + $0x6c] ss:$16 sps:$4 sm:$0xff]   ;;  %v6849_v41 = vld [vmem:[#allocation9 + $0x1c8] ss:$16 sps:$4 sm:$0xff]  }
 0x24c   :  { %4905 = vmatpush1.bf16.msra.mxu0 %v6756_v22 }
 0x24d   :  { %4906 = vmatprep.subr.bf16.mxu0 %v6761_v49 }
 0x24e   :  { %3115 = vmatpush1.bf16.msra.mxu1 %v6213_v50 }
 0x24f   :  { %3116 = vmatprep.subr.bf16.mxu1 %v6222_v52 }
 0x250   :  { %4907 = vmatpush1.bf16.msra.mxu0 %v6759_v53 }
 0x251   :  { %4908 = vmatprep.subr.bf16.mxu0 %v6764_v57 }
 0x252   :  { %3117 = vmatpush1.bf16.msra.mxu1 %v6221_v59 }
 0x253   :  { %3118 = vmatprep.subr.bf16.mxu1 %v6230_v61  ;;  %v6798_v61 = vld [vmem:[#allocation9 + $0x88] ss:$16 sps:$4 sm:$0xff]  }
 0x254   :  { %4909 = vmatpush1.bf16.msra.mxu0 %v6762_v62  ;;  %v6803_v62 = vld [vmem:[#allocation9 + $0xac] ss:$16 sps:$4 sm:$0xff]  }
 0x255   :  { %4910 = vmatprep.subr.bf16.mxu0 %v6767_v1 }
 0x256   :  { %3119 = vmatpush1.bf16.msra.mxu1 %v6229_v31  ;;  %v6818_v31 = vld [vmem:[#allocation9 + $0x424] ss:$16 sps:$4 sm:$0xff]  }
 0x257   :  { %3120 = vmatprep.subr.bf16.mxu1 %v6238_v2  ;;  %v6801_v2 = vld [vmem:[#allocation9 + $0xa8] ss:$16 sps:$4 sm:$0xff]  }
 0x258   :  { %4911 = vmatpush1.bf16.msra.mxu0 %v6765_v3  ;;  %v6806_v3 = vld [vmem:[#allocation9 + $0xcc] ss:$16 sps:$4 sm:$0xff]  }
 0x259   :  { %4912 = vmatprep.subr.bf16.mxu0 %v6770_v6  ;;  %v6804_v6 = vld [vmem:[#allocation9 + $0xc8] ss:$16 sps:$4 sm:$0xff]  }
 0x25a   :  { %3121 = vmatpush1.bf16.msra.mxu1 %v6237_v7  ;;  %v6809_v7 = vld [vmem:[#allocation9 + $0xec] ss:$16 sps:$4 sm:$0xff]  }
 0x25b   :  { %3122 = vmatprep.subr.bf16.mxu1 %v6246_v9  ;;  %v6822_v9 = vld [vmem:[#allocation9 + $0x440] ss:$16 sps:$4 sm:$0xff]  }
 0x25c   :  { %4913 = vmatpush1.bf16.msra.mxu0 %v6768_v10  ;;  %v6830_v10 = vld [vmem:[#allocation9 + $0x464] ss:$16 sps:$4 sm:$0xff]  }
 0x25d   :  { %4914 = vmatprep.subr.bf16.mxu0 %v6773_v13  ;;  %v6828_v13 = vld [vmem:[#allocation9 + $0x460] ss:$16 sps:$4 sm:$0xff]  }
 0x25e   :  { %3123 = vmatpush1.bf16.msra.mxu1 %v6245_v23  ;;  %v6836_v23 = vld [vmem:[#allocation9 + $0x484] ss:$16 sps:$4 sm:$0xff]  }
 0x25f   :  { %3124 = vmatprep.subr.bf16.mxu1 %v6254_v15  ;;  %v6813_v15 = vld [vmem:[#allocation9 + $0x108] ss:$16 sps:$4 sm:$0xff]  }
 0x260   :  { %4915 = vmatpush1.bf16.msra.mxu0 %v6771_v16  ;;  %v6821_v16 = vld [vmem:[#allocation9 + $0x12c] ss:$16 sps:$4 sm:$0xff]  }
 0x261   :  { %4916 = vmatprep.subr.bf16.mxu0 %v6779_v20  ;;  %v6819_v20 = vld [vmem:[#allocation9 + $0x128] ss:$16 sps:$4 sm:$0xff]  }
 0x262   :  { %3125 = vmatpush1.bf16.msra.mxu1 %v6253_v25  ;;  %v6827_v25 = vld [vmem:[#allocation9 + $0x14c] ss:$16 sps:$4 sm:$0xff]  }
 0x263   :  { %3135 = vmatprep.subr.bf16.mxu1 %v6262_v26  ;;  %v6840_v26 = vld [vmem:[#allocation9 + $0x4a0] ss:$16 sps:$4 sm:$0xff]  }
 0x264   :  { %4917 = vmatpush1.bf16.msra.mxu0 %v6777_v27  ;;  %v6848_v27 = vld [vmem:[#allocation9 + $0x4c4] ss:$16 sps:$4 sm:$0xff]  }
 0x265   :  { %4918 = vmatprep.subr.bf16.mxu0 %v6785_v28  ;;  %3127 = vmatmul.mubr.bf16.vlgmr.msra.gmra.mrb[8].mxu1 %v7588_v37  ;;  %v3233_v37 = vcombine.high %v7630_v8, %v7630_v8  ;;  %v6825_v28 = vld [vmem:[#allocation9 + $0x148] ss:$16 sps:$4 sm:$0xff]  }
 0x266   :  { %3136 = vmatpush1.bf16.msra.mxu1 %v6261_v29  ;;  %3167 = vmatprep.mubr.bf16.mxu1 %v7401_v43  ;;  %v7176_v43 = vld [vmem:[#allocation3 + $0x18] ss:$0 sps:$4 sm:$0xff]   ;;  %v6833_v29 = vld [vmem:[#allocation9 + $0x16c] ss:$16 sps:$4 sm:$0xff]  }
 0x267   :  { %5015 = vmatprep.subr.bf16.mxu1 %v6776_v55  ;;  %v3257_v44 = vpack.i.b16 %v3233_v37, %v3233_v37  ;;  %v6846_v55 = vld [vmem:[#allocation9 + $0x4c0] ss:$16 sps:$4 sm:$0xff]   ;;  %v6843_v37 = vld [vmem:[#allocation9 + $0x1a8] ss:$16 sps:$4 sm:$0xff]  }
 0x268   :  { %4919 = vmatpush1.bf16.msra.mxu0 %v6783_v56  ;;  %v6854_v56 = vld [vmem:[#allocation9 + $0x4e4] ss:$16 sps:$4 sm:$0xff]  }
 0x269   :  { %4920 = vmatprep.subr.bf16.mxu0 %v6791_v32  ;;  %v3262_v8 = vrot.slane %v3257_v44, %v7632_v14  ;;  %v6831_v32 = vld [vmem:[#allocation9 + $0x168] ss:$16 sps:$4 sm:$0xff]   ;;  %v6857_v44 = vld [vmem:[#allocation9 + $0x1ec] ss:$16 sps:$4 sm:$0xff]  }
 0x26c   :  { %4921 = vmatpush1.bf16.msra.mxu0 %v6789_v33  ;;  %v6839_v33 = vld [vmem:[#allocation9 + $0x18c] ss:$16 sps:$4 sm:$0xff]  }
 0x26d   :  { %4922 = vmatprep.subr.bf16.mxu0 %v6797_v34  ;;  %v6852_v34 = vld [vmem:[#allocation9 + $0x4e0] ss:$16 sps:$4 sm:$0xff]  }
 0x270   :  { %4923 = vmatpush1.bf16.msra.mxu0 %v6795_v35  ;;  %v6860_v35 = vld [vmem:[#allocation9 + $0x504] ss:$16 sps:$4 sm:$0xff]  }
 0x271   :  { %4933 = vmatprep.subr.bf16.mxu0 %v6812_v38  ;;  %6266 = vmatmul.mubr.msk.bf16.vlgmr.msra.gmra.mrb[8].mxu1 %vm2516_vm0, %v7176_v43  ;;  %v6837_v38 = vld [vmem:[#allocation9 + $0x188] ss:$16 sps:$4 sm:$0xff]   ;;  %v6851_v43 = vld [vmem:[#allocation9 + $0x1cc] ss:$16 sps:$4 sm:$0xff]  }
 0x272   :  { %5016 = vmatpush1.bf16.msra.mxu1 %v6774_v36  ;;  %5047 = vmatprep.mubr.bf16.mxu1 %v7641_v60  ;;  %v6792_v60 = vld [vmem:[#allocation9 + $0x68] ss:$16 sps:$4 sm:$0xff]   ;;  %v6845_v36 = vld [vmem:[#allocation9 + $0x1ac] ss:$16 sps:$4 sm:$0xff]  }
 0x273   :  { %5017 = vmatprep.subr.bf16.mxu1 %v6782_v39  ;;  %v6858_v39 = vld [vmem:[#allocation9 + $0x500] ss:$16 sps:$4 sm:$0xff]  }
 0x276   :  { %5018 = vmatpush1.bf16.msra.mxu1 %v6780_v42  ;;  %v6864_v42 = vld [vmem:[#allocation9 + $0x520] ss:$16 sps:$4 sm:$0xff]  }
 0x277   :  { %5019 = vmatprep.subr.bf16.mxu1 %v6788_v58  ;;  %v6872_v58 = vld [vmem:[#allocation9 + $0x544] ss:$16 sps:$4 sm:$0xff]  }
 0x278   :  { %v2841_v22 = vpop.f32.mrb[4].mxu1 }
 0x279   :  { %v3178_v47 = vpack.c.bf16 %v2841_v22, %v2841_v22  ;;  %v2843_v48 = vpop.f32.mrb[5].mxu1  ;;  %v6863_v22 = vld [vmem:[#allocation9 + $0x20c] ss:$16 sps:$4 sm:$0xff]  }
 0x27a   :  { %5020 = vmatpush1.bf16.msra.mxu1 %v6786_v45  ;;  %v3179_v49 = vpack.c.bf16 %v2843_v48, %v2843_v48  ;;  %v2845_v50 = vpop.f32.mrb[6].mxu1  ;;  %v6870_v45 = vld [vmem:[#allocation9 + $0x540] ss:$16 sps:$4 sm:$0xff]   ;;  %v6861_v48 = vld [vmem:[#allocation9 + $0x208] ss:$16 sps:$4 sm:$0xff]  }
 0x27b   :  { %v3293_v52 = vadd.bf16 %v3255_v30, %v3178_v47  ;;  %v2846_v53 = vpop.f32.mrb[7].mxu1  ;;  %5021 = vmatprep.subr.bf16.mxu1 %v6794_v46  ;;  %v6878_v30 = vld [vmem:[#allocation9 + $0x564] ss:$16 sps:$4 sm:$0xff]   ;;  %v6855_v46 = vld [vmem:[#allocation9 + $0x1e8] ss:$16 sps:$4 sm:$0xff]  }
 0x27c   :  { %v3294_v21 = vadd.bf16 %v3262_v8, %v3179_v49  ;;  %v6876_v8 = vld [vmem:[#allocation9 + $0x560] ss:$16 sps:$4 sm:$0xff]   ;;  %v6884_v47 = vld [vmem:[#allocation9 + $0x584] ss:$16 sps:$4 sm:$0xff]   ;;  %v6869_v49 = vld [vmem:[#allocation9 + $0x22c] ss:$16 sps:$4 sm:$0xff]  }
 0x27d   :  { %v3301_v57 = vmul.bf16 1045249613, %v3293_v52  ;;  %v6882_v50 = vld [vmem:[#allocation9 + $0x580] ss:$16 sps:$4 sm:$0xff]   ;;  %v6867_v53 = vld [vmem:[#allocation9 + $0x228] ss:$16 sps:$4 sm:$0xff]  }
 0x27e   :  { %v3302_v59 = vmul.bf16 1045249613, %v3294_v21  ;;  %5022 = vmatpush1.bf16.msra.mxu1 %v6792_v60  ;;  %v6890_v60 = vld [vmem:[#allocation9 + $0x5a4] ss:$16 sps:$4 sm:$0xff]  }
 0x27f   :  { %5023 = vmatprep.subr.bf16.mxu1 %v6800_v19  ;;  %v7670_v1 = vmax.bf16 %v3301_v57, %v3293_v52  ;;  %v3186_v52 = vcombine.high %v7618_v54, %v7618_v54  ;;  %v6875_v19 = vld [vmem:[#allocation9 + $0x24c] ss:$16 sps:$4 sm:$0xff]   ;;  %v6903_v54 = vld [vmem:[#allocation9 + $0x5e4] ss:$16 sps:$4 sm:$0xff]  }
 0x280   :  { %v7668_v24 = vmax.bf16 %v3302_v59, %v3294_v21  ;;  %v6888_v21 = vld [vmem:[#allocation9 + $0x5a0] ss:$16 sps:$4 sm:$0xff]   ;;  %v6897_v59 = vld [vmem:[#allocation9 + $0x5c4] ss:$16 sps:$4 sm:$0xff]  }
 0x281   :  { %v3200_v57 = vrot.slane %v3186_v52, %v7615_v51  ;;  %v6985_v52 = vld [vmem:[#allocation9 + $0x6a0] ss:$16 sps:$4 sm:$0xff]  }
 0x282   :  { %5024 = vmatpush1.bf16.msra.mxu1 %v6798_v61  ;;  %4924 = vmatprep.mubr.bf16.mxu0 %v7668_v24  ;;  %v6873_v61 = vld [vmem:[#allocation9 + $0x248] ss:$16 sps:$4 sm:$0xff]  }
 0x283   :  { %4925 = vmatmul.mubr.bf16.vlgmr.msra.gmra.mrb[8].mxu0 %v7670_v1  ;;  %5025 = vmatprep.subr.bf16.mxu1 %v6803_v62  ;;  %v6895_v62 = vld [vmem:[#allocation9 + $0x5c0] ss:$16 sps:$4 sm:$0xff]  }
 0x284   :  { %4934 = vmatpush1.bf16.msra.mxu0 %v6810_v0  ;;  %v3202_v0 = vcombine.high %v3200_v57, %v3200_v57 }
 0x285   :  { %4935 = vmatprep.subr.bf16.mxu0 %v6818_v31  ;;  %v6887_v31 = vld [vmem:[#allocation9 + $0x28c] ss:$16 sps:$4 sm:$0xff]  }
 0x286   :  { %5026 = vmatpush1.bf16.msra.mxu1 %v6801_v2  ;;  %v7680_v2 = vrot.slane %v3200_v57, %v7615_v51  ;;  %v6991_v57 = vld [vmem:[#allocation9 + $0x6c0] ss:$16 sps:$4 sm:$0xff]  }
 0x287   :  { %5027 = vmatprep.subr.bf16.mxu1 %v6806_v3  ;;  %v6901_v3 = vld [vmem:[#allocation9 + $0x5e0] ss:$16 sps:$4 sm:$0xff]  }
 0x288   :  { %4936 = vmatpush1.bf16.msra.mxu0 %v6816_v63  ;;  %v7683_v63 = vrot.slane %v3202_v0, %v7615_v51  ;;  %v6928_v0 = vld [vmem:[#allocation9 + $0x3e8] ss:$16 sps:$4 sm:$0xff]  }
 0x289   :  { %4937 = vmatprep.subr.bf16.mxu0 %v6824_v5  ;;  %v6957_v5 = vld [vmem:[#allocation9 + $0x604] ss:$16 sps:$4 sm:$0xff]  }
 0x28a   :  { %5028 = vmatpush1.bf16.msra.mxu1 %v6804_v6  ;;  %v6885_v6 = vld [vmem:[#allocation9 + $0x288] ss:$16 sps:$4 sm:$0xff]  }
 0x28b   :  { %5029 = vmatprep.subr.bf16.mxu1 %v6809_v7  ;;  %v6894_v7 = vld [vmem:[#allocation9 + $0x2ac] ss:$16 sps:$4 sm:$0xff]  }
 0x28c   :  { %4938 = vmatpush1.bf16.msra.mxu0 %v6822_v9  ;;  %v3264_v9 = vpack.i.b16 %v7680_v2, %v7680_v2 }
 0x28d   :  { %4939 = vmatprep.subr.bf16.mxu0 %v6830_v10  ;;  %v3271_v10 = vpack.i.b16 %v7683_v63, %v7683_v63 }
 0x28e   :  { %5030 = vmatpush1.bf16.msra.mxu1 %v6807_v11  ;;  %v6892_v11 = vld [vmem:[#allocation9 + $0x2a8] ss:$16 sps:$4 sm:$0xff]  }
 0x28f   :  { %5031 = vmatprep.subr.bf16.mxu1 %v6815_v12  ;;  %v6900_v12 = vld [vmem:[#allocation9 + $0x2cc] ss:$16 sps:$4 sm:$0xff]  }
 0x290   :  { %4940 = vmatpush1.bf16.msra.mxu0 %v6828_v13  ;;  %v3269_v13 = vrot.slane %v3264_v9, %v7632_v14  ;;  %v6934_v9 = vld [vmem:[#allocation9 + $0x428] ss:$16 sps:$4 sm:$0xff]  }
 0x291   :  { %4941 = vmatprep.subr.bf16.mxu0 %v6836_v23 }
 0x292   :  { %5032 = vmatpush1.bf16.msra.mxu1 %v6813_v15  ;;  %v3276_v15 = vrot.slane %v3271_v10, %v7632_v14  ;;  %v7017_v10 = vld [vmem:[#allocation9 + $0x744] ss:$16 sps:$4 sm:$0xff]  }
 0x293   :  { %5033 = vmatprep.subr.bf16.mxu1 %v6821_v16 }
 0x294   :  { %4942 = vmatpush1.bf16.msra.mxu0 %v6834_v17 }
 0x295   :  { %4943 = vmatprep.subr.bf16.mxu0 %v6842_v18  ;;  %v6898_v18 = vld [vmem:[#allocation9 + $0x2c8] ss:$16 sps:$4 sm:$0xff]  }
 0x296   :  { %5034 = vmatpush1.bf16.msra.mxu1 %v6819_v20 }
 0x297   :  { %5035 = vmatprep.subr.bf16.mxu1 %v6827_v25 }
 0x298   :  { %4944 = vmatpush1.bf16.msra.mxu0 %v6840_v26  ;;  %v6906_v26 = vld [vmem:[#allocation9 + $0x2ec] ss:$16 sps:$4 sm:$0xff]  }
 0x299   :  { %4945 = vmatprep.subr.bf16.mxu0 %v6848_v27 }
 0x29a   :  { %5036 = vmatpush1.bf16.msra.mxu1 %v6825_v28 }
 0x29b   :  { %5037 = vmatprep.subr.bf16.mxu1 %v6833_v29 }
 0x29c   :  { %4946 = vmatpush1.bf16.msra.mxu0 %v6846_v55 }
 0x29d   :  { %4947 = vmatprep.subr.bf16.mxu0 %v6854_v56  ;;  %v6904_v56 = vld [vmem:[#allocation9 + $0x2e8] ss:$16 sps:$4 sm:$0xff]  }
 0x29e   :  { %5038 = vmatpush1.bf16.msra.mxu1 %v6831_v32 }
 0x29f   :  { %5039 = vmatprep.subr.bf16.mxu1 %v6839_v33  ;;  %v6909_v33 = vld [vmem:[#allocation9 + $0x30c] ss:$16 sps:$4 sm:$0xff]  }
 0x2a0   :  { %4948 = vmatpush1.bf16.msra.mxu0 %v6852_v34 }
 0x2a1   :  { %4949 = vmatprep.subr.bf16.mxu0 %v6860_v35  ;;  %v6955_v35 = vld [vmem:[#allocation9 + $0x600] ss:$16 sps:$4 sm:$0xff]  }
 0x2a2   :  { %5040 = vmatpush1.bf16.msra.mxu1 %v6837_v38 }
 0x2a3   :  { %5041 = vmatprep.subr.bf16.mxu1 %v6845_v36  ;;  %v6907_v36 = vld [vmem:[#allocation9 + $0x308] ss:$16 sps:$4 sm:$0xff]  }
 0x2a4   :  { %4950 = vmatpush1.bf16.msra.mxu0 %v6858_v39  ;;  %v6963_v39 = vld [vmem:[#allocation9 + $0x624] ss:$16 sps:$4 sm:$0xff]  }
 0x2a5   :  { %4951 = vmatprep.subr.bf16.mxu0 %v6866_v40  ;;  %v6912_v40 = vld [vmem:[#allocation9 + $0x32c] ss:$16 sps:$4 sm:$0xff]  }
 0x2a6   :  { %5042 = vmatpush1.bf16.msra.mxu1 %v6843_v37  ;;  %v6961_v37 = vld [vmem:[#allocation9 + $0x620] ss:$16 sps:$4 sm:$0xff]  }
 0x2a7   :  { %5043 = vmatprep.subr.bf16.mxu1 %v6851_v43  ;;  %v6910_v43 = vld [vmem:[#allocation9 + $0x328] ss:$16 sps:$4 sm:$0xff]  }
 0x2a8   :  { %4952 = vmatpush1.bf16.msra.mxu0 %v6864_v42  ;;  %v6969_v42 = vld [vmem:[#allocation9 + $0x644] ss:$16 sps:$4 sm:$0xff]  }
 0x2a9   :  { %4953 = vmatprep.subr.bf16.mxu0 %v6872_v58  ;;  %v6915_v58 = vld [vmem:[#allocation9 + $0x34c] ss:$16 sps:$4 sm:$0xff]  }
 0x2aa   :  { %5044 = vmatpush1.bf16.msra.mxu1 %v6849_v41  ;;  %v6967_v41 = vld [vmem:[#allocation9 + $0x640] ss:$16 sps:$4 sm:$0xff]  }
 0x2ab   :  { %5045 = vmatprep.subr.bf16.mxu1 %v6857_v44  ;;  %v6913_v44 = vld [vmem:[#allocation9 + $0x348] ss:$16 sps:$4 sm:$0xff]  }
 0x2ac   :  { %4954 = vmatpush1.bf16.msra.mxu0 %v6870_v45  ;;  %v6975_v45 = vld [vmem:[#allocation9 + $0x664] ss:$16 sps:$4 sm:$0xff]  }
 0x2ad   :  { %4955 = vmatprep.subr.bf16.mxu0 %v6878_v30  ;;  %v6918_v30 = vld [vmem:[#allocation9 + $0x36c] ss:$16 sps:$4 sm:$0xff]  }
 0x2ae   :  { %5046 = vmatpush1.bf16.msra.mxu1 %v6855_v46  ;;  %v6973_v46 = vld [vmem:[#allocation9 + $0x660] ss:$16 sps:$4 sm:$0xff]  }
 0x2af   :  { %5056 = vmatprep.subr.bf16.mxu1 %v6863_v22  ;;  %v6916_v22 = vld [vmem:[#allocation9 + $0x368] ss:$16 sps:$4 sm:$0xff]  }
 0x2b0   :  { %4956 = vmatpush1.bf16.msra.mxu0 %v6876_v8  ;;  %v6981_v8 = vld [vmem:[#allocation9 + $0x684] ss:$16 sps:$4 sm:$0xff]  }
 0x2b1   :  { %5048 = vmatmul.mubr.bf16.vlgmr.msra.gmra.mrb[12].mxu1 %v7655_v4  ;;  %4957 = vmatprep.subr.bf16.mxu0 %v6884_v47  ;;  %v6881_v4 = vld [vmem:[#allocation9 + $0x26c] ss:$16 sps:$4 sm:$0xff]  }
 0x2b2   :  { %5057 = vmatpush1.bf16.msra.mxu1 %v6861_v48  ;;  %5088 = vmatprep.mubr.bf16.mxu1 %v7668_v24  ;;  %v6879_v24 = vld [vmem:[#allocation9 + $0x268] ss:$16 sps:$4 sm:$0xff]   ;;  %v6921_v47 = vld [vmem:[#allocation9 + $0x38c] ss:$16 sps:$4 sm:$0xff]   ;;  %v6979_v48 = vld [vmem:[#allocation9 + $0x680] ss:$16 sps:$4 sm:$0xff]  }
 0x2b3   :  { %5058 = vmatprep.subr.bf16.mxu1 %v6869_v49  ;;  %v6919_v49 = vld [vmem:[#allocation9 + $0x388] ss:$16 sps:$4 sm:$0xff]  }
 0x2b4   :  { %4958 = vmatpush1.bf16.msra.mxu0 %v6882_v50  ;;  %v6987_v50 = vld [vmem:[#allocation9 + $0x6a4] ss:$16 sps:$4 sm:$0xff]  }
 0x2b5   :  { %4959 = vmatprep.subr.bf16.mxu0 %v6890_v60  ;;  %v6924_v60 = vld [vmem:[#allocation9 + $0x3ac] ss:$16 sps:$4 sm:$0xff]  }
 0x2b6   :  { %5059 = vmatpush1.bf16.msra.mxu1 %v6867_v53  ;;  %v6922_v53 = vld [vmem:[#allocation9 + $0x3a8] ss:$16 sps:$4 sm:$0xff]  }
 0x2b7   :  { %5060 = vmatprep.subr.bf16.mxu1 %v6875_v19  ;;  %v6993_v19 = vld [vmem:[#allocation9 + $0x6c4] ss:$16 sps:$4 sm:$0xff]  }
 0x2b8   :  { %4960 = vmatpush1.bf16.msra.mxu0 %v6888_v21  ;;  %v6927_v21 = vld [vmem:[#allocation9 + $0x3cc] ss:$16 sps:$4 sm:$0xff]  }
 0x2b9   :  { %4961 = vmatprep.subr.bf16.mxu0 %v6897_v59  ;;  %v6925_v59 = vld [vmem:[#allocation9 + $0x3c8] ss:$16 sps:$4 sm:$0xff]  }
 0x2ba   :  { %5061 = vmatpush1.bf16.msra.mxu1 %v6873_v61  ;;  %v6999_v61 = vld [vmem:[#allocation9 + $0x6e4] ss:$16 sps:$4 sm:$0xff]  }
 0x2bb   :  { %5062 = vmatprep.subr.bf16.mxu1 %v6881_v4  ;;  %v6930_v4 = vld [vmem:[#allocation9 + $0x3ec] ss:$16 sps:$4 sm:$0xff]  }
 0x2bc   :  { %4962 = vmatpush1.bf16.msra.mxu0 %v6895_v62  ;;  %v6997_v62 = vld [vmem:[#allocation9 + $0x6e0] ss:$16 sps:$4 sm:$0xff]  }
 0x2bd   :  { %4963 = vmatprep.subr.bf16.mxu0 %v6903_v54  ;;  %v7005_v54 = vld [vmem:[#allocation9 + $0x704] ss:$16 sps:$4 sm:$0xff]  }
 0x2be   :  { %5063 = vmatpush1.bf16.msra.mxu1 %v6879_v24  ;;  %v6933_v24 = vld [vmem:[#allocation9 + $0x40c] ss:$16 sps:$4 sm:$0xff]  }
 0x2bf   :  { %5064 = vmatprep.subr.bf16.mxu1 %v6887_v31  ;;  %v7003_v31 = vld [vmem:[#allocation9 + $0x700] ss:$16 sps:$4 sm:$0xff]  }
 0x2c0   :  { %4964 = vmatpush1.bf16.msra.mxu0 %v6901_v3  ;;  %v6931_v3 = vld [vmem:[#allocation9 + $0x408] ss:$16 sps:$4 sm:$0xff]  }
 0x2c1   :  { %4974 = vmatprep.subr.bf16.mxu0 %v6957_v5  ;;  %v6936_v5 = vld [vmem:[#allocation9 + $0x42c] ss:$16 sps:$4 sm:$0xff]  }
 0x2c2   :  { %5065 = vmatpush1.bf16.msra.mxu1 %v6885_v6  ;;  %v7011_v6 = vld [vmem:[#allocation9 + $0x724] ss:$16 sps:$4 sm:$0xff]  }
 0x2c3   :  { %5066 = vmatprep.subr.bf16.mxu1 %v6894_v7  ;;  %v7009_v7 = vld [vmem:[#allocation9 + $0x720] ss:$16 sps:$4 sm:$0xff]  }
 0x2c6   :  { %v3005_v23 = vpop.f32.mrb[4].mxu0  ;;  %5067 = vmatpush1.bf16.msra.mxu1 %v6892_v11  ;;  %v6939_v11 = vld [vmem:[#allocation9 + $0x44c] ss:$16 sps:$4 sm:$0xff]  }
 0x2c7   :  { %v3180_v16 = vpack.c.bf16 %v3005_v23, %v3005_v23  ;;  %v3007_v17 = vpop.f32.mrb[5].mxu0  ;;  %5068 = vmatprep.subr.bf16.mxu1 %v6900_v12  ;;  %v7015_v12 = vld [vmem:[#allocation9 + $0x740] ss:$16 sps:$4 sm:$0xff]   ;;  %v7023_v23 = vld [vmem:[#allocation9 + $0x764] ss:$16 sps:$4 sm:$0xff]  }
 0x2c8   :  { %v3181_v20 = vpack.c.bf16 %v3007_v17, %v3007_v17  ;;  %v3009_v25 = vpop.f32.mrb[6].mxu0  ;;  %v7029_v17 = vld [vmem:[#allocation9 + $0x784] ss:$16 sps:$4 sm:$0xff]  }
 0x2c9   :  { %v3295_v27 = vadd.bf16 %v3269_v13, %v3180_v16  ;;  %v3010_v28 = vpop.f32.mrb[7].mxu0  ;;  %v6937_v13 = vld [vmem:[#allocation9 + $0x448] ss:$16 sps:$4 sm:$0xff]  }
 0x2ca   :  { %v3296_v29 = vadd.bf16 %v3276_v15, %v3181_v20  ;;  %5069 = vmatpush1.bf16.msra.mxu1 %v6898_v18  ;;  %v6942_v15 = vld [vmem:[#allocation9 + $0x46c] ss:$16 sps:$4 sm:$0xff]   ;;  %v6940_v16 = vld [vmem:[#allocation9 + $0x468] ss:$16 sps:$4 sm:$0xff]   ;;  %v7027_v20 = vld [vmem:[#allocation9 + $0x780] ss:$16 sps:$4 sm:$0xff]  }
 0x2cb   :  { %v3303_v55 = vmul.bf16 1045249613, %v3295_v27  ;;  %5070 = vmatprep.subr.bf16.mxu1 %v6906_v26  ;;  %v6945_v18 = vld [vmem:[#allocation9 + $0x48c] ss:$16 sps:$4 sm:$0xff]   ;;  %v6943_v25 = vld [vmem:[#allocation9 + $0x488] ss:$16 sps:$4 sm:$0xff]  }
 0x2cc   :  { %v3304_v32 = vmul.bf16 1045249613, %v3296_v29  ;;  %v7035_v26 = vld [vmem:[#allocation9 + $0x7a4] ss:$16 sps:$4 sm:$0xff]   ;;  %v7033_v28 = vld [vmem:[#allocation9 + $0x7a0] ss:$16 sps:$4 sm:$0xff]  }
 0x2cd   :  { %v7693_v38 = vmax.bf16 %v3303_v55, %v3295_v27  ;;  %v6948_v27 = vld [vmem:[#allocation9 + $0x4ac] ss:$16 sps:$4 sm:$0xff]   ;;  %v7041_v55 = vld [vmem:[#allocation9 + $0x7c4] ss:$16 sps:$4 sm:$0xff]  }
 0x2ce   :  { %v7691_v34 = vmax.bf16 %v3304_v32, %v3296_v29  ;;  %5071 = vmatpush1.bf16.msra.mxu1 %v6904_v56  ;;  %v6946_v29 = vld [vmem:[#allocation9 + $0x4a8] ss:$16 sps:$4 sm:$0xff]   ;;  %v6951_v56 = vld [vmem:[#allocation9 + $0x4cc] ss:$16 sps:$4 sm:$0xff]   ;;  %v7039_v32 = vld [vmem:[#allocation9 + $0x7c0] ss:$16 sps:$4 sm:$0xff]  }
 0x2cf   :  { %5072 = vmatprep.subr.bf16.mxu1 %v6909_v33  ;;  %v6949_v33 = vld [vmem:[#allocation9 + $0x4c8] ss:$16 sps:$4 sm:$0xff]  }
 0x2d0   :  { %4965 = vmatprep.mubr.bf16.mxu0 %v7691_v34 }
 0x2d1   :  { %4966 = vmatmul.mubr.bf16.vlgmr.msra.gmra.mrb[8].mxu0 %v7693_v38 }
 0x2d2   :  { %4975 = vmatpush1.bf16.msra.mxu0 %v6955_v35  ;;  %5073 = vmatpush1.bf16.msra.mxu1 %v6907_v36  ;;  %v6954_v35 = vld [vmem:[#allocation9 + $0x4ec] ss:$16 sps:$4 sm:$0xff]   ;;  %v7045_v36 = vld [vmem:[#allocation9 + $0x7e0] ss:$16 sps:$4 sm:$0xff]  }
 0x2d3   :  { %4976 = vmatprep.subr.bf16.mxu0 %v6963_v39  ;;  %5074 = vmatprep.subr.bf16.mxu1 %v6912_v40  ;;  %v6952_v39 = vld [vmem:[#allocation9 + $0x4e8] ss:$16 sps:$4 sm:$0xff]  }
 0x2d4   :  { %v7077_v40 = vld [vmem:[#allocation12 + $0x4] ss:$8 sps:$4 sm:$0xff]  }
 0x2d6   :  { %4977 = vmatpush1.bf16.msra.mxu0 %v6961_v37  ;;  %5075 = vmatpush1.bf16.msra.mxu1 %v6910_v43  ;;  %v6960_v37 = vld [vmem:[#allocation9 + $0x50c] ss:$16 sps:$4 sm:$0xff]   ;;  %v6958_v43 = vld [vmem:[#allocation9 + $0x508] ss:$16 sps:$4 sm:$0xff]  }
 0x2d7   :  { %4978 = vmatprep.subr.bf16.mxu0 %v6969_v42  ;;  %5076 = vmatprep.subr.bf16.mxu1 %v6915_v58  ;;  %v6966_v42 = vld [vmem:[#allocation9 + $0x52c] ss:$16 sps:$4 sm:$0xff]   ;;  %v6964_v58 = vld [vmem:[#allocation9 + $0x528] ss:$16 sps:$4 sm:$0xff]  }
 0x2da   :  { %4979 = vmatpush1.bf16.msra.mxu0 %v6967_v41  ;;  %5077 = vmatpush1.bf16.msra.mxu1 %v6913_v44  ;;  %v6972_v41 = vld [vmem:[#allocation9 + $0x54c] ss:$16 sps:$4 sm:$0xff]   ;;  %v6970_v44 = vld [vmem:[#allocation9 + $0x548] ss:$16 sps:$4 sm:$0xff]  }
 0x2db   :  { %4980 = vmatprep.subr.bf16.mxu0 %v6975_v45  ;;  %5078 = vmatprep.subr.bf16.mxu1 %v6918_v30  ;;  %v6978_v45 = vld [vmem:[#allocation9 + $0x56c] ss:$16 sps:$4 sm:$0xff]   ;;  %v6976_v30 = vld [vmem:[#allocation9 + $0x568] ss:$16 sps:$4 sm:$0xff]  }
 0x2de   :  { %4981 = vmatpush1.bf16.msra.mxu0 %v6973_v46  ;;  %5079 = vmatpush1.bf16.msra.mxu1 %v6916_v22  ;;  %v6984_v46 = vld [vmem:[#allocation9 + $0x58c] ss:$16 sps:$4 sm:$0xff]   ;;  %v6982_v22 = vld [vmem:[#allocation9 + $0x588] ss:$16 sps:$4 sm:$0xff]  }
 0x2df   :  { %4982 = vmatprep.subr.bf16.mxu0 %v6981_v8  ;;  %5080 = vmatprep.subr.bf16.mxu1 %v6921_v47  ;;  %v6990_v8 = vld [vmem:[#allocation9 + $0x5ac] ss:$16 sps:$4 sm:$0xff]   ;;  %v6988_v47 = vld [vmem:[#allocation9 + $0x5a8] ss:$16 sps:$4 sm:$0xff]  }
 0x2e2   :  { %4983 = vmatpush1.bf16.msra.mxu0 %v6979_v48  ;;  %5081 = vmatpush1.bf16.msra.mxu1 %v6919_v49  ;;  %v6996_v48 = vld [vmem:[#allocation9 + $0x5cc] ss:$16 sps:$4 sm:$0xff]   ;;  %v6994_v49 = vld [vmem:[#allocation9 + $0x5c8] ss:$16 sps:$4 sm:$0xff]  }
 0x2e3   :  { %4984 = vmatprep.subr.bf16.mxu0 %v6987_v50  ;;  %5082 = vmatprep.subr.bf16.mxu1 %v6924_v60  ;;  %v7002_v50 = vld [vmem:[#allocation9 + $0x5ec] ss:$16 sps:$4 sm:$0xff]   ;;  %v7000_v60 = vld [vmem:[#allocation9 + $0x5e8] ss:$16 sps:$4 sm:$0xff]  }
 0x2e6   :  { %4985 = vmatpush1.bf16.msra.mxu0 %v6985_v52  ;;  %5083 = vmatpush1.bf16.msra.mxu1 %v6922_v53  ;;  %v7008_v52 = vld [vmem:[#allocation9 + $0x60c] ss:$16 sps:$4 sm:$0xff]   ;;  %v7006_v53 = vld [vmem:[#allocation9 + $0x608] ss:$16 sps:$4 sm:$0xff]  }
 0x2e7   :  { %4986 = vmatprep.subr.bf16.mxu0 %v6993_v19  ;;  %5084 = vmatprep.subr.bf16.mxu1 %v6927_v21  ;;  %v7014_v19 = vld [vmem:[#allocation9 + $0x62c] ss:$16 sps:$4 sm:$0xff]   ;;  %v7012_v21 = vld [vmem:[#allocation9 + $0x628] ss:$16 sps:$4 sm:$0xff]  }
 0x2ea   :  { %4987 = vmatpush1.bf16.msra.mxu0 %v6991_v57  ;;  %5085 = vmatpush1.bf16.msra.mxu1 %v6925_v59  ;;  %v7020_v57 = vld [vmem:[#allocation9 + $0x64c] ss:$16 sps:$4 sm:$0xff]   ;;  %v7018_v59 = vld [vmem:[#allocation9 + $0x648] ss:$16 sps:$4 sm:$0xff]  }
 0x2eb   :  { %4988 = vmatprep.subr.bf16.mxu0 %v6999_v61  ;;  %5086 = vmatprep.subr.bf16.mxu1 %v6930_v4  ;;  %v7026_v61 = vld [vmem:[#allocation9 + $0x66c] ss:$16 sps:$4 sm:$0xff]   ;;  %v7024_v4 = vld [vmem:[#allocation9 + $0x668] ss:$16 sps:$4 sm:$0xff]  }
 0x2ee   :  { %4989 = vmatpush1.bf16.msra.mxu0 %v6997_v62  ;;  %5087 = vmatpush1.bf16.msra.mxu1 %v6928_v0  ;;  %v7032_v62 = vld [vmem:[#allocation9 + $0x68c] ss:$16 sps:$4 sm:$0xff]   ;;  %v3232_v0 = vcombine.high %v7680_v2, %v7680_v2 }
 0x2ef   :  { %4990 = vmatprep.subr.bf16.mxu0 %v7005_v54  ;;  %5097 = vmatprep.subr.bf16.mxu1 %v6933_v24  ;;  %v3234_v54 = vcombine.high %v7683_v63, %v7683_v63 }
 0x2f0   :  { %v3278_v24 = vpack.i.b16 %v3232_v0, %v3232_v0  ;;  %v7110_v0 = vld [vmem:[#allocation12 + $0xb4] ss:$8 sps:$4 sm:$0xff]  }
 0x2f1   :  { %5089 = vmatmul.mubr.bf16.vlgmr.msra.gmra.mrb[12].mxu1 %v7670_v1  ;;  %v7021_v1 = vld [vmem:[#allocation9 + $0x760] ss:$16 sps:$4 sm:$0xff]  }
 0x2f2   :  { %4991 = vmatpush1.bf16.msra.mxu0 %v7003_v31  ;;  %5098 = vmatpush1.bf16.msra.mxu1 %v6931_v3  ;;  %v7038_v31 = vld [vmem:[#allocation9 + $0x6ac] ss:$16 sps:$4 sm:$0xff]   ;;  %v3285_v3 = vpack.i.b16 %v3234_v54, %v3234_v54 }
 0x2f3   :  { %5129 = vmatprep.mubr.bf16.mxu1 %v7691_v34  ;;  %5099 = vmatprep.subr.bf16.mxu1 %v6936_v5  ;;  %v7047_v34 = vld [vmem:[#allocation9 + $0x7e4] ss:$16 sps:$4 sm:$0xff]   ;;  %v7036_v5 = vld [vmem:[#allocation9 + $0x6a8] ss:$16 sps:$4 sm:$0xff]  }
 0x2f4   :  { %4992 = vmatprep.subr.bf16.mxu0 %v7011_v6  ;;  %v3283_v6 = vrot.slane %v3278_v24, %v7632_v14  ;;  %v7108_v54 = vld [vmem:[#allocation12 + $0xb0] ss:$8 sps:$4 sm:$0xff]   ;;  %v7111_v24 = vld [vmem:[#allocation12 + $0xc0] ss:$8 sps:$4 sm:$0xff]  }
 0x2f6   :  { %4993 = vmatpush1.bf16.msra.mxu0 %v7009_v7  ;;  %5100 = vmatpush1.bf16.msra.mxu1 %v6934_v9  ;;  %v7044_v7 = vld [vmem:[#allocation9 + $0x6cc] ss:$16 sps:$4 sm:$0xff]  }
 0x2f7   :  { %4994 = vmatprep.subr.bf16.mxu0 %v7017_v10  ;;  %5101 = vmatprep.subr.bf16.mxu1 %v6939_v11  ;;  %v3290_v10 = vrot.slane %v3285_v3, %v7632_v14  ;;  %v7114_v3 = vld [vmem:[#allocation12 + $0xd0] ss:$8 sps:$4 sm:$0xff]  }
 0x2fa   :  { %4995 = vmatpush1.bf16.msra.mxu0 %v7015_v12  ;;  %5102 = vmatpush1.bf16.msra.mxu1 %v6937_v13  ;;  %v7042_v13 = vld [vmem:[#allocation9 + $0x6c8] ss:$16 sps:$4 sm:$0xff]  }
 0x2fb   :  { %4996 = vmatprep.subr.bf16.mxu0 %v7023_v23  ;;  %5103 = vmatprep.subr.bf16.mxu1 %v6942_v15 }
 0x2fe   :  { %4997 = vmatpush1.bf16.msra.mxu0 %v7021_v1  ;;  %5104 = vmatpush1.bf16.msra.mxu1 %v6940_v16  ;;  %v7050_v1 = vld [vmem:[#allocation9 + $0x6ec] ss:$16 sps:$4 sm:$0xff]  }
 0x2ff   :  { %4998 = vmatprep.subr.bf16.mxu0 %v7029_v17  ;;  %5105 = vmatprep.subr.bf16.mxu1 %v6945_v18 }
 0x302   :  { %4999 = vmatpush1.bf16.msra.mxu0 %v7027_v20  ;;  %5106 = vmatpush1.bf16.msra.mxu1 %v6943_v25  ;;  %v7048_v20 = vld [vmem:[#allocation9 + $0x6e8] ss:$16 sps:$4 sm:$0xff]  }
 0x303   :  { %5000 = vmatprep.subr.bf16.mxu0 %v7035_v26  ;;  %5107 = vmatprep.subr.bf16.mxu1 %v6948_v27  ;;  %v7053_v26 = vld [vmem:[#allocation9 + $0x70c] ss:$16 sps:$4 sm:$0xff]  }
 0x304   :  { %v7075_v27 = vld [vmem:[#allocation12] ss:$8 sps:$4 sm:$0xff]  }
 0x306   :  { %5001 = vmatpush1.bf16.msra.mxu0 %v7033_v28  ;;  %5108 = vmatpush1.bf16.msra.mxu1 %v6946_v29  ;;  %v7080_v29 = vld [vmem:[#allocation12 + $0x14] ss:$8 sps:$4 sm:$0xff]  }
 0x307   :  { %5002 = vmatprep.subr.bf16.mxu0 %v7041_v55  ;;  %5109 = vmatprep.subr.bf16.mxu1 %v6951_v56  ;;  %v7051_v55 = vld [vmem:[#allocation9 + $0x708] ss:$16 sps:$4 sm:$0xff]   ;;  %v7056_v56 = vld [vmem:[#allocation9 + $0x72c] ss:$16 sps:$4 sm:$0xff]  }
 0x30a   :  { %5003 = vmatpush1.bf16.msra.mxu0 %v7039_v32  ;;  %5110 = vmatpush1.bf16.msra.mxu1 %v6949_v33  ;;  %v7078_v32 = vld [vmem:[#allocation12 + $0x10] ss:$8 sps:$4 sm:$0xff]   ;;  %v7083_v33 = vld [vmem:[#allocation12 + $0x24] ss:$8 sps:$4 sm:$0xff]  }
 0x30b   :  { %5004 = vmatprep.subr.bf16.mxu0 %v7047_v34  ;;  %5111 = vmatprep.subr.bf16.mxu1 %v6954_v35  ;;  %v7054_v34 = vld [vmem:[#allocation9 + $0x728] ss:$16 sps:$4 sm:$0xff]   ;;  %v7059_v35 = vld [vmem:[#allocation9 + $0x74c] ss:$16 sps:$4 sm:$0xff]  }
 0x30e   :  { %5005 = vmatpush1.bf16.msra.mxu0 %v7045_v36  ;;  %5112 = vmatpush1.bf16.msra.mxu1 %v6952_v39  ;;  %v7081_v36 = vld [vmem:[#allocation12 + $0x20] ss:$8 sps:$4 sm:$0xff]   ;;  %v7086_v39 = vld [vmem:[#allocation12 + $0x34] ss:$8 sps:$4 sm:$0xff]  }
 0x30f   :  { %5633 = vmatprep.subr.bf16.mxu0 %v7077_v40  ;;  %5113 = vmatprep.subr.bf16.mxu1 %v6960_v37  ;;  %v7057_v40 = vld [vmem:[#allocation9 + $0x748] ss:$16 sps:$4 sm:$0xff]   ;;  %v7062_v37 = vld [vmem:[#allocation9 + $0x76c] ss:$16 sps:$4 sm:$0xff]  }
 0x312   :  { %5114 = vmatpush1.bf16.msra.mxu1 %v6958_v43  ;;  %v7084_v43 = vld [vmem:[#allocation12 + $0x30] ss:$8 sps:$4 sm:$0xff]  }
 0x313   :  { %5115 = vmatprep.subr.bf16.mxu1 %v6966_v42  ;;  %v7089_v42 = vld [vmem:[#allocation12 + $0x44] ss:$8 sps:$4 sm:$0xff]  }
 0x316   :  { %5116 = vmatpush1.bf16.msra.mxu1 %v6964_v58  ;;  %v7060_v58 = vld [vmem:[#allocation9 + $0x768] ss:$16 sps:$4 sm:$0xff]  }
 0x317   :  { %5117 = vmatprep.subr.bf16.mxu1 %v6972_v41  ;;  %v7065_v41 = vld [vmem:[#allocation9 + $0x78c] ss:$16 sps:$4 sm:$0xff]  }
 0x31a   :  { %5118 = vmatpush1.bf16.msra.mxu1 %v6970_v44  ;;  %v7087_v44 = vld [vmem:[#allocation12 + $0x40] ss:$8 sps:$4 sm:$0xff]  }
 0x31b   :  { %5119 = vmatprep.subr.bf16.mxu1 %v6978_v45  ;;  %v7092_v45 = vld [vmem:[#allocation12 + $0x54] ss:$8 sps:$4 sm:$0xff]  }
 0x31e   :  { %5120 = vmatpush1.bf16.msra.mxu1 %v6976_v30  ;;  %v7063_v30 = vld [vmem:[#allocation9 + $0x788] ss:$16 sps:$4 sm:$0xff]  }
 0x31f   :  { %5121 = vmatprep.subr.bf16.mxu1 %v6984_v46  ;;  %v7068_v46 = vld [vmem:[#allocation9 + $0x7ac] ss:$16 sps:$4 sm:$0xff]  }
 0x322   :  { %5122 = vmatpush1.bf16.msra.mxu1 %v6982_v22  ;;  %v7090_v22 = vld [vmem:[#allocation12 + $0x50] ss:$8 sps:$4 sm:$0xff]  }
 0x323   :  { %5123 = vmatprep.subr.bf16.mxu1 %v6990_v8  ;;  %v7095_v8 = vld [vmem:[#allocation12 + $0x64] ss:$8 sps:$4 sm:$0xff]  }
 0x326   :  { %5124 = vmatpush1.bf16.msra.mxu1 %v6988_v47  ;;  %v7066_v47 = vld [vmem:[#allocation9 + $0x7a8] ss:$16 sps:$4 sm:$0xff]  }
 0x327   :  { %5125 = vmatprep.subr.bf16.mxu1 %v6996_v48  ;;  %v7071_v48 = vld [vmem:[#allocation9 + $0x7cc] ss:$16 sps:$4 sm:$0xff]  }
 0x32a   :  { %5126 = vmatpush1.bf16.msra.mxu1 %v6994_v49  ;;  %v7093_v49 = vld [vmem:[#allocation12 + $0x60] ss:$8 sps:$4 sm:$0xff]  }
 0x32b   :  { %5127 = vmatprep.subr.bf16.mxu1 %v7002_v50  ;;  %v7098_v50 = vld [vmem:[#allocation12 + $0x74] ss:$8 sps:$4 sm:$0xff]  }
 0x32e   :  { %5128 = vmatpush1.bf16.msra.mxu1 %v7000_v60  ;;  %v7069_v60 = vld [vmem:[#allocation9 + $0x7c8] ss:$16 sps:$4 sm:$0xff]  }
 0x32f   :  { %5138 = vmatprep.subr.bf16.mxu1 %v7008_v52  ;;  %v7074_v52 = vld [vmem:[#allocation9 + $0x7ec] ss:$16 sps:$4 sm:$0xff]  }
 0x331   :  { %5130 = vmatmul.mubr.bf16.vlgmr.msra.gmra.mrb[12].mxu1 %v7693_v38  ;;  %v7030_v38 = vld [vmem:[#allocation9 + $0x688] ss:$16 sps:$4 sm:$0xff]  }
 0x332   :  { %5139 = vmatpush1.bf16.msra.mxu1 %v7006_v53  ;;  %v7096_v53 = vld [vmem:[#allocation12 + $0x70] ss:$8 sps:$4 sm:$0xff]  }
 0x333   :  { %5140 = vmatprep.subr.bf16.mxu1 %v7014_v19  ;;  %v7101_v19 = vld [vmem:[#allocation12 + $0x84] ss:$8 sps:$4 sm:$0xff]  }
 0x336   :  { %5141 = vmatpush1.bf16.msra.mxu1 %v7012_v21  ;;  %v7072_v21 = vld [vmem:[#allocation9 + $0x7e8] ss:$16 sps:$4 sm:$0xff]  }
 0x337   :  { %5142 = vmatprep.subr.bf16.mxu1 %v7020_v57  ;;  %v7099_v57 = vld [vmem:[#allocation12 + $0x80] ss:$8 sps:$4 sm:$0xff]  }
 0x33a   :  { %5143 = vmatpush1.bf16.msra.mxu1 %v7018_v59  ;;  %v7104_v59 = vld [vmem:[#allocation12 + $0x94] ss:$8 sps:$4 sm:$0xff]  }
 0x33b   :  { %5144 = vmatprep.subr.bf16.mxu1 %v7026_v61  ;;  %v7102_v61 = vld [vmem:[#allocation12 + $0x90] ss:$8 sps:$4 sm:$0xff]  }
 0x33e   :  { %5145 = vmatpush1.bf16.msra.mxu1 %v7024_v4  ;;  %v7107_v4 = vld [vmem:[#allocation12 + $0xa4] ss:$8 sps:$4 sm:$0xff]  }
 0x33f   :  { %5146 = vmatprep.subr.bf16.mxu1 %v7032_v62  ;;  %v7105_v62 = vld [vmem:[#allocation12 + $0xa0] ss:$8 sps:$4 sm:$0xff]  }
 0x342   :  { %5147 = vmatpush1.bf16.msra.mxu1 %v7030_v38  ;;  %v7113_v38 = vld [vmem:[#allocation12 + $0xc4] ss:$8 sps:$4 sm:$0xff]  }
 0x343   :  { %5148 = vmatprep.subr.bf16.mxu1 %v7038_v31  ;;  %v7116_v31 = vld [vmem:[#allocation12 + $0xd4] ss:$8 sps:$4 sm:$0xff]  }
 0x344   :  { %v3169_v9 = vpop.f32.mrb[8].mxu1 }
 0x345   :  { %v3182_v11 = vpack.c.bf16 %v3169_v9, %v3169_v9  ;;  %v3171_v2 = vpop.f32.mrb[9].mxu1  ;;  %v7120_v9 = vld [vmem:[#allocation12 + $0xf0] ss:$8 sps:$4 sm:$0xff]  }
 0x346   :  { %v3183_v12 = vpack.c.bf16 %v3171_v2, %v3171_v2  ;;  %5149 = vmatpush1.bf16.msra.mxu1 %v7036_v5  ;;  %v3173_v63 = vpop.f32.mrb[10].mxu1  ;;  %v7119_v5 = vld [vmem:[#allocation12 + $0xe4] ss:$8 sps:$4 sm:$0xff]  }
 0x347   :  { %v3297_v23 = vadd.bf16 %v3283_v6, %v3182_v11  ;;  %v3174_v15 = vpop.f32.mrb[11].mxu1  ;;  %5150 = vmatprep.subr.bf16.mxu1 %v7044_v7  ;;  %v7117_v6 = vld [vmem:[#allocation12 + $0xe0] ss:$8 sps:$4 sm:$0xff]   ;;  %v7122_v7 = vld [vmem:[#allocation12 + $0xf4] ss:$8 sps:$4 sm:$0xff]  }
 0x348   :  { %v3298_v16 = vadd.bf16 %v3290_v10, %v3183_v12  ;;  %v7125_v10 = vld [vmem:[#allocation12 + $0x104] ss:$8 sps:$4 sm:$0xff]   ;;  %v6523_v11 = vld.sshfl [vmem:[#allocation11] sm:$0x33 pattern:$0x75316420] }
 0x349   :  { %v3305_v17 = vmul.bf16 1045249613, %v3297_v23  ;;  %v5192_v2 = vcombine.high %v6523_v11, %v6523_v11  ;;  %v7711_v12 = vrot.slane %v6523_v11, %v7615_v51  ;;  %v7167_v11 = vld [vmem:[#allocation12 + $0x1e4] ss:$8 sps:$4 sm:$0xff]  }
 0x34a   :  { %v3306_v18 = vmul.bf16 1045249613, %v3298_v16  ;;  %5151 = vmatpush1.bf16.msra.mxu1 %v7042_v13 }
 0x34b   :  { %5152 = vmatprep.subr.bf16.mxu1 %v7050_v1  ;;  %v7706_v28 = vmax.bf16 %v3305_v17, %v3297_v23  ;;  %v5206_v63 = vrot.slane %v5192_v2, %v7615_v51  ;;  %v5210_v13 = vpack.i.b16 %v7711_v12, %v7711_v12  ;;  %v7165_v2 = vld [vmem:[#allocation12 + $0x1e0] ss:$8 sps:$4 sm:$0xff]  }
 0x34c   :  { %v3314_v25 = vmax.bf16 %v3306_v18, %v3298_v16 }
 0x34d   :  { %v5217_v23 = vpack.i.b16 %v5206_v63, %v5206_v63  ;;  %v5215_v15 = vrot.slane %v5210_v13, %v7632_v14  ;;  %v7170_v13 = vld [vmem:[#allocation12 + $0x1f4] ss:$8 sps:$4 sm:$0xff]  }
 0x34e   :  { %5153 = vmatpush1.bf16.msra.mxu1 %v7048_v20  ;;  %5006 = vmatprep.mubr.bf16.mxu0 %v3314_v25 }
 0x34f   :  { %5170 = vmatprep.mubr.bf16.mxu1 %v3314_v25  ;;  %5007 = vmatmul.mubr.bf16.vlgmr.msra.gmra.mrb[8].mxu0 %v7706_v28  ;;  %v5222_v16 = vrot.slane %v5217_v23, %v7632_v14 }
 0x350   :  { %5154 = vmatprep.subr.bf16.mxu1 %v7053_v26  ;;  %5634 = vmatpush1.bf16.msra.mxu0 %v7075_v27 }
 0x351   :  { %5635 = vmatprep.subr.bf16.mxu0 %v7080_v29 }
 0x352   :  { %5155 = vmatpush1.bf16.msra.mxu1 %v7051_v55 }
 0x353   :  { %5156 = vmatprep.subr.bf16.mxu1 %v7056_v56 }
 0x354   :  { %5636 = vmatpush1.bf16.msra.mxu0 %v7078_v32  ;;  %v7123_v32 = vld [vmem:[#allocation12 + $0x100] ss:$8 sps:$4 sm:$0xff]  }
 0x355   :  { %5637 = vmatprep.subr.bf16.mxu0 %v7083_v33 }
 0x356   :  { %5157 = vmatpush1.bf16.msra.mxu1 %v7054_v34  ;;  %v7128_v34 = vld [vmem:[#allocation12 + $0x114] ss:$8 sps:$4 sm:$0xff]  }
 0x357   :  { %5158 = vmatprep.subr.bf16.mxu1 %v7059_v35  ;;  %v7126_v35 = vld [vmem:[#allocation12 + $0x110] ss:$8 sps:$4 sm:$0xff]  }
 0x358   :  { %5638 = vmatpush1.bf16.msra.mxu0 %v7081_v36  ;;  %v7131_v36 = vld [vmem:[#allocation12 + $0x124] ss:$8 sps:$4 sm:$0xff]  }
 0x359   :  { %5639 = vmatprep.subr.bf16.mxu0 %v7086_v39  ;;  %v7129_v39 = vld [vmem:[#allocation12 + $0x120] ss:$8 sps:$4 sm:$0xff]  }
 0x35a   :  { %5159 = vmatpush1.bf16.msra.mxu1 %v7057_v40  ;;  %v7134_v40 = vld [vmem:[#allocation12 + $0x134] ss:$8 sps:$4 sm:$0xff]  }
 0x35b   :  { %5160 = vmatprep.subr.bf16.mxu1 %v7062_v37  ;;  %v7132_v37 = vld [vmem:[#allocation12 + $0x130] ss:$8 sps:$4 sm:$0xff]  }
 0x35c   :  { %5640 = vmatpush1.bf16.msra.mxu0 %v7084_v43  ;;  %v7137_v43 = vld [vmem:[#allocation12 + $0x144] ss:$8 sps:$4 sm:$0xff]  }
 0x35d   :  { %5641 = vmatprep.subr.bf16.mxu0 %v7089_v42  ;;  %v7135_v42 = vld [vmem:[#allocation12 + $0x140] ss:$8 sps:$4 sm:$0xff]  }
 0x35e   :  { %5161 = vmatpush1.bf16.msra.mxu1 %v7060_v58  ;;  %v7140_v58 = vld [vmem:[#allocation12 + $0x154] ss:$8 sps:$4 sm:$0xff]  }
 0x35f   :  { %5162 = vmatprep.subr.bf16.mxu1 %v7065_v41  ;;  %v5208_v41 = vcombine.high %v5206_v63, %v5206_v63 }
 0x360   :  { %5642 = vmatpush1.bf16.msra.mxu0 %v7087_v44  ;;  %v7138_v44 = vld [vmem:[#allocation12 + $0x150] ss:$8 sps:$4 sm:$0xff]  }
 0x361   :  { %5643 = vmatprep.subr.bf16.mxu0 %v7092_v45  ;;  %v7143_v45 = vld [vmem:[#allocation12 + $0x164] ss:$8 sps:$4 sm:$0xff]  }
 0x362   :  { %5163 = vmatpush1.bf16.msra.mxu1 %v7063_v30  ;;  %v5231_v30 = vpack.i.b16 %v5208_v41, %v5208_v41 }
 0x363   :  { %5164 = vmatprep.subr.bf16.mxu1 %v7068_v46  ;;  %v7141_v46 = vld [vmem:[#allocation12 + $0x160] ss:$8 sps:$4 sm:$0xff]  }
 0x364   :  { %5644 = vmatpush1.bf16.msra.mxu0 %v7090_v22  ;;  %v7146_v22 = vld [vmem:[#allocation12 + $0x174] ss:$8 sps:$4 sm:$0xff]  }
 0x365   :  { %5645 = vmatprep.subr.bf16.mxu0 %v7095_v8 }
 0x366   :  { %5165 = vmatpush1.bf16.msra.mxu1 %v7066_v47  ;;  %v5236_v47 = vrot.slane %v5231_v30, %v7632_v14 }
 0x367   :  { %5166 = vmatprep.subr.bf16.mxu1 %v7071_v48 }
 0x368   :  { %5646 = vmatpush1.bf16.msra.mxu0 %v7093_v49 }
 0x369   :  { %5647 = vmatprep.subr.bf16.mxu0 %v7098_v50 }
 0x36a   :  { %5167 = vmatpush1.bf16.msra.mxu1 %v7069_v60  ;;  %v7144_v60 = vld [vmem:[#allocation12 + $0x170] ss:$8 sps:$4 sm:$0xff]  }
 0x36b   :  { %5168 = vmatprep.subr.bf16.mxu1 %v7074_v52 }
 0x36c   :  { %5648 = vmatpush1.bf16.msra.mxu0 %v7096_v53  ;;  %v7149_v53 = vld [vmem:[#allocation12 + $0x184] ss:$8 sps:$4 sm:$0xff]  }
 0x36d   :  { %5649 = vmatprep.subr.bf16.mxu0 %v7101_v19 }
 0x36e   :  { %5169 = vmatpush1.bf16.msra.mxu1 %v7072_v21 }
 0x370   :  { %5650 = vmatpush1.bf16.msra.mxu0 %v7099_v57  ;;  %v7147_v57 = vld [vmem:[#allocation12 + $0x180] ss:$8 sps:$4 sm:$0xff]  }
 0x371   :  { %5171 = vmatmul.mubr.bf16.vlgmr.msra.gmra.mrb[12].mxu1 %v7706_v28  ;;  %5651 = vmatprep.subr.bf16.mxu0 %v7104_v59  ;;  %v7152_v59 = vld [vmem:[#allocation12 + $0x194] ss:$8 sps:$4 sm:$0xff]  }
 0x374   :  { %5652 = vmatpush1.bf16.msra.mxu0 %v7102_v61 }
 0x375   :  { %5653 = vmatprep.subr.bf16.mxu0 %v7107_v4  ;;  %v7150_v4 = vld [vmem:[#allocation12 + $0x190] ss:$8 sps:$4 sm:$0xff]  }
 0x378   :  { %5654 = vmatpush1.bf16.msra.mxu0 %v7105_v62  ;;  %v7155_v62 = vld [vmem:[#allocation12 + $0x1a4] ss:$8 sps:$4 sm:$0xff]  }
 0x379   :  { %5655 = vmatprep.subr.bf16.mxu0 %v7110_v0  ;;  %v7153_v0 = vld [vmem:[#allocation12 + $0x1a0] ss:$8 sps:$4 sm:$0xff]  }
 0x37c   :  { %5656 = vmatpush1.bf16.msra.mxu0 %v7108_v54  ;;  %v7158_v54 = vld [vmem:[#allocation12 + $0x1b4] ss:$8 sps:$4 sm:$0xff]  }
 0x37d   :  { %5657 = vmatprep.subr.bf16.mxu0 %v7113_v38  ;;  %v7156_v38 = vld [vmem:[#allocation12 + $0x1b0] ss:$8 sps:$4 sm:$0xff]  }
 0x380   :  { %5658 = vmatpush1.bf16.msra.mxu0 %v7111_v24  ;;  %v5207_v24 = vcombine.high %v7711_v12, %v7711_v12  ;;  %v7168_v12 = vld [vmem:[#allocation12 + $0x1f0] ss:$8 sps:$4 sm:$0xff]  }
 0x381   :  { %5659 = vmatprep.subr.bf16.mxu0 %v7116_v31  ;;  %v7161_v31 = vld [vmem:[#allocation12 + $0x1c4] ss:$8 sps:$4 sm:$0xff]  }
 0x384   :  { %5660 = vmatpush1.bf16.msra.mxu0 %v7114_v3  ;;  %v7159_v3 = vld [vmem:[#allocation12 + $0x1c0] ss:$8 sps:$4 sm:$0xff]  }
 0x385   :  { %5661 = vmatprep.subr.bf16.mxu0 %v7119_v5  ;;  %v5224_v5 = vpack.i.b16 %v5207_v24, %v5207_v24 }
 0x388   :  { %5662 = vmatpush1.bf16.msra.mxu0 %v7117_v6  ;;  %v7164_v6 = vld [vmem:[#allocation12 + $0x1d4] ss:$8 sps:$4 sm:$0xff]  }
 0x389   :  { %5663 = vmatprep.subr.bf16.mxu0 %v7122_v7  ;;  %v7162_v7 = vld [vmem:[#allocation12 + $0x1d0] ss:$8 sps:$4 sm:$0xff]  }
 0x38c   :  { %5664 = vmatpush1.bf16.msra.mxu0 %v7120_v9 }
 0x38d   :  { %5674 = vmatprep.subr.bf16.mxu0 %v7125_v10  ;;  %v5229_v10 = vrot.slane %v5224_v5, %v7632_v14 }
 0x422   :  { %v5008_v1 = vpop.f32.mrb[8].mxu0 }
 0x423   :  { %v5179_v17 = vpack.c.bf16 %v5008_v1, %v5008_v1  ;;  %v5010_v18 = vpop.f32.mrb[9].mxu0  ;;  %v6589_v1 = vld.sshfl [vmem:[#allocation15] sm:$0x11 pattern:$0x75316420] }
 0x424   :  { %v5180_v20 = vpack.c.bf16 %v5010_v18, %v5010_v18  ;;  %v5012_v25 = vpop.f32.mrb[10].mxu0  ;;  %v5762_v18 = vld [vmem:[#allocation2] sm:$0x1] }
 0x425   :  { %v5237_v26 = vadd.bf16 %v5215_v15, %v5179_v17  ;;  %v5013_v27 = vpop.f32.mrb[11].mxu0  ;;  %5765 = vperm.xlu0 %6682, %v5762_v18  }
 0x426   :  { %v5238_v28 = vadd.bf16 %v5222_v16, %v5180_v20  ;;  %v5780_v16 = vcombine.high %v6589_v1, %v6589_v1  ;;  %v6588_v20 = vld.sshfl [vmem:[#allocation14] sm:$0x11 pattern:$0x75316420] }
 0x427   :  { %v5241_v29 = vmul.bf16 1045249613, %v5237_v26  ;;  %v5726_v25 = vcombine.high %v6588_v20, %v6588_v20 }
 0x428   :  { %v5242_v55 = vmul.bf16 1045249613, %v5238_v28  ;;  %v5794_v17 = vrot.slane %v5780_v16, %v7615_v51 }
 0x429   :  { %v5245_v33 = vmax.bf16 %v5241_v29, %v5237_v26  ;;  %v5733_v26 = vrot.slane %v6588_v20, %v7615_v51  ;;  %v5740_v27 = vrot.slane %v5726_v25, %v7615_v51 }
 0x42a   :  { %v5246_v56 = vmax.bf16 %v5242_v55, %v5238_v28  ;;  %5829 = vmatprep.mubr.bf16.mxu1 %v5794_v17 }
 0x42b   :  { %v5742_v28 = vpack.i.b16 %v5733_v26, %v5733_v26  ;;  %v5749_v29 = vpack.i.b16 %v5740_v27, %v5740_v27 }
 0x42c   :  { %5665 = vmatprep.mubr.bf16.mxu0 %v5246_v56 }
 0x42d   :  { %5666 = vmatmul.mubr.bf16.vlgmr.msra.gmra.mrb[12].mxu0 %v5245_v33  ;;  %v5747_v55 = vrot.slane %v5742_v28, %v7632_v14 }
 0x42e   :  { %5675 = vmatpush1.bf16.msra.mxu0 %v7123_v32  ;;  %v5754_v32 = vrot.slane %v5749_v29, %v7632_v14 }
 0x42f   :  { %5676 = vmatprep.subr.bf16.mxu0 %v7128_v34 }
 0x432   :  { %5677 = vmatpush1.bf16.msra.mxu0 %v7126_v35 }
 0x433   :  { %5678 = vmatprep.subr.bf16.mxu0 %v7131_v36 }
 0x436   :  { %5679 = vmatpush1.bf16.msra.mxu0 %v7129_v39 }
 0x437   :  { %5680 = vmatprep.subr.bf16.mxu0 %v7134_v40 }
 0x43a   :  { %5681 = vmatpush1.bf16.msra.mxu0 %v7132_v37 }
 0x43b   :  { %5682 = vmatprep.subr.bf16.mxu0 %v7137_v43 }
 0x43e   :  { %5683 = vmatpush1.bf16.msra.mxu0 %v7135_v42 }
 0x43f   :  { %5684 = vmatprep.subr.bf16.mxu0 %v7140_v58 }
 0x442   :  { %5685 = vmatpush1.bf16.msra.mxu0 %v7138_v44  ;;  %v5787_v44 = vrot.slane %v6589_v1, %v7615_v51 }
 0x443   :  { %5686 = vmatprep.subr.bf16.mxu0 %v7143_v45 }
 0x444   :  { %v5172_v8 = vpop.f32.mrb[12].mxu1 }
 0x445   :  { %v5174_v48 = vpop.f32.mrb[13].mxu1  ;;  %v5181_v9 = vpack.c.bf16 %v5172_v8, %v5172_v8 }
 0x446   :  { %v5182_v49 = vpack.c.bf16 %v5174_v48, %v5174_v48  ;;  %v5176_v50 = vpop.f32.mrb[14].mxu1  ;;  %5687 = vmatpush1.bf16.msra.mxu0 %v7141_v46 }
 0x447   :  { %v5177_v52 = vpop.f32.mrb[15].mxu1  ;;  %5688 = vmatprep.subr.bf16.mxu0 %v7146_v22  ;;  %v5239_v63 = vadd.bf16 %v5229_v10, %v5181_v9 }
 0x448   :  { %v5240_v19 = vadd.bf16 %v5236_v47, %v5182_v49 }
 0x449   :  { %v5243_v23 = vmul.bf16 1045249613, %v5239_v63 }
 0x44a   :  { %v5244_v21 = vmul.bf16 1045249613, %v5240_v19  ;;  %5689 = vmatpush1.bf16.msra.mxu0 %v7144_v60 }
 0x44b   :  { %5690 = vmatprep.subr.bf16.mxu0 %v7149_v53  ;;  %v5247_v15 = vmax.bf16 %v5243_v23, %v5239_v63 }
 0x44c   :  { %v5248_v61 = vmax.bf16 %v5244_v21, %v5240_v19 }
 0x44e   :  { %5691 = vmatpush1.bf16.msra.mxu0 %v7147_v57  ;;  %5706 = vmatprep.mubr.bf16.mxu0 %v5248_v61 }
 0x44f   :  { %5692 = vmatprep.subr.bf16.mxu0 %v7152_v59 }
 0x452   :  { %5693 = vmatpush1.bf16.msra.mxu0 %v7150_v4 }
 0x453   :  { %5694 = vmatprep.subr.bf16.mxu0 %v7155_v62 }
 0x456   :  { %5695 = vmatpush1.bf16.msra.mxu0 %v7153_v0 }
 0x457   :  { %5696 = vmatprep.subr.bf16.mxu0 %v7158_v54 }
 0x45a   :  { %5697 = vmatpush1.bf16.msra.mxu0 %v7156_v38 }
 0x45b   :  { %5698 = vmatprep.subr.bf16.mxu0 %v7161_v31 }
 0x45e   :  { %5699 = vmatpush1.bf16.msra.mxu0 %v7159_v3 }
 0x45f   :  { %5700 = vmatprep.subr.bf16.mxu0 %v7164_v6 }
 0x462   :  { %5701 = vmatpush1.bf16.msra.mxu0 %v7162_v7 }
 0x463   :  { %5702 = vmatprep.subr.bf16.mxu0 %v7167_v11 }
 0x466   :  { %5703 = vmatpush1.bf16.msra.mxu0 %v7165_v2 }
 0x467   :  { %5704 = vmatprep.subr.bf16.mxu0 %v7170_v13 }
 0x46a   :  { %5705 = vmatpush1.bf16.msra.mxu0 %v7168_v12 }
 0x46d   :  { %5707 = vmatmul.mubr.bf16.vlgmr.msra.gmra.mrb[12].mxu0 %v5247_v15 }
 0x4a4   :  { %v5766_v45 = vpop.permute.xlu0 %5765 }
 0x4a5   :  { %v5771_v30 = vrot.slane %v5766_v45, %v7632_v14 }
 0x540   :  { %v5708_v56 = vpop.f32.mrb[12].mxu0 }
 0x541   :  { %v5715_v33 = vpack.c.bf16 %v5708_v56, %v5708_v56  ;;  %v5710_v34 = vpop.f32.mrb[13].mxu0 }
 0x542   :  { %v5716_v35 = vpack.c.bf16 %v5710_v34, %v5710_v34  ;;  %v5712_v36 = vpop.f32.mrb[14].mxu0 }
 0x543   :  { %v5755_v39 = vadd.bf16 %v5747_v55, %v5715_v33  ;;  %v5713_v40 = vpop.f32.mrb[15].mxu0 }
 0x544   :  { %v5756_v37 = vadd.bf16 %v5754_v32, %v5716_v35 }
 0x545   :  { %v5757_v43 = vmul.bf16 1045249613, %v5755_v39 }
 0x546   :  { %v5758_v42 = vmul.bf16 1045249613, %v5756_v37 }
 0x547   :  { %v5759_v41 = vmax.bf16 %v5757_v43, %v5755_v39 }
 0x548   :  { %v5760_v58 = vmax.bf16 %v5758_v42, %v5756_v37 }
 0x54a   :  { %5797 = vmatprep.subr.bf16.mxu1 %v5760_v58 }
 0x54b   :  { %5798 = vmatpush1.bf16.xpose.msra.mxu1 %v5759_v41 }
 0x552   :  { %5830 = vmatmul.mubr.bf16.vlgmr.msra.gmra.mrb[16].mxu1 %v5787_v44 }
 0x625   :  { %v5831_v46 = vpop.f32.mrb[16].mxu1 }
 0x626   :  { %v5832_v22 = vadd.f32 %v5831_v46, %v5771_v30  ;;  %v5833_v8 = vpop.f32.mrb[17].mxu1 }
 0x627   :  { %v5834_v47 = vpop.f32.mrb[18].mxu1 }
 0x628   :  { %v6590_v48 = vmul.f32 -1.442695, %v5832_v22  ;;  %v5835_v49 = vpop.f32.mrb[19].mxu1 }
 0x62a   :  { %7171 = vpow2.f32 %v6590_v48 }
 0x634   :  { %v7172_v50 = vpop.eup %7171 }
 0x635   :  { %v5840_v60 = vadd.f32 1.0, %v7172_v50 }
 0x637   :  { %7173 = vrcp.f32 %v5840_v60 }
 0x641   :  { %v7174_v52 = vpop.eup %7173 }
 0x642   :  { %5844 = vst.msk [vmem:[#allocation17] sm:$0x1] %vm5843_vm1, %v7174_v52 }
 0x643   :  { %7364 = shalt.err (!%p7361_p12)
}
 0x644   :  { %s7365_s10 = scalar_lea.hbm %s7750_s9, 16 }
 0x645   :  { %p7366_p13 = scmp.ne.s32.totalorder %s7750_s9, %s7365_s10  ;;  %p7369_p0 = scmp.lt.u32.totalorder %s7365_s10, %s7750_s9 }
 0x647   :  { %p7371_p1 = pnand %p7369_p0, %p7366_p13 }
 0x649   :  { %7374 = shalt.err (!%p7371_p1)
}
 0x64a   :  { %5854 = dma.vmem_to_hbm [thread:$0]  %s5852_s1, 16, %s7750_s9, [#allocation5]  }
 0x64b   :  { %7385 = dma.done.wait [#allocation5], 16  }
 0x64c   :  { %7386 = vsyncadd [#allocation5], 4294967280 }
 0x64d   :  { %5858 = vsyncpa [#allocation4], 1 }
 0x64e   :  { %5859 = vsyncpa [#allocation7], 1 }
 0x64f   :  { %5860 = vsyncpa [#allocation10], 1 }
 0x650   :  { %5861 = vsyncpa [#allocation13], 1 }
 0x651   :  { %5862 = vsyncpa [#allocation16], 1 }
 0x652   :  { %5863 = vsyncpa [#allocation5], 1 }

// kernel: tpu_custom_call.1
= control target key start
LH: loop header
LB: loop body
LE: loop exit
PB: predicated region body
PF: predicated region fallthrough
CT: control target
= control target key end

     0   :  { %s7741_s0 = inlined_call_operand.hbm [shape: bf16[8,784], index: 0, kind: input, shape index: {}]   ;;  %s7742_s1 = inlined_call_operand.hbm [shape: bf16[784,1024], index: 1, kind: input, shape index: {}]   ;;  %s7743_s2 = inlined_call_operand.hbm [shape: bf16[1,1024], index: 2, kind: input, shape index: {}]   ;;  %s7744_s3 = inlined_call_operand.hbm [shape: bf16[1024,512], index: 3, kind: input, shape index: {}]   ;;  %s7745_s4 = inlined_call_operand.hbm [shape: bf16[1,512], index: 4, kind: input, shape index: {}]   ;;  %s7746_s5 = inlined_call_operand.hbm [shape: bf16[512,256], index: 5, kind: input, shape index: {}]   ;;  %s7747_s6 = inlined_call_operand.hbm [shape: bf16[1,256], index: 6, kind: input, shape index: {}]   ;;  %s7748_s7 = inlined_call_operand.hbm [shape: bf16[1,256], index: 7, kind: input, shape index: {}]   ;;  %s7749_s8 = inlined_call_operand.<no memory space> [shape: f32[1,1], index: 8, kind: input, shape index: {}]   ;;  %s7750_s9 = inlined_call_operand.hbm [shape: f32[1,1,8], index: 9, kind: output, shape index: {}]  }
   0x1   :  { %v14_v0 = vstv %s7749_s8 }
   0x2   :  { %15 = vst [vmem:[#allocation2] sm:$0x1] %v14_v0 }
   0x3   :  { %16 = vsyncpa [#allocation4], 0 }
   0x4   :  { %17 = vsyncpa [#allocation7], 0 }
   0x5   :  { %18 = vsyncpa [#allocation10], 0 }
   0x6   :  { %19 = vsyncpa [#allocation13], 0 }
   0x7   :  { %20 = vsyncpa [#allocation16], 0 }
   0x8   :  { %21 = vsyncpa [#allocation5], 0  ;;  %s7387_s11 = smov [#allocation6]   ;;  %s7177_s15 = scalar_lea.hbm %s7742_s1, 50176 }
   0x9   :  { %s37_s12 = sshll.u32 %s7387_s11, 4  ;;  %p7178_p0 = scmp.ne.s32.totalorder %s7742_s1, %s7177_s15  ;;  %s38_s12 = int_to_ptr.vmem [resolvable:$true] %s37_s12 }
   0xa   :  { %p7181_p1 = scmp.lt.u32.totalorder %s7177_s15, %s7742_s1 }
   0xc   :  { %p7183_p2 = pnand %p7181_p1, %p7178_p0 }
   0xe   :  { %7186 = shalt.err (!%p7183_p2)
}
   0xf   :  { %s7187_s19 = scalar_lea.vmem %s38_s12, 50176  ;;  %p7192_p4 = scmp.lt.s32.totalorder %s38_s12, %s38_s12 }
  0x10   :  { %p7188_p3 = scmp.ne.s32.totalorder %s38_s12, %s7187_s19  ;;  %p7193_p5 = scmp.lt.s32.totalorder %s7187_s19, %s7187_s19 }
  0x12   :  { %p7194_p6 = por %p7193_p5, %p7192_p4 }
  0x14   :  { %p7195_p7 = pnand %p7194_p6, %p7188_p3 }
  0x16   :  { %7198 = shalt.err (!%p7195_p7)
}
  0x17   :  { %s7388_s20 = smov 512   ;;  %s7389_s21 = smov 32  }
  0x18   :  { %43 = dma.hbm_to_vmem [thread:$0]  %s7742_s1, 50176, %s38_s12, [#allocation7], %s7388_s20, %s7388_s20, %s7389_s21  }
  0x19   :  { %s7390_s24 = smov [#allocation9]   ;;  %s7199_s28 = scalar_lea.hbm %s7744_s3, 32768 }
  0x1a   :  { %s59_s25 = sshll.u32 %s7390_s24, 4  ;;  %p7200_p8 = scmp.ne.s32.totalorder %s7744_s3, %s7199_s28  ;;  %s60_s25 = int_to_ptr.vmem [resolvable:$true] %s59_s25 }
  0x1b   :  { %p7203_p9 = scmp.lt.u32.totalorder %s7199_s28, %s7744_s3 }
  0x1d   :  { %p7205_p10 = pnand %p7203_p9, %p7200_p8 }
  0x1f   :  { %7208 = shalt.err (!%p7205_p10)
}
  0x20   :  { %s7209_s13 = scalar_lea.vmem %s60_s25, 32768  ;;  %p7214_p12 = scmp.lt.s32.totalorder %s60_s25, %s60_s25 }
  0x21   :  { %p7210_p11 = scmp.ne.s32.totalorder %s60_s25, %s7209_s13  ;;  %p7215_p13 = scmp.lt.s32.totalorder %s7209_s13, %s7209_s13 }
  0x23   :  { %p7216_p0 = por %p7215_p13, %p7214_p12 }
  0x25   :  { %p7217_p1 = pnand %p7216_p0, %p7210_p11 }
  0x27   :  { %7220 = shalt.err (!%p7217_p1)
}
  0x28   :  { %s7391_s1 = smov 256   ;;  %s7392_s12 = smov 16  }
  0x29   :  { %65 = dma.hbm_to_vmem [thread:$0]  %s7744_s3, 32768, %s60_s25, [#allocation10], %s7391_s1, %s7391_s1, %s7392_s12  }
  0x2a   :  { %s7393_s16 = smov [#allocation12]   ;;  %s7221_s19 = scalar_lea.hbm %s7746_s5, 8192 }
  0x2b   :  { %s81_s17 = sshll.u32 %s7393_s16, 4  ;;  %p7222_p2 = scmp.ne.s32.totalorder %s7746_s5, %s7221_s19  ;;  %s82_s17 = int_to_ptr.vmem [resolvable:$true] %s81_s17 }
  0x2c   :  { %p7225_p3 = scmp.lt.u32.totalorder %s7221_s19, %s7746_s5 }
  0x2e   :  { %p7227_p4 = pnand %p7225_p3, %p7222_p2 }
  0x30   :  { %7230 = shalt.err (!%p7227_p4)
}
  0x31   :  { %s7231_s24 = scalar_lea.vmem %s82_s17, 8192  ;;  %p7236_p6 = scmp.lt.s32.totalorder %s82_s17, %s82_s17 }
  0x32   :  { %p7232_p5 = scmp.ne.s32.totalorder %s82_s17, %s7231_s24  ;;  %p7237_p7 = scmp.lt.s32.totalorder %s7231_s24, %s7231_s24 }
  0x34   :  { %p7238_p8 = por %p7237_p7, %p7236_p6 }
  0x36   :  { %p7239_p9 = pnand %p7238_p8, %p7232_p5 }
  0x38   :  { %7242 = shalt.err (!%p7239_p9)
}
  0x39   :  { %s7394_s3 = smov 128   ;;  %s7395_s25 = smov 8  }
  0x3a   :  { %87 = dma.hbm_to_vmem [thread:$0]  %s7746_s5, 8192, %s82_s17, [#allocation13], %s7394_s3, %s7394_s3, %s7395_s25  }
  0x3b   :  { %s7396_s28 = smov [#allocation3]   ;;  %s7397_s30 = smov [#allocation8]  }
  0x3c   :  { %s28_s29 = sshll.u32 %s7396_s28, 4  ;;  %s50_s10 = sshll.u32 %s7397_s30, 4  ;;  %s29_s29 = int_to_ptr.vmem [resolvable:$true] %s28_s29  ;;  %s51_s10 = int_to_ptr.vmem [resolvable:$true] %s50_s10 }
  0x3d   :  { %s7243_s1 = scalar_lea.hbm %s7741_s0, 448 }
  0x3e   :  { %p7244_p10 = scmp.ne.s32.totalorder %s7741_s0, %s7243_s1  ;;  %p7247_p11 = scmp.lt.u32.totalorder %s7243_s1, %s7741_s0 }
  0x40   :  { %p7249_p12 = pnand %p7247_p11, %p7244_p10 }
  0x42   :  { %7252 = shalt.err (!%p7249_p12)
}
  0x43   :  { %s7253_s5 = scalar_lea.vmem %s29_s29, 448  ;;  %p7258_p0 = scmp.lt.s32.totalorder %s29_s29, %s29_s29 }
  0x44   :  { %p7254_p13 = scmp.ne.s32.totalorder %s29_s29, %s7253_s5  ;;  %p7259_p1 = scmp.lt.s32.totalorder %s7253_s5, %s7253_s5 }
  0x46   :  { %p7260_p2 = por %p7259_p1, %p7258_p0 }
  0x48   :  { %p7261_p3 = pnand %p7260_p2, %p7254_p13 }
  0x4a   :  { %7264 = shalt.err (!%p7261_p3)
}
  0x4b   :  { %31 = dma.hbm_to_vmem [thread:$0]  %s7741_s0, 448, %s29_s29, [#allocation4]  }
  0x4c   :  { %s7265_s20 = scalar_lea.hbm %s7743_s2, 128 }
  0x4d   :  { %p7266_p4 = scmp.ne.s32.totalorder %s7743_s2, %s7265_s20  ;;  %p7269_p5 = scmp.lt.u32.totalorder %s7265_s20, %s7743_s2 }
  0x4f   :  { %p7271_p6 = pnand %p7269_p5, %p7266_p4 }
  0x51   :  { %7274 = shalt.err (!%p7271_p6)
}
  0x52   :  { %s7275_s3 = scalar_lea.vmem %s51_s10, 128  ;;  %p7280_p8 = scmp.lt.s32.totalorder %s51_s10, %s51_s10 }
  0x53   :  { %p7276_p7 = scmp.ne.s32.totalorder %s51_s10, %s7275_s3  ;;  %p7281_p9 = scmp.lt.s32.totalorder %s7275_s3, %s7275_s3 }
  0x55   :  { %p7282_p10 = por %p7281_p9, %p7280_p8 }
  0x57   :  { %p7283_p11 = pnand %p7282_p10, %p7276_p7 }
  0x59   :  { %7286 = shalt.err (!%p7283_p11)
}
  0x5a   :  { %53 = dma.hbm_to_vmem [thread:$0]  %s7743_s2, 128, %s51_s10, [#allocation7]  }
  0x5b   :  { %s7398_s26 = smov [#allocation11]   ;;  %s7399_s28 = smov [#allocation14]  }
  0x5c   :  { %s72_s27 = sshll.u32 %s7398_s26, 4  ;;  %s94_s29 = sshll.u32 %s7399_s28, 4  ;;  %s73_s27 = int_to_ptr.vmem [resolvable:$true] %s72_s27  ;;  %s95_s29 = int_to_ptr.vmem [resolvable:$true] %s94_s29 }
  0x5d   :  { %s7287_s13 = scalar_lea.hbm %s7745_s4, 64 }
  0x5e   :  { %p7288_p12 = scmp.ne.s32.totalorder %s7745_s4, %s7287_s13  ;;  %p7291_p13 = scmp.lt.u32.totalorder %s7287_s13, %s7745_s4 }
  0x60   :  { %p7293_p0 = pnand %p7291_p13, %p7288_p12 }
  0x62   :  { %7296 = shalt.err (!%p7293_p0)
}
  0x63   :  { %s7297_s2 = scalar_lea.vmem %s73_s27, 64  ;;  %p7302_p2 = scmp.lt.s32.totalorder %s73_s27, %s73_s27 }
  0x64   :  { %p7298_p1 = scmp.ne.s32.totalorder %s73_s27, %s7297_s2  ;;  %p7303_p3 = scmp.lt.s32.totalorder %s7297_s2, %s7297_s2 }
  0x66   :  { %p7304_p4 = por %p7303_p3, %p7302_p2 }
  0x68   :  { %p7305_p5 = pnand %p7304_p4, %p7298_p1 }
  0x6a   :  { %7308 = shalt.err (!%p7305_p5)
}
  0x6b   :  { %75 = dma.hbm_to_vmem [thread:$0]  %s7745_s4, 64, %s73_s27, [#allocation10]  }
  0x6c   :  { %s7309_s18 = scalar_lea.hbm %s7747_s6, 32 }
  0x6d   :  { %p7310_p6 = scmp.ne.s32.totalorder %s7747_s6, %s7309_s18  ;;  %p7313_p7 = scmp.lt.u32.totalorder %s7309_s18, %s7747_s6 }
  0x6f   :  { %p7315_p8 = pnand %p7313_p7, %p7310_p6 }
  0x71   :  { %7318 = shalt.err (!%p7315_p8)
}
  0x72   :  { %s7319_s22 = scalar_lea.vmem %s95_s29, 32  ;;  %p7324_p10 = scmp.lt.s32.totalorder %s95_s29, %s95_s29 }
  0x73   :  { %p7320_p9 = scmp.ne.s32.totalorder %s95_s29, %s7319_s22  ;;  %p7325_p11 = scmp.lt.s32.totalorder %s7319_s22, %s7319_s22 }
  0x75   :  { %p7326_p12 = por %p7325_p11, %p7324_p10 }
  0x77   :  { %p7327_p13 = pnand %p7326_p12, %p7320_p9 }
  0x79   :  { %7330 = shalt.err (!%p7327_p13)
}
  0x7a   :  { %97 = dma.hbm_to_vmem [thread:$0]  %s7747_s6, 32, %s95_s29, [#allocation13]  }
  0x7b   :  { %s7400_s24 = smov [#allocation15]   ;;  %s7331_s26 = scalar_lea.hbm %s7748_s7, 32 }
  0x7c   :  { %s104_s3 = sshll.u32 %s7400_s24, 4  ;;  %p7332_p0 = scmp.ne.s32.totalorder %s7748_s7, %s7331_s26  ;;  %s105_s3 = int_to_ptr.vmem [resolvable:$true] %s104_s3 }
  0x7d   :  { %p7335_p1 = scmp.lt.u32.totalorder %s7331_s26, %s7748_s7 }
  0x7f   :  { %p7337_p2 = pnand %p7335_p1, %p7332_p0 }
  0x81   :  { %7340 = shalt.err (!%p7337_p2)
}
  0x82   :  { %s7341_s13 = scalar_lea.vmem %s105_s3, 32  ;;  %p7346_p4 = scmp.lt.s32.totalorder %s105_s3, %s105_s3 }
  0x83   :  { %p7342_p3 = scmp.ne.s32.totalorder %s105_s3, %s7341_s13  ;;  %p7347_p5 = scmp.lt.s32.totalorder %s7341_s13, %s7341_s13 }
  0x85   :  { %p7348_p6 = por %p7347_p5, %p7346_p4 }
  0x87   :  { %p7349_p7 = pnand %p7348_p6, %p7342_p3 }
  0x89   :  { %7352 = shalt.err (!%p7349_p7)
}
  0x8a   :  { %107 = dma.hbm_to_vmem [thread:$0]  %s7748_s7, 32, %s105_s3, [#allocation16]  }
  0x8b   :  { %7375 = dma.done.wait [#allocation4], 448  }
  0x8c   :  { %7376 = vsyncadd [#allocation4], 4294966848 }
  0x8d   :  { %7377 = dma.done.wait [#allocation7], 50304  }
  0x8e   :  { %7378 = vsyncadd [#allocation7], 4294916992 }
  0x8f   :  { %7379 = dma.done.wait [#allocation10], 32832  }
  0x90   :  { %7380 = vsyncadd [#allocation10], 4294934464 }
  0x91   :  { %7381 = dma.done.wait [#allocation13], 8224  }
  0x92   :  { %7382 = vsyncadd [#allocation13], 4294959072 }
  0x93   :  { %7383 = dma.done.wait [#allocation16], 32  }
  0x94   :  { %7384 = vsyncadd [#allocation16], 4294967264  ;;  %v140_v1 = vld [vmem:[#allocation6] sm:$0xff]  ;;  %v7401_v43 = vmov 0   ;;  %v7556_v56 = vld [vmem:[#allocation3 + $0x8] sm:$0xff]  ;;  %vm2516_vm0 = vcmask 130048  }
  0x95   :  { %v144_v2 = vld [vmem:[#allocation6 + $0x20] sm:$0xff]  ;;  %6682 = vset.pattern.permute.xlu0 %v7401_v43  ;;  %v7564_v63 = vcombine.high %v7556_v56, %v7556_v56  ;;  %s7403_s7 = smov [#allocation17]   ;;  %vm5843_vm1 = vcmask 57344  }
  0x96   :  { %v268_v3 = vld [vmem:[#allocation6 + $0x400] sm:$0xff]  ;;  %v5872_v4 = vcombine.high %v140_v1, %v144_v2  ;;  %v5871_v6 = vcombine.low %v140_v1, %v144_v2  ;;  %s5851_s1 = sshll.u32 %s7403_s7, 4  ;;  %s5852_s1 = int_to_ptr.vmem [resolvable:$true] %s5851_s1 }
  0x97   :  { %v272_v5 = vld [vmem:[#allocation6 + $0x420] sm:$0xff]  ;;  %2593 = vmatprep.mubr.bf16.mxu0 %v7564_v63  ;;  %s7353_s12 = scalar_lea.vmem %s5852_s1, 16  ;;  %s7357_s14 = scalar_lea.vmem %s5852_s1, 32 }
  0x98   :  { %v148_v7 = vld [vmem:[#allocation6 + $0x40] sm:$0xff]  ;;  %v6000_v9 = vcombine.high %v268_v3, %v272_v5  ;;  %v5999_v10 = vcombine.low %v268_v3, %v272_v5  ;;  %2520 = vmatprep.subr.bf16.mxu1 %v5872_v4  ;;  %p7354_p8 = scmp.ne.s32.totalorder %s5852_s1, %s7353_s12  ;;  %p7358_p9 = scmp.lt.s32.totalorder %s5852_s1, %s5852_s1 }
  0x99   :  { %v152_v8 = vld [vmem:[#allocation6 + $0x60] sm:$0xff]  ;;  %2521 = vmatpush1.bf16.msra.mxu1 %v5871_v6  ;;  %p7359_p10 = scmp.lt.s32.totalorder %s7357_s14, %s7353_s12 }
  0x9a   :  { %v5880_v11 = vcombine.high %v148_v7, %v152_v8  ;;  %v276_v12 = vld [vmem:[#allocation6 + $0x440] sm:$0xff]  ;;  %2561 = vmatprep.subr.bf16.mxu0 %v6000_v9  ;;  %v5879_v19 = vcombine.low %v148_v7, %v152_v8 }
  0x9b   :  { %v280_v13 = vld [vmem:[#allocation6 + $0x460] sm:$0xff]  ;;  %2562 = vmatpush1.bf16.msra.mxu0 %v5999_v10  ;;  %p7360_p11 = por %p7359_p10, %p7358_p9 }
  0x9c   :  { %v156_v14 = vld [vmem:[#allocation6 + $0x80] sm:$0xff]  ;;  %v6008_v15 = vcombine.high %v276_v12, %v280_v13  ;;  %2522 = vmatprep.subr.bf16.mxu1 %v5880_v11  ;;  %v6007_v20 = vcombine.low %v276_v12, %v280_v13 }
  0x9d   :  { %v160_v16 = vld [vmem:[#allocation6 + $0xa0] sm:$0xff]  ;;  %2523 = vmatpush1.bf16.msra.mxu1 %v5879_v19  ;;  %p7361_p12 = pnand %p7360_p11, %p7354_p8 }
  0x9e   :  { %v284_v17 = vld [vmem:[#allocation6 + $0x480] sm:$0xff]  ;;  %v5888_v21 = vcombine.high %v156_v14, %v160_v16  ;;  %2563 = vmatprep.subr.bf16.mxu0 %v6008_v15  ;;  %v5887_v27 = vcombine.low %v156_v14, %v160_v16 }
  0x9f   :  { %v288_v18 = vld [vmem:[#allocation6 + $0x4a0] sm:$0xff]  ;;  %2564 = vmatpush1.bf16.msra.mxu0 %v6007_v20 }
  0xa0   :  { %v6016_v22 = vcombine.high %v284_v17, %v288_v18  ;;  %v164_v23 = vld [vmem:[#allocation6 + $0xc0] sm:$0xff]  ;;  %2524 = vmatprep.subr.bf16.mxu1 %v5888_v21  ;;  %v6015_v28 = vcombine.low %v284_v17, %v288_v18 }
  0xa1   :  { %v168_v24 = vld [vmem:[#allocation6 + $0xe0] sm:$0xff]  ;;  %2525 = vmatpush1.bf16.msra.mxu1 %v5887_v27 }
  0xa2   :  { %v292_v25 = vld [vmem:[#allocation6 + $0x4c0] sm:$0xff]  ;;  %v5896_v29 = vcombine.high %v164_v23, %v168_v24  ;;  %2565 = vmatprep.subr.bf16.mxu0 %v6016_v22  ;;  %v5895_v35 = vcombine.low %v164_v23, %v168_v24 }
  0xa3   :  { %v296_v26 = vld [vmem:[#allocation6 + $0x4e0] sm:$0xff]  ;;  %2566 = vmatpush1.bf16.msra.mxu0 %v6015_v28 }
  0xa4   :  { %v6024_v30 = vcombine.high %v292_v25, %v296_v26  ;;  %v172_v31 = vld [vmem:[#allocation6 + $0x100] sm:$0xff]  ;;  %2526 = vmatprep.subr.bf16.mxu1 %v5896_v29  ;;  %v6023_v36 = vcombine.low %v292_v25, %v296_v26 }
  0xa5   :  { %v176_v32 = vld [vmem:[#allocation6 + $0x120] sm:$0xff]  ;;  %2527 = vmatpush1.bf16.msra.mxu1 %v5895_v35 }
  0xa6   :  { %v300_v33 = vld [vmem:[#allocation6 + $0x500] sm:$0xff]  ;;  %v5904_v37 = vcombine.high %v172_v31, %v176_v32  ;;  %2567 = vmatprep.subr.bf16.mxu0 %v6024_v30  ;;  %v5903_v44 = vcombine.low %v172_v31, %v176_v32 }
  0xa7   :  { %v304_v34 = vld [vmem:[#allocation6 + $0x520] sm:$0xff]  ;;  %2568 = vmatpush1.bf16.msra.mxu0 %v6023_v36 }
  0xa8   :  { %v6032_v38 = vcombine.high %v300_v33, %v304_v34  ;;  %v180_v39 = vld [vmem:[#allocation6 + $0x140] sm:$0xff]  ;;  %2528 = vmatprep.subr.bf16.mxu1 %v5904_v37  ;;  %v6031_v45 = vcombine.low %v300_v33, %v304_v34 }
  0xa9   :  { %v184_v40 = vld [vmem:[#allocation6 + $0x160] sm:$0xff]  ;;  %2529 = vmatpush1.bf16.msra.mxu1 %v5903_v44 }
  0xaa   :  { %v308_v41 = vld [vmem:[#allocation6 + $0x540] sm:$0xff]  ;;  %v5912_v46 = vcombine.high %v180_v39, %v184_v40  ;;  %2569 = vmatprep.subr.bf16.mxu0 %v6032_v38  ;;  %v5911_v52 = vcombine.low %v180_v39, %v184_v40 }
  0xab   :  { %v312_v42 = vld [vmem:[#allocation6 + $0x560] sm:$0xff]  ;;  %2570 = vmatpush1.bf16.msra.mxu0 %v6031_v45 }
  0xac   :  { %v6040_v47 = vcombine.high %v308_v41, %v312_v42  ;;  %v188_v48 = vld [vmem:[#allocation6 + $0x180] sm:$0xff]  ;;  %2530 = vmatprep.subr.bf16.mxu1 %v5912_v46  ;;  %v6039_v53 = vcombine.low %v308_v41, %v312_v42 }
  0xad   :  { %v192_v49 = vld [vmem:[#allocation6 + $0x1a0] sm:$0xff]  ;;  %2531 = vmatpush1.bf16.msra.mxu1 %v5911_v52 }
  0xae   :  { %v316_v50 = vld [vmem:[#allocation6 + $0x580] sm:$0xff]  ;;  %v5920_v54 = vcombine.high %v188_v48, %v192_v49  ;;  %2571 = vmatprep.subr.bf16.mxu0 %v6040_v47  ;;  %v5919_v0 = vcombine.low %v188_v48, %v192_v49 }
  0xaf   :  { %v320_v51 = vld [vmem:[#allocation6 + $0x5a0] sm:$0xff]  ;;  %2572 = vmatpush1.bf16.msra.mxu0 %v6039_v53 }
  0xb0   :  { %v7554_v55 = vld [vmem:[#allocation3] sm:$0xff]  ;;  %v6048_v57 = vcombine.high %v316_v50, %v320_v51  ;;  %2532 = vmatprep.subr.bf16.mxu1 %v5920_v54  ;;  %v6047_v1 = vcombine.low %v316_v50, %v320_v51 }
  0xb1   :  { %v196_v58 = vld [vmem:[#allocation6 + $0x1c0] sm:$0xff]  ;;  %v7560_v60 = vcombine.high %v7554_v55, %v7554_v55  ;;  %2533 = vmatpush1.bf16.msra.mxu1 %v5919_v0 }
  0xb2   :  { %v200_v59 = vld [vmem:[#allocation6 + $0x1e0] sm:$0xff]  ;;  %2573 = vmatprep.subr.bf16.mxu0 %v6048_v57 }
  0xb3   :  { %v324_v61 = vld [vmem:[#allocation6 + $0x5c0] sm:$0xff]  ;;  %2552 = vmatprep.mubr.bf16.mxu1 %v7560_v60  ;;  %v5928_v2 = vcombine.high %v196_v58, %v200_v59  ;;  %v5927_v8 = vcombine.low %v196_v58, %v200_v59  ;;  %2574 = vmatpush1.bf16.msra.mxu0 %v6047_v1 }
  0xb4   :  { %v328_v62 = vld [vmem:[#allocation6 + $0x5e0] sm:$0xff] }
  0xb5   :  { %v6056_v3 = vcombine.high %v324_v61, %v328_v62  ;;  %v204_v4 = vld [vmem:[#allocation6 + $0x200] sm:$0xff]  ;;  %2534 = vmatprep.subr.bf16.mxu1 %v5928_v2  ;;  %v6055_v9 = vcombine.low %v324_v61, %v328_v62 }
  0xb6   :  { %v208_v5 = vld [vmem:[#allocation6 + $0x220] sm:$0xff]  ;;  %2535 = vmatpush1.bf16.msra.mxu1 %v5927_v8 }
  0xb7   :  { %v332_v6 = vld [vmem:[#allocation6 + $0x600] sm:$0xff]  ;;  %v5936_v10 = vcombine.high %v204_v4, %v208_v5  ;;  %2575 = vmatprep.subr.bf16.mxu0 %v6056_v3  ;;  %v5935_v16 = vcombine.low %v204_v4, %v208_v5 }
  0xb8   :  { %v336_v7 = vld [vmem:[#allocation6 + $0x620] sm:$0xff]  ;;  %2576 = vmatpush1.bf16.msra.mxu0 %v6055_v9  ;;  %v141_v9 = vld [vmem:[#allocation6 + $0x8] sm:$0xff] }
  0xb9   :  { %v6064_v11 = vcombine.high %v332_v6, %v336_v7  ;;  %v212_v12 = vld [vmem:[#allocation6 + $0x240] sm:$0xff]  ;;  %2536 = vmatprep.subr.bf16.mxu1 %v5936_v10  ;;  %v6063_v17 = vcombine.low %v332_v6, %v336_v7  ;;  %v145_v10 = vld [vmem:[#allocation6 + $0x28] sm:$0xff] }
  0xba   :  { %v216_v13 = vld [vmem:[#allocation6 + $0x260] sm:$0xff]  ;;  %2537 = vmatpush1.bf16.msra.mxu1 %v5935_v16 }
  0xbb   :  { %v340_v14 = vld [vmem:[#allocation6 + $0x640] sm:$0xff]  ;;  %v5944_v18 = vcombine.high %v212_v12, %v216_v13  ;;  %2577 = vmatprep.subr.bf16.mxu0 %v6064_v11  ;;  %v5943_v24 = vcombine.low %v212_v12, %v216_v13 }
  0xbc   :  { %v344_v15 = vld [vmem:[#allocation6 + $0x660] sm:$0xff]  ;;  %2578 = vmatpush1.bf16.msra.mxu0 %v6063_v17  ;;  %v149_v17 = vld [vmem:[#allocation6 + $0x48] sm:$0xff] }
  0xbd   :  { %v6072_v19 = vcombine.high %v340_v14, %v344_v15  ;;  %v220_v20 = vld [vmem:[#allocation6 + $0x280] sm:$0xff]  ;;  %2538 = vmatprep.subr.bf16.mxu1 %v5944_v18  ;;  %v6071_v25 = vcombine.low %v340_v14, %v344_v15  ;;  %v5874_v15 = vcombine.high %v141_v9, %v145_v10  ;;  %v153_v18 = vld [vmem:[#allocation6 + $0x68] sm:$0xff] }
  0xbe   :  { %v224_v21 = vld [vmem:[#allocation6 + $0x2a0] sm:$0xff]  ;;  %2539 = vmatpush1.bf16.msra.mxu1 %v5943_v24  ;;  %v7576_v24 = vcombine.low %v7556_v56, %v7556_v56  ;;  %v5881_v56 = vcombine.low %v149_v17, %v153_v18 }
  0xbf   :  { %v348_v22 = vld [vmem:[#allocation6 + $0x680] sm:$0xff]  ;;  %v5952_v26 = vcombine.high %v220_v20, %v224_v21  ;;  %2579 = vmatprep.subr.bf16.mxu0 %v6072_v19  ;;  %v5951_v32 = vcombine.low %v220_v20, %v224_v21  ;;  %v7570_v19 = vcombine.low %v7554_v55, %v7554_v55  ;;  %v157_v55 = vld [vmem:[#allocation6 + $0x88] sm:$0xff] }
  0xc0   :  { %v352_v23 = vld [vmem:[#allocation6 + $0x6a0] sm:$0xff]  ;;  %2580 = vmatpush1.bf16.msra.mxu0 %v6071_v25 }
  0xc1   :  { %v6080_v27 = vcombine.high %v348_v22, %v352_v23  ;;  %v228_v28 = vld [vmem:[#allocation6 + $0x2c0] sm:$0xff]  ;;  %2540 = vmatprep.subr.bf16.mxu1 %v5952_v26  ;;  %v6079_v33 = vcombine.low %v348_v22, %v352_v23  ;;  %v7572_v22 = vld [vmem:[#allocation3 + $0x10] sm:$0xff]  ;;  %v5873_v23 = vcombine.low %v141_v9, %v145_v10  ;;  %v5882_v26 = vcombine.high %v149_v17, %v153_v18  ;;  %v197_v10 = vld [vmem:[#allocation6 + $0x1c8] sm:$0xff] }
  0xc2   :  { %v232_v29 = vld [vmem:[#allocation6 + $0x2e0] sm:$0xff]  ;;  %2541 = vmatpush1.bf16.msra.mxu1 %v5951_v32  ;;  %v205_v18 = vld [vmem:[#allocation6 + $0x208] sm:$0xff] }
  0xc3   :  { %v356_v30 = vld [vmem:[#allocation6 + $0x6c0] sm:$0xff]  ;;  %v5960_v34 = vcombine.high %v228_v28, %v232_v29  ;;  %2581 = vmatprep.subr.bf16.mxu0 %v6080_v27  ;;  %v5959_v40 = vcombine.low %v228_v28, %v232_v29 }
  0xc4   :  { %v360_v31 = vld [vmem:[#allocation6 + $0x6e0] sm:$0xff]  ;;  %2582 = vmatpush1.bf16.msra.mxu0 %v6079_v33 }
  0xc5   :  { %v6088_v35 = vcombine.high %v356_v30, %v360_v31  ;;  %v236_v36 = vld [vmem:[#allocation6 + $0x300] sm:$0xff]  ;;  %2542 = vmatprep.subr.bf16.mxu1 %v5960_v34  ;;  %v6087_v41 = vcombine.low %v356_v30, %v360_v31  ;;  %v161_v30 = vld [vmem:[#allocation6 + $0xa8] sm:$0xff]  ;;  %v7580_v31 = vcombine.high %v7572_v22, %v7572_v22 }
  0xc6   :  { %v240_v37 = vld [vmem:[#allocation6 + $0x320] sm:$0xff]  ;;  %2543 = vmatpush1.bf16.msra.mxu1 %v5959_v40  ;;  %v5890_v33 = vcombine.high %v157_v55, %v161_v30 }
  0xc7   :  { %v364_v38 = vld [vmem:[#allocation6 + $0x700] sm:$0xff]  ;;  %v5968_v42 = vcombine.high %v236_v36, %v240_v37  ;;  %2583 = vmatprep.subr.bf16.mxu0 %v6088_v35  ;;  %v5967_v49 = vcombine.low %v236_v36, %v240_v37  ;;  %v165_v37 = vld [vmem:[#allocation6 + $0xc8] sm:$0xff] }
  0xc8   :  { %v368_v39 = vld [vmem:[#allocation6 + $0x720] sm:$0xff]  ;;  %2584 = vmatpush1.bf16.msra.mxu0 %v6087_v41 }
  0xc9   :  { %v6096_v44 = vcombine.high %v364_v38, %v368_v39  ;;  %v244_v45 = vld [vmem:[#allocation6 + $0x340] sm:$0xff]  ;;  %2544 = vmatprep.subr.bf16.mxu1 %v5968_v42  ;;  %v6095_v50 = vcombine.low %v364_v38, %v368_v39  ;;  %v169_v38 = vld [vmem:[#allocation6 + $0xe8] sm:$0xff]  ;;  %v5889_v39 = vcombine.low %v157_v55, %v161_v30 }
  0xca   :  { %v248_v46 = vld [vmem:[#allocation6 + $0x360] sm:$0xff]  ;;  %2545 = vmatpush1.bf16.msra.mxu1 %v5967_v49  ;;  %v5898_v41 = vcombine.high %v165_v37, %v169_v38  ;;  %v217_v55 = vld [vmem:[#allocation6 + $0x268] sm:$0xff] }
  0xcb   :  { %v372_v47 = vld [vmem:[#allocation6 + $0x740] sm:$0xff]  ;;  %v5976_v51 = vcombine.high %v244_v45, %v248_v46  ;;  %2585 = vmatprep.subr.bf16.mxu0 %v6096_v44  ;;  %v5975_v59 = vcombine.low %v244_v45, %v248_v46  ;;  %v173_v46 = vld [vmem:[#allocation6 + $0x108] sm:$0xff] }
  0xcc   :  { %v376_v48 = vld [vmem:[#allocation6 + $0x760] sm:$0xff]  ;;  %2586 = vmatpush1.bf16.msra.mxu0 %v6095_v50 }
  0xcd   :  { %v6104_v52 = vcombine.high %v372_v47, %v376_v48  ;;  %v252_v53 = vld [vmem:[#allocation6 + $0x380] sm:$0xff]  ;;  %2546 = vmatprep.subr.bf16.mxu1 %v5976_v51  ;;  %v6103_v61 = vcombine.low %v372_v47, %v376_v48  ;;  %v177_v47 = vld [vmem:[#allocation6 + $0x128] sm:$0xff]  ;;  %v5897_v48 = vcombine.low %v165_v37, %v169_v38 }
  0xce   :  { %v256_v54 = vld [vmem:[#allocation6 + $0x3a0] sm:$0xff]  ;;  %2547 = vmatpush1.bf16.msra.mxu1 %v5975_v59  ;;  %v5906_v50 = vcombine.high %v173_v46, %v177_v47  ;;  %v225_v37 = vld [vmem:[#allocation6 + $0x2a8] sm:$0xff] }
  0xcf   :  { %v380_v57 = vld [vmem:[#allocation6 + $0x780] sm:$0xff]  ;;  %v5984_v62 = vcombine.high %v252_v53, %v256_v54  ;;  %2587 = vmatprep.subr.bf16.mxu0 %v6104_v52  ;;  %v5983_v5 = vcombine.low %v252_v53, %v256_v54  ;;  %v181_v54 = vld [vmem:[#allocation6 + $0x148] sm:$0xff] }
  0xd0   :  { %v384_v58 = vld [vmem:[#allocation6 + $0x7a0] sm:$0xff]  ;;  %2588 = vmatpush1.bf16.msra.mxu0 %v6103_v61 }
  0xd1   :  { %v6112_v0 = vcombine.high %v380_v57, %v384_v58  ;;  %v260_v1 = vld [vmem:[#allocation6 + $0x3c0] sm:$0xff]  ;;  %2548 = vmatprep.subr.bf16.mxu1 %v5984_v62  ;;  %v6111_v6 = vcombine.low %v380_v57, %v384_v58  ;;  %v185_v57 = vld [vmem:[#allocation6 + $0x168] sm:$0xff]  ;;  %v5905_v58 = vcombine.low %v173_v46, %v177_v47 }
  0xd2   :  { %v264_v2 = vld [vmem:[#allocation6 + $0x3e0] sm:$0xff]  ;;  %2549 = vmatpush1.bf16.msra.mxu1 %v5983_v5  ;;  %v5914_v61 = vcombine.high %v181_v54, %v185_v57  ;;  %v233_v46 = vld [vmem:[#allocation6 + $0x2e8] sm:$0xff] }
  0xd3   :  { %v388_v3 = vld [vmem:[#allocation6 + $0x7c0] sm:$0xff]  ;;  %v5992_v7 = vcombine.high %v260_v1, %v264_v2  ;;  %2589 = vmatprep.subr.bf16.mxu0 %v6112_v0  ;;  %v5991_v13 = vcombine.low %v260_v1, %v264_v2  ;;  %v189_v2 = vld [vmem:[#allocation6 + $0x188] sm:$0xff] }
  0xd4   :  { %v392_v4 = vld [vmem:[#allocation6 + $0x7e0] sm:$0xff]  ;;  %2590 = vmatpush1.bf16.msra.mxu0 %v6111_v6 }
  0xd5   :  { %v6120_v8 = vcombine.high %v388_v3, %v392_v4  ;;  %v396_v11 = vld [vmem:[#allocation6 + $0x800] sm:$0xff]  ;;  %2550 = vmatprep.subr.bf16.mxu1 %v5992_v7  ;;  %v6119_v14 = vcombine.low %v388_v3, %v392_v4  ;;  %v193_v3 = vld [vmem:[#allocation6 + $0x1a8] sm:$0xff]  ;;  %v5913_v4 = vcombine.low %v181_v54, %v185_v57 }
  0xd6   :  { %v400_v12 = vld [vmem:[#allocation6 + $0x820] sm:$0xff]  ;;  %2551 = vmatpush1.bf16.msra.mxu1 %v5991_v13  ;;  %v5922_v6 = vcombine.high %v189_v2, %v193_v3  ;;  %v241_v54 = vld [vmem:[#allocation6 + $0x328] sm:$0xff] }
  0xd7   :  { %2591 = vmatprep.subr.bf16.mxu0 %v6120_v8  ;;  %v6128_v16 = vcombine.high %v396_v11, %v400_v12  ;;  %v404_v20 = vld [vmem:[#allocation6 + $0x840] sm:$0xff]  ;;  %v6127_v25 = vcombine.low %v396_v11, %v400_v12  ;;  %2684 = vmatprep.subr.bf16.mxu1 %v5874_v15  ;;  %v201_v11 = vld [vmem:[#allocation6 + $0x1e8] sm:$0xff]  ;;  %v5921_v12 = vcombine.low %v189_v2, %v193_v3 }
  0xd8   :  { %v408_v21 = vld [vmem:[#allocation6 + $0x860] sm:$0xff]  ;;  %2592 = vmatpush1.bf16.msra.mxu0 %v6119_v14  ;;  %v5930_v14 = vcombine.high %v197_v10, %v201_v11  ;;  %v249_v2 = vld [vmem:[#allocation6 + $0x368] sm:$0xff] }
  0xd9   :  { %v412_v27 = vld [vmem:[#allocation6 + $0x880] sm:$0xff]  ;;  %2602 = vmatprep.subr.bf16.mxu0 %v6128_v16  ;;  %v6136_v29 = vcombine.high %v404_v20, %v408_v21  ;;  %2553 = vmatmul.mubr.bf16.vlgmr.msra.gmra.mrb[0].mxu1 %v7570_v19  ;;  %v6135_v32 = vcombine.low %v404_v20, %v408_v21  ;;  %v209_v20 = vld [vmem:[#allocation6 + $0x228] sm:$0xff]  ;;  %v5929_v21 = vcombine.low %v197_v10, %v201_v11 }
  0xda   :  { %v416_v28 = vld [vmem:[#allocation6 + $0x8a0] sm:$0xff]  ;;  %2685 = vmatpush1.bf16.msra.mxu1 %v5873_v23  ;;  %2716 = vmatprep.mubr.bf16.mxu1 %v7560_v60  ;;  %v5937_v30 = vcombine.low %v205_v18, %v209_v20  ;;  %v257_v10 = vld [vmem:[#allocation6 + $0x3a8] sm:$0xff] }
  0xdb   :  { %2594 = vmatmul.mubr.bf16.vlgmr.msra.gmra.mrb[0].mxu0 %v7576_v24  ;;  %2686 = vmatprep.subr.bf16.mxu1 %v5882_v26  ;;  %v420_v34 = vld [vmem:[#allocation6 + $0x8c0] sm:$0xff]  ;;  %v6144_v36 = vcombine.high %v412_v27, %v416_v28  ;;  %v6143_v40 = vcombine.low %v412_v27, %v416_v28 }
  0xdc   :  { %2603 = vmatpush1.bf16.msra.mxu0 %v6127_v25  ;;  %v424_v35 = vld [vmem:[#allocation6 + $0x8e0] sm:$0xff]  ;;  %2634 = vmatprep.mubr.bf16.mxu0 %v7580_v31  ;;  %v5938_v25 = vcombine.high %v205_v18, %v209_v20  ;;  %v265_v18 = vld [vmem:[#allocation6 + $0x3e8] sm:$0xff] }
  0xdd   :  { %2604 = vmatprep.subr.bf16.mxu0 %v6136_v29  ;;  %v428_v42 = vld [vmem:[#allocation6 + $0x900] sm:$0xff]  ;;  %v6152_v45 = vcombine.high %v420_v34, %v424_v35  ;;  %v6151_v49 = vcombine.low %v420_v34, %v424_v35  ;;  %v213_v29 = vld [vmem:[#allocation6 + $0x248] sm:$0xff] }
  0xde   :  { %2687 = vmatpush1.bf16.msra.mxu1 %v5881_v56  ;;  %v432_v44 = vld [vmem:[#allocation6 + $0x920] sm:$0xff]  ;;  %v5945_v38 = vcombine.low %v213_v29, %v217_v55 }
  0xdf   :  { %2688 = vmatprep.subr.bf16.mxu1 %v5890_v33  ;;  %v436_v51 = vld [vmem:[#allocation6 + $0x940] sm:$0xff]  ;;  %v6160_v53 = vcombine.high %v428_v42, %v432_v44  ;;  %v6159_v59 = vcombine.low %v428_v42, %v432_v44 }
  0xe0   :  { %2605 = vmatpush1.bf16.msra.mxu0 %v6135_v32  ;;  %v440_v52 = vld [vmem:[#allocation6 + $0x960] sm:$0xff]  ;;  %v5946_v32 = vcombine.high %v213_v29, %v217_v55 }
  0xe1   :  { %2606 = vmatprep.subr.bf16.mxu0 %v6144_v36  ;;  %v444_v62 = vld [vmem:[#allocation6 + $0x980] sm:$0xff]  ;;  %v6168_v1 = vcombine.high %v436_v51, %v440_v52  ;;  %v6167_v5 = vcombine.low %v436_v51, %v440_v52  ;;  %v221_v36 = vld [vmem:[#allocation6 + $0x288] sm:$0xff] }
  0xe2   :  { %2689 = vmatpush1.bf16.msra.mxu1 %v5889_v39  ;;  %v448_v0 = vld [vmem:[#allocation6 + $0x9a0] sm:$0xff]  ;;  %v5953_v47 = vcombine.low %v221_v36, %v225_v37 }
  0xe3   :  { %2690 = vmatprep.subr.bf16.mxu1 %v5898_v41  ;;  %v452_v7 = vld [vmem:[#allocation6 + $0x9c0] sm:$0xff]  ;;  %v6176_v9 = vcombine.high %v444_v62, %v448_v0  ;;  %v6175_v13 = vcombine.low %v444_v62, %v448_v0 }
  0xe4   :  { %2607 = vmatpush1.bf16.msra.mxu0 %v6143_v40  ;;  %v456_v8 = vld [vmem:[#allocation6 + $0x9e0] sm:$0xff]  ;;  %v5954_v40 = vcombine.high %v221_v36, %v225_v37  ;;  %v146_v36 = vld [vmem:[#allocation6 + $0x30] sm:$0xff]  ;;  %v7588_v37 = vcombine.low %v7572_v22, %v7572_v22  ;;  %v293_v22 = vld [vmem:[#allocation6 + $0x4c8] sm:$0xff] }
  0xe5   :  { %2608 = vmatprep.subr.bf16.mxu0 %v6152_v45  ;;  %v460_v15 = vld [vmem:[#allocation6 + $0xa00] sm:$0xff]  ;;  %v6184_v17 = vcombine.high %v452_v7, %v456_v8  ;;  %v6183_v23 = vcombine.low %v452_v7, %v456_v8  ;;  %v229_v45 = vld [vmem:[#allocation6 + $0x2c8] sm:$0xff] }
  0xe6   :  { %2691 = vmatpush1.bf16.msra.mxu1 %v5897_v48  ;;  %v464_v16 = vld [vmem:[#allocation6 + $0xa20] sm:$0xff]  ;;  %v5961_v57 = vcombine.low %v229_v45, %v233_v46 }
  0xe7   :  { %2692 = vmatprep.subr.bf16.mxu1 %v5906_v50  ;;  %v468_v26 = vld [vmem:[#allocation6 + $0xa40] sm:$0xff]  ;;  %v6192_v28 = vcombine.high %v460_v15, %v464_v16  ;;  %v6191_v56 = vcombine.low %v460_v15, %v464_v16 }
  0xe8   :  { %2609 = vmatpush1.bf16.msra.mxu0 %v6151_v49  ;;  %v472_v27 = vld [vmem:[#allocation6 + $0xa60] sm:$0xff]  ;;  %v5962_v49 = vcombine.high %v229_v45, %v233_v46 }
  0xe9   :  { %2610 = vmatprep.subr.bf16.mxu0 %v6160_v53  ;;  %v476_v33 = vld [vmem:[#allocation6 + $0xa80] sm:$0xff]  ;;  %v6200_v35 = vcombine.high %v468_v26, %v472_v27  ;;  %v6199_v39 = vcombine.low %v468_v26, %v472_v27  ;;  %v237_v53 = vld [vmem:[#allocation6 + $0x308] sm:$0xff] }
  0xea   :  { %2693 = vmatpush1.bf16.msra.mxu1 %v5905_v58  ;;  %v480_v34 = vld [vmem:[#allocation6 + $0xaa0] sm:$0xff]  ;;  %v5969_v3 = vcombine.low %v237_v53, %v241_v54  ;;  %v273_v26 = vld [vmem:[#allocation6 + $0x428] sm:$0xff] }
  0xeb   :  { %2694 = vmatprep.subr.bf16.mxu1 %v5914_v61  ;;  %v484_v41 = vld [vmem:[#allocation6 + $0xac0] sm:$0xff]  ;;  %v6208_v44 = vcombine.high %v476_v33, %v480_v34  ;;  %v6207_v48 = vcombine.low %v476_v33, %v480_v34  ;;  %v281_v33 = vld [vmem:[#allocation6 + $0x468] sm:$0xff] }
  0xec   :  { %2611 = vmatpush1.bf16.msra.mxu0 %v6159_v59  ;;  %v488_v42 = vld [vmem:[#allocation6 + $0xae0] sm:$0xff]  ;;  %v5970_v59 = vcombine.high %v237_v53, %v241_v54  ;;  %v305_v53 = vld [vmem:[#allocation6 + $0x528] sm:$0xff]  ;;  %v6689_v54 = vld [vmem:[#allocation3 + $0x18] ss:$0 sps:$4 sm:$0xff]  }
  0xed   :  { %2612 = vmatprep.subr.bf16.mxu0 %v6168_v1  ;;  %v492_v50 = vld [vmem:[#allocation6 + $0xb00] sm:$0xff]  ;;  %v6216_v52 = vcombine.high %v484_v41, %v488_v42  ;;  %v6215_v58 = vcombine.low %v484_v41, %v488_v42  ;;  %v245_v1 = vld [vmem:[#allocation6 + $0x348] sm:$0xff] }
  0xee   :  { %2695 = vmatpush1.bf16.msra.mxu1 %v5913_v4  ;;  %v496_v51 = vld [vmem:[#allocation6 + $0xb20] sm:$0xff]  ;;  %v5977_v11 = vcombine.low %v245_v1, %v249_v2  ;;  %v285_v41 = vld [vmem:[#allocation6 + $0x488] sm:$0xff] }
  0xef   :  { %2696 = vmatprep.subr.bf16.mxu1 %v5922_v6  ;;  %v500_v61 = vld [vmem:[#allocation6 + $0xb40] sm:$0xff]  ;;  %v6224_v0 = vcombine.high %v492_v50, %v496_v51  ;;  %v6223_v4 = vcombine.low %v492_v50, %v496_v51  ;;  %v289_v42 = vld [vmem:[#allocation6 + $0x4a8] sm:$0xff]  ;;  %v150_v50 = vld [vmem:[#allocation6 + $0x50] sm:$0xff] }
  0xf0   :  { %2613 = vmatpush1.bf16.msra.mxu0 %v6167_v5  ;;  %v504_v62 = vld [vmem:[#allocation6 + $0xb60] sm:$0xff]  ;;  %v5978_v5 = vcombine.high %v245_v1, %v249_v2  ;;  %v6018_v46 = vcombine.high %v285_v41, %v289_v42  ;;  %v154_v51 = vld [vmem:[#allocation6 + $0x70] sm:$0xff]  ;;  %v313_v2 = vld [vmem:[#allocation6 + $0x568] sm:$0xff] }
  0xf1   :  { %2614 = vmatprep.subr.bf16.mxu0 %v6176_v9  ;;  %v508_v6 = vld [vmem:[#allocation6 + $0xb80] sm:$0xff]  ;;  %v6232_v8 = vcombine.high %v500_v61, %v504_v62  ;;  %v253_v9 = vld [vmem:[#allocation6 + $0x388] sm:$0xff]  ;;  %v5884_v1 = vcombine.high %v150_v50, %v154_v51 }
  0xf2   :  { %2697 = vmatpush1.bf16.msra.mxu1 %v5921_v12  ;;  %v512_v7 = vld [vmem:[#allocation6 + $0xba0] sm:$0xff]  ;;  %v6231_v12 = vcombine.low %v500_v61, %v504_v62  ;;  %v5985_v20 = vcombine.low %v253_v9, %v257_v10  ;;  %v158_v61 = vld [vmem:[#allocation6 + $0x90] sm:$0xff] }
  0xf3   :  { %2698 = vmatprep.subr.bf16.mxu1 %v5930_v14  ;;  %v516_v14 = vld [vmem:[#allocation6 + $0xbc0] sm:$0xff]  ;;  %v6240_v16 = vcombine.high %v508_v6, %v512_v7  ;;  %v162_v62 = vld [vmem:[#allocation6 + $0xb0] sm:$0xff] }
  0xf4   :  { %2615 = vmatpush1.bf16.msra.mxu0 %v6175_v13  ;;  %v5986_v13 = vcombine.high %v253_v9, %v257_v10  ;;  %v520_v15 = vld [vmem:[#allocation6 + $0xbe0] sm:$0xff]  ;;  %v5892_v9 = vcombine.high %v158_v61, %v162_v62  ;;  %v321_v10 = vld [vmem:[#allocation6 + $0x5a8] sm:$0xff] }
  0xf5   :  { %2616 = vmatprep.subr.bf16.mxu0 %v6184_v17  ;;  %v261_v17 = vld [vmem:[#allocation6 + $0x3c8] sm:$0xff]  ;;  %v6248_v27 = vcombine.high %v516_v14, %v520_v15  ;;  %v528_v29 = vld [vmem:[#allocation6 + $0xc20] sm:$0xff] }
  0xf6   :  { %2699 = vmatpush1.bf16.msra.mxu1 %v5929_v21  ;;  %v6239_v21 = vcombine.low %v508_v6, %v512_v7  ;;  %v5993_v55 = vcombine.low %v261_v17, %v265_v18  ;;  %v166_v6 = vld [vmem:[#allocation6 + $0xd0] sm:$0xff] }
  0xf7   :  { %2700 = vmatprep.subr.bf16.mxu1 %v5938_v25  ;;  %v269_v25 = vld [vmem:[#allocation6 + $0x408] sm:$0xff]  ;;  %v170_v7 = vld [vmem:[#allocation6 + $0xf0] sm:$0xff] }
  0xf8   :  { %2617 = vmatpush1.bf16.msra.mxu0 %v6183_v23  ;;  %v5994_v23 = vcombine.high %v261_v17, %v265_v18  ;;  %v5900_v17 = vcombine.high %v166_v6, %v170_v7  ;;  %v329_v18 = vld [vmem:[#allocation6 + $0x5e8] sm:$0xff] }
  0xf9   :  { %2618 = vmatprep.subr.bf16.mxu0 %v6192_v28  ;;  %v524_v28 = vld [vmem:[#allocation6 + $0xc00] sm:$0xff] }
  0xfa   :  { %2701 = vmatpush1.bf16.msra.mxu1 %v5937_v30  ;;  %v6247_v30 = vcombine.low %v516_v14, %v520_v15  ;;  %v6256_v34 = vcombine.high %v524_v28, %v528_v29  ;;  %v174_v14 = vld [vmem:[#allocation6 + $0x110] sm:$0xff] }
  0xfb   :  { %2702 = vmatprep.subr.bf16.mxu1 %v5946_v32  ;;  %v277_v32 = vld [vmem:[#allocation6 + $0x448] sm:$0xff]  ;;  %v178_v15 = vld [vmem:[#allocation6 + $0x130] sm:$0xff] }
  0xfc   :  { %2619 = vmatpush1.bf16.msra.mxu0 %v6191_v56  ;;  %v6002_v56 = vcombine.high %v269_v25, %v273_v26  ;;  %v6009_v45 = vcombine.low %v277_v32, %v281_v33 }
  0xfd   :  { %2620 = vmatprep.subr.bf16.mxu0 %v6200_v35  ;;  %v142_v35 = vld [vmem:[#allocation6 + $0x10] sm:$0xff] }
  0xfe   :  { %2703 = vmatpush1.bf16.msra.mxu1 %v5945_v38  ;;  %v6001_v38 = vcombine.low %v269_v25, %v273_v26  ;;  %v182_v25 = vld [vmem:[#allocation6 + $0x150] sm:$0xff] }
  0xff   :  { %2704 = vmatprep.subr.bf16.mxu1 %v5954_v40  ;;  %v6255_v40 = vcombine.low %v524_v28, %v528_v29  ;;  %v186_v26 = vld [vmem:[#allocation6 + $0x170] sm:$0xff]  ;;  %v5908_v28 = vcombine.high %v174_v14, %v178_v15  ;;  %v337_v29 = vld [vmem:[#allocation6 + $0x628] sm:$0xff] }
 0x100   :  { %2621 = vmatpush1.bf16.msra.mxu0 %v6199_v39  ;;  %v6010_v39 = vcombine.high %v277_v32, %v281_v33  ;;  %v190_v32 = vld [vmem:[#allocation6 + $0x190] sm:$0xff] }
 0x101   :  { %2622 = vmatprep.subr.bf16.mxu0 %v6208_v44  ;;  %v5876_v44 = vcombine.high %v142_v35, %v146_v36  ;;  %v194_v33 = vld [vmem:[#allocation6 + $0x1b0] sm:$0xff] }
 0x102   :  { %2705 = vmatpush1.bf16.msra.mxu1 %v5953_v47  ;;  %v297_v47 = vld [vmem:[#allocation6 + $0x4e8] sm:$0xff] }
 0x103   :  { %2706 = vmatprep.subr.bf16.mxu1 %v5962_v49  ;;  %v6026_v49 = vcombine.high %v293_v22, %v297_v47 }
 0x104   :  { %2623 = vmatpush1.bf16.msra.mxu0 %v6207_v48  ;;  %v6017_v48 = vcombine.low %v285_v41, %v289_v42  ;;  %v198_v41 = vld [vmem:[#allocation6 + $0x1d0] sm:$0xff] }
 0x105   :  { %2624 = vmatprep.subr.bf16.mxu0 %v6216_v52  ;;  %v301_v52 = vld [vmem:[#allocation6 + $0x508] sm:$0xff]  ;;  %v202_v42 = vld [vmem:[#allocation6 + $0x1f0] sm:$0xff] }
 0x106   :  { %2707 = vmatpush1.bf16.msra.mxu1 %v5961_v57  ;;  %v6025_v57 = vcombine.low %v293_v22, %v297_v47  ;;  %v5923_v47 = vcombine.low %v190_v32, %v194_v33 }
 0x107   :  { %2708 = vmatprep.subr.bf16.mxu1 %v5970_v59  ;;  %v6034_v59 = vcombine.high %v301_v52, %v305_v53 }
 0x108   :  { %2625 = vmatpush1.bf16.msra.mxu0 %v6215_v58  ;;  %v5875_v58 = vcombine.low %v142_v35, %v146_v36  ;;  %v5916_v35 = vcombine.high %v182_v25, %v186_v26  ;;  %v345_v36 = vld [vmem:[#allocation6 + $0x668] sm:$0xff] }
 0x109   :  { %2626 = vmatprep.subr.bf16.mxu0 %v6224_v0  ;;  %v309_v0 = vld [vmem:[#allocation6 + $0x548] sm:$0xff] }
 0x10a   :  { %2709 = vmatpush1.bf16.msra.mxu1 %v5969_v3  ;;  %v6033_v3 = vcombine.low %v301_v52, %v305_v53  ;;  %v5932_v52 = vcombine.high %v198_v41, %v202_v42  ;;  %v361_v53 = vld [vmem:[#allocation6 + $0x6e8] sm:$0xff] }
 0x10b   :  { %2710 = vmatprep.subr.bf16.mxu1 %v5978_v5  ;;  %v6042_v5 = vcombine.high %v309_v0, %v313_v2 }
 0x10c   :  { %2627 = vmatpush1.bf16.msra.mxu0 %v6223_v4  ;;  %v5883_v4 = vcombine.low %v150_v50, %v154_v51  ;;  %v210_v50 = vld [vmem:[#allocation6 + $0x230] sm:$0xff]  ;;  %v357_v51 = vld [vmem:[#allocation6 + $0x6c8] sm:$0xff] }
 0x10d   :  { %2628 = vmatprep.subr.bf16.mxu0 %v6232_v8  ;;  %v317_v8 = vld [vmem:[#allocation6 + $0x588] sm:$0xff] }
 0x10e   :  { %2711 = vmatpush1.bf16.msra.mxu1 %v5977_v11  ;;  %v6041_v11 = vcombine.low %v309_v0, %v313_v2  ;;  %v6089_v2 = vcombine.low %v357_v51, %v361_v53 }
 0x10f   :  { %2712 = vmatprep.subr.bf16.mxu1 %v5986_v13  ;;  %v6050_v13 = vcombine.high %v317_v8, %v321_v10 }
 0x110   :  { %2629 = vmatpush1.bf16.msra.mxu0 %v6231_v12  ;;  %v5891_v12 = vcombine.low %v158_v61, %v162_v62  ;;  %v218_v61 = vld [vmem:[#allocation6 + $0x270] sm:$0xff]  ;;  %v365_v62 = vld [vmem:[#allocation6 + $0x708] sm:$0xff] }
 0x111   :  { %2630 = vmatprep.subr.bf16.mxu0 %v6240_v16  ;;  %v325_v16 = vld [vmem:[#allocation6 + $0x5c8] sm:$0xff] }
 0x112   :  { %2713 = vmatpush1.bf16.msra.mxu1 %v5985_v20  ;;  %v6049_v20 = vcombine.low %v317_v8, %v321_v10 }
 0x113   :  { %2714 = vmatprep.subr.bf16.mxu1 %v5994_v23  ;;  %v6058_v23 = vcombine.high %v325_v16, %v329_v18 }
 0x114   :  { %2631 = vmatpush1.bf16.msra.mxu0 %v6239_v21  ;;  %v5899_v21 = vcombine.low %v166_v6, %v170_v7  ;;  %v226_v6 = vld [vmem:[#allocation6 + $0x2b0] sm:$0xff]  ;;  %v373_v7 = vld [vmem:[#allocation6 + $0x748] sm:$0xff] }
 0x115   :  { %2632 = vmatprep.subr.bf16.mxu0 %v6248_v27  ;;  %v333_v27 = vld [vmem:[#allocation6 + $0x608] sm:$0xff] }
 0x116   :  { %2715 = vmatpush1.bf16.msra.mxu1 %v5993_v55  ;;  %v6057_v55 = vcombine.low %v325_v16, %v329_v18 }
 0x117   :  { %2725 = vmatprep.subr.bf16.mxu1 %v6002_v56  ;;  %v6066_v56 = vcombine.high %v333_v27, %v337_v29 }
 0x118   :  { %2633 = vmatpush1.bf16.msra.mxu0 %v6247_v30  ;;  %v5907_v30 = vcombine.low %v174_v14, %v178_v15  ;;  %v234_v14 = vld [vmem:[#allocation6 + $0x2f0] sm:$0xff]  ;;  %v381_v15 = vld [vmem:[#allocation6 + $0x788] sm:$0xff] }
 0x119   :  { %2643 = vmatprep.subr.bf16.mxu0 %v6256_v34  ;;  %2717 = vmatmul.mubr.bf16.vlgmr.msra.gmra.mrb[4].mxu1 %v7570_v19  ;;  %v341_v34 = vld [vmem:[#allocation6 + $0x648] sm:$0xff] }
 0x11a   :  { %2726 = vmatpush1.bf16.msra.mxu1 %v6001_v38  ;;  %2757 = vmatprep.mubr.bf16.mxu1 %v7564_v63  ;;  %v6065_v38 = vcombine.low %v333_v27, %v337_v29  ;;  %v6073_v22 = vcombine.low %v341_v34, %v345_v36 }
 0x11b   :  { %2635 = vmatmul.mubr.bf16.vlgmr.msra.gmra.mrb[0].mxu0 %v7588_v37  ;;  %2727 = vmatprep.subr.bf16.mxu1 %v6010_v39  ;;  %v5915_v39 = vcombine.low %v182_v25, %v186_v26  ;;  %v242_v25 = vld [vmem:[#allocation6 + $0x330] sm:$0xff]  ;;  %v389_v26 = vld [vmem:[#allocation6 + $0x7c8] sm:$0xff] }
 0x11c   :  { %2644 = vmatpush1.bf16.msra.mxu0 %v6255_v40  ;;  %2675 = vmatprep.mubr.bf16.mxu0 %v7401_v43  ;;  %v6074_v40 = vcombine.high %v341_v34, %v345_v36 }
 0x11d   :  { %2848 = vmatprep.subr.bf16.mxu0 %v5876_v44  ;;  %v349_v44 = vld [vmem:[#allocation6 + $0x688] sm:$0xff] }
 0x11e   :  { %2728 = vmatpush1.bf16.msra.mxu1 %v6009_v45  ;;  %v5924_v45 = vcombine.high %v190_v32, %v194_v33  ;;  %v250_v32 = vld [vmem:[#allocation6 + $0x370] sm:$0xff]  ;;  %v397_v33 = vld [vmem:[#allocation6 + $0x808] sm:$0xff] }
 0x11f   :  { %2729 = vmatprep.subr.bf16.mxu1 %v6018_v46  ;;  %v353_v46 = vld [vmem:[#allocation6 + $0x6a8] sm:$0xff] }
 0x122   :  { %2730 = vmatpush1.bf16.msra.mxu1 %v6017_v48  ;;  %v6082_v48 = vcombine.high %v349_v44, %v353_v46 }
 0x123   :  { %2731 = vmatprep.subr.bf16.mxu1 %v6026_v49  ;;  %v206_v49 = vld [vmem:[#allocation6 + $0x210] sm:$0xff] }
 0x124   :  { %v5940_v0 = vcombine.high %v206_v49, %v210_v50 }
 0x126   :  { %2732 = vmatpush1.bf16.msra.mxu1 %v6025_v57  ;;  %v5931_v57 = vcombine.low %v198_v41, %v202_v42  ;;  %v258_v41 = vld [vmem:[#allocation6 + $0x3b0] sm:$0xff]  ;;  %v405_v42 = vld [vmem:[#allocation6 + $0x848] sm:$0xff] }
 0x127   :  { %6263 = vmatmul.mubr.msk.bf16.vlgmr.msra.gmra.mrb[0].mxu0 %vm2516_vm0, %v6689_v54  ;;  %2733 = vmatprep.subr.bf16.mxu1 %v6034_v59  ;;  %v6081_v54 = vcombine.low %v349_v44, %v353_v46  ;;  %v214_v59 = vld [vmem:[#allocation6 + $0x250] sm:$0xff] }
 0x128   :  { %2849 = vmatpush1.bf16.msra.mxu0 %v5875_v58  ;;  %2880 = vmatprep.mubr.bf16.mxu0 %v7560_v60  ;;  %v6090_v58 = vcombine.high %v357_v51, %v361_v53  ;;  %v5948_v8 = vcombine.high %v214_v59, %v218_v61 }
 0x129   :  { %2850 = vmatprep.subr.bf16.mxu0 %v5884_v1  ;;  %v369_v1 = vld [vmem:[#allocation6 + $0x728] sm:$0xff] }
 0x12a   :  { %2734 = vmatpush1.bf16.msra.mxu1 %v6033_v3  ;;  %v5939_v3 = vcombine.low %v206_v49, %v210_v50  ;;  %v6097_v10 = vcombine.low %v365_v62, %v369_v1  ;;  %v266_v49 = vld [vmem:[#allocation6 + $0x3f0] sm:$0xff]  ;;  %v413_v50 = vld [vmem:[#allocation6 + $0x888] sm:$0xff] }
 0x12b   :  { %2735 = vmatprep.subr.bf16.mxu1 %v6042_v5  ;;  %v222_v5 = vld [vmem:[#allocation6 + $0x290] sm:$0xff] }
 0x12c   :  { %2851 = vmatpush1.bf16.msra.mxu0 %v5883_v4  ;;  %v6098_v4 = vcombine.high %v365_v62, %v369_v1  ;;  %v5956_v16 = vcombine.high %v222_v5, %v226_v6 }
 0x12d   :  { %2852 = vmatprep.subr.bf16.mxu0 %v5892_v9  ;;  %v377_v9 = vld [vmem:[#allocation6 + $0x768] sm:$0xff] }
 0x12e   :  { %2736 = vmatpush1.bf16.msra.mxu1 %v6041_v11  ;;  %v5947_v11 = vcombine.low %v214_v59, %v218_v61  ;;  %v6105_v18 = vcombine.low %v373_v7, %v377_v9  ;;  %v274_v59 = vld [vmem:[#allocation6 + $0x430] sm:$0xff]  ;;  %v421_v61 = vld [vmem:[#allocation6 + $0x8c8] sm:$0xff] }
 0x12f   :  { %2737 = vmatprep.subr.bf16.mxu1 %v6050_v13  ;;  %v230_v13 = vld [vmem:[#allocation6 + $0x2d0] sm:$0xff] }
 0x130   :  { %2853 = vmatpush1.bf16.msra.mxu0 %v5891_v12  ;;  %v6106_v12 = vcombine.high %v373_v7, %v377_v9  ;;  %v5964_v27 = vcombine.high %v230_v13, %v234_v14 }
 0x131   :  { %2854 = vmatprep.subr.bf16.mxu0 %v5900_v17  ;;  %v385_v17 = vld [vmem:[#allocation6 + $0x7a8] sm:$0xff] }
 0x132   :  { %2738 = vmatpush1.bf16.msra.mxu1 %v6049_v20  ;;  %v5955_v20 = vcombine.low %v222_v5, %v226_v6  ;;  %v6113_v29 = vcombine.low %v381_v15, %v385_v17  ;;  %v282_v5 = vld [vmem:[#allocation6 + $0x470] sm:$0xff]  ;;  %v429_v6 = vld [vmem:[#allocation6 + $0x908] sm:$0xff] }
 0x133   :  { %2739 = vmatprep.subr.bf16.mxu1 %v6058_v23  ;;  %v238_v23 = vld [vmem:[#allocation6 + $0x310] sm:$0xff] }
 0x134   :  { %2855 = vmatpush1.bf16.msra.mxu0 %v5899_v21  ;;  %v6114_v21 = vcombine.high %v381_v15, %v385_v17  ;;  %v5972_v34 = vcombine.high %v238_v23, %v242_v25  ;;  %v441_v15 = vld [vmem:[#allocation6 + $0x968] sm:$0xff] }
 0x135   :  { %2856 = vmatprep.subr.bf16.mxu0 %v5908_v28  ;;  %v393_v28 = vld [vmem:[#allocation6 + $0x7e8] sm:$0xff] }
 0x136   :  { %2740 = vmatpush1.bf16.msra.mxu1 %v6057_v55  ;;  %v5963_v55 = vcombine.low %v230_v13, %v234_v14  ;;  %v6121_v36 = vcombine.low %v389_v26, %v393_v28  ;;  %v290_v13 = vld [vmem:[#allocation6 + $0x4b0] sm:$0xff]  ;;  %v437_v14 = vld [vmem:[#allocation6 + $0x948] sm:$0xff] }
 0x137   :  { %2741 = vmatprep.subr.bf16.mxu1 %v6066_v56  ;;  %v246_v56 = vld [vmem:[#allocation6 + $0x350] sm:$0xff] }
 0x138   :  { %2857 = vmatpush1.bf16.msra.mxu0 %v5907_v30  ;;  %v6122_v30 = vcombine.high %v389_v26, %v393_v28  ;;  %v5980_v44 = vcombine.high %v246_v56, %v250_v32  ;;  %v298_v26 = vld [vmem:[#allocation6 + $0x4f0] sm:$0xff]  ;;  %v6169_v28 = vcombine.low %v437_v14, %v441_v15 }
 0x139   :  { %2858 = vmatprep.subr.bf16.mxu0 %v5916_v35  ;;  %v401_v35 = vld [vmem:[#allocation6 + $0x828] sm:$0xff] }
 0x13a   :  { %2742 = vmatpush1.bf16.msra.mxu1 %v6065_v38  ;;  %v5971_v38 = vcombine.low %v238_v23, %v242_v25  ;;  %v6129_v46 = vcombine.low %v397_v33, %v401_v35  ;;  %v6170_v23 = vcombine.high %v437_v14, %v441_v15  ;;  %v294_v25 = vld [vmem:[#allocation6 + $0x4d0] sm:$0xff] }
 0x13b   :  { %2743 = vmatprep.subr.bf16.mxu1 %v6074_v40  ;;  %v254_v40 = vld [vmem:[#allocation6 + $0x390] sm:$0xff] }
 0x13c   :  { %2859 = vmatpush1.bf16.msra.mxu0 %v5915_v39  ;;  %v6130_v39 = vcombine.high %v397_v33, %v401_v35  ;;  %v5988_v51 = vcombine.high %v254_v40, %v258_v41  ;;  %v457_v33 = vld [vmem:[#allocation6 + $0x9e8] sm:$0xff]  ;;  %v342_v14 = vld [vmem:[#allocation6 + $0x650] sm:$0xff] }
 0x13d   :  { %2860 = vmatprep.subr.bf16.mxu0 %v5924_v45  ;;  %v409_v45 = vld [vmem:[#allocation6 + $0x868] sm:$0xff]  ;;  %v346_v15 = vld [vmem:[#allocation6 + $0x670] sm:$0xff] }
 0x13e   :  { %2744 = vmatpush1.bf16.msra.mxu1 %v6073_v22  ;;  %v5979_v22 = vcombine.low %v246_v56, %v250_v32  ;;  %v6137_v53 = vcombine.low %v405_v42, %v409_v45  ;;  %v302_v56 = vld [vmem:[#allocation6 + $0x510] sm:$0xff] }
 0x13f   :  { %2745 = vmatprep.subr.bf16.mxu1 %v6082_v48  ;;  %v262_v48 = vld [vmem:[#allocation6 + $0x3d0] sm:$0xff] }
 0x140   :  { %2861 = vmatpush1.bf16.msra.mxu0 %v5923_v47  ;;  %v6138_v47 = vcombine.high %v405_v42, %v409_v45  ;;  %v5996_v62 = vcombine.high %v262_v48, %v266_v49  ;;  %v306_v32 = vld [vmem:[#allocation6 + $0x530] sm:$0xff]  ;;  %v465_v42 = vld [vmem:[#allocation6 + $0xa28] sm:$0xff] }
 0x141   :  { %2862 = vmatprep.subr.bf16.mxu0 %v5932_v52  ;;  %v417_v52 = vld [vmem:[#allocation6 + $0x8a8] sm:$0xff] }
 0x142   :  { %2746 = vmatpush1.bf16.msra.mxu1 %v6081_v54  ;;  %v5987_v54 = vcombine.low %v254_v40, %v258_v41  ;;  %v6145_v1 = vcombine.low %v413_v50, %v417_v52  ;;  %v314_v40 = vld [vmem:[#allocation6 + $0x570] sm:$0xff]  ;;  %v461_v41 = vld [vmem:[#allocation6 + $0xa08] sm:$0xff] }
 0x143   :  { %2747 = vmatprep.subr.bf16.mxu1 %v6090_v58  ;;  %v270_v58 = vld [vmem:[#allocation6 + $0x410] sm:$0xff] }
 0x144   :  { %2863 = vmatpush1.bf16.msra.mxu0 %v5931_v57  ;;  %v6146_v57 = vcombine.high %v413_v50, %v417_v52  ;;  %v6004_v7 = vcombine.high %v270_v58, %v274_v59  ;;  %v318_v50 = vld [vmem:[#allocation6 + $0x590] sm:$0xff]  ;;  %v6193_v52 = vcombine.low %v461_v41, %v465_v42 }
 0x145   :  { %2864 = vmatprep.subr.bf16.mxu0 %v5940_v0  ;;  %v425_v0 = vld [vmem:[#allocation6 + $0x8e8] sm:$0xff] }
 0x146   :  { %2748 = vmatpush1.bf16.msra.mxu1 %v6089_v2  ;;  %v5995_v2 = vcombine.low %v262_v48, %v266_v49  ;;  %v6153_v9 = vcombine.low %v421_v61, %v425_v0  ;;  %v469_v48 = vld [vmem:[#allocation6 + $0xa48] sm:$0xff] }
 0x147   :  { %2749 = vmatprep.subr.bf16.mxu1 %v6098_v4  ;;  %v278_v4 = vld [vmem:[#allocation6 + $0x450] sm:$0xff]  ;;  %v473_v49 = vld [vmem:[#allocation6 + $0xa68] sm:$0xff] }
 0x148   :  { %2865 = vmatpush1.bf16.msra.mxu0 %v5939_v3  ;;  %v6154_v3 = vcombine.high %v421_v61, %v425_v0  ;;  %v326_v61 = vld [vmem:[#allocation6 + $0x5d0] sm:$0xff]  ;;  %v6201_v0 = vcombine.low %v469_v48, %v473_v49 }
 0x149   :  { %2866 = vmatprep.subr.bf16.mxu0 %v5948_v8  ;;  %v433_v8 = vld [vmem:[#allocation6 + $0x928] sm:$0xff] }
 0x14a   :  { %2750 = vmatpush1.bf16.msra.mxu1 %v6097_v10  ;;  %v6003_v10 = vcombine.low %v270_v58, %v274_v59  ;;  %v6161_v17 = vcombine.low %v429_v6, %v433_v8  ;;  %v477_v58 = vld [vmem:[#allocation6 + $0xa88] sm:$0xff] }
 0x14b   :  { %2751 = vmatprep.subr.bf16.mxu1 %v6106_v12  ;;  %v286_v12 = vld [vmem:[#allocation6 + $0x490] sm:$0xff]  ;;  %v481_v59 = vld [vmem:[#allocation6 + $0xaa8] sm:$0xff] }
 0x14c   :  { %2867 = vmatpush1.bf16.msra.mxu0 %v5947_v11  ;;  %v6162_v11 = vcombine.high %v429_v6, %v433_v8  ;;  %v334_v6 = vld [vmem:[#allocation6 + $0x610] sm:$0xff]  ;;  %v6209_v8 = vcombine.low %v477_v58, %v481_v59 }
 0x14d   :  { %2868 = vmatprep.subr.bf16.mxu0 %v5956_v16  ;;  %v6012_v16 = vcombine.high %v278_v4, %v282_v5 }
 0x14e   :  { %2752 = vmatpush1.bf16.msra.mxu1 %v6105_v18  ;;  %v445_v18 = vld [vmem:[#allocation6 + $0x988] sm:$0xff] }
 0x14f   :  { %2753 = vmatprep.subr.bf16.mxu1 %v6114_v21  ;;  %v6011_v21 = vcombine.low %v278_v4, %v282_v5  ;;  %v485_v4 = vld [vmem:[#allocation6 + $0xac8] sm:$0xff] }
 0x150   :  { %2869 = vmatpush1.bf16.msra.mxu0 %v5955_v20  ;;  %v449_v20 = vld [vmem:[#allocation6 + $0x9a8] sm:$0xff] }
 0x151   :  { %2870 = vmatprep.subr.bf16.mxu0 %v5964_v27  ;;  %v6020_v27 = vcombine.high %v286_v12, %v290_v13  ;;  %v6177_v35 = vcombine.low %v445_v18, %v449_v20  ;;  %v489_v5 = vld [vmem:[#allocation6 + $0xae8] sm:$0xff] }
 0x152   :  { %2754 = vmatpush1.bf16.msra.mxu1 %v6113_v29  ;;  %v453_v29 = vld [vmem:[#allocation6 + $0x9c8] sm:$0xff] }
 0x153   :  { %2755 = vmatprep.subr.bf16.mxu1 %v6122_v30  ;;  %v6178_v30 = vcombine.high %v445_v18, %v449_v20  ;;  %v6185_v45 = vcombine.low %v453_v29, %v457_v33  ;;  %v6076_v20 = vcombine.high %v342_v14, %v346_v15 }
 0x154   :  { %2871 = vmatpush1.bf16.msra.mxu0 %v5963_v55  ;;  %v6019_v55 = vcombine.low %v286_v12, %v290_v13  ;;  %v493_v12 = vld [vmem:[#allocation6 + $0xb08] sm:$0xff] }
 0x155   :  { %2872 = vmatprep.subr.bf16.mxu0 %v5972_v34  ;;  %v6028_v34 = vcombine.high %v294_v25, %v298_v26  ;;  %v497_v13 = vld [vmem:[#allocation6 + $0xb28] sm:$0xff] }
 0x156   :  { %2756 = vmatpush1.bf16.msra.mxu1 %v6121_v36  ;;  %v6027_v36 = vcombine.low %v294_v25, %v298_v26  ;;  %v6226_v18 = vcombine.high %v493_v12, %v497_v13  ;;  %v350_v25 = vld [vmem:[#allocation6 + $0x690] sm:$0xff] }
 0x157   :  { %2766 = vmatprep.subr.bf16.mxu1 %v6130_v39  ;;  %v310_v39 = vld [vmem:[#allocation6 + $0x550] sm:$0xff] }
 0x158   :  { %2873 = vmatpush1.bf16.msra.mxu0 %v5971_v38  ;;  %v6186_v38 = vcombine.high %v453_v29, %v457_v33  ;;  %v354_v26 = vld [vmem:[#allocation6 + $0x6b0] sm:$0xff] }
 0x159   :  { %2874 = vmatprep.subr.bf16.mxu0 %v5980_v44  ;;  %2758 = vmatmul.mubr.bf16.vlgmr.msra.gmra.mrb[4].mxu1 %v7576_v24  ;;  %v6036_v44 = vcombine.high %v302_v56, %v306_v32  ;;  %v362_v33 = vld [vmem:[#allocation6 + $0x6f0] sm:$0xff] }
 0x15a   :  { %2767 = vmatpush1.bf16.msra.mxu1 %v6129_v46  ;;  %2798 = vmatprep.mubr.bf16.mxu1 %v7580_v31  ;;  %v6035_v46 = vcombine.low %v302_v56, %v306_v32  ;;  %v513_v56 = vld [vmem:[#allocation6 + $0xba8] sm:$0xff]  ;;  %v358_v32 = vld [vmem:[#allocation6 + $0x6d0] sm:$0xff] }
 0x15b   :  { %2768 = vmatprep.subr.bf16.mxu1 %v6138_v47  ;;  %v6044_v47 = vcombine.high %v310_v39, %v314_v40 }
 0x15c   :  { %2875 = vmatpush1.bf16.msra.mxu0 %v5979_v22  ;;  %v6194_v22 = vcombine.high %v461_v41, %v465_v42  ;;  %v366_v41 = vld [vmem:[#allocation6 + $0x710] sm:$0xff] }
 0x15d   :  { %2876 = vmatprep.subr.bf16.mxu0 %v5988_v51  ;;  %v322_v51 = vld [vmem:[#allocation6 + $0x5b0] sm:$0xff] }
 0x15e   :  { %2769 = vmatpush1.bf16.msra.mxu1 %v6137_v53  ;;  %v6043_v53 = vcombine.low %v310_v39, %v314_v40  ;;  %v517_v39 = vld [vmem:[#allocation6 + $0xbc8] sm:$0xff]  ;;  %v370_v42 = vld [vmem:[#allocation6 + $0x730] sm:$0xff] }
 0x15f   :  { %2770 = vmatprep.subr.bf16.mxu1 %v6146_v57  ;;  %v6052_v57 = vcombine.high %v318_v50, %v322_v51  ;;  %v521_v40 = vld [vmem:[#allocation6 + $0xbe8] sm:$0xff] }
 0x160   :  { %2877 = vmatpush1.bf16.msra.mxu0 %v5987_v54  ;;  %v6202_v54 = vcombine.high %v469_v48, %v473_v49  ;;  %v529_v48 = vld [vmem:[#allocation6 + $0xc28] sm:$0xff]  ;;  %v374_v49 = vld [vmem:[#allocation6 + $0x750] sm:$0xff] }
 0x161   :  { %2878 = vmatprep.subr.bf16.mxu0 %v5996_v62  ;;  %v330_v62 = vld [vmem:[#allocation6 + $0x5f0] sm:$0xff] }
 0x162   :  { %2771 = vmatpush1.bf16.msra.mxu1 %v6145_v1  ;;  %v6051_v1 = vcombine.low %v318_v50, %v322_v51  ;;  %v378_v50 = vld [vmem:[#allocation6 + $0x770] sm:$0xff]  ;;  %v6249_v51 = vcombine.low %v517_v39, %v521_v40 }
 0x163   :  { %2772 = vmatprep.subr.bf16.mxu1 %v6154_v3  ;;  %v6060_v3 = vcombine.high %v326_v61, %v330_v62 }
 0x164   :  { %2879 = vmatpush1.bf16.msra.mxu0 %v5995_v2  ;;  %v6210_v2 = vcombine.high %v477_v58, %v481_v59  ;;  %v147_v58 = vld [vmem:[#allocation6 + $0x38] sm:$0xff]  ;;  %v382_v59 = vld [vmem:[#allocation6 + $0x790] sm:$0xff] }
 0x165   :  { %2889 = vmatprep.subr.bf16.mxu0 %v6004_v7  ;;  %v338_v7 = vld [vmem:[#allocation6 + $0x630] sm:$0xff] }
 0x166   :  { %2773 = vmatpush1.bf16.msra.mxu1 %v6153_v9  ;;  %v6059_v9 = vcombine.low %v326_v61, %v330_v62  ;;  %v386_v61 = vld [vmem:[#allocation6 + $0x7b0] sm:$0xff] }
 0x167   :  { %2881 = vmatmul.mubr.bf16.vlgmr.msra.gmra.mrb[4].mxu0 %v7570_v19  ;;  %2774 = vmatprep.subr.bf16.mxu1 %v6162_v11  ;;  %v6068_v11 = vcombine.high %v334_v6, %v338_v7 }
 0x168   :  { %2890 = vmatpush1.bf16.msra.mxu0 %v6003_v10  ;;  %2921 = vmatprep.mubr.bf16.mxu0 %v7564_v63  ;;  %v6218_v10 = vcombine.high %v485_v4, %v489_v5 }
 0x169   :  { %2891 = vmatprep.subr.bf16.mxu0 %v6012_v16  ;;  %v6217_v16 = vcombine.low %v485_v4, %v489_v5  ;;  %v394_v4 = vld [vmem:[#allocation6 + $0x7f0] sm:$0xff]  ;;  %v6115_v5 = vcombine.low %v382_v59, %v386_v61 }
 0x16a   :  { %2775 = vmatpush1.bf16.msra.mxu1 %v6161_v17  ;;  %v6067_v17 = vcombine.low %v334_v6, %v338_v7  ;;  %v398_v7 = vld [vmem:[#allocation6 + $0x810] sm:$0xff] }
 0x16b   :  { %2776 = vmatprep.subr.bf16.mxu1 %v6170_v23  ;;  %v505_v23 = vld [vmem:[#allocation6 + $0xb68] sm:$0xff] }
 0x16c   :  { %2892 = vmatpush1.bf16.msra.mxu0 %v6011_v21  ;;  %v501_v21 = vld [vmem:[#allocation6 + $0xb48] sm:$0xff] }
 0x16d   :  { %2893 = vmatprep.subr.bf16.mxu0 %v6020_v27  ;;  %v6225_v27 = vcombine.low %v493_v12, %v497_v13  ;;  %v6234_v29 = vcombine.high %v501_v21, %v505_v23  ;;  %v155_v12 = vld [vmem:[#allocation6 + $0x78] sm:$0xff]  ;;  %v406_v13 = vld [vmem:[#allocation6 + $0x850] sm:$0xff] }
 0x16e   :  { %2777 = vmatpush1.bf16.msra.mxu1 %v6169_v28  ;;  %v6075_v28 = vcombine.low %v342_v14, %v346_v15  ;;  %v410_v14 = vld [vmem:[#allocation6 + $0x870] sm:$0xff] }
 0x16f   :  { %2778 = vmatprep.subr.bf16.mxu1 %v6178_v30  ;;  %v509_v30 = vld [vmem:[#allocation6 + $0xb88] sm:$0xff] }
 0x170   :  { %2894 = vmatpush1.bf16.msra.mxu0 %v6019_v55  ;;  %v6084_v55 = vcombine.high %v350_v25, %v354_v26 }
 0x171   :  { %2895 = vmatprep.subr.bf16.mxu0 %v6028_v34  ;;  %v6233_v34 = vcombine.low %v501_v21, %v505_v23  ;;  %v163_v21 = vld [vmem:[#allocation6 + $0xb8] sm:$0xff] }
 0x172   :  { %2779 = vmatpush1.bf16.msra.mxu1 %v6177_v35  ;;  %v6083_v35 = vcombine.low %v350_v25, %v354_v26  ;;  %v7602_v23 = vld [vmem:[#allocation3 + $0x18] ss:$0 sps:$4 sm:$0xff]   ;;  %v414_v25 = vld [vmem:[#allocation6 + $0x890] sm:$0xff] }
 0x173   :  { %2780 = vmatprep.subr.bf16.mxu1 %v6186_v38  ;;  %v6092_v38 = vcombine.high %v358_v32, %v362_v33  ;;  %v418_v26 = vld [vmem:[#allocation6 + $0x8b0] sm:$0xff] }
 0x174   :  { %2896 = vmatpush1.bf16.msra.mxu0 %v6027_v36  ;;  %v6242_v36 = vcombine.high %v509_v30, %v513_v56 }
 0x175   :  { %2897 = vmatprep.subr.bf16.mxu0 %v6036_v44  ;;  %v6241_v44 = vcombine.low %v509_v30, %v513_v56  ;;  %v167_v30 = vld [vmem:[#allocation6 + $0xd8] sm:$0xff] }
 0x176   :  { %2781 = vmatpush1.bf16.msra.mxu1 %v6185_v45  ;;  %v6091_v45 = vcombine.low %v358_v32, %v362_v33  ;;  %v171_v56 = vld [vmem:[#allocation6 + $0xf8] sm:$0xff]  ;;  %v422_v32 = vld [vmem:[#allocation6 + $0x8d0] sm:$0xff] }
 0x177   :  { %2782 = vmatprep.subr.bf16.mxu1 %v6194_v22  ;;  %v6100_v22 = vcombine.high %v366_v41, %v370_v42  ;;  %v426_v33 = vld [vmem:[#allocation6 + $0x8f0] sm:$0xff] }
 0x178   :  { %2898 = vmatpush1.bf16.msra.mxu0 %v6035_v46  ;;  %v6250_v46 = vcombine.high %v517_v39, %v521_v40  ;;  %v6156_v39 = vcombine.high %v422_v32, %v426_v33  ;;  %v175_v40 = vld [vmem:[#allocation6 + $0x118] sm:$0xff] }
 0x179   :  { %2899 = vmatprep.subr.bf16.mxu0 %v6044_v47  ;;  %v525_v47 = vld [vmem:[#allocation6 + $0xc08] sm:$0xff] }
 0x17a   :  { %2783 = vmatpush1.bf16.msra.mxu1 %v6193_v52  ;;  %v6099_v52 = vcombine.low %v366_v41, %v370_v42  ;;  %v6257_v62 = vcombine.low %v525_v47, %v529_v48  ;;  %v179_v41 = vld [vmem:[#allocation6 + $0x138] sm:$0xff] }
 0x17b   :  { %2784 = vmatprep.subr.bf16.mxu1 %v6202_v54  ;;  %v6108_v54 = vcombine.high %v374_v49, %v378_v50 }
 0x17c   :  { %2900 = vmatpush1.bf16.msra.mxu0 %v6043_v53  ;;  %v6258_v53 = vcombine.high %v525_v47, %v529_v48  ;;  %v6155_v47 = vcombine.low %v422_v32, %v426_v33  ;;  %v5910_v48 = vcombine.high %v175_v40, %v179_v41  ;;  %v223_v33 = vld [vmem:[#allocation6 + $0x298] sm:$0xff] }
 0x17d   :  { %2901 = vmatprep.subr.bf16.mxu0 %v6052_v57  ;;  %v143_v57 = vld [vmem:[#allocation6 + $0x18] sm:$0xff] }
 0x17e   :  { %2785 = vmatpush1.bf16.msra.mxu1 %v6201_v0  ;;  %v6107_v0 = vcombine.low %v374_v49, %v378_v50  ;;  %v5877_v15 = vcombine.low %v143_v57, %v147_v58  ;;  %v183_v50 = vld [vmem:[#allocation6 + $0x158] sm:$0xff] }
 0x17f   :  { %2786 = vmatprep.subr.bf16.mxu1 %v6210_v2  ;;  %v6116_v2 = vcombine.high %v382_v59, %v386_v61  ;;  %v191_v61 = vld [vmem:[#allocation6 + $0x198] sm:$0xff] }
 0x180   :  { %2902 = vmatpush1.bf16.msra.mxu0 %v6051_v1  ;;  %v5878_v1 = vcombine.high %v143_v57, %v147_v58 }
 0x181   :  { %2903 = vmatprep.subr.bf16.mxu0 %v6060_v3  ;;  %v390_v3 = vld [vmem:[#allocation6 + $0x7d0] sm:$0xff] }
 0x182   :  { %2787 = vmatpush1.bf16.msra.mxu1 %v6209_v8  ;;  %v6124_v6 = vcombine.high %v390_v3, %v394_v4  ;;  %v402_v8 = vld [vmem:[#allocation6 + $0x830] sm:$0xff] }
 0x183   :  { %2788 = vmatprep.subr.bf16.mxu1 %v6218_v10  ;;  %v6132_v10 = vcombine.high %v398_v7, %v402_v8 }
 0x184   :  { %2904 = vmatpush1.bf16.msra.mxu0 %v6059_v9  ;;  %v6123_v9 = vcombine.low %v390_v3, %v394_v4 }
 0x185   :  { %2905 = vmatprep.subr.bf16.mxu0 %v6068_v11  ;;  %v151_v11 = vld [vmem:[#allocation6 + $0x58] sm:$0xff] }
 0x186   :  { %2789 = vmatpush1.bf16.msra.mxu1 %v6217_v16  ;;  %v6131_v16 = vcombine.low %v398_v7, %v402_v8  ;;  %v203_v7 = vld [vmem:[#allocation6 + $0x1f8] sm:$0xff]  ;;  %v454_v8 = vld [vmem:[#allocation6 + $0x9d0] sm:$0xff] }
 0x187   :  { %2790 = vmatprep.subr.bf16.mxu1 %v6226_v18  ;;  %v6140_v18 = vcombine.high %v406_v13, %v410_v14 }
 0x188   :  { %2906 = vmatpush1.bf16.msra.mxu0 %v6067_v17  ;;  %v5886_v17 = vcombine.high %v151_v11, %v155_v12 }
 0x189   :  { %2907 = vmatprep.subr.bf16.mxu0 %v6076_v20  ;;  %v159_v20 = vld [vmem:[#allocation6 + $0x98] sm:$0xff] }
 0x18a   :  { %2791 = vmatpush1.bf16.msra.mxu1 %v6225_v27  ;;  %v5885_v27 = vcombine.low %v151_v11, %v155_v12 }
 0x18b   :  { %2792 = vmatprep.subr.bf16.mxu1 %v6234_v29  ;;  %v5894_v29 = vcombine.high %v159_v20, %v163_v21 }
 0x18c   :  { %2908 = vmatpush1.bf16.msra.mxu0 %v6075_v28  ;;  %v6139_v28 = vcombine.low %v406_v13, %v410_v14  ;;  %v207_v14 = vld [vmem:[#allocation6 + $0x218] sm:$0xff] }
 0x18d   :  { %2909 = vmatprep.subr.bf16.mxu0 %v6084_v55  ;;  %v6148_v55 = vcombine.high %v414_v25, %v418_v26 }
 0x18e   :  { %2793 = vmatpush1.bf16.msra.mxu1 %v6233_v34  ;;  %v5893_v34 = vcombine.low %v159_v20, %v163_v21 }
 0x18f   :  { %2794 = vmatprep.subr.bf16.mxu1 %v6242_v36  ;;  %v5902_v36 = vcombine.high %v167_v30, %v171_v56 }
 0x190   :  { %2910 = vmatpush1.bf16.msra.mxu0 %v6083_v35  ;;  %v6147_v35 = vcombine.low %v414_v25, %v418_v26  ;;  %v215_v26 = vld [vmem:[#allocation6 + $0x258] sm:$0xff] }
 0x191   :  { %2911 = vmatprep.subr.bf16.mxu0 %v6092_v38 }
 0x192   :  { %2795 = vmatpush1.bf16.msra.mxu1 %v6241_v44  ;;  %v430_v44 = vld [vmem:[#allocation6 + $0x910] sm:$0xff] }
 0x193   :  { %2796 = vmatprep.subr.bf16.mxu1 %v6250_v46 }
 0x194   :  { %2912 = vmatpush1.bf16.msra.mxu0 %v6091_v45  ;;  %v434_v45 = vld [vmem:[#allocation6 + $0x930] sm:$0xff] }
 0x195   :  { %2913 = vmatprep.subr.bf16.mxu0 %v6100_v22  ;;  %v5901_v22 = vcombine.low %v167_v30, %v171_v56  ;;  %v6164_v49 = vcombine.high %v430_v44, %v434_v45  ;;  %v6163_v57 = vcombine.low %v430_v44, %v434_v45  ;;  %v231_v45 = vld [vmem:[#allocation6 + $0x2d8] sm:$0xff] }
 0x196   :  { %2797 = vmatpush1.bf16.msra.mxu1 %v6249_v51  ;;  %v187_v51 = vld [vmem:[#allocation6 + $0x178] sm:$0xff] }
 0x197   :  { %2807 = vmatprep.subr.bf16.mxu1 %v6258_v53  ;;  %v442_v53 = vld [vmem:[#allocation6 + $0x970] sm:$0xff]  ;;  %v5918_v58 = vcombine.high %v183_v50, %v187_v51 }
 0x198   :  { %2914 = vmatpush1.bf16.msra.mxu0 %v6099_v52  ;;  %v438_v52 = vld [vmem:[#allocation6 + $0x950] sm:$0xff] }
 0x199   :  { %2915 = vmatprep.subr.bf16.mxu0 %v6108_v54  ;;  %2799 = vmatmul.mubr.bf16.vlgmr.msra.gmra.mrb[4].mxu1 %v7588_v37  ;;  %v5909_v54 = vcombine.low %v175_v40, %v179_v41  ;;  %v6172_v59 = vcombine.high %v438_v52, %v442_v53  ;;  %v6171_v3 = vcombine.low %v438_v52, %v442_v53  ;;  %v243_v52 = vld [vmem:[#allocation6 + $0x338] sm:$0xff]  ;;  %v494_v53 = vld [vmem:[#allocation6 + $0xb10] sm:$0xff] }
 0x19a   :  { %2808 = vmatpush1.bf16.msra.mxu1 %v6257_v62  ;;  %2839 = vmatprep.mubr.bf16.mxu1 %v7401_v43  ;;  %v195_v62 = vld [vmem:[#allocation6 + $0x1b8] sm:$0xff] }
 0x19b   :  { %3012 = vmatprep.subr.bf16.mxu1 %v5878_v1  ;;  %v450_v1 = vld [vmem:[#allocation6 + $0x9b0] sm:$0xff]  ;;  %v5926_v4 = vcombine.high %v191_v61, %v195_v62 }
 0x19c   :  { %2916 = vmatpush1.bf16.msra.mxu0 %v6107_v0  ;;  %v446_v0 = vld [vmem:[#allocation6 + $0x990] sm:$0xff] }
 0x19d   :  { %2917 = vmatprep.subr.bf16.mxu0 %v6116_v2  ;;  %v5917_v2 = vcombine.low %v183_v50, %v187_v51  ;;  %v6179_v11 = vcombine.low %v446_v0, %v450_v1  ;;  %v239_v51 = vld [vmem:[#allocation6 + $0x318] sm:$0xff] }
 0x1a0   :  { %2918 = vmatpush1.bf16.msra.mxu0 %v6115_v5  ;;  %v6180_v5 = vcombine.high %v446_v0, %v450_v1  ;;  %v251_v0 = vld [vmem:[#allocation6 + $0x378] sm:$0xff]  ;;  %v502_v1 = vld [vmem:[#allocation6 + $0xb50] sm:$0xff] }
 0x1a1   :  { %2919 = vmatprep.subr.bf16.mxu0 %v6124_v6  ;;  %v199_v6 = vld [vmem:[#allocation6 + $0x1d8] sm:$0xff] }
 0x1a2   :  { %v5934_v12 = vcombine.high %v199_v6, %v203_v7 }
 0x1a4   :  { %2920 = vmatpush1.bf16.msra.mxu0 %v6123_v9  ;;  %v458_v9 = vld [vmem:[#allocation6 + $0x9f0] sm:$0xff] }
 0x1a5   :  { %2930 = vmatprep.subr.bf16.mxu0 %v6132_v10  ;;  %6264 = vmatmul.mubr.msk.bf16.vlgmr.msra.gmra.mrb[4].mxu1 %vm2516_vm0, %v7602_v23  ;;  %v5925_v10 = vcombine.low %v191_v61, %v195_v62  ;;  %v6188_v13 = vcombine.high %v454_v8, %v458_v9  ;;  %v6187_v20 = vcombine.low %v454_v8, %v458_v9  ;;  %v247_v62 = vld [vmem:[#allocation6 + $0x358] sm:$0xff]  ;;  %v510_v9 = vld [vmem:[#allocation6 + $0xb90] sm:$0xff] }
 0x1a6   :  { %3013 = vmatpush1.bf16.msra.mxu1 %v5877_v15  ;;  %3044 = vmatprep.mubr.bf16.mxu1 %v7560_v60  ;;  %v211_v15 = vld [vmem:[#allocation6 + $0x238] sm:$0xff] }
 0x1a7   :  { %2922 = vmatmul.mubr.bf16.vlgmr.msra.gmra.mrb[4].mxu0 %v7576_v24  ;;  %3014 = vmatprep.subr.bf16.mxu1 %v5886_v17  ;;  %v466_v17 = vld [vmem:[#allocation6 + $0xa30] sm:$0xff]  ;;  %v5942_v21 = vcombine.high %v207_v14, %v211_v15  ;;  %v259_v8 = vld [vmem:[#allocation6 + $0x3b8] sm:$0xff] }
 0x1a8   :  { %2931 = vmatpush1.bf16.msra.mxu0 %v6131_v16  ;;  %2962 = vmatprep.mubr.bf16.mxu0 %v7580_v31  ;;  %v462_v16 = vld [vmem:[#allocation6 + $0xa10] sm:$0xff] }
 0x1a9   :  { %2932 = vmatprep.subr.bf16.mxu0 %v6140_v18  ;;  %v5933_v18 = vcombine.low %v199_v6, %v203_v7  ;;  %v6196_v25 = vcombine.high %v462_v16, %v466_v17  ;;  %v6195_v30 = vcombine.low %v462_v16, %v466_v17  ;;  %v255_v7 = vld [vmem:[#allocation6 + $0x398] sm:$0xff]  ;;  %v518_v17 = vld [vmem:[#allocation6 + $0xbd0] sm:$0xff] }
 0x1aa   :  { %3015 = vmatpush1.bf16.msra.mxu1 %v5885_v27  ;;  %v219_v27 = vld [vmem:[#allocation6 + $0x278] sm:$0xff] }
 0x1ab   :  { %3016 = vmatprep.subr.bf16.mxu1 %v5894_v29  ;;  %v474_v29 = vld [vmem:[#allocation6 + $0xa70] sm:$0xff]  ;;  %v5950_v56 = vcombine.high %v215_v26, %v219_v27  ;;  %v267_v16 = vld [vmem:[#allocation6 + $0x3f8] sm:$0xff] }
 0x1ac   :  { %2933 = vmatpush1.bf16.msra.mxu0 %v6139_v28  ;;  %v7609_v38 = vpop.f32.mrb[0].mxu1  ;;  %v470_v28 = vld [vmem:[#allocation6 + $0xa50] sm:$0xff] }
 0x1ad   :  { %2934 = vmatprep.subr.bf16.mxu0 %v6148_v55  ;;  %v7611_v42 = vpop.f32.mrb[1].mxu1  ;;  %v5941_v55 = vcombine.low %v207_v14, %v211_v15  ;;  %v6204_v32 = vcombine.high %v470_v28, %v474_v29  ;;  %v6203_v40 = vcombine.low %v470_v28, %v474_v29  ;;  %v263_v15 = vld [vmem:[#allocation6 + $0x3d8] sm:$0xff]  ;;  %v526_v29 = vld [vmem:[#allocation6 + $0xc10] sm:$0xff] }
 0x1ae   :  { %3017 = vmatpush1.bf16.msra.mxu1 %v5893_v34  ;;  %v2558_v46 = vpop.f32.mrb[2].mxu1  ;;  %v227_v34 = vld [vmem:[#allocation6 + $0x2b8] sm:$0xff] }
 0x1af   :  { %v2559_v60 = vpop.f32.mrb[3].mxu1  ;;  %3018 = vmatprep.subr.bf16.mxu1 %v5902_v36  ;;  %v482_v36 = vld [vmem:[#allocation6 + $0xab0] sm:$0xff]  ;;  %v5958_v41 = vcombine.high %v223_v33, %v227_v34  ;;  %v235_v46 = vld [vmem:[#allocation6 + $0x2f8] sm:$0xff] }
 0x1b0   :  { %2935 = vmatpush1.bf16.msra.mxu0 %v6147_v35  ;;  %v478_v35 = vld [vmem:[#allocation6 + $0xa90] sm:$0xff]  ;;  %v275_v28 = vld [vmem:[#allocation6 + $0x438] sm:$0xff] }
 0x1b1   :  { %2936 = vmatprep.subr.bf16.mxu0 %v6156_v39  ;;  %v5949_v39 = vcombine.low %v215_v26, %v219_v27  ;;  %v6212_v44 = vcombine.high %v478_v35, %v482_v36  ;;  %v490_v60 = vld [vmem:[#allocation6 + $0xaf0] sm:$0xff]  ;;  %v271_v27 = vld [vmem:[#allocation6 + $0x418] sm:$0xff] }
 0x1b2   :  { %3019 = vmatpush1.bf16.msra.mxu1 %v5901_v22  ;;  %v486_v22 = vld [vmem:[#allocation6 + $0xad0] sm:$0xff] }
 0x1b3   :  { %3020 = vmatprep.subr.bf16.mxu1 %v5910_v48  ;;  %v6211_v48 = vcombine.low %v478_v35, %v482_v36  ;;  %v6220_v50 = vcombine.high %v486_v22, %v490_v60  ;;  %v3190_v35 = vlaneseq  ;;  %v279_v36 = vld [vmem:[#allocation6 + $0x458] sm:$0xff] }
 0x1b4   :  { %2937 = vmatpush1.bf16.msra.mxu0 %v6155_v47  ;;  %v5957_v47 = vcombine.low %v223_v33, %v227_v34  ;;  %v7402_v33 = vmov 1966171168  }
 0x1b5   :  { %2938 = vmatprep.subr.bf16.mxu0 %v6164_v49  ;;  %v5966_v49 = vcombine.high %v231_v45, %v235_v46  ;;  %v3188_v34 = vunpack.c.l.s4 %v7402_v33  ;;  %v335_v33 = vld [vmem:[#allocation6 + $0x618] sm:$0xff] }
 0x1b6   :  { %3021 = vmatpush1.bf16.msra.mxu1 %v5909_v54  ;;  %v498_v54 = vld [vmem:[#allocation6 + $0xb30] sm:$0xff] }
 0x1b7   :  { %3022 = vmatprep.subr.bf16.mxu1 %v5918_v58  ;;  %v6219_v58 = vcombine.low %v486_v22, %v490_v60  ;;  %v6228_v61 = vcombine.high %v494_v53, %v498_v54  ;;  %v3191_v22 = vshrl.u32 %v3190_v35, 7  ;;  %v287_v60 = vld [vmem:[#allocation6 + $0x498] sm:$0xff] }
 0x1b8   :  { %2939 = vmatpush1.bf16.msra.mxu0 %v6163_v57  ;;  %v5965_v57 = vcombine.low %v231_v45, %v235_v46  ;;  %v3189_v46 = vunpack.c.0.s8 %v3188_v34  ;;  %v339_v34 = vld [vmem:[#allocation6 + $0x638] sm:$0xff] }
 0x1b9   :  { %2940 = vmatprep.subr.bf16.mxu0 %v6172_v59  ;;  %v5974_v59 = vcombine.high %v239_v51, %v243_v52 }
 0x1ba   :  { %3023 = vmatpush1.bf16.msra.mxu1 %v5917_v2  ;;  %v506_v2 = vld [vmem:[#allocation6 + $0xb70] sm:$0xff] }
 0x1bb   :  { %3024 = vmatprep.subr.bf16.mxu1 %v5926_v4  ;;  %v6227_v4 = vcombine.low %v494_v53, %v498_v54  ;;  %v6236_v6 = vcombine.high %v502_v1, %v506_v2  ;;  %v299_v53 = vld [vmem:[#allocation6 + $0x4f8] sm:$0xff]  ;;  %v7618_v54 = vld [vmem:[#allocation8] sm:$0xff] }
 0x1bc   :  { %2941 = vmatpush1.bf16.msra.mxu0 %v6171_v3  ;;  %v5973_v3 = vcombine.low %v239_v51, %v243_v52  ;;  %v7615_v51 = vsub.s32 %v3189_v46, %v3191_v22  ;;  %v295_v52 = vld [vmem:[#allocation6 + $0x4d8] sm:$0xff]  ;;  %v6069_v46 = vcombine.low %v335_v33, %v339_v34 }
 0x1bd   :  { %2942 = vmatprep.subr.bf16.mxu0 %v6180_v5  ;;  %v5982_v5 = vcombine.high %v247_v62, %v251_v0 }
 0x1be   :  { %3025 = vmatpush1.bf16.msra.mxu1 %v5925_v10  ;;  %v514_v10 = vld [vmem:[#allocation6 + $0xbb0] sm:$0xff] }
 0x1bf   :  { %3026 = vmatprep.subr.bf16.mxu1 %v5934_v12  ;;  %v6235_v12 = vcombine.low %v502_v1, %v506_v2  ;;  %v6244_v14 = vcombine.high %v510_v9, %v514_v10 }
 0x1c0   :  { %2943 = vmatpush1.bf16.msra.mxu0 %v6179_v11  ;;  %v5981_v11 = vcombine.low %v247_v62, %v251_v0  ;;  %v6029_v62 = vcombine.low %v295_v52, %v299_v53  ;;  %v6690_v0 = vld [vmem:[#allocation9] ss:$16 sps:$4 sm:$0xff]  }
 0x1c1   :  { %2944 = vmatprep.subr.bf16.mxu0 %v6188_v13  ;;  %v5990_v13 = vcombine.high %v255_v7, %v259_v8 }
 0x1c2   :  { %3027 = vmatpush1.bf16.msra.mxu1 %v5933_v18  ;;  %v522_v18 = vld [vmem:[#allocation6 + $0xbf0] sm:$0xff] }
 0x1c3   :  { %3028 = vmatprep.subr.bf16.mxu1 %v5942_v21  ;;  %v6243_v21 = vcombine.low %v510_v9, %v514_v10  ;;  %v6252_v26 = vcombine.high %v518_v17, %v522_v18  ;;  %v6698_v9 = vld [vmem:[#allocation9 + $0x44] ss:$16 sps:$4 sm:$0xff]  }
 0x1c4   :  { %2945 = vmatpush1.bf16.msra.mxu0 %v6187_v20  ;;  %v5989_v20 = vcombine.low %v255_v7, %v259_v8  ;;  %v319_v10 = vld [vmem:[#allocation6 + $0x598] sm:$0xff] }
 0x1c5   :  { %2946 = vmatprep.subr.bf16.mxu0 %v6196_v25  ;;  %v5998_v25 = vcombine.high %v263_v15, %v267_v16 }
 0x1c6   :  { %3029 = vmatpush1.bf16.msra.mxu1 %v5941_v55  ;;  %v530_v55 = vld [vmem:[#allocation6 + $0xc30] sm:$0xff] }
 0x1c7   :  { %3030 = vmatprep.subr.bf16.mxu1 %v5950_v56  ;;  %v6251_v56 = vcombine.low %v518_v17, %v522_v18  ;;  %v6259_v45 = vcombine.low %v526_v29, %v530_v55  ;;  %v327_v17 = vld [vmem:[#allocation6 + $0x5d8] sm:$0xff] }
 0x1c8   :  { %2947 = vmatpush1.bf16.msra.mxu0 %v6195_v30  ;;  %v5997_v30 = vcombine.low %v263_v15, %v267_v16  ;;  %v6701_v16 = vld [vmem:[#allocation9 + $0x64] ss:$16 sps:$4 sm:$0xff]  }
 0x1c9   :  { %2948 = vmatprep.subr.bf16.mxu0 %v6204_v32  ;;  %v6006_v32 = vcombine.high %v271_v27, %v275_v28  ;;  %v331_v18 = vld [vmem:[#allocation6 + $0x5f8] sm:$0xff] }
 0x1ca   :  { %3031 = vmatpush1.bf16.msra.mxu1 %v5949_v39  ;;  %v283_v39 = vld [vmem:[#allocation6 + $0x478] sm:$0xff] }
 0x1cb   :  { %3032 = vmatprep.subr.bf16.mxu1 %v5958_v41  ;;  %v6005_v41 = vcombine.low %v271_v27, %v275_v28 }
 0x1cc   :  { %2949 = vmatpush1.bf16.msra.mxu0 %v6203_v40  ;;  %v6260_v40 = vcombine.high %v526_v29, %v530_v55  ;;  %v6699_v55 = vld [vmem:[#allocation9 + $0x60] ss:$16 sps:$4 sm:$0xff]  }
 0x1cd   :  { %2950 = vmatprep.subr.bf16.mxu0 %v6212_v44  ;;  %v6014_v44 = vcombine.high %v279_v36, %v283_v39 }
 0x1ce   :  { %3033 = vmatpush1.bf16.msra.mxu1 %v5957_v47  ;;  %v291_v47 = vld [vmem:[#allocation6 + $0x4b8] sm:$0xff] }
 0x1cf   :  { %3034 = vmatprep.subr.bf16.mxu1 %v5966_v49  ;;  %v6013_v49 = vcombine.low %v279_v36, %v283_v39  ;;  %v6702_v39 = vld [vmem:[#allocation9 + $0x80] ss:$16 sps:$4 sm:$0xff]  }
 0x1d0   :  { %2951 = vmatpush1.bf16.msra.mxu0 %v6211_v48  ;;  %v6692_v48 = vld [vmem:[#allocation9 + $0x4] ss:$16 sps:$4 sm:$0xff]  }
 0x1d1   :  { %2952 = vmatprep.subr.bf16.mxu0 %v6220_v50  ;;  %v6022_v50 = vcombine.high %v287_v60, %v291_v47 }
 0x1d2   :  { %3035 = vmatpush1.bf16.msra.mxu1 %v5965_v57  ;;  %v6030_v57 = vcombine.high %v295_v52, %v299_v53  ;;  %v6708_v53 = vld [vmem:[#allocation9 + $0xc0] ss:$16 sps:$4 sm:$0xff]  }
 0x1d3   :  { %3036 = vmatprep.subr.bf16.mxu1 %v5974_v59  ;;  %v303_v59 = vld [vmem:[#allocation6 + $0x518] sm:$0xff] }
 0x1d4   :  { %2953 = vmatpush1.bf16.msra.mxu0 %v6219_v58  ;;  %v7623_v58 = vrot.slane %v7618_v54, %v7615_v51 }
 0x1d5   :  { %2954 = vmatprep.subr.bf16.mxu0 %v6228_v61  ;;  %v307_v61 = vld [vmem:[#allocation6 + $0x538] sm:$0xff] }
 0x1d6   :  { %3037 = vmatpush1.bf16.msra.mxu1 %v5973_v3  ;;  %v6038_v1 = vcombine.high %v303_v59, %v307_v61  ;;  %v3201_v2 = vcombine.high %v7623_v58, %v7623_v58  ;;  %v6695_v3 = vld [vmem:[#allocation9 + $0x24] ss:$16 sps:$4 sm:$0xff]  }
 0x1d7   :  { %3038 = vmatprep.subr.bf16.mxu1 %v5982_v5  ;;  %v6037_v5 = vcombine.low %v303_v59, %v307_v61  ;;  %v359_v59 = vld [vmem:[#allocation6 + $0x6d8] sm:$0xff] }
 0x1d8   :  { %2955 = vmatpush1.bf16.msra.mxu0 %v6227_v4  ;;  %v315_v4 = vld [vmem:[#allocation6 + $0x578] sm:$0xff]  ;;  %v7630_v8 = vrot.slane %v3201_v2, %v7615_v51 }
 0x1d9   :  { %2956 = vmatprep.subr.bf16.mxu0 %v6236_v6  ;;  %v6693_v6 = vld [vmem:[#allocation9 + $0x20] ss:$16 sps:$4 sm:$0xff]   ;;  %v6716_v2 = vld [vmem:[#allocation9 + $0x104] ss:$16 sps:$4 sm:$0xff]  }
 0x1da   :  { %3039 = vmatpush1.bf16.msra.mxu1 %v5981_v11  ;;  %v323_v11 = vld [vmem:[#allocation6 + $0x5b8] sm:$0xff] }
 0x1db   :  { %3040 = vmatprep.subr.bf16.mxu1 %v5990_v13  ;;  %v6696_v13 = vld [vmem:[#allocation9 + $0x40] ss:$16 sps:$4 sm:$0xff]   ;;  %v6054_v15 = vcombine.high %v319_v10, %v323_v11 }
 0x1dc   :  { %2957 = vmatpush1.bf16.msra.mxu0 %v6235_v12  ;;  %v363_v61 = vld [vmem:[#allocation6 + $0x6f8] sm:$0xff] }
 0x1dd   :  { %2958 = vmatprep.subr.bf16.mxu0 %v6244_v14  ;;  %v7632_v14 = vsub.s32 0, %v3191_v22  ;;  %v6705_v22 = vld [vmem:[#allocation9 + $0xa0] ss:$16 sps:$4 sm:$0xff]  }
 0x1de   :  { %3041 = vmatpush1.bf16.msra.mxu1 %v5989_v20 }
 0x1df   :  { %3042 = vmatprep.subr.bf16.mxu1 %v5998_v25 }
 0x1e0   :  { %2959 = vmatpush1.bf16.msra.mxu0 %v6243_v21 }
 0x1e1   :  { %2960 = vmatprep.subr.bf16.mxu0 %v6252_v26  ;;  %v6053_v26 = vcombine.low %v319_v10, %v323_v11  ;;  %v379_v10 = vld [vmem:[#allocation6 + $0x778] sm:$0xff] }
 0x1e2   :  { %3043 = vmatpush1.bf16.msra.mxu1 %v5997_v30  ;;  %v6062_v30 = vcombine.high %v327_v17, %v331_v18 }
 0x1e3   :  { %3053 = vmatprep.subr.bf16.mxu1 %v6006_v32  ;;  %v6704_v32 = vld [vmem:[#allocation9 + $0x84] ss:$16 sps:$4 sm:$0xff]  }
 0x1e4   :  { %2961 = vmatpush1.bf16.msra.mxu0 %v6251_v56 }
 0x1e5   :  { %2971 = vmatprep.subr.bf16.mxu0 %v6260_v40  ;;  %3045 = vmatmul.mubr.bf16.vlgmr.msra.gmra.mrb[8].mxu1 %v7570_v19  ;;  %v6021_v19 = vcombine.low %v287_v60, %v291_v47  ;;  %v6070_v40 = vcombine.high %v335_v33, %v339_v34  ;;  %v403_v33 = vld [vmem:[#allocation6 + $0x838] sm:$0xff] }
 0x1e6   :  { %3054 = vmatpush1.bf16.msra.mxu1 %v6005_v41  ;;  %3085 = vmatprep.mubr.bf16.mxu1 %v7564_v63  ;;  %v311_v63 = vld [vmem:[#allocation6 + $0x558] sm:$0xff] }
 0x1e7   :  { %2963 = vmatmul.mubr.bf16.vlgmr.msra.gmra.mrb[4].mxu0 %v7588_v37  ;;  %3055 = vmatprep.subr.bf16.mxu1 %v6014_v44  ;;  %v6046_v7 = vcombine.high %v311_v63, %v315_v4  ;;  %v6045_v12 = vcombine.low %v311_v63, %v315_v4  ;;  %v343_v41 = vld [vmem:[#allocation6 + $0x658] sm:$0xff]  ;;  %v6093_v4 = vcombine.low %v359_v59, %v363_v61 }
 0x1e8   :  { %2972 = vmatpush1.bf16.msra.mxu0 %v6259_v45  ;;  %3003 = vmatprep.mubr.bf16.mxu0 %v7401_v43  ;;  %v347_v44 = vld [vmem:[#allocation6 + $0x678] sm:$0xff] }
 0x1e9   :  { %4851 = vmatprep.subr.bf16.mxu0 %v6692_v48  ;;  %v6078_v47 = vcombine.high %v343_v41, %v347_v44  ;;  %v6710_v48 = vld [vmem:[#allocation9 + $0xc4] ss:$16 sps:$4 sm:$0xff]   ;;  %v6077_v52 = vcombine.low %v343_v41, %v347_v44  ;;  %v6729_v41 = vld [vmem:[#allocation9 + $0x1a0] ss:$16 sps:$4 sm:$0xff]  }
 0x1ea   :  { %3056 = vmatpush1.bf16.msra.mxu1 %v6013_v49  ;;  %v351_v49 = vld [vmem:[#allocation6 + $0x698] sm:$0xff] }
 0x1eb   :  { %3057 = vmatprep.subr.bf16.mxu1 %v6022_v50  ;;  %v355_v50 = vld [vmem:[#allocation6 + $0x6b8] sm:$0xff] }
 0x1ec   :  { %v371_v63 = vld [vmem:[#allocation6 + $0x738] sm:$0xff] }
 0x1ee   :  { %3058 = vmatpush1.bf16.msra.mxu1 %v6021_v19  ;;  %v6086_v19 = vcombine.high %v351_v49, %v355_v50 }
 0x1ef   :  { %3059 = vmatprep.subr.bf16.mxu1 %v6030_v57  ;;  %v6713_v57 = vld [vmem:[#allocation9 + $0xe4] ss:$16 sps:$4 sm:$0xff]  }
 0x1f2   :  { %3060 = vmatpush1.bf16.msra.mxu1 %v6029_v62  ;;  %v6085_v62 = vcombine.low %v351_v49, %v355_v50  ;;  %v6732_v50 = vld [vmem:[#allocation9 + $0x1c0] ss:$16 sps:$4 sm:$0xff]  }
 0x1f3   :  { %6265 = vmatmul.mubr.msk.bf16.vlgmr.msra.gmra.mrb[4].mxu0 %vm2516_vm0, %v7602_v23  ;;  %3061 = vmatprep.subr.bf16.mxu1 %v6038_v1  ;;  %v3243_v23 = vpack.i.b16 %v7630_v8, %v7630_v8  ;;  %v6094_v1 = vcombine.high %v359_v59, %v363_v61  ;;  %v6735_v61 = vld [vmem:[#allocation9 + $0x1e0] ss:$16 sps:$4 sm:$0xff]  }
 0x1f4   :  { %4852 = vmatpush1.bf16.msra.mxu0 %v6690_v0  ;;  %v6711_v0 = vld [vmem:[#allocation9 + $0xe0] ss:$16 sps:$4 sm:$0xff]  }
 0x1f5   :  { %4853 = vmatprep.subr.bf16.mxu0 %v6695_v3  ;;  %v3248_v28 = vrot.slane %v3243_v23, %v7632_v14  ;;  %v367_v3 = vld [vmem:[#allocation6 + $0x718] sm:$0xff] }
 0x1f6   :  { %3062 = vmatpush1.bf16.msra.mxu1 %v6037_v5  ;;  %v6714_v5 = vld [vmem:[#allocation9 + $0x100] ss:$16 sps:$4 sm:$0xff]   ;;  %v6101_v11 = vcombine.low %v367_v3, %v371_v63  ;;  %v6722_v23 = vld [vmem:[#allocation9 + $0x144] ss:$16 sps:$4 sm:$0xff]  }
 0x1f7   :  { %3063 = vmatprep.subr.bf16.mxu1 %v6046_v7  ;;  %v6719_v7 = vld [vmem:[#allocation9 + $0x124] ss:$16 sps:$4 sm:$0xff]  }
 0x1f8   :  { %4854 = vmatpush1.bf16.msra.mxu0 %v6693_v6  ;;  %v6102_v6 = vcombine.high %v367_v3, %v371_v63  ;;  %v6738_v63 = vld [vmem:[#allocation9 + $0x200] ss:$16 sps:$4 sm:$0xff]  }
 0x1f9   :  { %4855 = vmatprep.subr.bf16.mxu0 %v6698_v9  ;;  %v375_v9 = vld [vmem:[#allocation6 + $0x758] sm:$0xff] }
 0x1fa   :  { %v2677_v20 = vpop.f32.mrb[0].mxu0  ;;  %3064 = vmatpush1.bf16.msra.mxu1 %v6045_v12  ;;  %v6717_v12 = vld [vmem:[#allocation9 + $0x120] ss:$16 sps:$4 sm:$0xff]  }
 0x1fb   :  { %v7637_v21 = vadd.f32 %v2677_v20, %v7609_v38  ;;  %v2679_v25 = vpop.f32.mrb[1].mxu0  ;;  %3065 = vmatprep.subr.bf16.mxu1 %v6054_v15  ;;  %v6061_v38 = vcombine.low %v327_v17, %v331_v18  ;;  %v383_v15 = vld [vmem:[#allocation6 + $0x798] sm:$0xff]  ;;  %v6109_v17 = vcombine.low %v375_v9, %v379_v10 }
 0x1fc   :  { %4856 = vmatpush1.bf16.msra.mxu0 %v6696_v13  ;;  %v6592_v27 = vadd.f32 %v2679_v25, %v7611_v42  ;;  %v2681_v29 = vpop.f32.mrb[2].mxu0  ;;  %v6707_v42 = vld [vmem:[#allocation9 + $0xa4] ss:$16 sps:$4 sm:$0xff]   ;;  %v6110_v13 = vcombine.high %v375_v9, %v379_v10  ;;  %v6720_v18 = vld [vmem:[#allocation9 + $0x140] ss:$16 sps:$4 sm:$0xff]  }
 0x1fd   :  { %v2682_v56 = vpop.f32.mrb[3].mxu0  ;;  %4857 = vmatprep.subr.bf16.mxu0 %v6701_v16  ;;  %v387_v16 = vld [vmem:[#allocation6 + $0x7b8] sm:$0xff] }
 0x1fe   :  { %v3177_v35 = vpack.c.bf16 %v6592_v27, %v6592_v27  ;;  %3066 = vmatpush1.bf16.msra.mxu1 %v6053_v26  ;;  %v6118_v20 = vcombine.high %v383_v15, %v387_v16  ;;  %v6725_v25 = vld [vmem:[#allocation9 + $0x164] ss:$16 sps:$4 sm:$0xff]   ;;  %v6723_v29 = vld [vmem:[#allocation9 + $0x160] ss:$16 sps:$4 sm:$0xff]  }
 0x1ff   :  { %3067 = vmatprep.subr.bf16.mxu1 %v6062_v30  ;;  %v391_v26 = vld [vmem:[#allocation6 + $0x7d8] sm:$0xff]  ;;  %v7646_v30 = vrot.slane %v7623_v58, %v7615_v51 }
 0x200   :  { %v3292_v36 = vadd.bf16 %v3248_v28, %v3177_v35  ;;  %4858 = vmatpush1.bf16.msra.mxu0 %v6699_v55  ;;  %v395_v27 = vld [vmem:[#allocation6 + $0x7f8] sm:$0xff]  ;;  %v6117_v28 = vcombine.low %v383_v15, %v387_v16 }
 0x201   :  { %4859 = vmatprep.subr.bf16.mxu0 %v6704_v32  ;;  %v6126_v55 = vcombine.high %v391_v26, %v395_v27  ;;  %v6728_v56 = vld [vmem:[#allocation9 + $0x184] ss:$16 sps:$4 sm:$0xff]   ;;  %v6125_v34 = vcombine.low %v391_v26, %v395_v27  ;;  %v6726_v35 = vld [vmem:[#allocation9 + $0x180] ss:$16 sps:$4 sm:$0xff]  }
 0x202   :  { %v3300_v45 = vmul.bf16 1045249613, %v3292_v36  ;;  %3068 = vmatpush1.bf16.msra.mxu1 %v6061_v38  ;;  %v399_v32 = vld [vmem:[#allocation6 + $0x818] sm:$0xff] }
 0x203   :  { %3069 = vmatprep.subr.bf16.mxu1 %v6070_v40  ;;  %v6134_v38 = vcombine.high %v399_v32, %v403_v33  ;;  %v407_v40 = vld [vmem:[#allocation6 + $0x858] sm:$0xff]  ;;  %v6133_v58 = vcombine.low %v399_v32, %v403_v33 }
 0x204   :  { %4860 = vmatpush1.bf16.msra.mxu0 %v6702_v39  ;;  %v7641_v60 = vmax.bf16 %v3300_v45, %v3292_v36  ;;  %v3236_v36 = vpack.i.b16 %v7646_v30, %v7646_v30  ;;  %v6731_v39 = vld [vmem:[#allocation9 + $0x1a4] ss:$16 sps:$4 sm:$0xff]   ;;  %v3176_v45 = vpack.c.bf16 %v7637_v21, %v7637_v21 }
 0x205   :  { %4861 = vmatprep.subr.bf16.mxu0 %v6707_v42  ;;  %v411_v42 = vld [vmem:[#allocation6 + $0x878] sm:$0xff] }
 0x206   :  { %4883 = vmatprep.mubr.bf16.mxu0 %v7641_v60  ;;  %3070 = vmatpush1.bf16.msra.mxu1 %v6069_v46  ;;  %v6142_v44 = vcombine.high %v407_v40, %v411_v42  ;;  %v3241_v46 = vrot.slane %v3236_v36, %v7632_v14  ;;  %v6141_v49 = vcombine.low %v407_v40, %v411_v42  ;;  %v423_v21 = vld [vmem:[#allocation6 + $0x8d8] sm:$0xff] }
 0x207   :  { %3071 = vmatprep.subr.bf16.mxu1 %v6078_v47  ;;  %v415_v47 = vld [vmem:[#allocation6 + $0x898] sm:$0xff] }
 0x208   :  { %4862 = vmatpush1.bf16.msra.mxu0 %v6705_v22  ;;  %v6734_v22 = vld [vmem:[#allocation9 + $0x1c4] ss:$16 sps:$4 sm:$0xff]   ;;  %v6753_v42 = vld [vmem:[#allocation9 + $0x2a0] ss:$16 sps:$4 sm:$0xff]  }
 0x209   :  { %4863 = vmatprep.subr.bf16.mxu0 %v6710_v48  ;;  %v419_v48 = vld [vmem:[#allocation6 + $0x8b8] sm:$0xff] }
 0x20a   :  { %3072 = vmatpush1.bf16.msra.mxu1 %v6077_v52  ;;  %v6150_v52 = vcombine.high %v415_v47, %v419_v48  ;;  %v6149_v59 = vcombine.low %v415_v47, %v419_v48  ;;  %v6755_v36 = vld [vmem:[#allocation9 + $0x2a4] ss:$16 sps:$4 sm:$0xff]  }
 0x20b   :  { %3073 = vmatprep.subr.bf16.mxu1 %v6086_v19  ;;  %v6737_v19 = vld [vmem:[#allocation9 + $0x1e4] ss:$16 sps:$4 sm:$0xff]  }
 0x20c   :  { %4864 = vmatpush1.bf16.msra.mxu0 %v6708_v53  ;;  %v3291_v53 = vadd.bf16 %v3241_v46, %v3176_v45  ;;  %v487_v47 = vld [vmem:[#allocation6 + $0xad8] sm:$0xff] }
 0x20d   :  { %4865 = vmatprep.subr.bf16.mxu0 %v6713_v57  ;;  %v427_v57 = vld [vmem:[#allocation6 + $0x8f8] sm:$0xff] }
 0x20e   :  { %3074 = vmatpush1.bf16.msra.mxu1 %v6085_v62  ;;  %v6158_v62 = vcombine.high %v423_v21, %v427_v57  ;;  %v491_v48 = vld [vmem:[#allocation6 + $0xaf8] sm:$0xff] }
 0x20f   :  { %3075 = vmatprep.subr.bf16.mxu1 %v6094_v1  ;;  %v435_v1 = vld [vmem:[#allocation6 + $0x938] sm:$0xff] }
 0x210   :  { %4866 = vmatpush1.bf16.msra.mxu0 %v6711_v0  ;;  %v431_v0 = vld [vmem:[#allocation6 + $0x918] sm:$0xff] }
 0x211   :  { %4867 = vmatprep.subr.bf16.mxu0 %v6716_v2  ;;  %v6157_v2 = vcombine.low %v423_v21, %v427_v57  ;;  %v6166_v3 = vcombine.high %v431_v0, %v435_v1  ;;  %v6165_v9 = vcombine.low %v431_v0, %v435_v1  ;;  %v499_v21 = vld [vmem:[#allocation6 + $0xb38] sm:$0xff] }
 0x212   :  { %3076 = vmatpush1.bf16.msra.mxu1 %v6093_v4  ;;  %v6764_v57 = vld [vmem:[#allocation9 + $0x304] ss:$16 sps:$4 sm:$0xff]  }
 0x213   :  { %3077 = vmatprep.subr.bf16.mxu1 %v6102_v6  ;;  %v443_v6 = vld [vmem:[#allocation6 + $0x978] sm:$0xff] }
 0x214   :  { %4868 = vmatpush1.bf16.msra.mxu0 %v6714_v5  ;;  %v439_v5 = vld [vmem:[#allocation6 + $0x958] sm:$0xff] }
 0x215   :  { %4869 = vmatprep.subr.bf16.mxu0 %v6719_v7  ;;  %v6743_v7 = vld [vmem:[#allocation9 + $0x224] ss:$16 sps:$4 sm:$0xff]   ;;  %v6174_v10 = vcombine.high %v439_v5, %v443_v6  ;;  %v6173_v15 = vcombine.low %v439_v5, %v443_v6 }
 0x216   :  { %3078 = vmatpush1.bf16.msra.mxu1 %v6101_v11  ;;  %v6741_v11 = vld [vmem:[#allocation9 + $0x220] ss:$16 sps:$4 sm:$0xff]   ;;  %v6767_v1 = vld [vmem:[#allocation9 + $0x324] ss:$16 sps:$4 sm:$0xff]  }
 0x217   :  { %3079 = vmatprep.subr.bf16.mxu1 %v6110_v13  ;;  %v451_v13 = vld [vmem:[#allocation6 + $0x9b8] sm:$0xff] }
 0x218   :  { %4870 = vmatpush1.bf16.msra.mxu0 %v6717_v12  ;;  %v447_v12 = vld [vmem:[#allocation6 + $0x998] sm:$0xff] }
 0x219   :  { %4871 = vmatprep.subr.bf16.mxu0 %v6722_v23  ;;  %v6746_v23 = vld [vmem:[#allocation9 + $0x244] ss:$16 sps:$4 sm:$0xff]   ;;  %v6182_v16 = vcombine.high %v447_v12, %v451_v13  ;;  %v6181_v26 = vcombine.low %v447_v12, %v451_v13 }
 0x21a   :  { %3080 = vmatpush1.bf16.msra.mxu1 %v6109_v17  ;;  %v6744_v17 = vld [vmem:[#allocation9 + $0x240] ss:$16 sps:$4 sm:$0xff]   ;;  %v6770_v6 = vld [vmem:[#allocation9 + $0x344] ss:$16 sps:$4 sm:$0xff]  }
 0x21b   :  { %3081 = vmatprep.subr.bf16.mxu1 %v6118_v20  ;;  %v459_v20 = vld [vmem:[#allocation6 + $0x9f8] sm:$0xff] }
 0x21c   :  { %4872 = vmatpush1.bf16.msra.mxu0 %v6720_v18  ;;  %v455_v18 = vld [vmem:[#allocation6 + $0x9d8] sm:$0xff] }
 0x21d   :  { %4873 = vmatprep.subr.bf16.mxu0 %v6725_v25  ;;  %v6749_v25 = vld [vmem:[#allocation9 + $0x264] ss:$16 sps:$4 sm:$0xff]   ;;  %v6190_v27 = vcombine.high %v455_v18, %v459_v20  ;;  %v6189_v32 = vcombine.low %v455_v18, %v459_v20 }
 0x21e   :  { %3082 = vmatpush1.bf16.msra.mxu1 %v6117_v28  ;;  %v6747_v28 = vld [vmem:[#allocation9 + $0x260] ss:$16 sps:$4 sm:$0xff]   ;;  %v6773_v13 = vld [vmem:[#allocation9 + $0x364] ss:$16 sps:$4 sm:$0xff]  }
 0x21f   :  { %3083 = vmatprep.subr.bf16.mxu1 %v6126_v55  ;;  %v467_v55 = vld [vmem:[#allocation6 + $0xa38] sm:$0xff] }
 0x220   :  { %4874 = vmatpush1.bf16.msra.mxu0 %v6723_v29  ;;  %v463_v29 = vld [vmem:[#allocation6 + $0xa18] sm:$0xff] }
 0x221   :  { %4875 = vmatprep.subr.bf16.mxu0 %v6728_v56  ;;  %v6752_v56 = vld [vmem:[#allocation9 + $0x284] ss:$16 sps:$4 sm:$0xff]   ;;  %v6198_v33 = vcombine.high %v463_v29, %v467_v55 }
 0x222   :  { %3084 = vmatpush1.bf16.msra.mxu1 %v6125_v34  ;;  %v6750_v34 = vld [vmem:[#allocation9 + $0x280] ss:$16 sps:$4 sm:$0xff]   ;;  %v6779_v20 = vld [vmem:[#allocation9 + $0x384] ss:$16 sps:$4 sm:$0xff]  }
 0x223   :  { %3094 = vmatprep.subr.bf16.mxu1 %v6134_v38  ;;  %v475_v38 = vld [vmem:[#allocation6 + $0xa78] sm:$0xff] }
 0x224   :  { %4876 = vmatpush1.bf16.msra.mxu0 %v6726_v35  ;;  %v471_v35 = vld [vmem:[#allocation6 + $0xa58] sm:$0xff] }
 0x225   :  { %4877 = vmatprep.subr.bf16.mxu0 %v6731_v39  ;;  %3086 = vmatmul.mubr.bf16.vlgmr.msra.gmra.mrb[8].mxu1 %v7576_v24  ;;  %v3299_v24 = vmul.bf16 1045249613, %v3291_v53  ;;  %v6197_v39 = vcombine.low %v463_v29, %v467_v55  ;;  %v6206_v40 = vcombine.high %v471_v35, %v475_v38  ;;  %v6205_v45 = vcombine.low %v471_v35, %v475_v38  ;;  %v507_v0 = vld [vmem:[#allocation6 + $0xb78] sm:$0xff]  ;;  %v6776_v55 = vld [vmem:[#allocation9 + $0xc] ss:$16 sps:$4 sm:$0xff]  }
 0x226   :  { %3095 = vmatpush1.bf16.msra.mxu1 %v6133_v58  ;;  %3126 = vmatprep.mubr.bf16.mxu1 %v7580_v31  ;;  %v6740_v31 = vld [vmem:[#allocation9 + $0x204] ss:$16 sps:$4 sm:$0xff]   ;;  %v6795_v35 = vld [vmem:[#allocation9 + $0x3e0] ss:$16 sps:$4 sm:$0xff]  }
 0x227   :  { %3096 = vmatprep.subr.bf16.mxu1 %v6142_v44  ;;  %v7655_v4 = vmax.bf16 %v3299_v24, %v3291_v53  ;;  %v479_v58 = vld [vmem:[#allocation6 + $0xa98] sm:$0xff] }
 0x228   :  { %4878 = vmatpush1.bf16.msra.mxu0 %v6729_v41  ;;  %v483_v41 = vld [vmem:[#allocation6 + $0xab8] sm:$0xff] }
 0x229   :  { %4879 = vmatprep.subr.bf16.mxu0 %v6734_v22  ;;  %v6758_v44 = vld [vmem:[#allocation9 + $0x2c4] ss:$16 sps:$4 sm:$0xff]   ;;  %v6214_v46 = vcombine.high %v479_v58, %v483_v41  ;;  %v6756_v22 = vld [vmem:[#allocation9 + $0x2c0] ss:$16 sps:$4 sm:$0xff]  }
 0x22a   :  { %3097 = vmatpush1.bf16.msra.mxu1 %v6141_v49  ;;  %v6761_v49 = vld [vmem:[#allocation9 + $0x2e4] ss:$16 sps:$4 sm:$0xff]   ;;  %v6759_v53 = vld [vmem:[#allocation9 + $0x2e0] ss:$16 sps:$4 sm:$0xff]  }
 0x22b   :  { %3098 = vmatprep.subr.bf16.mxu1 %v6150_v52  ;;  %v6222_v52 = vcombine.high %v487_v47, %v491_v48  ;;  %v503_v24 = vld [vmem:[#allocation6 + $0xb58] sm:$0xff] }
 0x22c   :  { %4880 = vmatpush1.bf16.msra.mxu0 %v6732_v50  ;;  %v6213_v50 = vcombine.low %v479_v58, %v483_v41  ;;  %v515_v5 = vld [vmem:[#allocation6 + $0xbb8] sm:$0xff]  ;;  %v6788_v58 = vld [vmem:[#allocation9 + $0x4c] ss:$16 sps:$4 sm:$0xff]  }
 0x22d   :  { %4881 = vmatprep.subr.bf16.mxu0 %v6737_v19  ;;  %v495_v19 = vld [vmem:[#allocation6 + $0xb18] sm:$0xff] }
 0x22e   :  { %3099 = vmatpush1.bf16.msra.mxu1 %v6149_v59  ;;  %v6221_v59 = vcombine.low %v487_v47, %v491_v48  ;;  %v523_v12 = vld [vmem:[#allocation6 + $0xbf8] sm:$0xff] }
 0x22f   :  { %3100 = vmatprep.subr.bf16.mxu1 %v6158_v62  ;;  %v6762_v62 = vld [vmem:[#allocation9 + $0x300] ss:$16 sps:$4 sm:$0xff]   ;;  %v6812_v38 = vld [vmem:[#allocation9 + $0x404] ss:$16 sps:$4 sm:$0xff]  }
 0x230   :  { %4882 = vmatpush1.bf16.msra.mxu0 %v6735_v61  ;;  %v6230_v61 = vcombine.high %v495_v19, %v499_v21  ;;  %v531_v18 = vld [vmem:[#allocation6 + $0xc38] sm:$0xff] }
 0x231   :  { %4892 = vmatprep.subr.bf16.mxu0 %v6740_v31  ;;  %v6229_v31 = vcombine.low %v495_v19, %v499_v21  ;;  %v6800_v19 = vld [vmem:[#allocation9 + $0x8c] ss:$16 sps:$4 sm:$0xff]  }
 0x232   :  { %3101 = vmatpush1.bf16.msra.mxu1 %v6157_v2  ;;  %v6238_v2 = vcombine.high %v503_v24, %v507_v0 }
 0x233   :  { %4884 = vmatmul.mubr.bf16.vlgmr.msra.gmra.mrb[8].mxu0 %v7655_v4  ;;  %3102 = vmatprep.subr.bf16.mxu1 %v6166_v3  ;;  %v6765_v3 = vld [vmem:[#allocation9 + $0x320] ss:$16 sps:$4 sm:$0xff]  }
 0x234   :  { %4893 = vmatpush1.bf16.msra.mxu0 %v6738_v63  ;;  %v511_v63 = vld [vmem:[#allocation6 + $0xb98] sm:$0xff] }
 0x235   :  { %4894 = vmatprep.subr.bf16.mxu0 %v6743_v7  ;;  %v6237_v7 = vcombine.low %v503_v24, %v507_v0  ;;  %v6810_v0 = vld [vmem:[#allocation9 + $0x400] ss:$16 sps:$4 sm:$0xff]  }
 0x236   :  { %3103 = vmatpush1.bf16.msra.mxu1 %v6165_v9  ;;  %v6246_v9 = vcombine.high %v511_v63, %v515_v5 }
 0x237   :  { %3104 = vmatprep.subr.bf16.mxu1 %v6174_v10  ;;  %v6768_v10 = vld [vmem:[#allocation9 + $0x340] ss:$16 sps:$4 sm:$0xff]  }
 0x238   :  { %4895 = vmatpush1.bf16.msra.mxu0 %v6741_v11  ;;  %v519_v11 = vld [vmem:[#allocation6 + $0xbd8] sm:$0xff] }
 0x239   :  { %4896 = vmatprep.subr.bf16.mxu0 %v6746_v23  ;;  %v6245_v23 = vcombine.low %v511_v63, %v515_v5  ;;  %v6816_v63 = vld [vmem:[#allocation9 + $0x420] ss:$16 sps:$4 sm:$0xff]   ;;  %v6824_v5 = vld [vmem:[#allocation9 + $0x444] ss:$16 sps:$4 sm:$0xff]  }
 0x23a   :  { %3105 = vmatpush1.bf16.msra.mxu1 %v6173_v15  ;;  %v6254_v15 = vcombine.high %v519_v11, %v523_v12 }
 0x23b   :  { %3106 = vmatprep.subr.bf16.mxu1 %v6182_v16  ;;  %v6771_v16 = vld [vmem:[#allocation9 + $0x360] ss:$16 sps:$4 sm:$0xff]  }
 0x23c   :  { %4897 = vmatpush1.bf16.msra.mxu0 %v6744_v17  ;;  %v527_v17 = vld [vmem:[#allocation6 + $0xc18] sm:$0xff] }
 0x23d   :  { %4898 = vmatprep.subr.bf16.mxu0 %v6749_v25  ;;  %v6253_v25 = vcombine.low %v519_v11, %v523_v12  ;;  %v6261_v29 = vcombine.low %v527_v17, %v531_v18  ;;  %v6807_v11 = vld [vmem:[#allocation9 + $0xe8] ss:$16 sps:$4 sm:$0xff]   ;;  %v6815_v12 = vld [vmem:[#allocation9 + $0x10c] ss:$16 sps:$4 sm:$0xff]  }
 0x23e   :  { %3107 = vmatpush1.bf16.msra.mxu1 %v6181_v26  ;;  %v6262_v26 = vcombine.high %v527_v17, %v531_v18  ;;  %v6834_v17 = vld [vmem:[#allocation9 + $0x480] ss:$16 sps:$4 sm:$0xff]   ;;  %v6842_v18 = vld [vmem:[#allocation9 + $0x4a4] ss:$16 sps:$4 sm:$0xff]  }
 0x23f   :  { %3108 = vmatprep.subr.bf16.mxu1 %v6190_v27  ;;  %v6777_v27 = vld [vmem:[#allocation9 + $0x380] ss:$16 sps:$4 sm:$0xff]  }
 0x240   :  { %4899 = vmatpush1.bf16.msra.mxu0 %v6747_v28  ;;  %v6785_v28 = vld [vmem:[#allocation9 + $0x3a4] ss:$16 sps:$4 sm:$0xff]  }
 0x241   :  { %4900 = vmatprep.subr.bf16.mxu0 %v6752_v56  ;;  %v6783_v56 = vld [vmem:[#allocation9 + $0x3a0] ss:$16 sps:$4 sm:$0xff]  }
 0x242   :  { %3109 = vmatpush1.bf16.msra.mxu1 %v6189_v32  ;;  %v6791_v32 = vld [vmem:[#allocation9 + $0x3c4] ss:$16 sps:$4 sm:$0xff]  }
 0x243   :  { %3110 = vmatprep.subr.bf16.mxu1 %v6198_v33  ;;  %v6789_v33 = vld [vmem:[#allocation9 + $0x3c0] ss:$16 sps:$4 sm:$0xff]  }
 0x244   :  { %4901 = vmatpush1.bf16.msra.mxu0 %v6750_v34  ;;  %v6797_v34 = vld [vmem:[#allocation9 + $0x3e4] ss:$16 sps:$4 sm:$0xff]  }
 0x245   :  { %4902 = vmatprep.subr.bf16.mxu0 %v6755_v36  ;;  %v6774_v36 = vld [vmem:[#allocation9 + $0x8] ss:$16 sps:$4 sm:$0xff]  }
 0x246   :  { %3111 = vmatpush1.bf16.msra.mxu1 %v6197_v39  ;;  %v6782_v39 = vld [vmem:[#allocation9 + $0x2c] ss:$16 sps:$4 sm:$0xff]  }
 0x247   :  { %3112 = vmatprep.subr.bf16.mxu1 %v6206_v40  ;;  %v3231_v40 = vcombine.high %v7646_v30, %v7646_v30 }
 0x248   :  { %4903 = vmatpush1.bf16.msra.mxu0 %v6753_v42  ;;  %v6780_v42 = vld [vmem:[#allocation9 + $0x28] ss:$16 sps:$4 sm:$0xff]  }
 0x249   :  { %4904 = vmatprep.subr.bf16.mxu0 %v6758_v44  ;;  %v3250_v41 = vpack.i.b16 %v3231_v40, %v3231_v40  ;;  %v6866_v40 = vld [vmem:[#allocation9 + $0x524] ss:$16 sps:$4 sm:$0xff]  }
 0x24a   :  { %3113 = vmatpush1.bf16.msra.mxu1 %v6205_v45  ;;  %v6786_v45 = vld [vmem:[#allocation9 + $0x48] ss:$16 sps:$4 sm:$0xff]  }
 0x24b   :  { %3114 = vmatprep.subr.bf16.mxu1 %v6214_v46  ;;  %v3255_v30 = vrot.slane %v3250_v41, %v7632_v14  ;;  %v6794_v46 = vld [vmem:[#allocation9 + $0x6c] ss:$16 sps:$4 sm:$0xff]   ;;  %v6849_v41 = vld [vmem:[#allocation9 + $0x1c8] ss:$16 sps:$4 sm:$0xff]  }
 0x24c   :  { %4905 = vmatpush1.bf16.msra.mxu0 %v6756_v22 }
 0x24d   :  { %4906 = vmatprep.subr.bf16.mxu0 %v6761_v49 }
 0x24e   :  { %3115 = vmatpush1.bf16.msra.mxu1 %v6213_v50 }
 0x24f   :  { %3116 = vmatprep.subr.bf16.mxu1 %v6222_v52 }
 0x250   :  { %4907 = vmatpush1.bf16.msra.mxu0 %v6759_v53 }
 0x251   :  { %4908 = vmatprep.subr.bf16.mxu0 %v6764_v57 }
 0x252   :  { %3117 = vmatpush1.bf16.msra.mxu1 %v6221_v59 }
 0x253   :  { %3118 = vmatprep.subr.bf16.mxu1 %v6230_v61  ;;  %v6798_v61 = vld [vmem:[#allocation9 + $0x88] ss:$16 sps:$4 sm:$0xff]  }
 0x254   :  { %4909 = vmatpush1.bf16.msra.mxu0 %v6762_v62  ;;  %v6803_v62 = vld [vmem:[#allocation9 + $0xac] ss:$16 sps:$4 sm:$0xff]  }
 0x255   :  { %4910 = vmatprep.subr.bf16.mxu0 %v6767_v1 }
 0x256   :  { %3119 = vmatpush1.bf16.msra.mxu1 %v6229_v31  ;;  %v6818_v31 = vld [vmem:[#allocation9 + $0x424] ss:$16 sps:$4 sm:$0xff]  }
 0x257   :  { %3120 = vmatprep.subr.bf16.mxu1 %v6238_v2  ;;  %v6801_v2 = vld [vmem:[#allocation9 + $0xa8] ss:$16 sps:$4 sm:$0xff]  }
 0x258   :  { %4911 = vmatpush1.bf16.msra.mxu0 %v6765_v3  ;;  %v6806_v3 = vld [vmem:[#allocation9 + $0xcc] ss:$16 sps:$4 sm:$0xff]  }
 0x259   :  { %4912 = vmatprep.subr.bf16.mxu0 %v6770_v6  ;;  %v6804_v6 = vld [vmem:[#allocation9 + $0xc8] ss:$16 sps:$4 sm:$0xff]  }
 0x25a   :  { %3121 = vmatpush1.bf16.msra.mxu1 %v6237_v7  ;;  %v6809_v7 = vld [vmem:[#allocation9 + $0xec] ss:$16 sps:$4 sm:$0xff]  }
 0x25b   :  { %3122 = vmatprep.subr.bf16.mxu1 %v6246_v9  ;;  %v6822_v9 = vld [vmem:[#allocation9 + $0x440] ss:$16 sps:$4 sm:$0xff]  }
 0x25c   :  { %4913 = vmatpush1.bf16.msra.mxu0 %v6768_v10  ;;  %v6830_v10 = vld [vmem:[#allocation9 + $0x464] ss:$16 sps:$4 sm:$0xff]  }
 0x25d   :  { %4914 = vmatprep.subr.bf16.mxu0 %v6773_v13  ;;  %v6828_v13 = vld [vmem:[#allocation9 + $0x460] ss:$16 sps:$4 sm:$0xff]  }
 0x25e   :  { %3123 = vmatpush1.bf16.msra.mxu1 %v6245_v23  ;;  %v6836_v23 = vld [vmem:[#allocation9 + $0x484] ss:$16 sps:$4 sm:$0xff]  }
 0x25f   :  { %3124 = vmatprep.subr.bf16.mxu1 %v6254_v15  ;;  %v6813_v15 = vld [vmem:[#allocation9 + $0x108] ss:$16 sps:$4 sm:$0xff]  }
 0x260   :  { %4915 = vmatpush1.bf16.msra.mxu0 %v6771_v16  ;;  %v6821_v16 = vld [vmem:[#allocation9 + $0x12c] ss:$16 sps:$4 sm:$0xff]  }
 0x261   :  { %4916 = vmatprep.subr.bf16.mxu0 %v6779_v20  ;;  %v6819_v20 = vld [vmem:[#allocation9 + $0x128] ss:$16 sps:$4 sm:$0xff]  }
 0x262   :  { %3125 = vmatpush1.bf16.msra.mxu1 %v6253_v25  ;;  %v6827_v25 = vld [vmem:[#allocation9 + $0x14c] ss:$16 sps:$4 sm:$0xff]  }
 0x263   :  { %3135 = vmatprep.subr.bf16.mxu1 %v6262_v26  ;;  %v6840_v26 = vld [vmem:[#allocation9 + $0x4a0] ss:$16 sps:$4 sm:$0xff]  }
 0x264   :  { %4917 = vmatpush1.bf16.msra.mxu0 %v6777_v27  ;;  %v6848_v27 = vld [vmem:[#allocation9 + $0x4c4] ss:$16 sps:$4 sm:$0xff]  }
 0x265   :  { %4918 = vmatprep.subr.bf16.mxu0 %v6785_v28  ;;  %3127 = vmatmul.mubr.bf16.vlgmr.msra.gmra.mrb[8].mxu1 %v7588_v37  ;;  %v3233_v37 = vcombine.high %v7630_v8, %v7630_v8  ;;  %v6825_v28 = vld [vmem:[#allocation9 + $0x148] ss:$16 sps:$4 sm:$0xff]  }
 0x266   :  { %3136 = vmatpush1.bf16.msra.mxu1 %v6261_v29  ;;  %3167 = vmatprep.mubr.bf16.mxu1 %v7401_v43  ;;  %v7176_v43 = vld [vmem:[#allocation3 + $0x18] ss:$0 sps:$4 sm:$0xff]   ;;  %v6833_v29 = vld [vmem:[#allocation9 + $0x16c] ss:$16 sps:$4 sm:$0xff]  }
 0x267   :  { %5015 = vmatprep.subr.bf16.mxu1 %v6776_v55  ;;  %v3257_v44 = vpack.i.b16 %v3233_v37, %v3233_v37  ;;  %v6846_v55 = vld [vmem:[#allocation9 + $0x4c0] ss:$16 sps:$4 sm:$0xff]   ;;  %v6843_v37 = vld [vmem:[#allocation9 + $0x1a8] ss:$16 sps:$4 sm:$0xff]  }
 0x268   :  { %4919 = vmatpush1.bf16.msra.mxu0 %v6783_v56  ;;  %v6854_v56 = vld [vmem:[#allocation9 + $0x4e4] ss:$16 sps:$4 sm:$0xff]  }
 0x269   :  { %4920 = vmatprep.subr.bf16.mxu0 %v6791_v32  ;;  %v3262_v8 = vrot.slane %v3257_v44, %v7632_v14  ;;  %v6831_v32 = vld [vmem:[#allocation9 + $0x168] ss:$16 sps:$4 sm:$0xff]   ;;  %v6857_v44 = vld [vmem:[#allocation9 + $0x1ec] ss:$16 sps:$4 sm:$0xff]  }
 0x26c   :  { %4921 = vmatpush1.bf16.msra.mxu0 %v6789_v33  ;;  %v6839_v33 = vld [vmem:[#allocation9 + $0x18c] ss:$16 sps:$4 sm:$0xff]  }
 0x26d   :  { %4922 = vmatprep.subr.bf16.mxu0 %v6797_v34  ;;  %v6852_v34 = vld [vmem:[#allocation9 + $0x4e0] ss:$16 sps:$4 sm:$0xff]  }
 0x270   :  { %4923 = vmatpush1.bf16.msra.mxu0 %v6795_v35  ;;  %v6860_v35 = vld [vmem:[#allocation9 + $0x504] ss:$16 sps:$4 sm:$0xff]  }
 0x271   :  { %4933 = vmatprep.subr.bf16.mxu0 %v6812_v38  ;;  %6266 = vmatmul.mubr.msk.bf16.vlgmr.msra.gmra.mrb[8].mxu1 %vm2516_vm0, %v7176_v43  ;;  %v6837_v38 = vld [vmem:[#allocation9 + $0x188] ss:$16 sps:$4 sm:$0xff]   ;;  %v6851_v43 = vld [vmem:[#allocation9 + $0x1cc] ss:$16 sps:$4 sm:$0xff]  }
 0x272   :  { %5016 = vmatpush1.bf16.msra.mxu1 %v6774_v36  ;;  %5047 = vmatprep.mubr.bf16.mxu1 %v7641_v60  ;;  %v6792_v60 = vld [vmem:[#allocation9 + $0x68] ss:$16 sps:$4 sm:$0xff]   ;;  %v6845_v36 = vld [vmem:[#allocation9 + $0x1ac] ss:$16 sps:$4 sm:$0xff]  }
 0x273   :  { %5017 = vmatprep.subr.bf16.mxu1 %v6782_v39  ;;  %v6858_v39 = vld [vmem:[#allocation9 + $0x500] ss:$16 sps:$4 sm:$0xff]  }
 0x276   :  { %5018 = vmatpush1.bf16.msra.mxu1 %v6780_v42  ;;  %v6864_v42 = vld [vmem:[#allocation9 + $0x520] ss:$16 sps:$4 sm:$0xff]  }
 0x277   :  { %5019 = vmatprep.subr.bf16.mxu1 %v6788_v58  ;;  %v6872_v58 = vld [vmem:[#allocation9 + $0x544] ss:$16 sps:$4 sm:$0xff]  }
 0x278   :  { %v2841_v22 = vpop.f32.mrb[4].mxu1 }
 0x279   :  { %v3178_v47 = vpack.c.bf16 %v2841_v22, %v2841_v22  ;;  %v2843_v48 = vpop.f32.mrb[5].mxu1  ;;  %v6863_v22 = vld [vmem:[#allocation9 + $0x20c] ss:$16 sps:$4 sm:$0xff]  }
 0x27a   :  { %5020 = vmatpush1.bf16.msra.mxu1 %v6786_v45  ;;  %v3179_v49 = vpack.c.bf16 %v2843_v48, %v2843_v48  ;;  %v2845_v50 = vpop.f32.mrb[6].mxu1  ;;  %v6870_v45 = vld [vmem:[#allocation9 + $0x540] ss:$16 sps:$4 sm:$0xff]   ;;  %v6861_v48 = vld [vmem:[#allocation9 + $0x208] ss:$16 sps:$4 sm:$0xff]  }
 0x27b   :  { %v3293_v52 = vadd.bf16 %v3255_v30, %v3178_v47  ;;  %v2846_v53 = vpop.f32.mrb[7].mxu1  ;;  %5021 = vmatprep.subr.bf16.mxu1 %v6794_v46  ;;  %v6878_v30 = vld [vmem:[#allocation9 + $0x564] ss:$16 sps:$4 sm:$0xff]   ;;  %v6855_v46 = vld [vmem:[#allocation9 + $0x1e8] ss:$16 sps:$4 sm:$0xff]  }
 0x27c   :  { %v3294_v21 = vadd.bf16 %v3262_v8, %v3179_v49  ;;  %v6876_v8 = vld [vmem:[#allocation9 + $0x560] ss:$16 sps:$4 sm:$0xff]   ;;  %v6884_v47 = vld [vmem:[#allocation9 + $0x584] ss:$16 sps:$4 sm:$0xff]   ;;  %v6869_v49 = vld [vmem:[#allocation9 + $0x22c] ss:$16 sps:$4 sm:$0xff]  }
 0x27d   :  { %v3301_v57 = vmul.bf16 1045249613, %v3293_v52  ;;  %v6882_v50 = vld [vmem:[#allocation9 + $0x580] ss:$16 sps:$4 sm:$0xff]   ;;  %v6867_v53 = vld [vmem:[#allocation9 + $0x228] ss:$16 sps:$4 sm:$0xff]  }
 0x27e   :  { %v3302_v59 = vmul.bf16 1045249613, %v3294_v21  ;;  %5022 = vmatpush1.bf16.msra.mxu1 %v6792_v60  ;;  %v6890_v60 = vld [vmem:[#allocation9 + $0x5a4] ss:$16 sps:$4 sm:$0xff]  }
 0x27f   :  { %5023 = vmatprep.subr.bf16.mxu1 %v6800_v19  ;;  %v7670_v1 = vmax.bf16 %v3301_v57, %v3293_v52  ;;  %v3186_v52 = vcombine.high %v7618_v54, %v7618_v54  ;;  %v6875_v19 = vld [vmem:[#allocation9 + $0x24c] ss:$16 sps:$4 sm:$0xff]   ;;  %v6903_v54 = vld [vmem:[#allocation9 + $0x5e4] ss:$16 sps:$4 sm:$0xff]  }
 0x280   :  { %v7668_v24 = vmax.bf16 %v3302_v59, %v3294_v21  ;;  %v6888_v21 = vld [vmem:[#allocation9 + $0x5a0] ss:$16 sps:$4 sm:$0xff]   ;;  %v6897_v59 = vld [vmem:[#allocation9 + $0x5c4] ss:$16 sps:$4 sm:$0xff]  }
 0x281   :  { %v3200_v57 = vrot.slane %v3186_v52, %v7615_v51  ;;  %v6985_v52 = vld [vmem:[#allocation9 + $0x6a0] ss:$16 sps:$4 sm:$0xff]  }
 0x282   :  { %5024 = vmatpush1.bf16.msra.mxu1 %v6798_v61  ;;  %4924 = vmatprep.mubr.bf16.mxu0 %v7668_v24  ;;  %v6873_v61 = vld [vmem:[#allocation9 + $0x248] ss:$16 sps:$4 sm:$0xff]  }
 0x283   :  { %4925 = vmatmul.mubr.bf16.vlgmr.msra.gmra.mrb[8].mxu0 %v7670_v1  ;;  %5025 = vmatprep.subr.bf16.mxu1 %v6803_v62  ;;  %v6895_v62 = vld [vmem:[#allocation9 + $0x5c0] ss:$16 sps:$4 sm:$0xff]  }
 0x284   :  { %4934 = vmatpush1.bf16.msra.mxu0 %v6810_v0  ;;  %v3202_v0 = vcombine.high %v3200_v57, %v3200_v57 }
 0x285   :  { %4935 = vmatprep.subr.bf16.mxu0 %v6818_v31  ;;  %v6887_v31 = vld [vmem:[#allocation9 + $0x28c] ss:$16 sps:$4 sm:$0xff]  }
 0x286   :  { %5026 = vmatpush1.bf16.msra.mxu1 %v6801_v2  ;;  %v7680_v2 = vrot.slane %v3200_v57, %v7615_v51  ;;  %v6991_v57 = vld [vmem:[#allocation9 + $0x6c0] ss:$16 sps:$4 sm:$0xff]  }
 0x287   :  { %5027 = vmatprep.subr.bf16.mxu1 %v6806_v3  ;;  %v6901_v3 = vld [vmem:[#allocation9 + $0x5e0] ss:$16 sps:$4 sm:$0xff]  }
 0x288   :  { %4936 = vmatpush1.bf16.msra.mxu0 %v6816_v63  ;;  %v7683_v63 = vrot.slane %v3202_v0, %v7615_v51  ;;  %v6928_v0 = vld [vmem:[#allocation9 + $0x3e8] ss:$16 sps:$4 sm:$0xff]  }
 0x289   :  { %4937 = vmatprep.subr.bf16.mxu0 %v6824_v5  ;;  %v6957_v5 = vld [vmem:[#allocation9 + $0x604] ss:$16 sps:$4 sm:$0xff]  }
 0x28a   :  { %5028 = vmatpush1.bf16.msra.mxu1 %v6804_v6  ;;  %v6885_v6 = vld [vmem:[#allocation9 + $0x288] ss:$16 sps:$4 sm:$0xff]  }
 0x28b   :  { %5029 = vmatprep.subr.bf16.mxu1 %v6809_v7  ;;  %v6894_v7 = vld [vmem:[#allocation9 + $0x2ac] ss:$16 sps:$4 sm:$0xff]  }
 0x28c   :  { %4938 = vmatpush1.bf16.msra.mxu0 %v6822_v9  ;;  %v3264_v9 = vpack.i.b16 %v7680_v2, %v7680_v2 }
 0x28d   :  { %4939 = vmatprep.subr.bf16.mxu0 %v6830_v10  ;;  %v3271_v10 = vpack.i.b16 %v7683_v63, %v7683_v63 }
 0x28e   :  { %5030 = vmatpush1.bf16.msra.mxu1 %v6807_v11  ;;  %v6892_v11 = vld [vmem:[#allocation9 + $0x2a8] ss:$16 sps:$4 sm:$0xff]  }
 0x28f   :  { %5031 = vmatprep.subr.bf16.mxu1 %v6815_v12  ;;  %v6900_v12 = vld [vmem:[#allocation9 + $0x2cc] ss:$16 sps:$4 sm:$0xff]  }
 0x290   :  { %4940 = vmatpush1.bf16.msra.mxu0 %v6828_v13  ;;  %v3269_v13 = vrot.slane %v3264_v9, %v7632_v14  ;;  %v6934_v9 = vld [vmem:[#allocation9 + $0x428] ss:$16 sps:$4 sm:$0xff]  }
 0x291   :  { %4941 = vmatprep.subr.bf16.mxu0 %v6836_v23 }
 0x292   :  { %5032 = vmatpush1.bf16.msra.mxu1 %v6813_v15  ;;  %v3276_v15 = vrot.slane %v3271_v10, %v7632_v14  ;;  %v7017_v10 = vld [vmem:[#allocation9 + $0x744] ss:$16 sps:$4 sm:$0xff]  }
 0x293   :  { %5033 = vmatprep.subr.bf16.mxu1 %v6821_v16 }
 0x294   :  { %4942 = vmatpush1.bf16.msra.mxu0 %v6834_v17 }
 0x295   :  { %4943 = vmatprep.subr.bf16.mxu0 %v6842_v18  ;;  %v6898_v18 = vld [vmem:[#allocation9 + $0x2c8] ss:$16 sps:$4 sm:$0xff]  }
 0x296   :  { %5034 = vmatpush1.bf16.msra.mxu1 %v6819_v20 }
 0x297   :  { %5035 = vmatprep.subr.bf16.mxu1 %v6827_v25 }
 0x298   :  { %4944 = vmatpush1.bf16.msra.mxu0 %v6840_v26  ;;  %v6906_v26 = vld [vmem:[#allocation9 + $0x2ec] ss:$16 sps:$4 sm:$0xff]  }
 0x299   :  { %4945 = vmatprep.subr.bf16.mxu0 %v6848_v27 }
 0x29a   :  { %5036 = vmatpush1.bf16.msra.mxu1 %v6825_v28 }
 0x29b   :  { %5037 = vmatprep.subr.bf16.mxu1 %v6833_v29 }
 0x29c   :  { %4946 = vmatpush1.bf16.msra.mxu0 %v6846_v55 }
 0x29d   :  { %4947 = vmatprep.subr.bf16.mxu0 %v6854_v56  ;;  %v6904_v56 = vld [vmem:[#allocation9 + $0x2e8] ss:$16 sps:$4 sm:$0xff]  }
 0x29e   :  { %5038 = vmatpush1.bf16.msra.mxu1 %v6831_v32 }
 0x29f   :  { %5039 = vmatprep.subr.bf16.mxu1 %v6839_v33  ;;  %v6909_v33 = vld [vmem:[#allocation9 + $0x30c] ss:$16 sps:$4 sm:$0xff]  }
 0x2a0   :  { %4948 = vmatpush1.bf16.msra.mxu0 %v6852_v34 }
 0x2a1   :  { %4949 = vmatprep.subr.bf16.mxu0 %v6860_v35  ;;  %v6955_v35 = vld [vmem:[#allocation9 + $0x600] ss:$16 sps:$4 sm:$0xff]  }
 0x2a2   :  { %5040 = vmatpush1.bf16.msra.mxu1 %v6837_v38 }
 0x2a3   :  { %5041 = vmatprep.subr.bf16.mxu1 %v6845_v36  ;;  %v6907_v36 = vld [vmem:[#allocation9 + $0x308] ss:$16 sps:$4 sm:$0xff]  }
 0x2a4   :  { %4950 = vmatpush1.bf16.msra.mxu0 %v6858_v39  ;;  %v6963_v39 = vld [vmem:[#allocation9 + $0x624] ss:$16 sps:$4 sm:$0xff]  }
 0x2a5   :  { %4951 = vmatprep.subr.bf16.mxu0 %v6866_v40  ;;  %v6912_v40 = vld [vmem:[#allocation9 + $0x32c] ss:$16 sps:$4 sm:$0xff]  }
 0x2a6   :  { %5042 = vmatpush1.bf16.msra.mxu1 %v6843_v37  ;;  %v6961_v37 = vld [vmem:[#allocation9 + $0x620] ss:$16 sps:$4 sm:$0xff]  }
 0x2a7   :  { %5043 = vmatprep.subr.bf16.mxu1 %v6851_v43  ;;  %v6910_v43 = vld [vmem:[#allocation9 + $0x328] ss:$16 sps:$4 sm:$0xff]  }
 0x2a8   :  { %4952 = vmatpush1.bf16.msra.mxu0 %v6864_v42  ;;  %v6969_v42 = vld [vmem:[#allocation9 + $0x644] ss:$16 sps:$4 sm:$0xff]  }
 0x2a9   :  { %4953 = vmatprep.subr.bf16.mxu0 %v6872_v58  ;;  %v6915_v58 = vld [vmem:[#allocation9 + $0x34c] ss:$16 sps:$4 sm:$0xff]  }
 0x2aa   :  { %5044 = vmatpush1.bf16.msra.mxu1 %v6849_v41  ;;  %v6967_v41 = vld [vmem:[#allocation9 + $0x640] ss:$16 sps:$4 sm:$0xff]  }
 0x2ab   :  { %5045 = vmatprep.subr.bf16.mxu1 %v6857_v44  ;;  %v6913_v44 = vld [vmem:[#allocation9 + $0x348] ss:$16 sps:$4 sm:$0xff]  }
 0x2ac   :  { %4954 = vmatpush1.bf16.msra.mxu0 %v6870_v45  ;;  %v6975_v45 = vld [vmem:[#allocation9 + $0x664] ss:$16 sps:$4 sm:$0xff]  }
 0x2ad   :  { %4955 = vmatprep.subr.bf16.mxu0 %v6878_v30  ;;  %v6918_v30 = vld [vmem:[#allocation9 + $0x36c] ss:$16 sps:$4 sm:$0xff]  }
 0x2ae   :  { %5046 = vmatpush1.bf16.msra.mxu1 %v6855_v46  ;;  %v6973_v46 = vld [vmem:[#allocation9 + $0x660] ss:$16 sps:$4 sm:$0xff]  }
 0x2af   :  { %5056 = vmatprep.subr.bf16.mxu1 %v6863_v22  ;;  %v6916_v22 = vld [vmem:[#allocation9 + $0x368] ss:$16 sps:$4 sm:$0xff]  }
 0x2b0   :  { %4956 = vmatpush1.bf16.msra.mxu0 %v6876_v8  ;;  %v6981_v8 = vld [vmem:[#allocation9 + $0x684] ss:$16 sps:$4 sm:$0xff]  }
 0x2b1   :  { %5048 = vmatmul.mubr.bf16.vlgmr.msra.gmra.mrb[12].mxu1 %v7655_v4  ;;  %4957 = vmatprep.subr.bf16.mxu0 %v6884_v47  ;;  %v6881_v4 = vld [vmem:[#allocation9 + $0x26c] ss:$16 sps:$4 sm:$0xff]  }
 0x2b2   :  { %5057 = vmatpush1.bf16.msra.mxu1 %v6861_v48  ;;  %5088 = vmatprep.mubr.bf16.mxu1 %v7668_v24  ;;  %v6879_v24 = vld [vmem:[#allocation9 + $0x268] ss:$16 sps:$4 sm:$0xff]   ;;  %v6921_v47 = vld [vmem:[#allocation9 + $0x38c] ss:$16 sps:$4 sm:$0xff]   ;;  %v6979_v48 = vld [vmem:[#allocation9 + $0x680] ss:$16 sps:$4 sm:$0xff]  }
 0x2b3   :  { %5058 = vmatprep.subr.bf16.mxu1 %v6869_v49  ;;  %v6919_v49 = vld [vmem:[#allocation9 + $0x388] ss:$16 sps:$4 sm:$0xff]  }
 0x2b4   :  { %4958 = vmatpush1.bf16.msra.mxu0 %v6882_v50  ;;  %v6987_v50 = vld [vmem:[#allocation9 + $0x6a4] ss:$16 sps:$4 sm:$0xff]  }
 0x2b5   :  { %4959 = vmatprep.subr.bf16.mxu0 %v6890_v60  ;;  %v6924_v60 = vld [vmem:[#allocation9 + $0x3ac] ss:$16 sps:$4 sm:$0xff]  }
 0x2b6   :  { %5059 = vmatpush1.bf16.msra.mxu1 %v6867_v53  ;;  %v6922_v53 = vld [vmem:[#allocation9 + $0x3a8] ss:$16 sps:$4 sm:$0xff]  }
 0x2b7   :  { %5060 = vmatprep.subr.bf16.mxu1 %v6875_v19  ;;  %v6993_v19 = vld [vmem:[#allocation9 + $0x6c4] ss:$16 sps:$4 sm:$0xff]  }
 0x2b8   :  { %4960 = vmatpush1.bf16.msra.mxu0 %v6888_v21  ;;  %v6927_v21 = vld [vmem:[#allocation9 + $0x3cc] ss:$16 sps:$4 sm:$0xff]  }
 0x2b9   :  { %4961 = vmatprep.subr.bf16.mxu0 %v6897_v59  ;;  %v6925_v59 = vld [vmem:[#allocation9 + $0x3c8] ss:$16 sps:$4 sm:$0xff]  }
 0x2ba   :  { %5061 = vmatpush1.bf16.msra.mxu1 %v6873_v61  ;;  %v6999_v61 = vld [vmem:[#allocation9 + $0x6e4] ss:$16 sps:$4 sm:$0xff]  }
 0x2bb   :  { %5062 = vmatprep.subr.bf16.mxu1 %v6881_v4  ;;  %v6930_v4 = vld [vmem:[#allocation9 + $0x3ec] ss:$16 sps:$4 sm:$0xff]  }
 0x2bc   :  { %4962 = vmatpush1.bf16.msra.mxu0 %v6895_v62  ;;  %v6997_v62 = vld [vmem:[#allocation9 + $0x6e0] ss:$16 sps:$4 sm:$0xff]  }
 0x2bd   :  { %4963 = vmatprep.subr.bf16.mxu0 %v6903_v54  ;;  %v7005_v54 = vld [vmem:[#allocation9 + $0x704] ss:$16 sps:$4 sm:$0xff]  }
 0x2be   :  { %5063 = vmatpush1.bf16.msra.mxu1 %v6879_v24  ;;  %v6933_v24 = vld [vmem:[#allocation9 + $0x40c] ss:$16 sps:$4 sm:$0xff]  }
 0x2bf   :  { %5064 = vmatprep.subr.bf16.mxu1 %v6887_v31  ;;  %v7003_v31 = vld [vmem:[#allocation9 + $0x700] ss:$16 sps:$4 sm:$0xff]  }
 0x2c0   :  { %4964 = vmatpush1.bf16.msra.mxu0 %v6901_v3  ;;  %v6931_v3 = vld [vmem:[#allocation9 + $0x408] ss:$16 sps:$4 sm:$0xff]  }
 0x2c1   :  { %4974 = vmatprep.subr.bf16.mxu0 %v6957_v5  ;;  %v6936_v5 = vld [vmem:[#allocation9 + $0x42c] ss:$16 sps:$4 sm:$0xff]  }
 0x2c2   :  { %5065 = vmatpush1.bf16.msra.mxu1 %v6885_v6  ;;  %v7011_v6 = vld [vmem:[#allocation9 + $0x724] ss:$16 sps:$4 sm:$0xff]  }
 0x2c3   :  { %5066 = vmatprep.subr.bf16.mxu1 %v6894_v7  ;;  %v7009_v7 = vld [vmem:[#allocation9 + $0x720] ss:$16 sps:$4 sm:$0xff]  }
 0x2c6   :  { %v3005_v23 = vpop.f32.mrb[4].mxu0  ;;  %5067 = vmatpush1.bf16.msra.mxu1 %v6892_v11  ;;  %v6939_v11 = vld [vmem:[#allocation9 + $0x44c] ss:$16 sps:$4 sm:$0xff]  }
 0x2c7   :  { %v3180_v16 = vpack.c.bf16 %v3005_v23, %v3005_v23  ;;  %v3007_v17 = vpop.f32.mrb[5].mxu0  ;;  %5068 = vmatprep.subr.bf16.mxu1 %v6900_v12  ;;  %v7015_v12 = vld [vmem:[#allocation9 + $0x740] ss:$16 sps:$4 sm:$0xff]   ;;  %v7023_v23 = vld [vmem:[#allocation9 + $0x764] ss:$16 sps:$4 sm:$0xff]  }
 0x2c8   :  { %v3181_v20 = vpack.c.bf16 %v3007_v17, %v3007_v17  ;;  %v3009_v25 = vpop.f32.mrb[6].mxu0  ;;  %v7029_v17 = vld [vmem:[#allocation9 + $0x784] ss:$16 sps:$4 sm:$0xff]  }
 0x2c9   :  { %v3295_v27 = vadd.bf16 %v3269_v13, %v3180_v16  ;;  %v3010_v28 = vpop.f32.mrb[7].mxu0  ;;  %v6937_v13 = vld [vmem:[#allocation9 + $0x448] ss:$16 sps:$4 sm:$0xff]  }
 0x2ca   :  { %v3296_v29 = vadd.bf16 %v3276_v15, %v3181_v20  ;;  %5069 = vmatpush1.bf16.msra.mxu1 %v6898_v18  ;;  %v6942_v15 = vld [vmem:[#allocation9 + $0x46c] ss:$16 sps:$4 sm:$0xff]   ;;  %v6940_v16 = vld [vmem:[#allocation9 + $0x468] ss:$16 sps:$4 sm:$0xff]   ;;  %v7027_v20 = vld [vmem:[#allocation9 + $0x780] ss:$16 sps:$4 sm:$0xff]  }
 0x2cb   :  { %v3303_v55 = vmul.bf16 1045249613, %v3295_v27  ;;  %5070 = vmatprep.subr.bf16.mxu1 %v6906_v26  ;;  %v6945_v18 = vld [vmem:[#allocation9 + $0x48c] ss:$16 sps:$4 sm:$0xff]   ;;  %v6943_v25 = vld [vmem:[#allocation9 + $0x488] ss:$16 sps:$4 sm:$0xff]  }
 0x2cc   :  { %v3304_v32 = vmul.bf16 1045249613, %v3296_v29  ;;  %v7035_v26 = vld [vmem:[#allocation9 + $0x7a4] ss:$16 sps:$4 sm:$0xff]   ;;  %v7033_v28 = vld [vmem:[#allocation9 + $0x7a0] ss:$16 sps:$4 sm:$0xff]  }
 0x2cd   :  { %v7693_v38 = vmax.bf16 %v3303_v55, %v3295_v27  ;;  %v6948_v27 = vld [vmem:[#allocation9 + $0x4ac] ss:$16 sps:$4 sm:$0xff]   ;;  %v7041_v55 = vld [vmem:[#allocation9 + $0x7c4] ss:$16 sps:$4 sm:$0xff]  }
 0x2ce   :  { %v7691_v34 = vmax.bf16 %v3304_v32, %v3296_v29  ;;  %5071 = vmatpush1.bf16.msra.mxu1 %v6904_v56  ;;  %v6946_v29 = vld [vmem:[#allocation9 + $0x4a8] ss:$16 sps:$4 sm:$0xff]   ;;  %v6951_v56 = vld [vmem:[#allocation9 + $0x4cc] ss:$16 sps:$4 sm:$0xff]   ;;  %v7039_v32 = vld [vmem:[#allocation9 + $0x7c0] ss:$16 sps:$4 sm:$0xff]  }
 0x2cf   :  { %5072 = vmatprep.subr.bf16.mxu1 %v6909_v33  ;;  %v6949_v33 = vld [vmem:[#allocation9 + $0x4c8] ss:$16 sps:$4 sm:$0xff]  }
 0x2d0   :  { %4965 = vmatprep.mubr.bf16.mxu0 %v7691_v34 }
 0x2d1   :  { %4966 = vmatmul.mubr.bf16.vlgmr.msra.gmra.mrb[8].mxu0 %v7693_v38 }
 0x2d2   :  { %4975 = vmatpush1.bf16.msra.mxu0 %v6955_v35  ;;  %5073 = vmatpush1.bf16.msra.mxu1 %v6907_v36  ;;  %v6954_v35 = vld [vmem:[#allocation9 + $0x4ec] ss:$16 sps:$4 sm:$0xff]   ;;  %v7045_v36 = vld [vmem:[#allocation9 + $0x7e0] ss:$16 sps:$4 sm:$0xff]  }
 0x2d3   :  { %4976 = vmatprep.subr.bf16.mxu0 %v6963_v39  ;;  %5074 = vmatprep.subr.bf16.mxu1 %v6912_v40  ;;  %v6952_v39 = vld [vmem:[#allocation9 + $0x4e8] ss:$16 sps:$4 sm:$0xff]  }
 0x2d4   :  { %v7077_v40 = vld [vmem:[#allocation12 + $0x4] ss:$8 sps:$4 sm:$0xff]  }
 0x2d6   :  { %4977 = vmatpush1.bf16.msra.mxu0 %v6961_v37  ;;  %5075 = vmatpush1.bf16.msra.mxu1 %v6910_v43  ;;  %v6960_v37 = vld [vmem:[#allocation9 + $0x50c] ss:$16 sps:$4 sm:$0xff]   ;;  %v6958_v43 = vld [vmem:[#allocation9 + $0x508] ss:$16 sps:$4 sm:$0xff]  }
 0x2d7   :  { %4978 = vmatprep.subr.bf16.mxu0 %v6969_v42  ;;  %5076 = vmatprep.subr.bf16.mxu1 %v6915_v58  ;;  %v6966_v42 = vld [vmem:[#allocation9 + $0x52c] ss:$16 sps:$4 sm:$0xff]   ;;  %v6964_v58 = vld [vmem:[#allocation9 + $0x528] ss:$16 sps:$4 sm:$0xff]  }
 0x2da   :  { %4979 = vmatpush1.bf16.msra.mxu0 %v6967_v41  ;;  %5077 = vmatpush1.bf16.msra.mxu1 %v6913_v44  ;;  %v6972_v41 = vld [vmem:[#allocation9 + $0x54c] ss:$16 sps:$4 sm:$0xff]   ;;  %v6970_v44 = vld [vmem:[#allocation9 + $0x548] ss:$16 sps:$4 sm:$0xff]  }
 0x2db   :  { %4980 = vmatprep.subr.bf16.mxu0 %v6975_v45  ;;  %5078 = vmatprep.subr.bf16.mxu1 %v6918_v30  ;;  %v6978_v45 = vld [vmem:[#allocation9 + $0x56c] ss:$16 sps:$4 sm:$0xff]   ;;  %v6976_v30 = vld [vmem:[#allocation9 + $0x568] ss:$16 sps:$4 sm:$0xff]  }
 0x2de   :  { %4981 = vmatpush1.bf16.msra.mxu0 %v6973_v46  ;;  %5079 = vmatpush1.bf16.msra.mxu1 %v6916_v22  ;;  %v6984_v46 = vld [vmem:[#allocation9 + $0x58c] ss:$16 sps:$4 sm:$0xff]   ;;  %v6982_v22 = vld [vmem:[#allocation9 + $0x588] ss:$16 sps:$4 sm:$0xff]  }
 0x2df   :  { %4982 = vmatprep.subr.bf16.mxu0 %v6981_v8  ;;  %5080 = vmatprep.subr.bf16.mxu1 %v6921_v47  ;;  %v6990_v8 = vld [vmem:[#allocation9 + $0x5ac] ss:$16 sps:$4 sm:$0xff]   ;;  %v6988_v47 = vld [vmem:[#allocation9 + $0x5a8] ss:$16 sps:$4 sm:$0xff]  }
 0x2e2   :  { %4983 = vmatpush1.bf16.msra.mxu0 %v6979_v48  ;;  %5081 = vmatpush1.bf16.msra.mxu1 %v6919_v49  ;;  %v6996_v48 = vld [vmem:[#allocation9 + $0x5cc] ss:$16 sps:$4 sm:$0xff]   ;;  %v6994_v49 = vld [vmem:[#allocation9 + $0x5c8] ss:$16 sps:$4 sm:$0xff]  }
 0x2e3   :  { %4984 = vmatprep.subr.bf16.mxu0 %v6987_v50  ;;  %5082 = vmatprep.subr.bf16.mxu1 %v6924_v60  ;;  %v7002_v50 = vld [vmem:[#allocation9 + $0x5ec] ss:$16 sps:$4 sm:$0xff]   ;;  %v7000_v60 = vld [vmem:[#allocation9 + $0x5e8] ss:$16 sps:$4 sm:$0xff]  }
 0x2e6   :  { %4985 = vmatpush1.bf16.msra.mxu0 %v6985_v52  ;;  %5083 = vmatpush1.bf16.msra.mxu1 %v6922_v53  ;;  %v7008_v52 = vld [vmem:[#allocation9 + $0x60c] ss:$16 sps:$4 sm:$0xff]   ;;  %v7006_v53 = vld [vmem:[#allocation9 + $0x608] ss:$16 sps:$4 sm:$0xff]  }
 0x2e7   :  { %4986 = vmatprep.subr.bf16.mxu0 %v6993_v19  ;;  %5084 = vmatprep.subr.bf16.mxu1 %v6927_v21  ;;  %v7014_v19 = vld [vmem:[#allocation9 + $0x62c] ss:$16 sps:$4 sm:$0xff]   ;;  %v7012_v21 = vld [vmem:[#allocation9 + $0x628] ss:$16 sps:$4 sm:$0xff]  }
 0x2ea   :  { %4987 = vmatpush1.bf16.msra.mxu0 %v6991_v57  ;;  %5085 = vmatpush1.bf16.msra.mxu1 %v6925_v59  ;;  %v7020_v57 = vld [vmem:[#allocation9 + $0x64c] ss:$16 sps:$4 sm:$0xff]   ;;  %v7018_v59 = vld [vmem:[#allocation9 + $0x648] ss:$16 sps:$4 sm:$0xff]  }
 0x2eb   :  { %4988 = vmatprep.subr.bf16.mxu0 %v6999_v61  ;;  %5086 = vmatprep.subr.bf16.mxu1 %v6930_v4  ;;  %v7026_v61 = vld [vmem:[#allocation9 + $0x66c] ss:$16 sps:$4 sm:$0xff]   ;;  %v7024_v4 = vld [vmem:[#allocation9 + $0x668] ss:$16 sps:$4 sm:$0xff]  }
 0x2ee   :  { %4989 = vmatpush1.bf16.msra.mxu0 %v6997_v62  ;;  %5087 = vmatpush1.bf16.msra.mxu1 %v6928_v0  ;;  %v7032_v62 = vld [vmem:[#allocation9 + $0x68c] ss:$16 sps:$4 sm:$0xff]   ;;  %v3232_v0 = vcombine.high %v7680_v2, %v7680_v2 }
 0x2ef   :  { %4990 = vmatprep.subr.bf16.mxu0 %v7005_v54  ;;  %5097 = vmatprep.subr.bf16.mxu1 %v6933_v24  ;;  %v3234_v54 = vcombine.high %v7683_v63, %v7683_v63 }
 0x2f0   :  { %v3278_v24 = vpack.i.b16 %v3232_v0, %v3232_v0  ;;  %v7110_v0 = vld [vmem:[#allocation12 + $0xb4] ss:$8 sps:$4 sm:$0xff]  }
 0x2f1   :  { %5089 = vmatmul.mubr.bf16.vlgmr.msra.gmra.mrb[12].mxu1 %v7670_v1  ;;  %v7021_v1 = vld [vmem:[#allocation9 + $0x760] ss:$16 sps:$4 sm:$0xff]  }
 0x2f2   :  { %4991 = vmatpush1.bf16.msra.mxu0 %v7003_v31  ;;  %5098 = vmatpush1.bf16.msra.mxu1 %v6931_v3  ;;  %v7038_v31 = vld [vmem:[#allocation9 + $0x6ac] ss:$16 sps:$4 sm:$0xff]   ;;  %v3285_v3 = vpack.i.b16 %v3234_v54, %v3234_v54 }
 0x2f3   :  { %5129 = vmatprep.mubr.bf16.mxu1 %v7691_v34  ;;  %5099 = vmatprep.subr.bf16.mxu1 %v6936_v5  ;;  %v7047_v34 = vld [vmem:[#allocation9 + $0x7e4] ss:$16 sps:$4 sm:$0xff]   ;;  %v7036_v5 = vld [vmem:[#allocation9 + $0x6a8] ss:$16 sps:$4 sm:$0xff]  }
 0x2f4   :  { %4992 = vmatprep.subr.bf16.mxu0 %v7011_v6  ;;  %v3283_v6 = vrot.slane %v3278_v24, %v7632_v14  ;;  %v7108_v54 = vld [vmem:[#allocation12 + $0xb0] ss:$8 sps:$4 sm:$0xff]   ;;  %v7111_v24 = vld [vmem:[#allocation12 + $0xc0] ss:$8 sps:$4 sm:$0xff]  }
 0x2f6   :  { %4993 = vmatpush1.bf16.msra.mxu0 %v7009_v7  ;;  %5100 = vmatpush1.bf16.msra.mxu1 %v6934_v9  ;;  %v7044_v7 = vld [vmem:[#allocation9 + $0x6cc] ss:$16 sps:$4 sm:$0xff]  }
 0x2f7   :  { %4994 = vmatprep.subr.bf16.mxu0 %v7017_v10  ;;  %5101 = vmatprep.subr.bf16.mxu1 %v6939_v11  ;;  %v3290_v10 = vrot.slane %v3285_v3, %v7632_v14  ;;  %v7114_v3 = vld [vmem:[#allocation12 + $0xd0] ss:$8 sps:$4 sm:$0xff]  }
 0x2fa   :  { %4995 = vmatpush1.bf16.msra.mxu0 %v7015_v12  ;;  %5102 = vmatpush1.bf16.msra.mxu1 %v6937_v13  ;;  %v7042_v13 = vld [vmem:[#allocation9 + $0x6c8] ss:$16 sps:$4 sm:$0xff]  }
 0x2fb   :  { %4996 = vmatprep.subr.bf16.mxu0 %v7023_v23  ;;  %5103 = vmatprep.subr.bf16.mxu1 %v6942_v15 }
 0x2fe   :  { %4997 = vmatpush1.bf16.msra.mxu0 %v7021_v1  ;;  %5104 = vmatpush1.bf16.msra.mxu1 %v6940_v16  ;;  %v7050_v1 = vld [vmem:[#allocation9 + $0x6ec] ss:$16 sps:$4 sm:$0xff]  }
 0x2ff   :  { %4998 = vmatprep.subr.bf16.mxu0 %v7029_v17  ;;  %5105 = vmatprep.subr.bf16.mxu1 %v6945_v18 }
 0x302   :  { %4999 = vmatpush1.bf16.msra.mxu0 %v7027_v20  ;;  %5106 = vmatpush1.bf16.msra.mxu1 %v6943_v25  ;;  %v7048_v20 = vld [vmem:[#allocation9 + $0x6e8] ss:$16 sps:$4 sm:$0xff]  }
 0x303   :  { %5000 = vmatprep.subr.bf16.mxu0 %v7035_v26  ;;  %5107 = vmatprep.subr.bf16.mxu1 %v6948_v27  ;;  %v7053_v26 = vld [vmem:[#allocation9 + $0x70c] ss:$16 sps:$4 sm:$0xff]  }
 0x304   :  { %v7075_v27 = vld [vmem:[#allocation12] ss:$8 sps:$4 sm:$0xff]  }
 0x306   :  { %5001 = vmatpush1.bf16.msra.mxu0 %v7033_v28  ;;  %5108 = vmatpush1.bf16.msra.mxu1 %v6946_v29  ;;  %v7080_v29 = vld [vmem:[#allocation12 + $0x14] ss:$8 sps:$4 sm:$0xff]  }
 0x307   :  { %5002 = vmatprep.subr.bf16.mxu0 %v7041_v55  ;;  %5109 = vmatprep.subr.bf16.mxu1 %v6951_v56  ;;  %v7051_v55 = vld [vmem:[#allocation9 + $0x708] ss:$16 sps:$4 sm:$0xff]   ;;  %v7056_v56 = vld [vmem:[#allocation9 + $0x72c] ss:$16 sps:$4 sm:$0xff]  }
 0x30a   :  { %5003 = vmatpush1.bf16.msra.mxu0 %v7039_v32  ;;  %5110 = vmatpush1.bf16.msra.mxu1 %v6949_v33  ;;  %v7078_v32 = vld [vmem:[#allocation12 + $0x10] ss:$8 sps:$4 sm:$0xff]   ;;  %v7083_v33 = vld [vmem:[#allocation12 + $0x24] ss:$8 sps:$4 sm:$0xff]  }
 0x30b   :  { %5004 = vmatprep.subr.bf16.mxu0 %v7047_v34  ;;  %5111 = vmatprep.subr.bf16.mxu1 %v6954_v35  ;;  %v7054_v34 = vld [vmem:[#allocation9 + $0x728] ss:$16 sps:$4 sm:$0xff]   ;;  %v7059_v35 = vld [vmem:[#allocation9 + $0x74c] ss:$16 sps:$4 sm:$0xff]  }
 0x30e   :  { %5005 = vmatpush1.bf16.msra.mxu0 %v7045_v36  ;;  %5112 = vmatpush1.bf16.msra.mxu1 %v6952_v39  ;;  %v7081_v36 = vld [vmem:[#allocation12 + $0x20] ss:$8 sps:$4 sm:$0xff]   ;;  %v7086_v39 = vld [vmem:[#allocation12 + $0x34] ss:$8 sps:$4 sm:$0xff]  }
 0x30f   :  { %5633 = vmatprep.subr.bf16.mxu0 %v7077_v40  ;;  %5113 = vmatprep.subr.bf16.mxu1 %v6960_v37  ;;  %v7057_v40 = vld [vmem:[#allocation9 + $0x748] ss:$16 sps:$4 sm:$0xff]   ;;  %v7062_v37 = vld [vmem:[#allocation9 + $0x76c] ss:$16 sps:$4 sm:$0xff]  }
 0x312   :  { %5114 = vmatpush1.bf16.msra.mxu1 %v6958_v43  ;;  %v7084_v43 = vld [vmem:[#allocation12 + $0x30] ss:$8 sps:$4 sm:$0xff]  }
 0x313   :  { %5115 = vmatprep.subr.bf16.mxu1 %v6966_v42  ;;  %v7089_v42 = vld [vmem:[#allocation12 + $0x44] ss:$8 sps:$4 sm:$0xff]  }
 0x316   :  { %5116 = vmatpush1.bf16.msra.mxu1 %v6964_v58  ;;  %v7060_v58 = vld [vmem:[#allocation9 + $0x768] ss:$16 sps:$4 sm:$0xff]  }
 0x317   :  { %5117 = vmatprep.subr.bf16.mxu1 %v6972_v41  ;;  %v7065_v41 = vld [vmem:[#allocation9 + $0x78c] ss:$16 sps:$4 sm:$0xff]  }
 0x31a   :  { %5118 = vmatpush1.bf16.msra.mxu1 %v6970_v44  ;;  %v7087_v44 = vld [vmem:[#allocation12 + $0x40] ss:$8 sps:$4 sm:$0xff]  }
 0x31b   :  { %5119 = vmatprep.subr.bf16.mxu1 %v6978_v45  ;;  %v7092_v45 = vld [vmem:[#allocation12 + $0x54] ss:$8 sps:$4 sm:$0xff]  }
 0x31e   :  { %5120 = vmatpush1.bf16.msra.mxu1 %v6976_v30  ;;  %v7063_v30 = vld [vmem:[#allocation9 + $0x788] ss:$16 sps:$4 sm:$0xff]  }
 0x31f   :  { %5121 = vmatprep.subr.bf16.mxu1 %v6984_v46  ;;  %v7068_v46 = vld [vmem:[#allocation9 + $0x7ac] ss:$16 sps:$4 sm:$0xff]  }
 0x322   :  { %5122 = vmatpush1.bf16.msra.mxu1 %v6982_v22  ;;  %v7090_v22 = vld [vmem:[#allocation12 + $0x50] ss:$8 sps:$4 sm:$0xff]  }
 0x323   :  { %5123 = vmatprep.subr.bf16.mxu1 %v6990_v8  ;;  %v7095_v8 = vld [vmem:[#allocation12 + $0x64] ss:$8 sps:$4 sm:$0xff]  }
 0x326   :  { %5124 = vmatpush1.bf16.msra.mxu1 %v6988_v47  ;;  %v7066_v47 = vld [vmem:[#allocation9 + $0x7a8] ss:$16 sps:$4 sm:$0xff]  }
 0x327   :  { %5125 = vmatprep.subr.bf16.mxu1 %v6996_v48  ;;  %v7071_v48 = vld [vmem:[#allocation9 + $0x7cc] ss:$16 sps:$4 sm:$0xff]  }
 0x32a   :  { %5126 = vmatpush1.bf16.msra.mxu1 %v6994_v49  ;;  %v7093_v49 = vld [vmem:[#allocation12 + $0x60] ss:$8 sps:$4 sm:$0xff]  }
 0x32b   :  { %5127 = vmatprep.subr.bf16.mxu1 %v7002_v50  ;;  %v7098_v50 = vld [vmem:[#allocation12 + $0x74] ss:$8 sps:$4 sm:$0xff]  }
 0x32e   :  { %5128 = vmatpush1.bf16.msra.mxu1 %v7000_v60  ;;  %v7069_v60 = vld [vmem:[#allocation9 + $0x7c8] ss:$16 sps:$4 sm:$0xff]  }
 0x32f   :  { %5138 = vmatprep.subr.bf16.mxu1 %v7008_v52  ;;  %v7074_v52 = vld [vmem:[#allocation9 + $0x7ec] ss:$16 sps:$4 sm:$0xff]  }
 0x331   :  { %5130 = vmatmul.mubr.bf16.vlgmr.msra.gmra.mrb[12].mxu1 %v7693_v38  ;;  %v7030_v38 = vld [vmem:[#allocation9 + $0x688] ss:$16 sps:$4 sm:$0xff]  }
 0x332   :  { %5139 = vmatpush1.bf16.msra.mxu1 %v7006_v53  ;;  %v7096_v53 = vld [vmem:[#allocation12 + $0x70] ss:$8 sps:$4 sm:$0xff]  }
 0x333   :  { %5140 = vmatprep.subr.bf16.mxu1 %v7014_v19  ;;  %v7101_v19 = vld [vmem:[#allocation12 + $0x84] ss:$8 sps:$4 sm:$0xff]  }
 0x336   :  { %5141 = vmatpush1.bf16.msra.mxu1 %v7012_v21  ;;  %v7072_v21 = vld [vmem:[#allocation9 + $0x7e8] ss:$16 sps:$4 sm:$0xff]  }
 0x337   :  { %5142 = vmatprep.subr.bf16.mxu1 %v7020_v57  ;;  %v7099_v57 = vld [vmem:[#allocation12 + $0x80] ss:$8 sps:$4 sm:$0xff]  }
 0x33a   :  { %5143 = vmatpush1.bf16.msra.mxu1 %v7018_v59  ;;  %v7104_v59 = vld [vmem:[#allocation12 + $0x94] ss:$8 sps:$4 sm:$0xff]  }
 0x33b   :  { %5144 = vmatprep.subr.bf16.mxu1 %v7026_v61  ;;  %v7102_v61 = vld [vmem:[#allocation12 + $0x90] ss:$8 sps:$4 sm:$0xff]  }
 0x33e   :  { %5145 = vmatpush1.bf16.msra.mxu1 %v7024_v4  ;;  %v7107_v4 = vld [vmem:[#allocation12 + $0xa4] ss:$8 sps:$4 sm:$0xff]  }
 0x33f   :  { %5146 = vmatprep.subr.bf16.mxu1 %v7032_v62  ;;  %v7105_v62 = vld [vmem:[#allocation12 + $0xa0] ss:$8 sps:$4 sm:$0xff]  }
 0x342   :  { %5147 = vmatpush1.bf16.msra.mxu1 %v7030_v38  ;;  %v7113_v38 = vld [vmem:[#allocation12 + $0xc4] ss:$8 sps:$4 sm:$0xff]  }
 0x343   :  { %5148 = vmatprep.subr.bf16.mxu1 %v7038_v31  ;;  %v7116_v31 = vld [vmem:[#allocation12 + $0xd4] ss:$8 sps:$4 sm:$0xff]  }
 0x344   :  { %v3169_v9 = vpop.f32.mrb[8].mxu1 }
 0x345   :  { %v3182_v11 = vpack.c.bf16 %v3169_v9, %v3169_v9  ;;  %v3171_v2 = vpop.f32.mrb[9].mxu1  ;;  %v7120_v9 = vld [vmem:[#allocation12 + $0xf0] ss:$8 sps:$4 sm:$0xff]  }
 0x346   :  { %v3183_v12 = vpack.c.bf16 %v3171_v2, %v3171_v2  ;;  %5149 = vmatpush1.bf16.msra.mxu1 %v7036_v5  ;;  %v3173_v63 = vpop.f32.mrb[10].mxu1  ;;  %v7119_v5 = vld [vmem:[#allocation12 + $0xe4] ss:$8 sps:$4 sm:$0xff]  }
 0x347   :  { %v3297_v23 = vadd.bf16 %v3283_v6, %v3182_v11  ;;  %v3174_v15 = vpop.f32.mrb[11].mxu1  ;;  %5150 = vmatprep.subr.bf16.mxu1 %v7044_v7  ;;  %v7117_v6 = vld [vmem:[#allocation12 + $0xe0] ss:$8 sps:$4 sm:$0xff]   ;;  %v7122_v7 = vld [vmem:[#allocation12 + $0xf4] ss:$8 sps:$4 sm:$0xff]  }
 0x348   :  { %v3298_v16 = vadd.bf16 %v3290_v10, %v3183_v12  ;;  %v7125_v10 = vld [vmem:[#allocation12 + $0x104] ss:$8 sps:$4 sm:$0xff]   ;;  %v6523_v11 = vld.sshfl [vmem:[#allocation11] sm:$0x33 pattern:$0x75316420] }
 0x349   :  { %v3305_v17 = vmul.bf16 1045249613, %v3297_v23  ;;  %v5192_v2 = vcombine.high %v6523_v11, %v6523_v11  ;;  %v7711_v12 = vrot.slane %v6523_v11, %v7615_v51  ;;  %v7167_v11 = vld [vmem:[#allocation12 + $0x1e4] ss:$8 sps:$4 sm:$0xff]  }
 0x34a   :  { %v3306_v18 = vmul.bf16 1045249613, %v3298_v16  ;;  %5151 = vmatpush1.bf16.msra.mxu1 %v7042_v13 }
 0x34b   :  { %5152 = vmatprep.subr.bf16.mxu1 %v7050_v1  ;;  %v7706_v28 = vmax.bf16 %v3305_v17, %v3297_v23  ;;  %v5206_v63 = vrot.slane %v5192_v2, %v7615_v51  ;;  %v5210_v13 = vpack.i.b16 %v7711_v12, %v7711_v12  ;;  %v7165_v2 = vld [vmem:[#allocation12 + $0x1e0] ss:$8 sps:$4 sm:$0xff]  }
 0x34c   :  { %v3314_v25 = vmax.bf16 %v3306_v18, %v3298_v16 }
 0x34d   :  { %v5217_v23 = vpack.i.b16 %v5206_v63, %v5206_v63  ;;  %v5215_v15 = vrot.slane %v5210_v13, %v7632_v14  ;;  %v7170_v13 = vld [vmem:[#allocation12 + $0x1f4] ss:$8 sps:$4 sm:$0xff]  }
 0x34e   :  { %5153 = vmatpush1.bf16.msra.mxu1 %v7048_v20  ;;  %5006 = vmatprep.mubr.bf16.mxu0 %v3314_v25 }
 0x34f   :  { %5170 = vmatprep.mubr.bf16.mxu1 %v3314_v25  ;;  %5007 = vmatmul.mubr.bf16.vlgmr.msra.gmra.mrb[8].mxu0 %v7706_v28  ;;  %v5222_v16 = vrot.slane %v5217_v23, %v7632_v14 }
 0x350   :  { %5154 = vmatprep.subr.bf16.mxu1 %v7053_v26  ;;  %5634 = vmatpush1.bf16.msra.mxu0 %v7075_v27 }
 0x351   :  { %5635 = vmatprep.subr.bf16.mxu0 %v7080_v29 }
 0x352   :  { %5155 = vmatpush1.bf16.msra.mxu1 %v7051_v55 }
 0x353   :  { %5156 = vmatprep.subr.bf16.mxu1 %v7056_v56 }
 0x354   :  { %5636 = vmatpush1.bf16.msra.mxu0 %v7078_v32  ;;  %v7123_v32 = vld [vmem:[#allocation12 + $0x100] ss:$8 sps:$4 sm:$0xff]  }
 0x355   :  { %5637 = vmatprep.subr.bf16.mxu0 %v7083_v33 }
 0x356   :  { %5157 = vmatpush1.bf16.msra.mxu1 %v7054_v34  ;;  %v7128_v34 = vld [vmem:[#allocation12 + $0x114] ss:$8 sps:$4 sm:$0xff]  }
 0x357   :  { %5158 = vmatprep.subr.bf16.mxu1 %v7059_v35  ;;  %v7126_v35 = vld [vmem:[#allocation12 + $0x110] ss:$8 sps:$4 sm:$0xff]  }
 0x358   :  { %5638 = vmatpush1.bf16.msra.mxu0 %v7081_v36  ;;  %v7131_v36 = vld [vmem:[#allocation12 + $0x124] ss:$8 sps:$4 sm:$0xff]  }
 0x359   :  { %5639 = vmatprep.subr.bf16.mxu0 %v7086_v39  ;;  %v7129_v39 = vld [vmem:[#allocation12 + $0x120] ss:$8 sps:$4 sm:$0xff]  }
 0x35a   :  { %5159 = vmatpush1.bf16.msra.mxu1 %v7057_v40  ;;  %v7134_v40 = vld [vmem:[#allocation12 + $0x134] ss:$8 sps:$4 sm:$0xff]  }
 0x35b   :  { %5160 = vmatprep.subr.bf16.mxu1 %v7062_v37  ;;  %v7132_v37 = vld [vmem:[#allocation12 + $0x130] ss:$8 sps:$4 sm:$0xff]  }
 0x35c   :  { %5640 = vmatpush1.bf16.msra.mxu0 %v7084_v43  ;;  %v7137_v43 = vld [vmem:[#allocation12 + $0x144] ss:$8 sps:$4 sm:$0xff]  }
 0x35d   :  { %5641 = vmatprep.subr.bf16.mxu0 %v7089_v42  ;;  %v7135_v42 = vld [vmem:[#allocation12 + $0x140] ss:$8 sps:$4 sm:$0xff]  }
 0x35e   :  { %5161 = vmatpush1.bf16.msra.mxu1 %v7060_v58  ;;  %v7140_v58 = vld [vmem:[#allocation12 + $0x154] ss:$8 sps:$4 sm:$0xff]  }
 0x35f   :  { %5162 = vmatprep.subr.bf16.mxu1 %v7065_v41  ;;  %v5208_v41 = vcombine.high %v5206_v63, %v5206_v63 }
 0x360   :  { %5642 = vmatpush1.bf16.msra.mxu0 %v7087_v44  ;;  %v7138_v44 = vld [vmem:[#allocation12 + $0x150] ss:$8 sps:$4 sm:$0xff]  }
 0x361   :  { %5643 = vmatprep.subr.bf16.mxu0 %v7092_v45  ;;  %v7143_v45 = vld [vmem:[#allocation12 + $0x164] ss:$8 sps:$4 sm:$0xff]  }
 0x362   :  { %5163 = vmatpush1.bf16.msra.mxu1 %v7063_v30  ;;  %v5231_v30 = vpack.i.b16 %v5208_v41, %v5208_v41 }
 0x363   :  { %5164 = vmatprep.subr.bf16.mxu1 %v7068_v46  ;;  %v7141_v46 = vld [vmem:[#allocation12 + $0x160] ss:$8 sps:$4 sm:$0xff]  }
 0x364   :  { %5644 = vmatpush1.bf16.msra.mxu0 %v7090_v22  ;;  %v7146_v22 = vld [vmem:[#allocation12 + $0x174] ss:$8 sps:$4 sm:$0xff]  }
 0x365   :  { %5645 = vmatprep.subr.bf16.mxu0 %v7095_v8 }
 0x366   :  { %5165 = vmatpush1.bf16.msra.mxu1 %v7066_v47  ;;  %v5236_v47 = vrot.slane %v5231_v30, %v7632_v14 }
 0x367   :  { %5166 = vmatprep.subr.bf16.mxu1 %v7071_v48 }
 0x368   :  { %5646 = vmatpush1.bf16.msra.mxu0 %v7093_v49 }
 0x369   :  { %5647 = vmatprep.subr.bf16.mxu0 %v7098_v50 }
 0x36a   :  { %5167 = vmatpush1.bf16.msra.mxu1 %v7069_v60  ;;  %v7144_v60 = vld [vmem:[#allocation12 + $0x170] ss:$8 sps:$4 sm:$0xff]  }
 0x36b   :  { %5168 = vmatprep.subr.bf16.mxu1 %v7074_v52 }
 0x36c   :  { %5648 = vmatpush1.bf16.msra.mxu0 %v7096_v53  ;;  %v7149_v53 = vld [vmem:[#allocation12 + $0x184] ss:$8 sps:$4 sm:$0xff]  }
 0x36d   :  { %5649 = vmatprep.subr.bf16.mxu0 %v7101_v19 }
 0x36e   :  { %5169 = vmatpush1.bf16.msra.mxu1 %v7072_v21 }
 0x370   :  { %5650 = vmatpush1.bf16.msra.mxu0 %v7099_v57  ;;  %v7147_v57 = vld [vmem:[#allocation12 + $0x180] ss:$8 sps:$4 sm:$0xff]  }
 0x371   :  { %5171 = vmatmul.mubr.bf16.vlgmr.msra.gmra.mrb[12].mxu1 %v7706_v28  ;;  %5651 = vmatprep.subr.bf16.mxu0 %v7104_v59  ;;  %v7152_v59 = vld [vmem:[#allocation12 + $0x194] ss:$8 sps:$4 sm:$0xff]  }
 0x374   :  { %5652 = vmatpush1.bf16.msra.mxu0 %v7102_v61 }
 0x375   :  { %5653 = vmatprep.subr.bf16.mxu0 %v7107_v4  ;;  %v7150_v4 = vld [vmem:[#allocation12 + $0x190] ss:$8 sps:$4 sm:$0xff]  }
 0x378   :  { %5654 = vmatpush1.bf16.msra.mxu0 %v7105_v62  ;;  %v7155_v62 = vld [vmem:[#allocation12 + $0x1a4] ss:$8 sps:$4 sm:$0xff]  }
 0x379   :  { %5655 = vmatprep.subr.bf16.mxu0 %v7110_v0  ;;  %v7153_v0 = vld [vmem:[#allocation12 + $0x1a0] ss:$8 sps:$4 sm:$0xff]  }
 0x37c   :  { %5656 = vmatpush1.bf16.msra.mxu0 %v7108_v54  ;;  %v7158_v54 = vld [vmem:[#allocation12 + $0x1b4] ss:$8 sps:$4 sm:$0xff]  }
 0x37d   :  { %5657 = vmatprep.subr.bf16.mxu0 %v7113_v38  ;;  %v7156_v38 = vld [vmem:[#allocation12 + $0x1b0] ss:$8 sps:$4 sm:$0xff]  }
 0x380   :  { %5658 = vmatpush1.bf16.msra.mxu0 %v7111_v24  ;;  %v5207_v24 = vcombine.high %v7711_v12, %v7711_v12  ;;  %v7168_v12 = vld [vmem:[#allocation12 + $0x1f0] ss:$8 sps:$4 sm:$0xff]  }
 0x381   :  { %5659 = vmatprep.subr.bf16.mxu0 %v7116_v31  ;;  %v7161_v31 = vld [vmem:[#allocation12 + $0x1c4] ss:$8 sps:$4 sm:$0xff]  }
 0x384   :  { %5660 = vmatpush1.bf16.msra.mxu0 %v7114_v3  ;;  %v7159_v3 = vld [vmem:[#allocation12 + $0x1c0] ss:$8 sps:$4 sm:$0xff]  }
 0x385   :  { %5661 = vmatprep.subr.bf16.mxu0 %v7119_v5  ;;  %v5224_v5 = vpack.i.b16 %v5207_v24, %v5207_v24 }
 0x388   :  { %5662 = vmatpush1.bf16.msra.mxu0 %v7117_v6  ;;  %v7164_v6 = vld [vmem:[#allocation12 + $0x1d4] ss:$8 sps:$4 sm:$0xff]  }
 0x389   :  { %5663 = vmatprep.subr.bf16.mxu0 %v7122_v7  ;;  %v7162_v7 = vld [vmem:[#allocation12 + $0x1d0] ss:$8 sps:$4 sm:$0xff]  }
 0x38c   :  { %5664 = vmatpush1.bf16.msra.mxu0 %v7120_v9 }
 0x38d   :  { %5674 = vmatprep.subr.bf16.mxu0 %v7125_v10  ;;  %v5229_v10 = vrot.slane %v5224_v5, %v7632_v14 }
 0x422   :  { %v5008_v1 = vpop.f32.mrb[8].mxu0 }
 0x423   :  { %v5179_v17 = vpack.c.bf16 %v5008_v1, %v5008_v1  ;;  %v5010_v18 = vpop.f32.mrb[9].mxu0  ;;  %v6589_v1 = vld.sshfl [vmem:[#allocation15] sm:$0x11 pattern:$0x75316420] }
 0x424   :  { %v5180_v20 = vpack.c.bf16 %v5010_v18, %v5010_v18  ;;  %v5012_v25 = vpop.f32.mrb[10].mxu0  ;;  %v5762_v18 = vld [vmem:[#allocation2] sm:$0x1] }
 0x425   :  { %v5237_v26 = vadd.bf16 %v5215_v15, %v5179_v17  ;;  %v5013_v27 = vpop.f32.mrb[11].mxu0  ;;  %5765 = vperm.xlu0 %6682, %v5762_v18  }
 0x426   :  { %v5238_v28 = vadd.bf16 %v5222_v16, %v5180_v20  ;;  %v5780_v16 = vcombine.high %v6589_v1, %v6589_v1  ;;  %v6588_v20 = vld.sshfl [vmem:[#allocation14] sm:$0x11 pattern:$0x75316420] }
 0x427   :  { %v5241_v29 = vmul.bf16 1045249613, %v5237_v26  ;;  %v5726_v25 = vcombine.high %v6588_v20, %v6588_v20 }
 0x428   :  { %v5242_v55 = vmul.bf16 1045249613, %v5238_v28  ;;  %v5794_v17 = vrot.slane %v5780_v16, %v7615_v51 }
 0x429   :  { %v5245_v33 = vmax.bf16 %v5241_v29, %v5237_v26  ;;  %v5733_v26 = vrot.slane %v6588_v20, %v7615_v51  ;;  %v5740_v27 = vrot.slane %v5726_v25, %v7615_v51 }
 0x42a   :  { %v5246_v56 = vmax.bf16 %v5242_v55, %v5238_v28  ;;  %5829 = vmatprep.mubr.bf16.mxu1 %v5794_v17 }
 0x42b   :  { %v5742_v28 = vpack.i.b16 %v5733_v26, %v5733_v26  ;;  %v5749_v29 = vpack.i.b16 %v5740_v27, %v5740_v27 }
 0x42c   :  { %5665 = vmatprep.mubr.bf16.mxu0 %v5246_v56 }
 0x42d   :  { %5666 = vmatmul.mubr.bf16.vlgmr.msra.gmra.mrb[12].mxu0 %v5245_v33  ;;  %v5747_v55 = vrot.slane %v5742_v28, %v7632_v14 }
 0x42e   :  { %5675 = vmatpush1.bf16.msra.mxu0 %v7123_v32  ;;  %v5754_v32 = vrot.slane %v5749_v29, %v7632_v14 }
 0x42f   :  { %5676 = vmatprep.subr.bf16.mxu0 %v7128_v34 }
 0x432   :  { %5677 = vmatpush1.bf16.msra.mxu0 %v7126_v35 }
 0x433   :  { %5678 = vmatprep.subr.bf16.mxu0 %v7131_v36 }
 0x436   :  { %5679 = vmatpush1.bf16.msra.mxu0 %v7129_v39 }
 0x437   :  { %5680 = vmatprep.subr.bf16.mxu0 %v7134_v40 }
 0x43a   :  { %5681 = vmatpush1.bf16.msra.mxu0 %v7132_v37 }
 0x43b   :  { %5682 = vmatprep.subr.bf16.mxu0 %v7137_v43 }
 0x43e   :  { %5683 = vmatpush1.bf16.msra.mxu0 %v7135_v42 }
 0x43f   :  { %5684 = vmatprep.subr.bf16.mxu0 %v7140_v58 }
 0x442   :  { %5685 = vmatpush1.bf16.msra.mxu0 %v7138_v44  ;;  %v5787_v44 = vrot.slane %v6589_v1, %v7615_v51 }
 0x443   :  { %5686 = vmatprep.subr.bf16.mxu0 %v7143_v45 }
 0x444   :  { %v5172_v8 = vpop.f32.mrb[12].mxu1 }
 0x445   :  { %v5174_v48 = vpop.f32.mrb[13].mxu1  ;;  %v5181_v9 = vpack.c.bf16 %v5172_v8, %v5172_v8 }
 0x446   :  { %v5182_v49 = vpack.c.bf16 %v5174_v48, %v5174_v48  ;;  %v5176_v50 = vpop.f32.mrb[14].mxu1  ;;  %5687 = vmatpush1.bf16.msra.mxu0 %v7141_v46 }
 0x447   :  { %v5177_v52 = vpop.f32.mrb[15].mxu1  ;;  %5688 = vmatprep.subr.bf16.mxu0 %v7146_v22  ;;  %v5239_v63 = vadd.bf16 %v5229_v10, %v5181_v9 }
 0x448   :  { %v5240_v19 = vadd.bf16 %v5236_v47, %v5182_v49 }
 0x449   :  { %v5243_v23 = vmul.bf16 1045249613, %v5239_v63 }
 0x44a   :  { %v5244_v21 = vmul.bf16 1045249613, %v5240_v19  ;;  %5689 = vmatpush1.bf16.msra.mxu0 %v7144_v60 }
 0x44b   :  { %5690 = vmatprep.subr.bf16.mxu0 %v7149_v53  ;;  %v5247_v15 = vmax.bf16 %v5243_v23, %v5239_v63 }
 0x44c   :  { %v5248_v61 = vmax.bf16 %v5244_v21, %v5240_v19 }
 0x44e   :  { %5691 = vmatpush1.bf16.msra.mxu0 %v7147_v57  ;;  %5706 = vmatprep.mubr.bf16.mxu0 %v5248_v61 }
 0x44f   :  { %5692 = vmatprep.subr.bf16.mxu0 %v7152_v59 }
 0x452   :  { %5693 = vmatpush1.bf16.msra.mxu0 %v7150_v4 }
 0x453   :  { %5694 = vmatprep.subr.bf16.mxu0 %v7155_v62 }
 0x456   :  { %5695 = vmatpush1.bf16.msra.mxu0 %v7153_v0 }
 0x457   :  { %5696 = vmatprep.subr.bf16.mxu0 %v7158_v54 }
 0x45a   :  { %5697 = vmatpush1.bf16.msra.mxu0 %v7156_v38 }
 0x45b   :  { %5698 = vmatprep.subr.bf16.mxu0 %v7161_v31 }
 0x45e   :  { %5699 = vmatpush1.bf16.msra.mxu0 %v7159_v3 }
 0x45f   :  { %5700 = vmatprep.subr.bf16.mxu0 %v7164_v6 }
 0x462   :  { %5701 = vmatpush1.bf16.msra.mxu0 %v7162_v7 }
 0x463   :  { %5702 = vmatprep.subr.bf16.mxu0 %v7167_v11 }
 0x466   :  { %5703 = vmatpush1.bf16.msra.mxu0 %v7165_v2 }
 0x467   :  { %5704 = vmatprep.subr.bf16.mxu0 %v7170_v13 }
 0x46a   :  { %5705 = vmatpush1.bf16.msra.mxu0 %v7168_v12 }
 0x46d   :  { %5707 = vmatmul.mubr.bf16.vlgmr.msra.gmra.mrb[12].mxu0 %v5247_v15 }
 0x4a4   :  { %v5766_v45 = vpop.permute.xlu0 %5765 }
 0x4a5   :  { %v5771_v30 = vrot.slane %v5766_v45, %v7632_v14 }
 0x540   :  { %v5708_v56 = vpop.f32.mrb[12].mxu0 }
 0x541   :  { %v5715_v33 = vpack.c.bf16 %v5708_v56, %v5708_v56  ;;  %v5710_v34 = vpop.f32.mrb[13].mxu0 }
 0x542   :  { %v5716_v35 = vpack.c.bf16 %v5710_v34, %v5710_v34  ;;  %v5712_v36 = vpop.f32.mrb[14].mxu0 }
 0x543   :  { %v5755_v39 = vadd.bf16 %v5747_v55, %v5715_v33  ;;  %v5713_v40 = vpop.f32.mrb[15].mxu0 }
 0x544   :  { %v5756_v37 = vadd.bf16 %v5754_v32, %v5716_v35 }
 0x545   :  { %v5757_v43 = vmul.bf16 1045249613, %v5755_v39 }
 0x546   :  { %v5758_v42 = vmul.bf16 1045249613, %v5756_v37 }
 0x547   :  { %v5759_v41 = vmax.bf16 %v5757_v43, %v5755_v39 }
 0x548   :  { %v5760_v58 = vmax.bf16 %v5758_v42, %v5756_v37 }
 0x54a   :  { %5797 = vmatprep.subr.bf16.mxu1 %v5760_v58 }
 0x54b   :  { %5798 = vmatpush1.bf16.xpose.msra.mxu1 %v5759_v41 }
 0x552   :  { %5830 = vmatmul.mubr.bf16.vlgmr.msra.gmra.mrb[16].mxu1 %v5787_v44 }
 0x625   :  { %v5831_v46 = vpop.f32.mrb[16].mxu1 }
 0x626   :  { %v5832_v22 = vadd.f32 %v5831_v46, %v5771_v30  ;;  %v5833_v8 = vpop.f32.mrb[17].mxu1 }
 0x627   :  { %v5834_v47 = vpop.f32.mrb[18].mxu1 }
 0x628   :  { %v6590_v48 = vmul.f32 -1.442695, %v5832_v22  ;;  %v5835_v49 = vpop.f32.mrb[19].mxu1 }
 0x62a   :  { %7171 = vpow2.f32 %v6590_v48 }
 0x634   :  { %v7172_v50 = vpop.eup %7171 }
 0x635   :  { %v5840_v60 = vadd.f32 1.0, %v7172_v50 }
 0x637   :  { %7173 = vrcp.f32 %v5840_v60 }
 0x641   :  { %v7174_v52 = vpop.eup %7173 }
 0x642   :  { %5844 = vst.msk [vmem:[#allocation17] sm:$0x1] %vm5843_vm1, %v7174_v52 }
 0x643   :  { %7364 = shalt.err (!%p7361_p12)
}
 0x644   :  { %s7365_s10 = scalar_lea.hbm %s7750_s9, 16 }
 0x645   :  { %p7366_p13 = scmp.ne.s32.totalorder %s7750_s9, %s7365_s10  ;;  %p7369_p0 = scmp.lt.u32.totalorder %s7365_s10, %s7750_s9 }
 0x647   :  { %p7371_p1 = pnand %p7369_p0, %p7366_p13 }
 0x649   :  { %7374 = shalt.err (!%p7371_p1)
}
 0x64a   :  { %5854 = dma.vmem_to_hbm [thread:$0]  %s5852_s1, 16, %s7750_s9, [#allocation5]  }
 0x64b   :  { %7385 = dma.done.wait [#allocation5], 16  }
 0x64c   :  { %7386 = vsyncadd [#allocation5], 4294967280 }
 0x64d   :  { %5858 = vsyncpa [#allocation4], 1 }
 0x64e   :  { %5859 = vsyncpa [#allocation7], 1 }
 0x64f   :  { %5860 = vsyncpa [#allocation10], 1 }
 0x650   :  { %5861 = vsyncpa [#allocation13], 1 }
 0x651   :  { %5862 = vsyncpa [#allocation16], 1 }
 0x652   :  { %5863 = vsyncpa [#allocation5], 1 }

</bundles_post_ra>
